<compile_context>
chip_gen: v7x
topology: tpu7x:2x2x1
jax: 0.10.0
libtpu: 0.0.40
codegen_flags: <defaults>
</compile_context>

<pallas_src>
import functools

import jax
import jax.numpy as jnp
from jax import lax
from jax.experimental import pallas as pl
from jax.experimental.pallas import tpu as pltpu

LEAKY_SLOPE = 0.01
BN_EPS = 1e-5
_HI = lax.Precision.HIGHEST


def _round_up(x, m):
    return ((x + m - 1) // m) * m


# ----------------------------- Pallas kernels ------------------------------

def _conv1x1_stats_kernel(x_ref, w_ref, y_ref, s_ref):
    """y = x @ w (1x1 conv, bias-free) plus per-tile [sum; sum_sq] of y."""
    y = jnp.dot(x_ref[...], w_ref[...], preferred_element_type=jnp.float32)
    y_ref[...] = y
    s = jnp.sum(y, axis=0, keepdims=True)
    sq = jnp.sum(y * y, axis=0, keepdims=True)
    s_ref[...] = jnp.concatenate([s, sq], axis=0)[None]


def _conv3x3_stats_kernel(y_ref, sc_ref, sh_ref, w_ref, z_ref, s_ref, pad_ref):
    """Fused: BN1 affine + LeakyReLU on load, 3x3 conv (pad=1) via 9 shifted
    taps against a zero-padded VMEM scratch, per-image [sum; sum_sq] of z."""
    Hp, Wp, C = pad_ref.shape
    H, W = Hp - 2, Wp - 2
    cout = z_ref.shape[-1]

    # BN1 normalize + LeakyReLU applied in-register on the loaded tile.
    y = y_ref[0] * sc_ref[...] + sh_ref[...]
    y = jnp.where(y >= 0, y, LEAKY_SLOPE * y)

    # Zero-padded halo lives in VMEM scratch (zeroed each step: parallel-safe).
    pad_ref[...] = jnp.zeros_like(pad_ref)
    pad_ref[1:H + 1, 1:W + 1, :] = y

    acc = jnp.zeros((H * W, cout), jnp.float32)
    for kh in range(3):
        for kw in range(3):
            patch = pad_ref[kh:kh + H, kw:kw + W, :]
            acc = acc + jnp.dot(patch.reshape(H * W, C), w_ref[kh * 3 + kw],
                                preferred_element_type=jnp.float32)

    z_ref[0] = acc.reshape(H, W, cout)
    s = jnp.sum(acc, axis=0, keepdims=True)
    sq = jnp.sum(acc * acc, axis=0, keepdims=True)
    s_ref[...] = jnp.concatenate([s, sq], axis=0)[None]


def _bn_act_kernel(x_ref, sc_ref, sh_ref, o_ref):
    y = x_ref[...] * sc_ref[...] + sh_ref[...]
    o_ref[...] = jnp.where(y >= 0, y, LEAKY_SLOPE * y)


# ----------------------------- kernel wrappers ------------------------------

def conv1x1_bn_stats(x2d, w, tm=512):
    """(M, K) @ (K, C); also returns per-channel [sum; sum_sq] over rows.

    Rows are zero-padded to a tile multiple; padded rows contribute exactly
    zero to the statistics (no bias is added), so stats stay correct.
    """
    M, K = x2d.shape
    _, C = w.shape
    tm = max(8, min(tm, _round_up(M, 8)))
    Mp = _round_up(M, tm)
    if Mp != M:
        x2d = jnp.pad(x2d, ((0, Mp - M), (0, 0)))
    T = Mp // tm
    y, parts = pl.pallas_call(
        _conv1x1_stats_kernel,
        out_shape=(jax.ShapeDtypeStruct((Mp, C), jnp.float32),
                   jax.ShapeDtypeStruct((T, 2, C), jnp.float32)),
        grid_spec=pltpu.PrefetchScalarGridSpec(
            num_scalar_prefetch=0,
            grid=(T,),
            in_specs=[pl.BlockSpec((tm, K), lambda i: (i, 0)),
                      pl.BlockSpec((K, C), lambda i: (0, 0))],
            out_specs=[pl.BlockSpec((tm, C), lambda i: (i, 0)),
                       pl.BlockSpec((1, 2, C), lambda i: (i, 0, 0))]),
        compiler_params=pltpu.CompilerParams(
            dimension_semantics=("parallel",)),
    )(x2d, w)
    return y[:M], jnp.sum(parts, axis=0)


def conv3x3_bn_stats(y4d, scale1, shift1, w2):
    """Per-image fused BN1-act (on load) + 3x3 conv + BN2 partial stats."""
    N, H, W, C = y4d.shape
    cout = w2.shape[-1]
    w_taps = w2.reshape(9, C, cout)                     # (kh*3+kw, cin, cout)
    z, parts = pl.pallas_call(
        _conv3x3_stats_kernel,
        out_shape=(jax.ShapeDtypeStruct((N, H, W, cout), jnp.float32),
                   jax.ShapeDtypeStruct((N, 2, cout), jnp.float32)),
        grid_spec=pltpu.PrefetchScalarGridSpec(
            num_scalar_prefetch=0,
            grid=(N,),
            in_specs=[pl.BlockSpec((1, H, W, C), lambda n: (n, 0, 0, 0)),
                      pl.BlockSpec((1, C), lambda n: (0, 0)),
                      pl.BlockSpec((1, C), lambda n: (0, 0)),
                      pl.BlockSpec((9, C, cout), lambda n: (0, 0, 0))],
            out_specs=[pl.BlockSpec((1, H, W, cout), lambda n: (n, 0, 0, 0)),
                       pl.BlockSpec((1, 2, cout), lambda n: (n, 0, 0))],
            scratch_shapes=[pltpu.VMEM((H + 2, W + 2, C), jnp.float32)]),
        compiler_params=pltpu.CompilerParams(
            dimension_semantics=("parallel",)),
    )(y4d, scale1.reshape(1, C), shift1.reshape(1, C), w_taps)
    return z, jnp.sum(parts, axis=0)


def bn_act(x2d, scale, shift, tm=512):
    """Fused per-channel affine (BN normalize) + LeakyReLU on (M, C)."""
    M, C = x2d.shape
    tm = max(8, min(tm, _round_up(M, 8)))
    Mp = _round_up(M, tm)
    if Mp != M:
        x2d = jnp.pad(x2d, ((0, Mp - M), (0, 0)))
    out = pl.pallas_call(
        _bn_act_kernel,
        out_shape=jax.ShapeDtypeStruct((Mp, C), jnp.float32),
        grid_spec=pltpu.PrefetchScalarGridSpec(
            num_scalar_prefetch=0,
            grid=(Mp // tm,),
            in_specs=[pl.BlockSpec((tm, C), lambda i: (i, 0)),
                      pl.BlockSpec((1, C), lambda i: (0, 0)),
                      pl.BlockSpec((1, C), lambda i: (0, 0))],
            out_specs=pl.BlockSpec((tm, C), lambda i: (i, 0))),
        compiler_params=pltpu.CompilerParams(
            dimension_semantics=("parallel",)),
    )(x2d, scale.reshape(1, C), shift.reshape(1, C))
    return out[:M]


def bn_scale_shift(stats, count, gamma, beta):
    """Training-mode BatchNorm scale/shift from fused [sum; sum_sq] stats.

    Single-pass E[x^2]-mean^2 in f32 (fine at these magnitudes / counts).
    """
    mean = stats[0] / count
    var = jnp.maximum(stats[1] / count - mean * mean, 0.0)
    scale = gamma / jnp.sqrt(var + BN_EPS)
    shift = beta - mean * scale
    return scale, shift


# -------------------------------- JAX glue ---------------------------------

def bilinear_matrix(out_size, in_size):
    """(out_size, in_size) interpolation matrix, PyTorch align_corners=False."""
    i = jnp.arange(out_size, dtype=jnp.float32)
    s = (i + 0.5) * (in_size / out_size) - 0.5
    s = jnp.maximum(s, 0.0)
    i0 = jnp.minimum(jnp.floor(s).astype(jnp.int32), in_size - 1)
    i1 = jnp.minimum(i0 + 1, in_size - 1)
    f = s - i0.astype(jnp.float32)
    cols = jnp.arange(in_size, dtype=jnp.int32)
    return ((cols[None, :] == i0[:, None]).astype(jnp.float32) * (1.0 - f)[:, None]
            + (cols[None, :] == i1[:, None]).astype(jnp.float32) * f[:, None])


def resize_with_matrices(x, Rh, Rw):
    """NHWC separable bilinear resize as two dense matmuls (MXU, no gathers)."""
    t = jnp.einsum('oh,nhwc->nowc', Rh, x, precision=_HI)
    return jnp.einsum('pw,nowc->nopc', Rw, t, precision=_HI)


def base_up_block_forward(params, x1_nchw, x2_nchw):
    x1 = jnp.transpose(x1_nchw, (0, 2, 3, 1)).astype(jnp.float32)
    x2 = jnp.transpose(x2_nchw, (0, 2, 3, 1)).astype(jnp.float32)
    N, H, W, _ = x1.shape
    _, Hs, Ws, _ = x2.shape
    H2, W2 = 2 * H, 2 * W

    # _upsample_add (x2 -> x1 size) followed by block1's 2x upsample, both as
    # separable resize matmuls; the two x2 resamples are composed into one and
    # upsample/concat commute (channel-wise linear maps).
    # TODO(synk): resize matmuls stay in XLA glue; could be fused into the
    # conv1x1 pipeline since both are linear.
    Rh1, Rw1 = bilinear_matrix(H, Hs), bilinear_matrix(W, Ws)
    Rh2, Rw2 = bilinear_matrix(H2, H), bilinear_matrix(W2, W)
    x1u = resize_with_matrices(x1, Rh2, Rw2)
    x2u = resize_with_matrices(x2, jnp.matmul(Rh2, Rh1, precision=_HI),
                               jnp.matmul(Rw2, Rw1, precision=_HI))
    x = jnp.concatenate([x1u, x2u], axis=-1)            # (N, H2, W2, Cin)

    M = N * H2 * W2
    cin = x.shape[-1]
    cmid = params["w1"].shape[1]
    cout = params["w2"].shape[-1]

    # block1: Conv1x1 fused with BN1 statistics (bias dropped: cancelled by BN).
    y2d, stats1 = conv1x1_bn_stats(x.reshape(M, cin), params["w1"])
    scale1, shift1 = bn_scale_shift(stats1, M,
                                    params["bn1_gamma"], params["bn1_beta"])

    # block2: BN1-normalize+LeakyReLU fused into the in-kernel 3x3 conv,
    # which also emits BN2 partial statistics.
    z4d, stats2 = conv3x3_bn_stats(y2d.reshape(N, H2, W2, cmid),
                                   scale1, shift1, params["w2"])
    scale2, shift2 = bn_scale_shift(stats2, M,
                                    params["bn2_gamma"], params["bn2_beta"])

    # Final BN2 normalize + LeakyReLU (the one remaining elementwise pass).
    out2d = bn_act(z4d.reshape(M, cout), scale2, shift2)
    out = out2d.reshape(N, H2, W2, cout)
    return jnp.transpose(out, (0, 3, 1, 2))             # back to NCHW


def init_params(key, in_channels, out_channels):
    """Deterministic synthetic params matching _initialize_weights()."""
    c_mid = out_channels * 2
    k1, k2 = jax.random.split(key)
    # Conv2d kaiming_normal_(mode='fan_out', nonlinearity='relu'), bias = 0.
    std1 = (2.0 / (c_mid * 1 * 1)) ** 0.5
    w1 = jax.random.normal(k1, (in_channels, c_mid), jnp.float32) * std1
    std2 = (2.0 / (out_channels * 3 * 3)) ** 0.5
    w2 = jax.random.normal(k2, (3, 3, c_mid, out_channels), jnp.float32) * std2
    return dict(
        # Conv biases are zero by init and cancelled by training-mode BN, so
        # they are kept only for the reference path, not plumbed into kernels.
        w1=w1, b1=jnp.zeros((c_mid,), jnp.float32),
        w2=w2, b2=jnp.zeros((out_channels,), jnp.float32),
        bn1_gamma=jnp.ones((c_mid,), jnp.float32),
        bn1_beta=jnp.zeros((c_mid,), jnp.float32),
        bn2_gamma=jnp.ones((out_channels,), jnp.float32),
        bn2_beta=jnp.zeros((out_channels,), jnp.float32),
    )


# --------------------------- pure-JAX reference -----------------------------

def bilinear_upsample_gather(x, out_h, out_w):
    """Gather-based PyTorch bilinear (align_corners=False), NHWC. Ref only."""
    N, H, W, C = x.shape

    def src(out_size, in_size):
        i = jnp.arange(out_size, dtype=jnp.float32)
        s = (i + 0.5) * (in_size / out_size) - 0.5
        s = jnp.maximum(s, 0.0)
        i0 = jnp.minimum(jnp.floor(s).astype(jnp.int32), in_size - 1)
        i1 = jnp.minimum(i0 + 1, in_size - 1)
        f = s - i0.astype(jnp.float32)
        return i0, i1, f

    h0, h1, fh = src(out_h, H)
    w0, w1, fw = src(out_w, W)
    rows = (x[:, h0, :, :] * (1.0 - fh)[None, :, None, None]
            + x[:, h1, :, :] * fh[None, :, None, None])
    return (rows[:, :, w0, :] * (1.0 - fw)[None, None, :, None]
            + rows[:, :, w1, :] * fw[None, None, :, None])


def im2col_3x3(x):
    """(N,H,W,C) -> (N*H*W, 9*C); column order (kh, kw, c), pad=1. Ref only."""
    N, H, W, C = x.shape
    xp = jnp.pad(x, ((0, 0), (1, 1), (1, 1), (0, 0)))
    cols = [xp[:, kh:kh + H, kw:kw + W, :] for kh in range(3) for kw in range(3)]
    return jnp.concatenate(cols, axis=-1).reshape(N * H * W, 9 * C)


def reference_forward(params, x1_nchw, x2_nchw):
    """Pure-JAX reference (gather upsample, HBM im2col) for a sanity check."""
    x1 = jnp.transpose(x1_nchw, (0, 2, 3, 1)).astype(jnp.float32)
    x2 = jnp.transpose(x2_nchw, (0, 2, 3, 1)).astype(jnp.float32)
    N, H, W, _ = x1.shape
    x = jnp.concatenate([x1, bilinear_upsample_gather(x2, H, W)], axis=-1)
    x = bilinear_upsample_gather(x, 2 * H, 2 * W)
    H2, W2 = 2 * H, 2 * W

    def bn_relu(y2d, gamma, beta):
        mean = y2d.mean(axis=0)
        var = y2d.var(axis=0)
        y = (y2d - mean) / jnp.sqrt(var + BN_EPS) * gamma + beta
        return jnp.where(y >= 0, y, LEAKY_SLOPE * y)

    y = jnp.dot(x.reshape(N * H2 * W2, -1), params["w1"],
                precision=_HI) + params["b1"]
    y = bn_relu(y, params["bn1_gamma"], params["bn1_beta"])
    cmid = y.shape[-1]
    cout = params["w2"].shape[-1]
    z = jnp.dot(im2col_3x3(y.reshape(N, H2, W2, cmid)),
                params["w2"].reshape(9 * cmid, cout),
                precision=_HI) + params["b2"]
    z = bn_relu(z, params["bn2_gamma"], params["bn2_beta"])
    return jnp.transpose(z.reshape(N, H2, W2, cout), (0, 3, 1, 2))


if __name__ == "__main__":
    key = jax.random.PRNGKey(0)
    kx1, kx2, kp = jax.random.split(key, 3)

    in_channels, out_channels = 8, 4
    # x1: fine feature map, x2: coarse feature map (half resolution).
    x1 = jax.random.normal(kx1, (2, 4, 16, 16), jnp.float32)   # (N, C1, H, W)
    x2 = jax.random.normal(kx2, (2, 4, 8, 8), jnp.float32)     # (N, C2, H/2, W/2)
    params = init_params(kp, in_channels, out_channels)

    fwd = jax.jit(functools.partial(base_up_block_forward, params))
    out = jax.block_until_ready(fwd(x1, x2))
    assert out.shape == (2, out_channels, 32, 32), out.shape

    ref = reference_forward(params, x1, x2)
    max_err = float(jnp.max(jnp.abs(out - ref)))
    assert jnp.allclose(out, ref, rtol=1e-4, atol=1e-4), max_err

    print("KERNEL_OK")
</pallas_src>

<mosaic_0001>
module attributes {stable_mosaic.version = 11 : i64} {
  func.func @_conv1x1_stats_kernel(%arg0: i32, %arg1: memref<512x8xf32, #tpu.memory_space<vmem>>, %arg2: memref<8x8xf32, #tpu.memory_space<vmem>>, %arg3: memref<512x8xf32, #tpu.memory_space<vmem>>, %arg4: memref<1x2x8xf32, #tpu.memory_space<vmem>>) attributes {dimension_semantics = [#tpu.dimension_semantics<parallel>], iteration_bounds = array<i64: 4>, scalar_prefetch = 0 : i64, scratch_operands = 0 : i64, tpu.core_type = #tpu.core_type<tc>, window_params = [{transform_indices = @transform_0, window_bounds = array<i64: 512, 8>}, {pipeline_mode = #tpu.pipeline_mode<synchronous>, transform_indices = @transform_1, window_bounds = array<i64: 8, 8>}, {transform_indices = @transform_2, window_bounds = array<i64: 512, 8>}, {transform_indices = @transform_3, window_bounds = array<i64: 1, 2, 8>}]} {
    %c0 = arith.constant 0 : index
    %c0_0 = arith.constant 0 : index
    %0 = vector.load %arg1[%c0, %c0_0] : memref<512x8xf32, #tpu.memory_space<vmem>>, vector<512x8xf32>
    %c0_1 = arith.constant 0 : index
    %c0_2 = arith.constant 0 : index
    %1 = vector.load %arg2[%c0_1, %c0_2] : memref<8x8xf32, #tpu.memory_space<vmem>>, vector<8x8xf32>
    %cst = arith.constant dense<0.000000e+00> : vector<512x8xf32>
    %2 = tpu.matmul %0, %1, %cst {dimension_numbers = #tpu.dot_dimension_numbers<[1], [0], [0], [1], [0, 0, 1, 1], [], []>} : vector<512x8xf32>, vector<8x8xf32>, vector<512x8xf32> -> vector<512x8xf32>
    %c0_3 = arith.constant 0 : index
    %c0_4 = arith.constant 0 : index
    %3 = vector.load %arg3[%c0_3, %c0_4] : memref<512x8xf32, #tpu.memory_space<vmem>>, vector<512x8xf32>
    tpu.vector_store %arg3[%c0_3, %c0_4], %2 {strides = array<i32>} : memref<512x8xf32, #tpu.memory_space<vmem>>, vector<512x8xf32>,
    %cst_5 = arith.constant dense<0.000000e+00> : vector<8xf32>
    %4 = vector.multi_reduction <add>, %2, %cst_5 [0] : vector<512x8xf32> to vector<8xf32>
    %5 = vector.shape_cast %4 : vector<8xf32> to vector<1x8xf32>
    %6 = arith.mulf %2, %2 : vector<512x8xf32>
    %cst_6 = arith.constant dense<0.000000e+00> : vector<8xf32>
    %7 = vector.multi_reduction <add>, %6, %cst_6 [0] : vector<512x8xf32> to vector<8xf32>
    %8 = vector.shape_cast %7 : vector<8xf32> to vector<1x8xf32>
    %9 = tpu.concatenate %5, %8 in 0 : vector<1x8xf32>, vector<1x8xf32> -> vector<2x8xf32>
    %10 = vector.shape_cast %9 : vector<2x8xf32> to vector<1x2x8xf32>
    %c0_7 = arith.constant 0 : index
    %c0_8 = arith.constant 0 : index
    %c0_9 = arith.constant 0 : index
    %11 = vector.load %arg4[%c0_7, %c0_8, %c0_9] : memref<1x2x8xf32, #tpu.memory_space<vmem>>, vector<1x2x8xf32>
    tpu.vector_store %arg4[%c0_7, %c0_8, %c0_9], %10 {strides = array<i32>} : memref<1x2x8xf32, #tpu.memory_space<vmem>>, vector<1x2x8xf32>,
    return
  }
  func.func @transform_0(%arg0: i32) -> (i32, i32) {
    %c0_i32 = arith.constant 0 : i32
    %c0_i32_0 = arith.constant 0 : i32
    return %arg0, %c0_i32 : i32, i32
  }
  func.func @transform_1(%arg0: i32) -> (i32, i32) {
    %c0_i32 = arith.constant 0 : i32
    %c0_i32_0 = arith.constant 0 : i32
    %c0_i32_1 = arith.constant 0 : i32
    return %c0_i32, %c0_i32_0 : i32, i32
  }
  func.func @transform_2(%arg0: i32) -> (i32, i32) {
    %c0_i32 = arith.constant 0 : i32
    %c0_i32_0 = arith.constant 0 : i32
    return %arg0, %c0_i32 : i32, i32
  }
  func.func @transform_3(%arg0: i32) -> (i32, i32, i32) {
    %c0_i32 = arith.constant 0 : i32
    %c0_i32_0 = arith.constant 0 : i32
    %c0_i32_1 = arith.constant 0 : i32
    return %arg0, %c0_i32, %c0_i32_0 : i32, i32, i32
  }
}

module attributes {stable_mosaic.version = 11 : i64} {
  func.func @_conv3x3_stats_kernel(%arg0: i32, %arg1: memref<1x32x32x8xf32, #tpu.memory_space<vmem>>, %arg2: memref<1x8xf32, #tpu.memory_space<vmem>>, %arg3: memref<1x8xf32, #tpu.memory_space<vmem>>, %arg4: memref<9x8x4xf32, #tpu.memory_space<vmem>>, %arg5: memref<1x32x32x4xf32, #tpu.memory_space<vmem>>, %arg6: memref<1x2x4xf32, #tpu.memory_space<vmem>>, %arg7: memref<34x34x8xf32, #tpu.memory_space<vmem>>) attributes {dimension_semantics = [#tpu.dimension_semantics<parallel>], iteration_bounds = array<i64: 2>, scalar_prefetch = 0 : i64, scratch_operands = 1 : i64, tpu.core_type = #tpu.core_type<tc>, window_params = [{transform_indices = @transform_0, window_bounds = array<i64: 1, 32, 32, 8>}, {pipeline_mode = #tpu.pipeline_mode<synchronous>, transform_indices = @transform_1, window_bounds = array<i64: 1, 8>}, {pipeline_mode = #tpu.pipeline_mode<synchronous>, transform_indices = @transform_2, window_bounds = array<i64: 1, 8>}, {pipeline_mode = #tpu.pipeline_mode<synchronous>, transform_indices = @transform_3, window_bounds = array<i64: 9, 8, 4>}, {transform_indices = @transform_4, window_bounds = array<i64: 1, 32, 32, 4>}, {transform_indices = @transform_5, window_bounds = array<i64: 1, 2, 4>}]} {
    %c0 = arith.constant 0 : index
    %c0_0 = arith.constant 0 : index
    %c0_1 = arith.constant 0 : index
    %c0_2 = arith.constant 0 : index
    %0 = vector.load %arg1[%c0, %c0_0, %c0_1, %c0_2] : memref<1x32x32x8xf32, #tpu.memory_space<vmem>>, vector<1x32x32x8xf32>
    %1 = vector.shape_cast %0 : vector<1x32x32x8xf32> to vector<32x32x8xf32>
    %c0_3 = arith.constant 0 : index
    %c0_4 = arith.constant 0 : index
    %2 = vector.load %arg2[%c0_3, %c0_4] : memref<1x8xf32, #tpu.memory_space<vmem>>, vector<1x8xf32>
    %3 = vector.shape_cast %2 : vector<1x8xf32> to vector<1x1x8xf32>
    %4 = vector.broadcast %3 : vector<1x1x8xf32> to vector<32x32x8xf32>
    %5 = arith.mulf %1, %4 : vector<32x32x8xf32>
    %c0_5 = arith.constant 0 : index
    %c0_6 = arith.constant 0 : index
    %6 = vector.load %arg3[%c0_5, %c0_6] : memref<1x8xf32, #tpu.memory_space<vmem>>, vector<1x8xf32>
    %7 = vector.shape_cast %6 : vector<1x8xf32> to vector<1x1x8xf32>
    %8 = vector.broadcast %7 : vector<1x1x8xf32> to vector<32x32x8xf32>
    %9 = arith.addf %5, %8 : vector<32x32x8xf32>
    %cst = arith.constant 0.000000e+00 : f32
    %10 = vector.broadcast %cst : f32 to vector<32x32x8xf32>
    %11 = arith.cmpf oge, %9, %10 : vector<32x32x8xf32>
    %cst_7 = arith.constant 0.00999999977 : f32
    %12 = vector.broadcast %cst_7 : f32 to vector<32x32x8xf32>
    %13 = arith.mulf %12, %9 : vector<32x32x8xf32>
    %14 = arith.select %11, %9, %13 : vector<32x32x8xi1>, vector<32x32x8xf32>
    %cst_8 = arith.constant 0.000000e+00 : f32
    %15 = vector.broadcast %cst_8 : f32 to vector<34x34x8xf32>
    %c0_9 = arith.constant 0 : index
    %c0_10 = arith.constant 0 : index
    %c0_11 = arith.constant 0 : index
    %16 = vector.load %arg7[%c0_9, %c0_10, %c0_11] : memref<34x34x8xf32, #tpu.memory_space<vmem>>, vector<34x34x8xf32>
    tpu.vector_store %arg7[%c0_9, %c0_10, %c0_11], %15 {strides = array<i32>} : memref<34x34x8xf32, #tpu.memory_space<vmem>>, vector<34x34x8xf32>,
    %c1 = arith.constant 1 : index
    %c1_12 = arith.constant 1 : index
    %c0_13 = arith.constant 0 : index
    %17 = vector.load %arg7[%c1, %c1_12, %c0_13] : memref<34x34x8xf32, #tpu.memory_space<vmem>>, vector<32x32x8xf32>
    tpu.vector_store %arg7[%c1, %c1_12, %c0_13], %14 {strides = array<i32>} : memref<34x34x8xf32, #tpu.memory_space<vmem>>, vector<32x32x8xf32>,
    %cst_14 = arith.constant 0.000000e+00 : f32
    %18 = vector.broadcast %cst_14 : f32 to vector<1024x4xf32>
    %c0_15 = arith.constant 0 : index
    %c0_16 = arith.constant 0 : index
    %c0_17 = arith.constant 0 : index
    %19 = vector.load %arg7[%c0_15, %c0_16, %c0_17] : memref<34x34x8xf32, #tpu.memory_space<vmem>>, vector<32x32x8xf32>
    %20 = vector.shape_cast %19 : vector<32x32x8xf32> to vector<1024x8xf32>
    %c0_18 = arith.constant 0 : index
    %c0_19 = arith.constant 0 : index
    %c0_20 = arith.constant 0 : index
    %21 = vector.load %arg4[%c0_18, %c0_19, %c0_20] : memref<9x8x4xf32, #tpu.memory_space<vmem>>, vector<1x8x4xf32>
    %22 = vector.shape_cast %21 : vector<1x8x4xf32> to vector<8x4xf32>
    %cst_21 = arith.constant dense<0.000000e+00> : vector<1024x4xf32>
    %23 = tpu.matmul %20, %22, %cst_21 {dimension_numbers = #tpu.dot_dimension_numbers<[1], [0], [0], [1], [0, 0, 1, 1], [], []>} : vector<1024x8xf32>, vector<8x4xf32>, vector<1024x4xf32> -> vector<1024x4xf32>
    %24 = arith.addf %18, %23 : vector<1024x4xf32>
    %c0_22 = arith.constant 0 : index
    %c1_23 = arith.constant 1 : index
    %c0_24 = arith.constant 0 : index
    %25 = vector.load %arg7[%c0_22, %c1_23, %c0_24] : memref<34x34x8xf32, #tpu.memory_space<vmem>>, vector<32x32x8xf32>
    %26 = vector.shape_cast %25 : vector<32x32x8xf32> to vector<1024x8xf32>
    %c1_25 = arith.constant 1 : index
    %c0_26 = arith.constant 0 : index
    %c0_27 = arith.constant 0 : index
    %27 = vector.load %arg4[%c1_25, %c0_26, %c0_27] : memref<9x8x4xf32, #tpu.memory_space<vmem>>, vector<1x8x4xf32>
    %28 = vector.shape_cast %27 : vector<1x8x4xf32> to vector<8x4xf32>
    %cst_28 = arith.constant dense<0.000000e+00> : vector<1024x4xf32>
    %29 = tpu.matmul %26, %28, %cst_28 {dimension_numbers = #tpu.dot_dimension_numbers<[1], [0], [0], [1], [0, 0, 1, 1], [], []>} : vector<1024x8xf32>, vector<8x4xf32>, vector<1024x4xf32> -> vector<1024x4xf32>
    %30 = arith.addf %24, %29 : vector<1024x4xf32>
    %c0_29 = arith.constant 0 : index
    %c2 = arith.constant 2 : index
    %c0_30 = arith.constant 0 : index
    %31 = vector.load %arg7[%c0_29, %c2, %c0_30] : memref<34x34x8xf32, #tpu.memory_space<vmem>>, vector<32x32x8xf32>
    %32 = vector.shape_cast %31 : vector<32x32x8xf32> to vector<1024x8xf32>
    %c2_31 = arith.constant 2 : index
    %c0_32 = arith.constant 0 : index
    %c0_33 = arith.constant 0 : index
    %33 = vector.load %arg4[%c2_31, %c0_32, %c0_33] : memref<9x8x4xf32, #tpu.memory_space<vmem>>, vector<1x8x4xf32>
    %34 = vector.shape_cast %33 : vector<1x8x4xf32> to vector<8x4xf32>
    %cst_34 = arith.constant dense<0.000000e+00> : vector<1024x4xf32>
    %35 = tpu.matmul %32, %34, %cst_34 {dimension_numbers = #tpu.dot_dimension_numbers<[1], [0], [0], [1], [0, 0, 1, 1], [], []>} : vector<1024x8xf32>, vector<8x4xf32>, vector<1024x4xf32> -> vector<1024x4xf32>
    %36 = arith.addf %30, %35 : vector<1024x4xf32>
    %c1_35 = arith.constant 1 : index
    %c0_36 = arith.constant 0 : index
    %c0_37 = arith.constant 0 : index
    %37 = vector.load %arg7[%c1_35, %c0_36, %c0_37] : memref<34x34x8xf32, #tpu.memory_space<vmem>>, vector<32x32x8xf32>
    %38 = vector.shape_cast %37 : vector<32x32x8xf32> to vector<1024x8xf32>
    %c3 = arith.constant 3 : index
    %c0_38 = arith.constant 0 : index
    %c0_39 = arith.constant 0 : index
    %39 = vector.load %arg4[%c3, %c0_38, %c0_39] : memref<9x8x4xf32, #tpu.memory_space<vmem>>, vector<1x8x4xf32>
    %40 = vector.shape_cast %39 : vector<1x8x4xf32> to vector<8x4xf32>
    %cst_40 = arith.constant dense<0.000000e+00> : vector<1024x4xf32>
    %41 = tpu.matmul %38, %40, %cst_40 {dimension_numbers = #tpu.dot_dimension_numbers<[1], [0], [0], [1], [0, 0, 1, 1], [], []>} : vector<1024x8xf32>, vector<8x4xf32>, vector<1024x4xf32> -> vector<1024x4xf32>
    %42 = arith.addf %36, %41 : vector<1024x4xf32>
    %c1_41 = arith.constant 1 : index
    %c1_42 = arith.constant 1 : index
    %c0_43 = arith.constant 0 : index
    %43 = vector.load %arg7[%c1_41, %c1_42, %c0_43] : memref<34x34x8xf32, #tpu.memory_space<vmem>>, vector<32x32x8xf32>
    %44 = vector.shape_cast %43 : vector<32x32x8xf32> to vector<1024x8xf32>
    %c4 = arith.constant 4 : index
    %c0_44 = arith.constant 0 : index
    %c0_45 = arith.constant 0 : index
    %45 = vector.load %arg4[%c4, %c0_44, %c0_45] : memref<9x8x4xf32, #tpu.memory_space<vmem>>, vector<1x8x4xf32>
    %46 = vector.shape_cast %45 : vector<1x8x4xf32> to vector<8x4xf32>
    %cst_46 = arith.constant dense<0.000000e+00> : vector<1024x4xf32>
    %47 = tpu.matmul %44, %46, %cst_46 {dimension_numbers = #tpu.dot_dimension_numbers<[1], [0], [0], [1], [0, 0, 1, 1], [], []>} : vector<1024x8xf32>, vector<8x4xf32>, vector<1024x4xf32> -> vector<1024x4xf32>
    %48 = arith.addf %42, %47 : vector<1024x4xf32>
    %c1_47 = arith.constant 1 : index
    %c2_48 = arith.constant 2 : index
    %c0_49 = arith.constant 0 : index
    %49 = vector.load %arg7[%c1_47, %c2_48, %c0_49] : memref<34x34x8xf32, #tpu.memory_space<vmem>>, vector<32x32x8xf32>
    %50 = vector.shape_cast %49 : vector<32x32x8xf32> to vector<1024x8xf32>
    %c5 = arith.constant 5 : index
    %c0_50 = arith.constant 0 : index
    %c0_51 = arith.constant 0 : index
    %51 = vector.load %arg4[%c5, %c0_50, %c0_51] : memref<9x8x4xf32, #tpu.memory_space<vmem>>, vector<1x8x4xf32>
    %52 = vector.shape_cast %51 : vector<1x8x4xf32> to vector<8x4xf32>
    %cst_52 = arith.constant dense<0.000000e+00> : vector<1024x4xf32>
    %53 = tpu.matmul %50, %52, %cst_52 {dimension_numbers = #tpu.dot_dimension_numbers<[1], [0], [0], [1], [0, 0, 1, 1], [], []>} : vector<1024x8xf32>, vector<8x4xf32>, vector<1024x4xf32> -> vector<1024x4xf32>
    %54 = arith.addf %48, %53 : vector<1024x4xf32>
    %c2_53 = arith.constant 2 : index
    %c0_54 = arith.constant 0 : index
    %c0_55 = arith.constant 0 : index
    %55 = vector.load %arg7[%c2_53, %c0_54, %c0_55] : memref<34x34x8xf32, #tpu.memory_space<vmem>>, vector<32x32x8xf32>
    %56 = vector.shape_cast %55 : vector<32x32x8xf32> to vector<1024x8xf32>
    %c6 = arith.constant 6 : index
    %c0_56 = arith.constant 0 : index
    %c0_57 = arith.constant 0 : index
    %57 = vector.load %arg4[%c6, %c0_56, %c0_57] : memref<9x8x4xf32, #tpu.memory_space<vmem>>, vector<1x8x4xf32>
    %58 = vector.shape_cast %57 : vector<1x8x4xf32> to vector<8x4xf32>
    %cst_58 = arith.constant dense<0.000000e+00> : vector<1024x4xf32>
    %59 = tpu.matmul %56, %58, %cst_58 {dimension_numbers = #tpu.dot_dimension_numbers<[1], [0], [0], [1], [0, 0, 1, 1], [], []>} : vector<1024x8xf32>, vector<8x4xf32>, vector<1024x4xf32> -> vector<1024x4xf32>
    %60 = arith.addf %54, %59 : vector<1024x4xf32>
    %c2_59 = arith.constant 2 : index
    %c1_60 = arith.constant 1 : index
    %c0_61 = arith.constant 0 : index
    %61 = vector.load %arg7[%c2_59, %c1_60, %c0_61] : memref<34x34x8xf32, #tpu.memory_space<vmem>>, vector<32x32x8xf32>
    %62 = vector.shape_cast %61 : vector<32x32x8xf32> to vector<1024x8xf32>
    %c7 = arith.constant 7 : index
    %c0_62 = arith.constant 0 : index
    %c0_63 = arith.constant 0 : index
    %63 = vector.load %arg4[%c7, %c0_62, %c0_63] : memref<9x8x4xf32, #tpu.memory_space<vmem>>, vector<1x8x4xf32>
    %64 = vector.shape_cast %63 : vector<1x8x4xf32> to vector<8x4xf32>
    %cst_64 = arith.constant dense<0.000000e+00> : vector<1024x4xf32>
    %65 = tpu.matmul %62, %64, %cst_64 {dimension_numbers = #tpu.dot_dimension_numbers<[1], [0], [0], [1], [0, 0, 1, 1], [], []>} : vector<1024x8xf32>, vector<8x4xf32>, vector<1024x4xf32> -> vector<1024x4xf32>
    %66 = arith.addf %60, %65 : vector<1024x4xf32>
    %c2_65 = arith.constant 2 : index
    %c2_66 = arith.constant 2 : index
    %c0_67 = arith.constant 0 : index
    %67 = vector.load %arg7[%c2_65, %c2_66, %c0_67] : memref<34x34x8xf32, #tpu.memory_space<vmem>>, vector<32x32x8xf32>
    %68 = vector.shape_cast %67 : vector<32x32x8xf32> to vector<1024x8xf32>
    %c8 = arith.constant 8 : index
    %c0_68 = arith.constant 0 : index
    %c0_69 = arith.constant 0 : index
    %69 = vector.load %arg4[%c8, %c0_68, %c0_69] : memref<9x8x4xf32, #tpu.memory_space<vmem>>, vector<1x8x4xf32>
    %70 = vector.shape_cast %69 : vector<1x8x4xf32> to vector<8x4xf32>
    %cst_70 = arith.constant dense<0.000000e+00> : vector<1024x4xf32>
    %71 = tpu.matmul %68, %70, %cst_70 {dimension_numbers = #tpu.dot_dimension_numbers<[1], [0], [0], [1], [0, 0, 1, 1], [], []>} : vector<1024x8xf32>, vector<8x4xf32>, vector<1024x4xf32> -> vector<1024x4xf32>
    %72 = arith.addf %66, %71 : vector<1024x4xf32>
    %73 = vector.shape_cast %72 : vector<1024x4xf32> to vector<32x32x4xf32>
    %c0_71 = arith.constant 0 : index
    %c0_72 = arith.constant 0 : index
    %c0_73 = arith.constant 0 : index
    %c0_74 = arith.constant 0 : index
    %74 = vector.load %arg5[%c0_71, %c0_72, %c0_73, %c0_74] : memref<1x32x32x4xf32, #tpu.memory_space<vmem>>, vector<1x32x32x4xf32>
    %75 = vector.shape_cast %74 : vector<1x32x32x4xf32> to vector<32x32x4xf32>
    %76 = vector.shape_cast %73 : vector<32x32x4xf32> to vector<1x32x32x4xf32>
    tpu.vector_store %arg5[%c0_71, %c0_72, %c0_73, %c0_74], %76 {strides = array<i32>} : memref<1x32x32x4xf32, #tpu.memory_space<vmem>>, vector<1x32x32x4xf32>,
    %cst_75 = arith.constant dense<0.000000e+00> : vector<4xf32>
    %77 = vector.multi_reduction <add>, %72, %cst_75 [0] : vector<1024x4xf32> to vector<4xf32>
    %78 = vector.shape_cast %77 : vector<4xf32> to vector<1x4xf32>
    %79 = arith.mulf %72, %72 : vector<1024x4xf32>
    %cst_76 = arith.constant dense<0.000000e+00> : vector<4xf32>
    %80 = vector.multi_reduction <add>, %79, %cst_76 [0] : vector<1024x4xf32> to vector<4xf32>
    %81 = vector.shape_cast %80 : vector<4xf32> to vector<1x4xf32>
    %82 = tpu.concatenate %78, %81 in 0 : vector<1x4xf32>, vector<1x4xf32> -> vector<2x4xf32>
    %83 = vector.shape_cast %82 : vector<2x4xf32> to vector<1x2x4xf32>
    %c0_77 = arith.constant 0 : index
    %c0_78 = arith.constant 0 : index
    %c0_79 = arith.constant 0 : index
    %84 = vector.load %arg6[%c0_77, %c0_78, %c0_79] : memref<1x2x4xf32, #tpu.memory_space<vmem>>, vector<1x2x4xf32>
    tpu.vector_store %arg6[%c0_77, %c0_78, %c0_79], %83 {strides = array<i32>} : memref<1x2x4xf32, #tpu.memory_space<vmem>>, vector<1x2x4xf32>,
    return
  }
  func.func @transform_0(%arg0: i32) -> (i32, i32, i32, i32) {
    %c0_i32 = arith.constant 0 : i32
    %c0_i32_0 = arith.constant 0 : i32
    %c0_i32_1 = arith.constant 0 : i32
    %c0_i32_2 = arith.constant 0 : i32
    return %arg0, %c0_i32, %c0_i32_0, %c0_i32_1 : i32, i32, i32, i32
  }
  func.func @transform_1(%arg0: i32) -> (i32, i32) {
    %c0_i32 = arith.constant 0 : i32
    %c0_i32_0 = arith.constant 0 : i32
    %c0_i32_1 = arith.constant 0 : i32
    return %c0_i32, %c0_i32_0 : i32, i32
  }
  func.func @transform_2(%arg0: i32) -> (i32, i32) {
    %c0_i32 = arith.constant 0 : i32
    %c0_i32_0 = arith.constant 0 : i32
    %c0_i32_1 = arith.constant 0 : i32
    return %c0_i32, %c0_i32_0 : i32, i32
  }
  func.func @transform_3(%arg0: i32) -> (i32, i32, i32) {
    %c0_i32 = arith.constant 0 : i32
    %c0_i32_0 = arith.constant 0 : i32
    %c0_i32_1 = arith.constant 0 : i32
    %c0_i32_2 = arith.constant 0 : i32
    return %c0_i32, %c0_i32_0, %c0_i32_1 : i32, i32, i32
  }
  func.func @transform_4(%arg0: i32) -> (i32, i32, i32, i32) {
    %c0_i32 = arith.constant 0 : i32
    %c0_i32_0 = arith.constant 0 : i32
    %c0_i32_1 = arith.constant 0 : i32
    %c0_i32_2 = arith.constant 0 : i32
    return %arg0, %c0_i32, %c0_i32_0, %c0_i32_1 : i32, i32, i32, i32
  }
  func.func @transform_5(%arg0: i32) -> (i32, i32, i32) {
    %c0_i32 = arith.constant 0 : i32
    %c0_i32_0 = arith.constant 0 : i32
    %c0_i32_1 = arith.constant 0 : i32
    return %arg0, %c0_i32, %c0_i32_0 : i32, i32, i32
  }
}

module attributes {stable_mosaic.version = 11 : i64} {
  func.func @_bn_act_kernel(%arg0: i32, %arg1: memref<512x4xf32, #tpu.memory_space<vmem>>, %arg2: memref<1x4xf32, #tpu.memory_space<vmem>>, %arg3: memref<1x4xf32, #tpu.memory_space<vmem>>, %arg4: memref<512x4xf32, #tpu.memory_space<vmem>>) attributes {dimension_semantics = [#tpu.dimension_semantics<parallel>], iteration_bounds = array<i64: 4>, scalar_prefetch = 0 : i64, scratch_operands = 0 : i64, tpu.core_type = #tpu.core_type<tc>, window_params = [{transform_indices = @transform_0, window_bounds = array<i64: 512, 4>}, {pipeline_mode = #tpu.pipeline_mode<synchronous>, transform_indices = @transform_1, window_bounds = array<i64: 1, 4>}, {pipeline_mode = #tpu.pipeline_mode<synchronous>, transform_indices = @transform_2, window_bounds = array<i64: 1, 4>}, {transform_indices = @transform_3, window_bounds = array<i64: 512, 4>}]} {
    %c0 = arith.constant 0 : index
    %c0_0 = arith.constant 0 : index
    %0 = vector.load %arg1[%c0, %c0_0] : memref<512x4xf32, #tpu.memory_space<vmem>>, vector<512x4xf32>
    %c0_1 = arith.constant 0 : index
    %c0_2 = arith.constant 0 : index
    %1 = vector.load %arg2[%c0_1, %c0_2] : memref<1x4xf32, #tpu.memory_space<vmem>>, vector<1x4xf32>
    %2 = vector.broadcast %1 : vector<1x4xf32> to vector<512x4xf32>
    %3 = arith.mulf %0, %2 : vector<512x4xf32>
    %c0_3 = arith.constant 0 : index
    %c0_4 = arith.constant 0 : index
    %4 = vector.load %arg3[%c0_3, %c0_4] : memref<1x4xf32, #tpu.memory_space<vmem>>, vector<1x4xf32>
    %5 = vector.broadcast %4 : vector<1x4xf32> to vector<512x4xf32>
    %6 = arith.addf %3, %5 : vector<512x4xf32>
    %cst = arith.constant 0.000000e+00 : f32
    %7 = vector.broadcast %cst : f32 to vector<512x4xf32>
    %8 = arith.cmpf oge, %6, %7 : vector<512x4xf32>
    %cst_5 = arith.constant 0.00999999977 : f32
    %9 = vector.broadcast %cst_5 : f32 to vector<512x4xf32>
    %10 = arith.mulf %9, %6 : vector<512x4xf32>
    %11 = arith.select %8, %6, %10 : vector<512x4xi1>, vector<512x4xf32>
    %c0_6 = arith.constant 0 : index
    %c0_7 = arith.constant 0 : index
    %12 = vector.load %arg4[%c0_6, %c0_7] : memref<512x4xf32, #tpu.memory_space<vmem>>, vector<512x4xf32>
    tpu.vector_store %arg4[%c0_6, %c0_7], %11 {strides = array<i32>} : memref<512x4xf32, #tpu.memory_space<vmem>>, vector<512x4xf32>,
    return
  }
  func.func @transform_0(%arg0: i32) -> (i32, i32) {
    %c0_i32 = arith.constant 0 : i32
    %c0_i32_0 = arith.constant 0 : i32
    return %arg0, %c0_i32 : i32, i32
  }
  func.func @transform_1(%arg0: i32) -> (i32, i32) {
    %c0_i32 = arith.constant 0 : i32
    %c0_i32_0 = arith.constant 0 : i32
    %c0_i32_1 = arith.constant 0 : i32
    return %c0_i32, %c0_i32_0 : i32, i32
  }
  func.func @transform_2(%arg0: i32) -> (i32, i32) {
    %c0_i32 = arith.constant 0 : i32
    %c0_i32_0 = arith.constant 0 : i32
    %c0_i32_1 = arith.constant 0 : i32
    return %c0_i32, %c0_i32_0 : i32, i32
  }
  func.func @transform_3(%arg0: i32) -> (i32, i32) {
    %c0_i32 = arith.constant 0 : i32
    %c0_i32_0 = arith.constant 0 : i32
    return %arg0, %c0_i32 : i32, i32
  }
}

</mosaic_0001>

<bundles_post_ra>
// kernel: base_up_block_forward.5
= control target key start
LH: loop header
LB: loop body
LE: loop exit
PB: predicated region body
PF: predicated region fallthrough
CT: control target
= control target key end

     0   :  { %s742_s12 = smov 0   ;;  %s1096_s0 = inlined_call_operand.vmem [shape: f32[2048,4], index: 0, kind: input, shape index: {}]   ;;  %s1097_s1 = inlined_call_operand.vmem [shape: f32[1,4], index: 1, kind: input, shape index: {}]   ;;  %s1098_s2 = inlined_call_operand.vmem [shape: f32[1,4], index: 2, kind: input, shape index: {}]   ;;  %s1099_s3 = inlined_call_operand.vmem [shape: f32[2048,4], index: 3, kind: output, shape index: {}]  }
   0x1 LB: > { %s693_s13 = sadd.s32 4294967295, %s720_s12   ;;  %p697_p0 = scmp.ge.s32.totalorder %s720_s12, 1  ;;  %s720_s12 = sphi %s742_s12, %s13_s12  }
   0x2   : > { %p138_p1 = scmp.lt.s32.totalorder %s720_s12, 5 }
   0x4   : > { %p139_p2 = pnand %p697_p0, %p138_p1 }
   0x5   : > { %s698_s14 = sshll.u32 (!%p139_p2), %s693_s13, 6  ;;  %v756_v0 = vld [vmem:[%s1097_s1] ss:$0 sm:$0xff] (!%p139_p2)  ;;  %vm572_vm0 = vcmask (!%p139_p2), 31744  }
   0x6   : > { %142 = sbr.rel (%p139_p2) target bundleno = 102 (0x66), region = 32  ;;  %p163_p3 = scmp.lt.s32.totalorder (!%p139_p2), %s698_s14, 255  ;;  %v766_v1 = vld [vmem:[%s1098_s2] ss:$0 sm:$0xff] (!%p139_p2) }
   0xd   : > { %s1101_s14 = smov (!%p163_p3, %s698_s14), 255 }
   0xe   : > { %s699_s15 = sshll.u32 %s1101_s14, 3 }
   0xf   : > { %s761_s20 = scalar_lea.vmem %s1096_s0, %s699_s15  ;;  %s794_s25 = scalar_lea.vmem %s1099_s3, %s699_s15 }
  0x10   : > { %v174_v2 = vld [vmem:[%s761_s20] sm:$0xff]  ;;  %v175_v3 = vld [vmem:[%s761_s20 + $0x8] sm:$0xff]  ;;  %v176_v4 = vld [vmem:[%s761_s20 + $0x10] sm:$0xff] }
  0x11   : > { %v245_v5 = vmul.f32 %v756_v0, %v174_v2  ;;  %v246_v6 = vmul.f32 %v756_v0, %v175_v3  ;;  %v247_v7 = vmul.f32 %v756_v0, %v176_v4  ;;  %v177_v8 = vld [vmem:[%s761_s20 + $0x18] sm:$0xff]  ;;  %v178_v9 = vld [vmem:[%s761_s20 + $0x20] sm:$0xff]  ;;  %v179_v10 = vld [vmem:[%s761_s20 + $0x28] sm:$0xff] }
  0x12   : > { %v248_v11 = vmul.f32 %v756_v0, %v177_v8  ;;  %v249_v12 = vmul.f32 %v756_v0, %v178_v9  ;;  %v250_v13 = vmul.f32 %v756_v0, %v179_v10  ;;  %v180_v14 = vld [vmem:[%s761_s20 + $0x30] sm:$0xff]  ;;  %v181_v15 = vld [vmem:[%s761_s20 + $0x38] sm:$0xff]  ;;  %v182_v24 = vld [vmem:[%s761_s20 + $0x40] sm:$0xff] }
  0x13   : > { %v316_v16 = vadd.f32 %v766_v1, %v245_v5  ;;  %v317_v17 = vadd.f32 %v766_v1, %v246_v6  ;;  %v318_v18 = vadd.f32 %v766_v1, %v247_v7  ;;  %v251_v19 = vmul.f32 %v756_v0, %v180_v14  ;;  %v183_v32 = vld [vmem:[%s761_s20 + $0x48] sm:$0xff]  ;;  %v184_v33 = vld [vmem:[%s761_s20 + $0x50] sm:$0xff]  ;;  %v185_v34 = vld [vmem:[%s761_s20 + $0x58] sm:$0xff] }
  0x14   : > { %v319_v20 = vadd.f32 %v766_v1, %v248_v11  ;;  %v320_v21 = vadd.f32 %v766_v1, %v249_v12  ;;  %v321_v22 = vadd.f32 %v766_v1, %v250_v13  ;;  %v252_v23 = vmul.f32 %v756_v0, %v181_v15  ;;  %v186_v46 = vld [vmem:[%s761_s20 + $0x60] sm:$0xff]  ;;  %v187_v47 = vld [vmem:[%s761_s20 + $0x68] sm:$0xff]  ;;  %v188_v58 = vld [vmem:[%s761_s20 + $0x70] sm:$0xff] }
  0x15   : > { %vm380_vm1 = vcmp.ge.f32.partialorder %v316_v16, 0.0  ;;  %v444_v25 = vmul.f32 0.01, %v316_v16  ;;  %vm381_vm2 = vcmp.ge.f32.partialorder %v317_v17, 0.0  ;;  %v445_v26 = vmul.f32 0.01, %v317_v17 }
  0x16   : > { %vm382_vm3 = vcmp.ge.f32.partialorder %v318_v18, 0.0  ;;  %v446_v27 = vmul.f32 0.01, %v318_v18  ;;  %vm383_vm4 = vcmp.ge.f32.partialorder %v319_v20, 0.0  ;;  %v447_v28 = vmul.f32 0.01, %v319_v20 }
  0x17   : > { %v508_v29 = vsel %vm380_vm1, %v316_v16, %v444_v25  ;;  %v509_v30 = vsel %vm381_vm2, %v317_v17, %v445_v26  ;;  %vm384_vm5 = vcmp.ge.f32.partialorder %v320_v21, 0.0  ;;  %v448_v31 = vmul.f32 0.01, %v320_v21  ;;  %v189_v59 = vld [vmem:[%s761_s20 + $0x78] sm:$0xff]  ;;  %v190_v6 = vld [vmem:[%s761_s20 + $0x80] sm:$0xff]  ;;  %v191_v7 = vld [vmem:[%s761_s20 + $0x88] sm:$0xff] }
  0x18   : > { %573 = vst.msk [vmem:[%s794_s25] sm:$0xff] %vm572_vm0, %v508_v29  ;;  %574 = vst.msk [vmem:[%s794_s25 + $0x8] sm:$0xff] %vm572_vm0, %v509_v30  ;;  %v510_v35 = vsel %vm382_vm3, %v318_v18, %v446_v27  ;;  %v511_v36 = vsel %vm383_vm4, %v319_v20, %v447_v28  ;;  %vm385_vm6 = vcmp.ge.f32.partialorder %v321_v22, 0.0  ;;  %v449_v37 = vmul.f32 0.01, %v321_v22  ;;  %v192_v12 = vld [vmem:[%s761_s20 + $0x90] sm:$0xff] }
  0x19   : > { %575 = vst.msk [vmem:[%s794_s25 + $0x10] sm:$0xff] %vm572_vm0, %v510_v35  ;;  %576 = vst.msk [vmem:[%s794_s25 + $0x18] sm:$0xff] %vm572_vm0, %v511_v36  ;;  %v512_v38 = vsel %vm384_vm5, %v320_v21, %v448_v31  ;;  %v322_v39 = vadd.f32 %v766_v1, %v251_v19  ;;  %v323_v40 = vadd.f32 %v766_v1, %v252_v23  ;;  %v193_v13 = vld [vmem:[%s761_s20 + $0x98] sm:$0xff]  ;;  %v195_v25 = vld [vmem:[%s761_s20 + $0xa8] sm:$0xff] }
  0x1a   : > { %v253_v41 = vmul.f32 %v756_v0, %v182_v24  ;;  %577 = vst.msk [vmem:[%s794_s25 + $0x20] sm:$0xff] %vm572_vm0, %v512_v38  ;;  %v513_v42 = vsel %vm385_vm6, %v321_v22, %v449_v37  ;;  %v254_v43 = vmul.f32 %v756_v0, %v183_v32  ;;  %v255_v44 = vmul.f32 %v756_v0, %v184_v33  ;;  %v194_v24 = vld [vmem:[%s761_s20 + $0xa0] sm:$0xff]  ;;  %v196_v36 = vld [vmem:[%s761_s20 + $0xb0] sm:$0xff]  ;;  %v197_v37 = vld [vmem:[%s761_s20 + $0xb8] sm:$0xff] }
  0x1b   : > { %v256_v45 = vmul.f32 %v756_v0, %v185_v34  ;;  %578 = vst.msk [vmem:[%s794_s25 + $0x28] sm:$0xff] %vm572_vm0, %v513_v42  ;;  %vm386_vm7 = vcmp.ge.f32.partialorder %v322_v39, 0.0  ;;  %v450_v48 = vmul.f32 0.01, %v322_v39  ;;  %vm387_vm8 = vcmp.ge.f32.partialorder %v323_v40, 0.0 }
  0x1c   : > { %v451_v49 = vmul.f32 0.01, %v323_v40  ;;  %v324_v50 = vadd.f32 %v766_v1, %v253_v41  ;;  %v325_v51 = vadd.f32 %v766_v1, %v254_v43  ;;  %v326_v52 = vadd.f32 %v766_v1, %v255_v44 }
  0x1d   : > { %v327_v53 = vadd.f32 %v766_v1, %v256_v45  ;;  %v514_v54 = vsel %vm386_vm7, %v322_v39, %v450_v48  ;;  %v257_v56 = vmul.f32 %v756_v0, %v186_v46  ;;  %v258_v57 = vmul.f32 %v756_v0, %v187_v47  ;;  %v198_v46 = vld [vmem:[%s761_s20 + $0xc0] sm:$0xff]  ;;  %v199_v47 = vld [vmem:[%s761_s20 + $0xc8] sm:$0xff] }
  0x1e   : > { %v515_v55 = vsel %vm387_vm8, %v323_v40, %v451_v49  ;;  %579 = vst.msk [vmem:[%s794_s25 + $0x30] sm:$0xff] %vm572_vm0, %v514_v54  ;;  %vm388_vm9 = vcmp.ge.f32.partialorder %v324_v50, 0.0  ;;  %v452_v60 = vmul.f32 0.01, %v324_v50  ;;  %vm389_vm10 = vcmp.ge.f32.partialorder %v325_v51, 0.0 }
  0x1f   : > { %580 = vst.msk [vmem:[%s794_s25 + $0x38] sm:$0xff] %vm572_vm0, %v515_v55  ;;  %v453_v61 = vmul.f32 0.01, %v325_v51  ;;  %vm390_vm11 = vcmp.ge.f32.partialorder %v326_v52, 0.0  ;;  %v454_v62 = vmul.f32 0.01, %v326_v52  ;;  %v328_v4 = vadd.f32 %v766_v1, %v257_v56 }
  0x20   : > { %vm391_vm12 = vcmp.ge.f32.partialorder %v327_v53, 0.0  ;;  %v455_v63 = vmul.f32 0.01, %v327_v53  ;;  %v516_v2 = vsel %vm388_vm9, %v324_v50, %v452_v60  ;;  %v329_v5 = vadd.f32 %v766_v1, %v258_v57 }
  0x21   : > { %v517_v3 = vsel %vm389_vm10, %v325_v51, %v453_v61  ;;  %581 = vst.msk [vmem:[%s794_s25 + $0x40] sm:$0xff] %vm572_vm0, %v516_v2  ;;  %v518_v8 = vsel %vm390_vm11, %v326_v52, %v454_v62  ;;  %v259_v10 = vmul.f32 %v756_v0, %v188_v58  ;;  %v260_v11 = vmul.f32 %v756_v0, %v189_v59  ;;  %v200_v52 = vld [vmem:[%s761_s20 + $0xd0] sm:$0xff]  ;;  %v202_v2 = vld [vmem:[%s761_s20 + $0xe0] sm:$0xff] }
  0x22   : > { %582 = vst.msk [vmem:[%s794_s25 + $0x48] sm:$0xff] %vm572_vm0, %v517_v3  ;;  %v519_v9 = vsel %vm391_vm12, %v327_v53, %v455_v63  ;;  %583 = vst.msk [vmem:[%s794_s25 + $0x50] sm:$0xff] %vm572_vm0, %v518_v8  ;;  %vm392_vm13 = vcmp.ge.f32.partialorder %v328_v4, 0.0  ;;  %v456_v14 = vmul.f32 0.01, %v328_v4  ;;  %vm393_vm14 = vcmp.ge.f32.partialorder %v329_v5, 0.0 }
  0x23   : > { %584 = vst.msk [vmem:[%s794_s25 + $0x58] sm:$0xff] %vm572_vm0, %v519_v9  ;;  %v457_v15 = vmul.f32 0.01, %v329_v5  ;;  %v330_v16 = vadd.f32 %v766_v1, %v259_v10  ;;  %v331_v17 = vadd.f32 %v766_v1, %v260_v11  ;;  %v261_v18 = vmul.f32 %v756_v0, %v190_v6  ;;  %v201_v53 = vld [vmem:[%s761_s20 + $0xd8] sm:$0xff]  ;;  %v203_v3 = vld [vmem:[%s761_s20 + $0xe8] sm:$0xff] }
  0x24   : > { %v262_v19 = vmul.f32 %v756_v0, %v191_v7  ;;  %v520_v20 = vsel %vm392_vm13, %v328_v4, %v456_v14  ;;  %v263_v22 = vmul.f32 %v756_v0, %v192_v12  ;;  %v264_v23 = vmul.f32 %v756_v0, %v193_v13  ;;  %v204_v14 = vld [vmem:[%s761_s20 + $0xf0] sm:$0xff] }
  0x25   : > { %v521_v21 = vsel %vm393_vm14, %v329_v5, %v457_v15  ;;  %585 = vst.msk [vmem:[%s794_s25 + $0x60] sm:$0xff] %vm572_vm0, %v520_v20  ;;  %vm394_vm15 = vcmp.ge.f32.partialorder %v330_v16, 0.0  ;;  %v458_v26 = vmul.f32 0.01, %v330_v16  ;;  %vm395_vm1 = vcmp.ge.f32.partialorder %v331_v17, 0.0  ;;  %v205_v15 = vld [vmem:[%s761_s20 + $0xf8] sm:$0xff] }
  0x26   : > { %586 = vst.msk [vmem:[%s794_s25 + $0x68] sm:$0xff] %vm572_vm0, %v521_v21  ;;  %v459_v27 = vmul.f32 0.01, %v331_v17  ;;  %v332_v28 = vadd.f32 %v766_v1, %v261_v18  ;;  %v333_v29 = vadd.f32 %v766_v1, %v262_v19  ;;  %v334_v30 = vadd.f32 %v766_v1, %v263_v22 }
  0x27   : > { %v335_v31 = vadd.f32 %v766_v1, %v264_v23  ;;  %v522_v32 = vsel %vm394_vm15, %v330_v16, %v458_v26  ;;  %v265_v34 = vmul.f32 %v756_v0, %v194_v24  ;;  %v266_v35 = vmul.f32 %v756_v0, %v195_v25  ;;  %v206_v24 = vld [vmem:[%s761_s20 + $0x100] sm:$0xff]  ;;  %v207_v25 = vld [vmem:[%s761_s20 + $0x108] sm:$0xff] }
  0x28   : > { %v523_v33 = vsel %vm395_vm1, %v331_v17, %v459_v27  ;;  %587 = vst.msk [vmem:[%s794_s25 + $0x70] sm:$0xff] %vm572_vm0, %v522_v32  ;;  %vm396_vm2 = vcmp.ge.f32.partialorder %v332_v28, 0.0  ;;  %v460_v38 = vmul.f32 0.01, %v332_v28  ;;  %vm397_vm3 = vcmp.ge.f32.partialorder %v333_v29, 0.0 }
  0x29   : > { %588 = vst.msk [vmem:[%s794_s25 + $0x78] sm:$0xff] %vm572_vm0, %v523_v33  ;;  %v461_v39 = vmul.f32 0.01, %v333_v29  ;;  %vm398_vm4 = vcmp.ge.f32.partialorder %v334_v30, 0.0  ;;  %v462_v40 = vmul.f32 0.01, %v334_v30  ;;  %v336_v44 = vadd.f32 %v766_v1, %v265_v34 }
  0x2a   : > { %vm399_vm5 = vcmp.ge.f32.partialorder %v335_v31, 0.0  ;;  %v463_v41 = vmul.f32 0.01, %v335_v31  ;;  %v524_v42 = vsel %vm396_vm2, %v332_v28, %v460_v38  ;;  %v337_v45 = vadd.f32 %v766_v1, %v266_v35 }
  0x2b   : > { %v525_v43 = vsel %vm397_vm3, %v333_v29, %v461_v39  ;;  %589 = vst.msk [vmem:[%s794_s25 + $0x80] sm:$0xff] %vm572_vm0, %v524_v42  ;;  %v526_v48 = vsel %vm398_vm4, %v334_v30, %v462_v40  ;;  %v267_v50 = vmul.f32 %v756_v0, %v196_v36  ;;  %v268_v51 = vmul.f32 %v756_v0, %v197_v37  ;;  %v208_v30 = vld [vmem:[%s761_s20 + $0x110] sm:$0xff]  ;;  %v210_v42 = vld [vmem:[%s761_s20 + $0x120] sm:$0xff] }
  0x2c   : > { %590 = vst.msk [vmem:[%s794_s25 + $0x88] sm:$0xff] %vm572_vm0, %v525_v43  ;;  %v527_v49 = vsel %vm399_vm5, %v335_v31, %v463_v41  ;;  %591 = vst.msk [vmem:[%s794_s25 + $0x90] sm:$0xff] %vm572_vm0, %v526_v48  ;;  %vm400_vm6 = vcmp.ge.f32.partialorder %v336_v44, 0.0  ;;  %v464_v54 = vmul.f32 0.01, %v336_v44  ;;  %vm401_vm7 = vcmp.ge.f32.partialorder %v337_v45, 0.0 }
  0x2d   : > { %592 = vst.msk [vmem:[%s794_s25 + $0x98] sm:$0xff] %vm572_vm0, %v527_v49  ;;  %v465_v55 = vmul.f32 0.01, %v337_v45  ;;  %v338_v56 = vadd.f32 %v766_v1, %v267_v50  ;;  %v339_v57 = vadd.f32 %v766_v1, %v268_v51  ;;  %v269_v58 = vmul.f32 %v756_v0, %v198_v46  ;;  %v209_v31 = vld [vmem:[%s761_s20 + $0x118] sm:$0xff]  ;;  %v211_v43 = vld [vmem:[%s761_s20 + $0x128] sm:$0xff] }
  0x2e   : > { %v270_v59 = vmul.f32 %v756_v0, %v199_v47  ;;  %v528_v60 = vsel %vm400_vm6, %v336_v44, %v464_v54  ;;  %v271_v62 = vmul.f32 %v756_v0, %v200_v52  ;;  %v272_v63 = vmul.f32 %v756_v0, %v201_v53  ;;  %v212_v54 = vld [vmem:[%s761_s20 + $0x130] sm:$0xff] }
  0x2f   : > { %v529_v61 = vsel %vm401_vm7, %v337_v45, %v465_v55  ;;  %593 = vst.msk [vmem:[%s794_s25 + $0xa0] sm:$0xff] %vm572_vm0, %v528_v60  ;;  %vm402_vm8 = vcmp.ge.f32.partialorder %v338_v56, 0.0  ;;  %v466_v4 = vmul.f32 0.01, %v338_v56  ;;  %vm403_vm9 = vcmp.ge.f32.partialorder %v339_v57, 0.0  ;;  %v213_v55 = vld [vmem:[%s761_s20 + $0x138] sm:$0xff] }
  0x30   : > { %594 = vst.msk [vmem:[%s794_s25 + $0xa8] sm:$0xff] %vm572_vm0, %v529_v61  ;;  %v467_v5 = vmul.f32 0.01, %v339_v57  ;;  %v340_v6 = vadd.f32 %v766_v1, %v269_v58  ;;  %v341_v7 = vadd.f32 %v766_v1, %v270_v59  ;;  %v342_v8 = vadd.f32 %v766_v1, %v271_v62 }
  0x31   : > { %v343_v9 = vadd.f32 %v766_v1, %v272_v63  ;;  %v530_v10 = vsel %vm402_vm8, %v338_v56, %v466_v4  ;;  %v273_v12 = vmul.f32 %v756_v0, %v202_v2  ;;  %v274_v13 = vmul.f32 %v756_v0, %v203_v3  ;;  %v214_v2 = vld [vmem:[%s761_s20 + $0x140] sm:$0xff]  ;;  %v215_v3 = vld [vmem:[%s761_s20 + $0x148] sm:$0xff] }
  0x32   : > { %v531_v11 = vsel %vm403_vm9, %v339_v57, %v467_v5  ;;  %595 = vst.msk [vmem:[%s794_s25 + $0xb0] sm:$0xff] %vm572_vm0, %v530_v10  ;;  %vm404_vm10 = vcmp.ge.f32.partialorder %v340_v6, 0.0  ;;  %v468_v16 = vmul.f32 0.01, %v340_v6  ;;  %vm405_vm11 = vcmp.ge.f32.partialorder %v341_v7, 0.0 }
  0x33   : > { %596 = vst.msk [vmem:[%s794_s25 + $0xb8] sm:$0xff] %vm572_vm0, %v531_v11  ;;  %v469_v17 = vmul.f32 0.01, %v341_v7  ;;  %vm406_vm12 = vcmp.ge.f32.partialorder %v342_v8, 0.0  ;;  %v470_v18 = vmul.f32 0.01, %v342_v8  ;;  %v344_v22 = vadd.f32 %v766_v1, %v273_v12 }
  0x34   : > { %vm407_vm13 = vcmp.ge.f32.partialorder %v343_v9, 0.0  ;;  %v471_v19 = vmul.f32 0.01, %v343_v9  ;;  %v532_v20 = vsel %vm404_vm10, %v340_v6, %v468_v16  ;;  %v345_v23 = vadd.f32 %v766_v1, %v274_v13 }
  0x35   : > { %v533_v21 = vsel %vm405_vm11, %v341_v7, %v469_v17  ;;  %597 = vst.msk [vmem:[%s794_s25 + $0xc0] sm:$0xff] %vm572_vm0, %v532_v20  ;;  %v534_v26 = vsel %vm406_vm12, %v342_v8, %v470_v18  ;;  %v275_v28 = vmul.f32 %v756_v0, %v204_v14  ;;  %v276_v29 = vmul.f32 %v756_v0, %v205_v15  ;;  %v216_v8 = vld [vmem:[%s761_s20 + $0x150] sm:$0xff]  ;;  %v218_v20 = vld [vmem:[%s761_s20 + $0x160] sm:$0xff] }
  0x36   : > { %598 = vst.msk [vmem:[%s794_s25 + $0xc8] sm:$0xff] %vm572_vm0, %v533_v21  ;;  %v535_v27 = vsel %vm407_vm13, %v343_v9, %v471_v19  ;;  %599 = vst.msk [vmem:[%s794_s25 + $0xd0] sm:$0xff] %vm572_vm0, %v534_v26  ;;  %vm408_vm14 = vcmp.ge.f32.partialorder %v344_v22, 0.0  ;;  %v472_v32 = vmul.f32 0.01, %v344_v22  ;;  %vm409_vm15 = vcmp.ge.f32.partialorder %v345_v23, 0.0 }
  0x37   : > { %600 = vst.msk [vmem:[%s794_s25 + $0xd8] sm:$0xff] %vm572_vm0, %v535_v27  ;;  %v473_v33 = vmul.f32 0.01, %v345_v23  ;;  %v346_v34 = vadd.f32 %v766_v1, %v275_v28  ;;  %v347_v35 = vadd.f32 %v766_v1, %v276_v29  ;;  %v277_v36 = vmul.f32 %v756_v0, %v206_v24  ;;  %v217_v9 = vld [vmem:[%s761_s20 + $0x158] sm:$0xff]  ;;  %v219_v21 = vld [vmem:[%s761_s20 + $0x168] sm:$0xff] }
  0x38   : > { %v278_v37 = vmul.f32 %v756_v0, %v207_v25  ;;  %v536_v38 = vsel %vm408_vm14, %v344_v22, %v472_v32  ;;  %v279_v40 = vmul.f32 %v756_v0, %v208_v30  ;;  %v280_v41 = vmul.f32 %v756_v0, %v209_v31  ;;  %v220_v32 = vld [vmem:[%s761_s20 + $0x170] sm:$0xff] }
  0x39   : > { %v537_v39 = vsel %vm409_vm15, %v345_v23, %v473_v33  ;;  %601 = vst.msk [vmem:[%s794_s25 + $0xe0] sm:$0xff] %vm572_vm0, %v536_v38  ;;  %vm410_vm1 = vcmp.ge.f32.partialorder %v346_v34, 0.0  ;;  %v474_v44 = vmul.f32 0.01, %v346_v34  ;;  %vm411_vm2 = vcmp.ge.f32.partialorder %v347_v35, 0.0  ;;  %v221_v33 = vld [vmem:[%s761_s20 + $0x178] sm:$0xff] }
  0x3a   : > { %602 = vst.msk [vmem:[%s794_s25 + $0xe8] sm:$0xff] %vm572_vm0, %v537_v39  ;;  %v475_v45 = vmul.f32 0.01, %v347_v35  ;;  %v348_v46 = vadd.f32 %v766_v1, %v277_v36  ;;  %v349_v47 = vadd.f32 %v766_v1, %v278_v37  ;;  %v350_v48 = vadd.f32 %v766_v1, %v279_v40 }
  0x3b   : > { %v351_v49 = vadd.f32 %v766_v1, %v280_v41  ;;  %v538_v50 = vsel %vm410_vm1, %v346_v34, %v474_v44  ;;  %v281_v52 = vmul.f32 %v756_v0, %v210_v42  ;;  %v282_v53 = vmul.f32 %v756_v0, %v211_v43  ;;  %v222_v42 = vld [vmem:[%s761_s20 + $0x180] sm:$0xff]  ;;  %v223_v43 = vld [vmem:[%s761_s20 + $0x188] sm:$0xff] }
  0x3c   : > { %v539_v51 = vsel %vm411_vm2, %v347_v35, %v475_v45  ;;  %603 = vst.msk [vmem:[%s794_s25 + $0xf0] sm:$0xff] %vm572_vm0, %v538_v50  ;;  %vm412_vm3 = vcmp.ge.f32.partialorder %v348_v46, 0.0  ;;  %v476_v56 = vmul.f32 0.01, %v348_v46  ;;  %vm413_vm4 = vcmp.ge.f32.partialorder %v349_v47, 0.0 }
  0x3d   : > { %604 = vst.msk [vmem:[%s794_s25 + $0xf8] sm:$0xff] %vm572_vm0, %v539_v51  ;;  %v477_v57 = vmul.f32 0.01, %v349_v47  ;;  %vm414_vm5 = vcmp.ge.f32.partialorder %v350_v48, 0.0  ;;  %v478_v58 = vmul.f32 0.01, %v350_v48  ;;  %v352_v62 = vadd.f32 %v766_v1, %v281_v52 }
  0x3e   : > { %vm415_vm6 = vcmp.ge.f32.partialorder %v351_v49, 0.0  ;;  %v479_v59 = vmul.f32 0.01, %v351_v49  ;;  %v540_v60 = vsel %vm412_vm3, %v348_v46, %v476_v56  ;;  %v353_v63 = vadd.f32 %v766_v1, %v282_v53 }
  0x3f   : > { %v541_v61 = vsel %vm413_vm4, %v349_v47, %v477_v57  ;;  %605 = vst.msk [vmem:[%s794_s25 + $0x100] sm:$0xff] %vm572_vm0, %v540_v60  ;;  %v542_v4 = vsel %vm414_vm5, %v350_v48, %v478_v58  ;;  %v283_v6 = vmul.f32 %v756_v0, %v212_v54  ;;  %v284_v7 = vmul.f32 %v756_v0, %v213_v55  ;;  %v224_v48 = vld [vmem:[%s761_s20 + $0x190] sm:$0xff]  ;;  %v226_v60 = vld [vmem:[%s761_s20 + $0x1a0] sm:$0xff] }
  0x40   : > { %606 = vst.msk [vmem:[%s794_s25 + $0x108] sm:$0xff] %vm572_vm0, %v541_v61  ;;  %v543_v5 = vsel %vm415_vm6, %v351_v49, %v479_v59  ;;  %607 = vst.msk [vmem:[%s794_s25 + $0x110] sm:$0xff] %vm572_vm0, %v542_v4  ;;  %vm416_vm7 = vcmp.ge.f32.partialorder %v352_v62, 0.0  ;;  %v480_v10 = vmul.f32 0.01, %v352_v62  ;;  %vm417_vm8 = vcmp.ge.f32.partialorder %v353_v63, 0.0 }
  0x41   : > { %608 = vst.msk [vmem:[%s794_s25 + $0x118] sm:$0xff] %vm572_vm0, %v543_v5  ;;  %v481_v11 = vmul.f32 0.01, %v353_v63  ;;  %v354_v12 = vadd.f32 %v766_v1, %v283_v6  ;;  %v355_v13 = vadd.f32 %v766_v1, %v284_v7  ;;  %v285_v14 = vmul.f32 %v756_v0, %v214_v2  ;;  %v225_v49 = vld [vmem:[%s761_s20 + $0x198] sm:$0xff]  ;;  %v227_v61 = vld [vmem:[%s761_s20 + $0x1a8] sm:$0xff] }
  0x42   : > { %v286_v15 = vmul.f32 %v756_v0, %v215_v3  ;;  %v544_v16 = vsel %vm416_vm7, %v352_v62, %v480_v10  ;;  %v287_v18 = vmul.f32 %v756_v0, %v216_v8  ;;  %v288_v19 = vmul.f32 %v756_v0, %v217_v9  ;;  %v228_v10 = vld [vmem:[%s761_s20 + $0x1b0] sm:$0xff] }
  0x43   : > { %v545_v17 = vsel %vm417_vm8, %v353_v63, %v481_v11  ;;  %609 = vst.msk [vmem:[%s794_s25 + $0x120] sm:$0xff] %vm572_vm0, %v544_v16  ;;  %vm418_vm9 = vcmp.ge.f32.partialorder %v354_v12, 0.0  ;;  %v482_v22 = vmul.f32 0.01, %v354_v12  ;;  %vm419_vm10 = vcmp.ge.f32.partialorder %v355_v13, 0.0  ;;  %v229_v11 = vld [vmem:[%s761_s20 + $0x1b8] sm:$0xff] }
  0x44   : > { %610 = vst.msk [vmem:[%s794_s25 + $0x128] sm:$0xff] %vm572_vm0, %v545_v17  ;;  %v483_v23 = vmul.f32 0.01, %v355_v13  ;;  %v356_v24 = vadd.f32 %v766_v1, %v285_v14  ;;  %v357_v25 = vadd.f32 %v766_v1, %v286_v15  ;;  %v358_v26 = vadd.f32 %v766_v1, %v287_v18 }
  0x45   : > { %v359_v27 = vadd.f32 %v766_v1, %v288_v19  ;;  %v546_v28 = vsel %vm418_vm9, %v354_v12, %v482_v22  ;;  %v289_v30 = vmul.f32 %v756_v0, %v218_v20  ;;  %v290_v31 = vmul.f32 %v756_v0, %v219_v21  ;;  %v230_v20 = vld [vmem:[%s761_s20 + $0x1c0] sm:$0xff]  ;;  %v231_v21 = vld [vmem:[%s761_s20 + $0x1c8] sm:$0xff] }
  0x46   : > { %v547_v29 = vsel %vm419_vm10, %v355_v13, %v483_v23  ;;  %611 = vst.msk [vmem:[%s794_s25 + $0x130] sm:$0xff] %vm572_vm0, %v546_v28  ;;  %vm420_vm11 = vcmp.ge.f32.partialorder %v356_v24, 0.0  ;;  %v484_v34 = vmul.f32 0.01, %v356_v24  ;;  %vm421_vm12 = vcmp.ge.f32.partialorder %v357_v25, 0.0 }
  0x47   : > { %612 = vst.msk [vmem:[%s794_s25 + $0x138] sm:$0xff] %vm572_vm0, %v547_v29  ;;  %v485_v35 = vmul.f32 0.01, %v357_v25  ;;  %vm422_vm13 = vcmp.ge.f32.partialorder %v358_v26, 0.0  ;;  %v486_v36 = vmul.f32 0.01, %v358_v26  ;;  %v360_v40 = vadd.f32 %v766_v1, %v289_v30 }
  0x48   : > { %vm423_vm14 = vcmp.ge.f32.partialorder %v359_v27, 0.0  ;;  %v487_v37 = vmul.f32 0.01, %v359_v27  ;;  %v548_v38 = vsel %vm420_vm11, %v356_v24, %v484_v34  ;;  %v361_v41 = vadd.f32 %v766_v1, %v290_v31 }
  0x49   : > { %v549_v39 = vsel %vm421_vm12, %v357_v25, %v485_v35  ;;  %613 = vst.msk [vmem:[%s794_s25 + $0x140] sm:$0xff] %vm572_vm0, %v548_v38  ;;  %v550_v44 = vsel %vm422_vm13, %v358_v26, %v486_v36  ;;  %v291_v46 = vmul.f32 %v756_v0, %v220_v32  ;;  %v292_v47 = vmul.f32 %v756_v0, %v221_v33  ;;  %v232_v26 = vld [vmem:[%s761_s20 + $0x1d0] sm:$0xff]  ;;  %v234_v38 = vld [vmem:[%s761_s20 + $0x1e0] sm:$0xff] }
  0x4a   : > { %614 = vst.msk [vmem:[%s794_s25 + $0x148] sm:$0xff] %vm572_vm0, %v549_v39  ;;  %v551_v45 = vsel %vm423_vm14, %v359_v27, %v487_v37  ;;  %615 = vst.msk [vmem:[%s794_s25 + $0x150] sm:$0xff] %vm572_vm0, %v550_v44  ;;  %vm424_vm15 = vcmp.ge.f32.partialorder %v360_v40, 0.0  ;;  %v488_v50 = vmul.f32 0.01, %v360_v40  ;;  %vm425_vm1 = vcmp.ge.f32.partialorder %v361_v41, 0.0 }
  0x4b   : > { %616 = vst.msk [vmem:[%s794_s25 + $0x158] sm:$0xff] %vm572_vm0, %v551_v45  ;;  %v489_v51 = vmul.f32 0.01, %v361_v41  ;;  %v362_v52 = vadd.f32 %v766_v1, %v291_v46  ;;  %v363_v53 = vadd.f32 %v766_v1, %v292_v47  ;;  %v293_v54 = vmul.f32 %v756_v0, %v222_v42  ;;  %v233_v27 = vld [vmem:[%s761_s20 + $0x1d8] sm:$0xff]  ;;  %v235_v39 = vld [vmem:[%s761_s20 + $0x1e8] sm:$0xff] }
  0x4c   : > { %v294_v55 = vmul.f32 %v756_v0, %v223_v43  ;;  %v552_v56 = vsel %vm424_vm15, %v360_v40, %v488_v50  ;;  %v295_v58 = vmul.f32 %v756_v0, %v224_v48  ;;  %v296_v59 = vmul.f32 %v756_v0, %v225_v49  ;;  %v236_v50 = vld [vmem:[%s761_s20 + $0x1f0] sm:$0xff] }
  0x4d   : > { %v553_v57 = vsel %vm425_vm1, %v361_v41, %v489_v51  ;;  %617 = vst.msk [vmem:[%s794_s25 + $0x160] sm:$0xff] %vm572_vm0, %v552_v56  ;;  %vm426_vm2 = vcmp.ge.f32.partialorder %v362_v52, 0.0  ;;  %v490_v62 = vmul.f32 0.01, %v362_v52  ;;  %vm427_vm3 = vcmp.ge.f32.partialorder %v363_v53, 0.0  ;;  %v237_v51 = vld [vmem:[%s761_s20 + $0x1f8] sm:$0xff] }
  0x4e   : > { %618 = vst.msk [vmem:[%s794_s25 + $0x168] sm:$0xff] %vm572_vm0, %v553_v57  ;;  %v491_v63 = vmul.f32 0.01, %v363_v53  ;;  %v364_v2 = vadd.f32 %v766_v1, %v293_v54  ;;  %v365_v3 = vadd.f32 %v766_v1, %v294_v55  ;;  %v366_v4 = vadd.f32 %v766_v1, %v295_v58 }
  0x4f   : > { %v367_v5 = vadd.f32 %v766_v1, %v296_v59  ;;  %v554_v6 = vsel %vm426_vm2, %v362_v52, %v490_v62  ;;  %v297_v8 = vmul.f32 %v756_v0, %v226_v60  ;;  %v298_v9 = vmul.f32 %v756_v0, %v227_v61 }
  0x50   : > { %v555_v7 = vsel %vm427_vm3, %v363_v53, %v491_v63  ;;  %619 = vst.msk [vmem:[%s794_s25 + $0x170] sm:$0xff] %vm572_vm0, %v554_v6  ;;  %vm428_vm4 = vcmp.ge.f32.partialorder %v364_v2, 0.0  ;;  %v492_v12 = vmul.f32 0.01, %v364_v2  ;;  %vm429_vm5 = vcmp.ge.f32.partialorder %v365_v3, 0.0 }
  0x51   : > { %620 = vst.msk [vmem:[%s794_s25 + $0x178] sm:$0xff] %vm572_vm0, %v555_v7  ;;  %v493_v13 = vmul.f32 0.01, %v365_v3  ;;  %vm430_vm6 = vcmp.ge.f32.partialorder %v366_v4, 0.0  ;;  %v494_v14 = vmul.f32 0.01, %v366_v4  ;;  %v368_v18 = vadd.f32 %v766_v1, %v297_v8 }
  0x52   : > { %vm431_vm7 = vcmp.ge.f32.partialorder %v367_v5, 0.0  ;;  %v495_v15 = vmul.f32 0.01, %v367_v5  ;;  %v556_v16 = vsel %vm428_vm4, %v364_v2, %v492_v12  ;;  %v369_v19 = vadd.f32 %v766_v1, %v298_v9 }
  0x53   : > { %v557_v17 = vsel %vm429_vm5, %v365_v3, %v493_v13  ;;  %621 = vst.msk [vmem:[%s794_s25 + $0x180] sm:$0xff] %vm572_vm0, %v556_v16  ;;  %v558_v22 = vsel %vm430_vm6, %v366_v4, %v494_v14  ;;  %v299_v24 = vmul.f32 %v756_v0, %v228_v10  ;;  %v300_v25 = vmul.f32 %v756_v0, %v229_v11 }
  0x54   : > { %622 = vst.msk [vmem:[%s794_s25 + $0x188] sm:$0xff] %vm572_vm0, %v557_v17  ;;  %v559_v23 = vsel %vm431_vm7, %v367_v5, %v495_v15  ;;  %623 = vst.msk [vmem:[%s794_s25 + $0x190] sm:$0xff] %vm572_vm0, %v558_v22  ;;  %vm432_vm8 = vcmp.ge.f32.partialorder %v368_v18, 0.0  ;;  %v496_v28 = vmul.f32 0.01, %v368_v18  ;;  %vm433_vm9 = vcmp.ge.f32.partialorder %v369_v19, 0.0 }
  0x55   : > { %624 = vst.msk [vmem:[%s794_s25 + $0x198] sm:$0xff] %vm572_vm0, %v559_v23  ;;  %v497_v29 = vmul.f32 0.01, %v369_v19  ;;  %v370_v30 = vadd.f32 %v766_v1, %v299_v24  ;;  %v371_v31 = vadd.f32 %v766_v1, %v300_v25  ;;  %v301_v32 = vmul.f32 %v756_v0, %v230_v20 }
  0x56   : > { %v302_v33 = vmul.f32 %v756_v0, %v231_v21  ;;  %v560_v34 = vsel %vm432_vm8, %v368_v18, %v496_v28  ;;  %v303_v36 = vmul.f32 %v756_v0, %v232_v26  ;;  %v304_v37 = vmul.f32 %v756_v0, %v233_v27 }
  0x57   : > { %v561_v35 = vsel %vm433_vm9, %v369_v19, %v497_v29  ;;  %625 = vst.msk [vmem:[%s794_s25 + $0x1a0] sm:$0xff] %vm572_vm0, %v560_v34  ;;  %vm434_vm10 = vcmp.ge.f32.partialorder %v370_v30, 0.0  ;;  %v498_v40 = vmul.f32 0.01, %v370_v30  ;;  %vm435_vm11 = vcmp.ge.f32.partialorder %v371_v31, 0.0 }
  0x58   : > { %626 = vst.msk [vmem:[%s794_s25 + $0x1a8] sm:$0xff] %vm572_vm0, %v561_v35  ;;  %v499_v41 = vmul.f32 0.01, %v371_v31  ;;  %v372_v42 = vadd.f32 %v766_v1, %v301_v32  ;;  %v373_v43 = vadd.f32 %v766_v1, %v302_v33  ;;  %v374_v44 = vadd.f32 %v766_v1, %v303_v36 }
  0x59   : > { %v375_v45 = vadd.f32 %v766_v1, %v304_v37  ;;  %v562_v46 = vsel %vm434_vm10, %v370_v30, %v498_v40  ;;  %v305_v48 = vmul.f32 %v756_v0, %v234_v38  ;;  %v306_v49 = vmul.f32 %v756_v0, %v235_v39 }
  0x5a   : > { %v563_v47 = vsel %vm435_vm11, %v371_v31, %v499_v41  ;;  %627 = vst.msk [vmem:[%s794_s25 + $0x1b0] sm:$0xff] %vm572_vm0, %v562_v46  ;;  %vm436_vm12 = vcmp.ge.f32.partialorder %v372_v42, 0.0  ;;  %v500_v52 = vmul.f32 0.01, %v372_v42  ;;  %vm437_vm13 = vcmp.ge.f32.partialorder %v373_v43, 0.0 }
  0x5b   : > { %628 = vst.msk [vmem:[%s794_s25 + $0x1b8] sm:$0xff] %vm572_vm0, %v563_v47  ;;  %v501_v53 = vmul.f32 0.01, %v373_v43  ;;  %vm438_vm14 = vcmp.ge.f32.partialorder %v374_v44, 0.0  ;;  %v502_v54 = vmul.f32 0.01, %v374_v44  ;;  %v376_v58 = vadd.f32 %v766_v1, %v305_v48 }
  0x5c   : > { %vm439_vm15 = vcmp.ge.f32.partialorder %v375_v45, 0.0  ;;  %v503_v55 = vmul.f32 0.01, %v375_v45  ;;  %v564_v56 = vsel %vm436_vm12, %v372_v42, %v500_v52  ;;  %v377_v59 = vadd.f32 %v766_v1, %v306_v49 }
  0x5d   : > { %v565_v57 = vsel %vm437_vm13, %v373_v43, %v501_v53  ;;  %629 = vst.msk [vmem:[%s794_s25 + $0x1c0] sm:$0xff] %vm572_vm0, %v564_v56  ;;  %v566_v60 = vsel %vm438_vm14, %v374_v44, %v502_v54  ;;  %v307_v62 = vmul.f32 %v756_v0, %v236_v50  ;;  %v308_v63 = vmul.f32 %v756_v0, %v237_v51 }
  0x5e   : > { %630 = vst.msk [vmem:[%s794_s25 + $0x1c8] sm:$0xff] %vm572_vm0, %v565_v57  ;;  %v567_v61 = vsel %vm439_vm15, %v375_v45, %v503_v55  ;;  %631 = vst.msk [vmem:[%s794_s25 + $0x1d0] sm:$0xff] %vm572_vm0, %v566_v60  ;;  %vm440_vm1 = vcmp.ge.f32.partialorder %v376_v58, 0.0  ;;  %v504_v2 = vmul.f32 0.01, %v376_v58  ;;  %vm441_vm2 = vcmp.ge.f32.partialorder %v377_v59, 0.0 }
  0x5f   : > { %632 = vst.msk [vmem:[%s794_s25 + $0x1d8] sm:$0xff] %vm572_vm0, %v567_v61  ;;  %v505_v3 = vmul.f32 0.01, %v377_v59  ;;  %v378_v4 = vadd.f32 %v766_v1, %v307_v62  ;;  %v379_v5 = vadd.f32 %v766_v1, %v308_v63 }
  0x60   : > { %v568_v6 = vsel %vm440_vm1, %v376_v58, %v504_v2 }
  0x61   : > { %v569_v7 = vsel %vm441_vm2, %v377_v59, %v505_v3  ;;  %633 = vst.msk [vmem:[%s794_s25 + $0x1e0] sm:$0xff] %vm572_vm0, %v568_v6  ;;  %vm442_vm3 = vcmp.ge.f32.partialorder %v378_v4, 0.0  ;;  %v506_v0 = vmul.f32 0.01, %v378_v4  ;;  %vm443_vm4 = vcmp.ge.f32.partialorder %v379_v5, 0.0 }
  0x62   : > { %634 = vst.msk [vmem:[%s794_s25 + $0x1e8] sm:$0xff] %vm572_vm0, %v569_v7  ;;  %v507_v8 = vmul.f32 0.01, %v379_v5 }
  0x63   : > { %v570_v9 = vsel %vm442_vm3, %v378_v4, %v506_v0 }
  0x64   : > { %v571_v10 = vsel %vm443_vm4, %v379_v5, %v507_v8  ;;  %635 = vst.msk [vmem:[%s794_s25 + $0x1f0] sm:$0xff] %vm572_vm0, %v570_v9 }
  0x65   : > { %636 = vst.msk [vmem:[%s794_s25 + $0x1f8] sm:$0xff] %vm572_vm0, %v571_v10 }
  0x66 PF: > { %s13_s12 = sadd.s32 1, %s720_s12  }
  0x67   : > { %p10_p4 = scmp.ge.s32.totalorder %s13_s12, 6  }
  0x69   :  { %12 = sbr.rel (!%p10_p4) target bundleno = 1 (0x1), region = 62 }

// kernel: base_up_block_forward.3
= control target key start
LH: loop header
LB: loop body
LE: loop exit
PB: predicated region body
PF: predicated region fallthrough
CT: control target
= control target key end

     0   :  { %s1590_s12 = smov 0   ;;  %s2205_s0 = inlined_call_operand.vmem [shape: f32[2048,8], index: 0, kind: input, shape index: {}]   ;;  %s2206_s1 = inlined_call_operand.vmem [shape: f32[8,8], index: 1, kind: input, shape index: {}]   ;;  %s2207_s2 = inlined_call_operand.vmem [shape: f32[2048,8], index: 2, kind: output, shape index: {0}]   ;;  %s2208_s3 = inlined_call_operand.vmem [shape: f32[4,2,8], index: 3, kind: output, shape index: {1}]  }
   0x1 LB: > { %s1596_s13 = sadd.s32 4294967295, %s1568_s12   ;;  %p1317_p0 = scmp.ge.s32.totalorder %s1568_s12, 1  ;;  %s1568_s12 = sphi %s1590_s12, %s14_s12  }
   0x2   : > { %p141_p1 = scmp.lt.s32.totalorder %s1568_s12, 5 }
   0x4   : > { %p142_p2 = pnand %p1317_p0, %p141_p1 }
   0x5   : > { %v249_v0 = vld [vmem:[%s2206_s1] sm:$0xff] (!%p142_p2)  ;;  %s1318_s16 = sshll.u32 (!%p142_p2), %s1596_s13, 6  ;;  %vm250_vm0 = vcmask (!%p142_p2), 64512   ;;  %p181_p4 = scmp.lt.s32.totalorder (!%p142_p2), %s1596_s13, 3  ;;  %vm1222_vm1 = vcmask (!%p142_p2), 1040384   ;;  %vm1224_vm2 = vcmask (!%p142_p2), 58368  }
   0x6   : > { %145 = sbr.rel (%p142_p2) target bundleno = 376 (0x178), region = 28  ;;  %1454 = vmatprep.subr.mxu0 (!%p142_p2), %v249_v0  ;;  %p170_p3 = scmp.lt.s32.totalorder (!%p142_p2), %s1318_s16, 255  ;;  %1552 = vmatprep.subr.mxu1 (!%p142_p2), %v249_v0 }
   0x7   : > { %1455 = vmatpush3.msra.mxu0 (!%p142_p2), %v249_v0  ;;  %1553 = vmatpush3.msra.mxu1 (!%p142_p2), %v249_v0 }
   0xd   : > { %s2210_s16 = smov (!%p170_p3, %s1318_s16), 255  ;;  %s2212_s13 = smov (!%p181_p4, %s1596_s13), 3 }
   0xe   : > { %s1319_s17 = sshll.u32 %s2210_s16, 3  ;;  %s1322_s24 = sshll.u32 %s2212_s13, 1 }
   0xf   : > { %s1612_s20 = scalar_lea.vmem %s2205_s0, %s1319_s17  ;;  %s1747_s23 = scalar_lea.vmem %s2207_s2, %s1319_s17 }
  0x10   : > { %v185_v1 = vld [vmem:[%s1612_s20] sm:$0xff]  ;;  %v186_v2 = vld [vmem:[%s1612_s20 + $0x8] sm:$0xff]  ;;  %v187_v3 = vld [vmem:[%s1612_s20 + $0x10] sm:$0xff]  ;;  %s184_s27 = scalar_lea.vmem %s2208_s3, %s1322_s24 }
  0x11   : > { %1456 = vmatprep.mubr.msk.f32.mxu0 %vm250_vm0, %v185_v1  ;;  %v188_v4 = vld [vmem:[%s1612_s20 + $0x18] sm:$0xff]  ;;  %v189_v5 = vld [vmem:[%s1612_s20 + $0x20] sm:$0xff]  ;;  %v190_v6 = vld [vmem:[%s1612_s20 + $0x28] sm:$0xff] }
  0x12   : > { %1457 = vmatmul.mubr.msk.f32.vlgmr.msra.gmra.mrb[0].mxu0 %vm250_vm0, %v186_v2  ;;  %v191_v7 = vld [vmem:[%s1612_s20 + $0x30] sm:$0xff]  ;;  %v217_v8 = vld [vmem:[%s1612_s20 + $0x100] sm:$0xff]  ;;  %v192_v9 = vld [vmem:[%s1612_s20 + $0x38] sm:$0xff] }
  0x13   : > { %1459 = vmatprep.mubr.msk.f32.mxu0 %vm250_vm0, %v187_v3  ;;  %1504 = vmatprep.mubr.msk.f32.mxu1 %vm250_vm0, %v217_v8  ;;  %v218_v10 = vld [vmem:[%s1612_s20 + $0x108] sm:$0xff]  ;;  %v219_v11 = vld [vmem:[%s1612_s20 + $0x110] sm:$0xff]  ;;  %v193_v12 = vld [vmem:[%s1612_s20 + $0x40] sm:$0xff] }
  0x14   : > { %1505 = vmatmul.mubr.msk.f32.vlgmr.msra.gmra.mrb[0].mxu1 %vm250_vm0, %v218_v10  ;;  %v220_v13 = vld [vmem:[%s1612_s20 + $0x118] sm:$0xff]  ;;  %v221_v14 = vld [vmem:[%s1612_s20 + $0x120] sm:$0xff]  ;;  %v194_v15 = vld [vmem:[%s1612_s20 + $0x48] sm:$0xff] }
  0x15   : > { %1507 = vmatprep.mubr.msk.f32.mxu1 %vm250_vm0, %v219_v11  ;;  %v195_v16 = vld [vmem:[%s1612_s20 + $0x50] sm:$0xff]  ;;  %v222_v17 = vld [vmem:[%s1612_s20 + $0x128] sm:$0xff]  ;;  %v196_v19 = vld [vmem:[%s1612_s20 + $0x58] sm:$0xff] }
  0x16   : > { %1460 = vmatmul.mubr.msk.f32.gmra.mrb[2].mxu0 %vm250_vm0, %v188_v4  ;;  %v223_v18 = vld [vmem:[%s1612_s20 + $0x130] sm:$0xff]  ;;  %v197_v20 = vld [vmem:[%s1612_s20 + $0x60] sm:$0xff]  ;;  %v224_v21 = vld [vmem:[%s1612_s20 + $0x138] sm:$0xff] }
  0x17   : > { %1462 = vmatprep.mubr.msk.f32.mxu0 %vm250_vm0, %v189_v5  ;;  %v225_v22 = vld [vmem:[%s1612_s20 + $0x140] sm:$0xff]  ;;  %v198_v23 = vld [vmem:[%s1612_s20 + $0x68] sm:$0xff]  ;;  %v199_v24 = vld [vmem:[%s1612_s20 + $0x70] sm:$0xff] }
  0x18   : > { %1508 = vmatmul.mubr.msk.f32.gmra.mrb[2].mxu1 %vm250_vm0, %v220_v13  ;;  %v226_v25 = vld [vmem:[%s1612_s20 + $0x148] sm:$0xff]  ;;  %v227_v26 = vld [vmem:[%s1612_s20 + $0x150] sm:$0xff]  ;;  %v200_v27 = vld [vmem:[%s1612_s20 + $0x78] sm:$0xff] }
  0x19   : > { %1510 = vmatprep.mubr.msk.f32.mxu1 %vm250_vm0, %v221_v14  ;;  %v201_v28 = vld [vmem:[%s1612_s20 + $0x80] sm:$0xff]  ;;  %v228_v29 = vld [vmem:[%s1612_s20 + $0x158] sm:$0xff]  ;;  %v202_v31 = vld [vmem:[%s1612_s20 + $0x88] sm:$0xff] }
  0x1a   : > { %1463 = vmatmul.mubr.msk.f32.gmra.mrb[4].mxu0 %vm250_vm0, %v190_v6  ;;  %v229_v30 = vld [vmem:[%s1612_s20 + $0x160] sm:$0xff]  ;;  %v203_v32 = vld [vmem:[%s1612_s20 + $0x90] sm:$0xff]  ;;  %v230_v33 = vld [vmem:[%s1612_s20 + $0x168] sm:$0xff] }
  0x1b   : > { %1465 = vmatprep.mubr.msk.f32.mxu0 %vm250_vm0, %v191_v7  ;;  %v231_v34 = vld [vmem:[%s1612_s20 + $0x170] sm:$0xff]  ;;  %v204_v35 = vld [vmem:[%s1612_s20 + $0x98] sm:$0xff]  ;;  %v205_v36 = vld [vmem:[%s1612_s20 + $0xa0] sm:$0xff] }
  0x1c   : > { %1511 = vmatmul.mubr.msk.f32.gmra.mrb[4].mxu1 %vm250_vm0, %v222_v17  ;;  %v232_v37 = vld [vmem:[%s1612_s20 + $0x178] sm:$0xff]  ;;  %v233_v38 = vld [vmem:[%s1612_s20 + $0x180] sm:$0xff]  ;;  %v206_v39 = vld [vmem:[%s1612_s20 + $0xa8] sm:$0xff] }
  0x1d   : > { %1513 = vmatprep.mubr.msk.f32.mxu1 %vm250_vm0, %v223_v18  ;;  %v207_v40 = vld [vmem:[%s1612_s20 + $0xb0] sm:$0xff]  ;;  %v234_v41 = vld [vmem:[%s1612_s20 + $0x188] sm:$0xff]  ;;  %v208_v43 = vld [vmem:[%s1612_s20 + $0xb8] sm:$0xff] }
  0x1e   : > { %1466 = vmatmul.mubr.msk.f32.gmra.mrb[6].mxu0 %vm250_vm0, %v192_v9  ;;  %v235_v42 = vld [vmem:[%s1612_s20 + $0x190] sm:$0xff]  ;;  %v209_v44 = vld [vmem:[%s1612_s20 + $0xc0] sm:$0xff]  ;;  %v236_v45 = vld [vmem:[%s1612_s20 + $0x198] sm:$0xff] }
  0x1f   : > { %1468 = vmatprep.mubr.msk.f32.mxu0 %vm250_vm0, %v193_v12  ;;  %v237_v46 = vld [vmem:[%s1612_s20 + $0x1a0] sm:$0xff]  ;;  %v210_v47 = vld [vmem:[%s1612_s20 + $0xc8] sm:$0xff]  ;;  %v211_v48 = vld [vmem:[%s1612_s20 + $0xd0] sm:$0xff] }
  0x20   : > { %1514 = vmatmul.mubr.msk.f32.gmra.mrb[6].mxu1 %vm250_vm0, %v224_v21  ;;  %v238_v49 = vld [vmem:[%s1612_s20 + $0x1a8] sm:$0xff]  ;;  %v239_v50 = vld [vmem:[%s1612_s20 + $0x1b0] sm:$0xff]  ;;  %v212_v51 = vld [vmem:[%s1612_s20 + $0xd8] sm:$0xff] }
  0x21   : > { %1516 = vmatprep.mubr.msk.f32.mxu1 %vm250_vm0, %v225_v22  ;;  %v213_v52 = vld [vmem:[%s1612_s20 + $0xe0] sm:$0xff]  ;;  %v240_v53 = vld [vmem:[%s1612_s20 + $0x1b8] sm:$0xff]  ;;  %v214_v55 = vld [vmem:[%s1612_s20 + $0xe8] sm:$0xff] }
  0x22   : > { %1469 = vmatmul.mubr.msk.f32.gmra.mrb[8].mxu0 %vm250_vm0, %v194_v15  ;;  %v241_v54 = vld [vmem:[%s1612_s20 + $0x1c0] sm:$0xff]  ;;  %v215_v56 = vld [vmem:[%s1612_s20 + $0xf0] sm:$0xff]  ;;  %v242_v57 = vld [vmem:[%s1612_s20 + $0x1c8] sm:$0xff] }
  0x23   : > { %1471 = vmatprep.mubr.msk.f32.mxu0 %vm250_vm0, %v195_v16  ;;  %v243_v58 = vld [vmem:[%s1612_s20 + $0x1d0] sm:$0xff]  ;;  %v216_v59 = vld [vmem:[%s1612_s20 + $0xf8] sm:$0xff]  ;;  %v245_v61 = vld [vmem:[%s1612_s20 + $0x1e0] sm:$0xff] }
  0x24   : > { %1517 = vmatmul.mubr.msk.f32.gmra.mrb[8].mxu1 %vm250_vm0, %v226_v25  ;;  %v244_v60 = vld [vmem:[%s1612_s20 + $0x1d8] sm:$0xff]  ;;  %v246_v62 = vld [vmem:[%s1612_s20 + $0x1e8] sm:$0xff]  ;;  %v247_v63 = vld [vmem:[%s1612_s20 + $0x1f0] sm:$0xff] }
  0x25   : > { %1519 = vmatprep.mubr.msk.f32.mxu1 %vm250_vm0, %v227_v26  ;;  %v248_v0 = vld [vmem:[%s1612_s20 + $0x1f8] sm:$0xff] }
  0x26   : > { %1472 = vmatmul.mubr.msk.f32.gmra.mrb[10].mxu0 %vm250_vm0, %v196_v19 }
  0x27   : > { %1474 = vmatprep.mubr.msk.f32.mxu0 %vm250_vm0, %v197_v20 }
  0x28   : > { %1520 = vmatmul.mubr.msk.f32.gmra.mrb[10].mxu1 %vm250_vm0, %v228_v29 }
  0x29   : > { %1522 = vmatprep.mubr.msk.f32.mxu1 %vm250_vm0, %v229_v30 }
  0x2a   : > { %1475 = vmatmul.mubr.msk.f32.gmra.mrb[12].mxu0 %vm250_vm0, %v198_v23 }
  0x2b   : > { %1477 = vmatprep.mubr.msk.f32.mxu0 %vm250_vm0, %v199_v24 }
  0x2c   : > { %1523 = vmatmul.mubr.msk.f32.gmra.mrb[12].mxu1 %vm250_vm0, %v230_v33 }
  0x2d   : > { %1525 = vmatprep.mubr.msk.f32.mxu1 %vm250_vm0, %v231_v34 }
  0x2e   : > { %1478 = vmatmul.mubr.msk.f32.gmra.mrb[14].mxu0 %vm250_vm0, %v200_v27 }
  0x2f   : > { %1480 = vmatprep.mubr.msk.f32.mxu0 %vm250_vm0, %v201_v28 }
  0x30   : > { %1526 = vmatmul.mubr.msk.f32.gmra.mrb[14].mxu1 %vm250_vm0, %v232_v37 }
  0x31   : > { %1528 = vmatprep.mubr.msk.f32.mxu1 %vm250_vm0, %v233_v38 }
  0x32   : > { %1481 = vmatmul.mubr.msk.f32.gmra.mrb[16].mxu0 %vm250_vm0, %v202_v31 }
  0x33   : > { %1483 = vmatprep.mubr.msk.f32.mxu0 %vm250_vm0, %v203_v32 }
  0x34   : > { %1529 = vmatmul.mubr.msk.f32.gmra.mrb[16].mxu1 %vm250_vm0, %v234_v41 }
  0x35   : > { %1531 = vmatprep.mubr.msk.f32.mxu1 %vm250_vm0, %v235_v42 }
  0x36   : > { %1484 = vmatmul.mubr.msk.f32.gmra.mrb[18].mxu0 %vm250_vm0, %v204_v35 }
  0x37   : > { %1486 = vmatprep.mubr.msk.f32.mxu0 %vm250_vm0, %v205_v36 }
  0x38   : > { %1532 = vmatmul.mubr.msk.f32.gmra.mrb[18].mxu1 %vm250_vm0, %v236_v45 }
  0x39   : > { %1534 = vmatprep.mubr.msk.f32.mxu1 %vm250_vm0, %v237_v46 }
  0x3a   : > { %1487 = vmatmul.mubr.msk.f32.gmra.mrb[20].mxu0 %vm250_vm0, %v206_v39 }
  0x3b   : > { %1489 = vmatprep.mubr.msk.f32.mxu0 %vm250_vm0, %v207_v40 }
  0x3c   : > { %1535 = vmatmul.mubr.msk.f32.gmra.mrb[20].mxu1 %vm250_vm0, %v238_v49 }
  0x3d   : > { %1537 = vmatprep.mubr.msk.f32.mxu1 %vm250_vm0, %v239_v50 }
  0x3e   : > { %1490 = vmatmul.mubr.msk.f32.gmra.mrb[22].mxu0 %vm250_vm0, %v208_v43 }
  0x3f   : > { %1492 = vmatprep.mubr.msk.f32.mxu0 %vm250_vm0, %v209_v44 }
  0x40   : > { %1538 = vmatmul.mubr.msk.f32.gmra.mrb[22].mxu1 %vm250_vm0, %v240_v53 }
  0x41   : > { %1540 = vmatprep.mubr.msk.f32.mxu1 %vm250_vm0, %v241_v54 }
  0x42   : > { %1493 = vmatmul.mubr.msk.f32.gmra.mrb[24].mxu0 %vm250_vm0, %v210_v47 }
  0x43   : > { %1495 = vmatprep.mubr.msk.f32.mxu0 %vm250_vm0, %v211_v48 }
  0x44   : > { %1541 = vmatmul.mubr.msk.f32.gmra.mrb[24].mxu1 %vm250_vm0, %v242_v57 }
  0x45   : > { %1543 = vmatprep.mubr.msk.f32.mxu1 %vm250_vm0, %v243_v58 }
  0x46   : > { %1496 = vmatmul.mubr.msk.f32.gmra.mrb[26].mxu0 %vm250_vm0, %v212_v51 }
  0x47   : > { %1498 = vmatprep.mubr.msk.f32.mxu0 %vm250_vm0, %v213_v52 }
  0x48   : > { %1544 = vmatmul.mubr.msk.f32.gmra.mrb[26].mxu1 %vm250_vm0, %v244_v60 }
  0x49   : > { %1546 = vmatprep.mubr.msk.f32.mxu1 %vm250_vm0, %v245_v61 }
  0x4a   : > { %1499 = vmatmul.mubr.msk.f32.gmra.mrb[28].mxu0 %vm250_vm0, %v214_v55 }
  0x4b   : > { %1501 = vmatprep.mubr.msk.f32.mxu0 %vm250_vm0, %v215_v56 }
  0x4c   : > { %1547 = vmatmul.mubr.msk.f32.gmra.mrb[28].mxu1 %vm250_vm0, %v246_v62 }
  0x4d   : > { %1549 = vmatprep.mubr.msk.f32.mxu1 %vm250_vm0, %v247_v63 }
  0x4e   : > { %1502 = vmatmul.mubr.msk.f32.gmra.mrb[30].mxu0 %vm250_vm0, %v216_v59 }
  0x50   : > { %1550 = vmatmul.mubr.msk.f32.gmra.mrb[30].mxu1 %vm250_vm0, %v248_v0 }
  0xe5   : > { %v1458_v1 = vpop.f32.mrb[0].mxu0 }
  0xe6   : > { %829 = vst.msk [vmem:[%s1747_s23 + $0x8] sm:$0xff] %vm250_vm0, %v1458_v1  ;;  %v893_v2 = vsel %vm250_vm0, %v1458_v1, 0.0  ;;  %v1026_v3 = vmul.f32 %v1458_v1, %v1458_v1  ;;  %v509_v4 = vpop.f32.mrb[1].mxu0 }
  0xe7   : > { %828 = vst.msk [vmem:[%s1747_s23] sm:$0xff] %vm250_vm0, %v509_v4  ;;  %v892_v5 = vsel %vm250_vm0, %v509_v4, 0.0  ;;  %v1025_v6 = vmul.f32 %v509_v4, %v509_v4  ;;  %v1770_v27 = vpop.f32.mrb[0].mxu1 }
  0xe8   : > { %v1090_v7 = vsel %vm250_vm0, %v1026_v3, 0.0  ;;  %v894_v8 = vadd.f32 %v893_v2, %v892_v5  ;;  %861 = vst.msk [vmem:[%s1747_s23 + $0x108] sm:$0xff] %vm250_vm0, %v1770_v27  ;;  %v1775_v30 = vpop.f32.mrb[1].mxu1 }
  0xe9   : > { %v1089_v9 = vsel %vm250_vm0, %v1025_v6, 0.0  ;;  %v1461_v10 = vpop.f32.mrb[2].mxu0  ;;  %860 = vst.msk [vmem:[%s1747_s23 + $0x100] sm:$0xff] %vm250_vm0, %v1775_v30 }
  0xea   : > { %v1091_v11 = vadd.f32 %v1090_v7, %v1089_v9  ;;  %831 = vst.msk [vmem:[%s1747_s23 + $0x18] sm:$0xff] %vm250_vm0, %v1461_v10  ;;  %v519_v12 = vpop.f32.mrb[3].mxu0  ;;  %v1028_v13 = vmul.f32 %v1461_v10, %v1461_v10  ;;  %v897_v17 = vsel %vm250_vm0, %v1461_v10, 0.0 }
  0xeb   : > { %830 = vst.msk [vmem:[%s1747_s23 + $0x10] sm:$0xff] %vm250_vm0, %v519_v12  ;;  %v895_v14 = vsel %vm250_vm0, %v519_v12, 0.0  ;;  %v1027_v15 = vmul.f32 %v519_v12, %v519_v12  ;;  %v1788_v41 = vpop.f32.mrb[2].mxu1 }
  0xec   : > { %v896_v16 = vadd.f32 %v895_v14, %v894_v8  ;;  %v1094_v23 = vsel %vm250_vm0, %v1028_v13, 0.0  ;;  %863 = vst.msk [vmem:[%s1747_s23 + $0x118] sm:$0xff] %vm250_vm0, %v1788_v41  ;;  %v1793_v44 = vpop.f32.mrb[3].mxu1 }
  0xed   : > { %v1092_v18 = vsel %vm250_vm0, %v1027_v15, 0.0  ;;  %v1464_v19 = vpop.f32.mrb[4].mxu0  ;;  %862 = vst.msk [vmem:[%s1747_s23 + $0x110] sm:$0xff] %vm250_vm0, %v1793_v44 }
  0xee   : > { %v1093_v20 = vadd.f32 %v1092_v18, %v1091_v11  ;;  %833 = vst.msk [vmem:[%s1747_s23 + $0x28] sm:$0xff] %vm250_vm0, %v1464_v19  ;;  %v529_v21 = vpop.f32.mrb[5].mxu0  ;;  %v898_v22 = vadd.f32 %v897_v17, %v896_v16  ;;  %v1030_v24 = vmul.f32 %v1464_v19, %v1464_v19  ;;  %v901_v31 = vsel %vm250_vm0, %v1464_v19, 0.0 }
  0xef   : > { %832 = vst.msk [vmem:[%s1747_s23 + $0x20] sm:$0xff] %vm250_vm0, %v529_v21  ;;  %v899_v25 = vsel %vm250_vm0, %v529_v21, 0.0  ;;  %v1029_v26 = vmul.f32 %v529_v21, %v529_v21  ;;  %v1806_v55 = vpop.f32.mrb[4].mxu1 }
  0xf0   : > { %v900_v28 = vadd.f32 %v899_v25, %v898_v22  ;;  %v1095_v29 = vadd.f32 %v1094_v23, %v1093_v20  ;;  %v1098_v37 = vsel %vm250_vm0, %v1030_v24, 0.0  ;;  %865 = vst.msk [vmem:[%s1747_s23 + $0x128] sm:$0xff] %vm250_vm0, %v1806_v55  ;;  %v1811_v58 = vpop.f32.mrb[5].mxu1 }
  0xf1   : > { %v1096_v32 = vsel %vm250_vm0, %v1029_v26, 0.0  ;;  %v1467_v33 = vpop.f32.mrb[6].mxu0  ;;  %864 = vst.msk [vmem:[%s1747_s23 + $0x120] sm:$0xff] %vm250_vm0, %v1811_v58 }
  0xf2   : > { %v1097_v34 = vadd.f32 %v1096_v32, %v1095_v29  ;;  %835 = vst.msk [vmem:[%s1747_s23 + $0x38] sm:$0xff] %vm250_vm0, %v1467_v33  ;;  %v539_v35 = vpop.f32.mrb[7].mxu0  ;;  %v902_v36 = vadd.f32 %v901_v31, %v900_v28  ;;  %v1032_v38 = vmul.f32 %v1467_v33, %v1467_v33  ;;  %v905_v45 = vsel %vm250_vm0, %v1467_v33, 0.0 }
  0xf3   : > { %834 = vst.msk [vmem:[%s1747_s23 + $0x30] sm:$0xff] %vm250_vm0, %v539_v35  ;;  %v903_v39 = vsel %vm250_vm0, %v539_v35, 0.0  ;;  %v1031_v40 = vmul.f32 %v539_v35, %v539_v35  ;;  %v1824_v5 = vpop.f32.mrb[6].mxu1 }
  0xf4   : > { %v904_v42 = vadd.f32 %v903_v39, %v902_v36  ;;  %v1099_v43 = vadd.f32 %v1098_v37, %v1097_v34  ;;  %v1102_v51 = vsel %vm250_vm0, %v1032_v38, 0.0  ;;  %867 = vst.msk [vmem:[%s1747_s23 + $0x138] sm:$0xff] %vm250_vm0, %v1824_v5  ;;  %v1829_v8 = vpop.f32.mrb[7].mxu1 }
  0xf5   : > { %v1100_v46 = vsel %vm250_vm0, %v1031_v40, 0.0  ;;  %v1470_v47 = vpop.f32.mrb[8].mxu0  ;;  %866 = vst.msk [vmem:[%s1747_s23 + $0x130] sm:$0xff] %vm250_vm0, %v1829_v8 }
  0xf6   : > { %v1101_v48 = vadd.f32 %v1100_v46, %v1099_v43  ;;  %837 = vst.msk [vmem:[%s1747_s23 + $0x48] sm:$0xff] %vm250_vm0, %v1470_v47  ;;  %v549_v49 = vpop.f32.mrb[9].mxu0  ;;  %v906_v50 = vadd.f32 %v905_v45, %v904_v42  ;;  %v1034_v52 = vmul.f32 %v1470_v47, %v1470_v47  ;;  %v909_v59 = vsel %vm250_vm0, %v1470_v47, 0.0 }
  0xf7   : > { %836 = vst.msk [vmem:[%s1747_s23 + $0x40] sm:$0xff] %vm250_vm0, %v549_v49  ;;  %v907_v53 = vsel %vm250_vm0, %v549_v49, 0.0  ;;  %v1033_v54 = vmul.f32 %v549_v49, %v549_v49  ;;  %v1842_v19 = vpop.f32.mrb[8].mxu1 }
  0xf8   : > { %v908_v56 = vadd.f32 %v907_v53, %v906_v50  ;;  %v1103_v57 = vadd.f32 %v1102_v51, %v1101_v48  ;;  %v1106_v1 = vsel %vm250_vm0, %v1034_v52, 0.0  ;;  %869 = vst.msk [vmem:[%s1747_s23 + $0x148] sm:$0xff] %vm250_vm0, %v1842_v19  ;;  %v1847_v22 = vpop.f32.mrb[9].mxu1 }
  0xf9   : > { %v1104_v60 = vsel %vm250_vm0, %v1033_v54, 0.0  ;;  %v1473_v61 = vpop.f32.mrb[10].mxu0  ;;  %868 = vst.msk [vmem:[%s1747_s23 + $0x140] sm:$0xff] %vm250_vm0, %v1847_v22 }
  0xfa   : > { %v1105_v62 = vadd.f32 %v1104_v60, %v1103_v57  ;;  %839 = vst.msk [vmem:[%s1747_s23 + $0x58] sm:$0xff] %vm250_vm0, %v1473_v61  ;;  %v559_v63 = vpop.f32.mrb[11].mxu0  ;;  %v910_v0 = vadd.f32 %v909_v59, %v908_v56  ;;  %v1036_v2 = vmul.f32 %v1473_v61, %v1473_v61  ;;  %v913_v9 = vsel %vm250_vm0, %v1473_v61, 0.0 }
  0xfb   : > { %838 = vst.msk [vmem:[%s1747_s23 + $0x50] sm:$0xff] %vm250_vm0, %v559_v63  ;;  %v911_v3 = vsel %vm250_vm0, %v559_v63, 0.0  ;;  %v1035_v4 = vmul.f32 %v559_v63, %v559_v63  ;;  %v1860_v35 = vpop.f32.mrb[10].mxu1 }
  0xfc   : > { %v912_v6 = vadd.f32 %v911_v3, %v910_v0  ;;  %v1107_v7 = vadd.f32 %v1106_v1, %v1105_v62  ;;  %v1110_v15 = vsel %vm250_vm0, %v1036_v2, 0.0  ;;  %871 = vst.msk [vmem:[%s1747_s23 + $0x158] sm:$0xff] %vm250_vm0, %v1860_v35  ;;  %v1865_v38 = vpop.f32.mrb[11].mxu1 }
  0xfd   : > { %v1108_v10 = vsel %vm250_vm0, %v1035_v4, 0.0  ;;  %v1476_v11 = vpop.f32.mrb[12].mxu0  ;;  %870 = vst.msk [vmem:[%s1747_s23 + $0x150] sm:$0xff] %vm250_vm0, %v1865_v38 }
  0xfe   : > { %v1109_v12 = vadd.f32 %v1108_v10, %v1107_v7  ;;  %841 = vst.msk [vmem:[%s1747_s23 + $0x68] sm:$0xff] %vm250_vm0, %v1476_v11  ;;  %v569_v13 = vpop.f32.mrb[13].mxu0  ;;  %v914_v14 = vadd.f32 %v913_v9, %v912_v6  ;;  %v1038_v16 = vmul.f32 %v1476_v11, %v1476_v11  ;;  %v917_v23 = vsel %vm250_vm0, %v1476_v11, 0.0 }
  0xff   : > { %840 = vst.msk [vmem:[%s1747_s23 + $0x60] sm:$0xff] %vm250_vm0, %v569_v13  ;;  %v915_v17 = vsel %vm250_vm0, %v569_v13, 0.0  ;;  %v1037_v18 = vmul.f32 %v569_v13, %v569_v13  ;;  %v1878_v51 = vpop.f32.mrb[12].mxu1 }
 0x100   : > { %v916_v20 = vadd.f32 %v915_v17, %v914_v14  ;;  %v1111_v21 = vadd.f32 %v1110_v15, %v1109_v12  ;;  %v1114_v31 = vsel %vm250_vm0, %v1038_v16, 0.0  ;;  %873 = vst.msk [vmem:[%s1747_s23 + $0x168] sm:$0xff] %vm250_vm0, %v1878_v51  ;;  %v1883_v54 = vpop.f32.mrb[13].mxu1 }
 0x101   : > { %v1112_v24 = vsel %vm250_vm0, %v1037_v18, 0.0  ;;  %v1479_v25 = vpop.f32.mrb[14].mxu0  ;;  %872 = vst.msk [vmem:[%s1747_s23 + $0x160] sm:$0xff] %vm250_vm0, %v1883_v54 }
 0x102   : > { %v1113_v26 = vadd.f32 %v1112_v24, %v1111_v21  ;;  %843 = vst.msk [vmem:[%s1747_s23 + $0x78] sm:$0xff] %vm250_vm0, %v1479_v25  ;;  %v579_v28 = vpop.f32.mrb[15].mxu0  ;;  %v918_v29 = vadd.f32 %v917_v23, %v916_v20  ;;  %v1040_v32 = vmul.f32 %v1479_v25, %v1479_v25  ;;  %v921_v39 = vsel %vm250_vm0, %v1479_v25, 0.0 }
 0x103   : > { %842 = vst.msk [vmem:[%s1747_s23 + $0x70] sm:$0xff] %vm250_vm0, %v579_v28  ;;  %v919_v33 = vsel %vm250_vm0, %v579_v28, 0.0  ;;  %v1039_v34 = vmul.f32 %v579_v28, %v579_v28  ;;  %v1896_v3 = vpop.f32.mrb[14].mxu1 }
 0x104   : > { %v920_v36 = vadd.f32 %v919_v33, %v918_v29  ;;  %v1115_v37 = vadd.f32 %v1114_v31, %v1113_v26  ;;  %v1118_v47 = vsel %vm250_vm0, %v1040_v32, 0.0  ;;  %875 = vst.msk [vmem:[%s1747_s23 + $0x178] sm:$0xff] %vm250_vm0, %v1896_v3  ;;  %v1901_v7 = vpop.f32.mrb[15].mxu1 }
 0x105   : > { %v1116_v40 = vsel %vm250_vm0, %v1039_v34, 0.0  ;;  %v1482_v42 = vpop.f32.mrb[16].mxu0  ;;  %874 = vst.msk [vmem:[%s1747_s23 + $0x170] sm:$0xff] %vm250_vm0, %v1901_v7 }
 0x106   : > { %v1117_v43 = vadd.f32 %v1116_v40, %v1115_v37  ;;  %845 = vst.msk [vmem:[%s1747_s23 + $0x88] sm:$0xff] %vm250_vm0, %v1482_v42  ;;  %v589_v45 = vpop.f32.mrb[17].mxu0  ;;  %v922_v46 = vadd.f32 %v921_v39, %v920_v36  ;;  %v1042_v48 = vmul.f32 %v1482_v42, %v1482_v42  ;;  %v925_v56 = vsel %vm250_vm0, %v1482_v42, 0.0 }
 0x107   : > { %844 = vst.msk [vmem:[%s1747_s23 + $0x80] sm:$0xff] %vm250_vm0, %v589_v45  ;;  %v923_v49 = vsel %vm250_vm0, %v589_v45, 0.0  ;;  %v1041_v50 = vmul.f32 %v589_v45, %v589_v45  ;;  %v1914_v20 = vpop.f32.mrb[16].mxu1 }
 0x108   : > { %v924_v52 = vadd.f32 %v923_v49, %v922_v46  ;;  %v1119_v53 = vadd.f32 %v1118_v47, %v1117_v43  ;;  %v1122_v63 = vsel %vm250_vm0, %v1042_v48, 0.0  ;;  %877 = vst.msk [vmem:[%s1747_s23 + $0x188] sm:$0xff] %vm250_vm0, %v1914_v20  ;;  %v1919_v24 = vpop.f32.mrb[17].mxu1 }
 0x109   : > { %v1120_v57 = vsel %vm250_vm0, %v1041_v50, 0.0  ;;  %v1485_v59 = vpop.f32.mrb[18].mxu0  ;;  %876 = vst.msk [vmem:[%s1747_s23 + $0x180] sm:$0xff] %vm250_vm0, %v1919_v24 }
 0x10a   : > { %v1121_v60 = vadd.f32 %v1120_v57, %v1119_v53  ;;  %847 = vst.msk [vmem:[%s1747_s23 + $0x98] sm:$0xff] %vm250_vm0, %v1485_v59  ;;  %v599_v61 = vpop.f32.mrb[19].mxu0  ;;  %v926_v62 = vadd.f32 %v925_v56, %v924_v52  ;;  %v1044_v0 = vmul.f32 %v1485_v59, %v1485_v59  ;;  %v929_v9 = vsel %vm250_vm0, %v1485_v59, 0.0 }
 0x10b   : > { %846 = vst.msk [vmem:[%s1747_s23 + $0x90] sm:$0xff] %vm250_vm0, %v599_v61  ;;  %v927_v1 = vsel %vm250_vm0, %v599_v61, 0.0  ;;  %v1043_v2 = vmul.f32 %v599_v61, %v599_v61  ;;  %v1932_v39 = vpop.f32.mrb[18].mxu1 }
 0x10c   : > { %v928_v4 = vadd.f32 %v927_v1, %v926_v62  ;;  %v1123_v6 = vadd.f32 %v1122_v63, %v1121_v60  ;;  %v1126_v15 = vsel %vm250_vm0, %v1044_v0, 0.0  ;;  %879 = vst.msk [vmem:[%s1747_s23 + $0x198] sm:$0xff] %vm250_vm0, %v1932_v39  ;;  %v1937_v43 = vpop.f32.mrb[19].mxu1 }
 0x10d   : > { %v1124_v10 = vsel %vm250_vm0, %v1043_v2, 0.0  ;;  %v1488_v11 = vpop.f32.mrb[20].mxu0  ;;  %878 = vst.msk [vmem:[%s1747_s23 + $0x190] sm:$0xff] %vm250_vm0, %v1937_v43 }
 0x10e   : > { %v1125_v12 = vadd.f32 %v1124_v10, %v1123_v6  ;;  %849 = vst.msk [vmem:[%s1747_s23 + $0xa8] sm:$0xff] %vm250_vm0, %v1488_v11  ;;  %v609_v13 = vpop.f32.mrb[21].mxu0  ;;  %v930_v14 = vadd.f32 %v929_v9, %v928_v4  ;;  %v1046_v16 = vmul.f32 %v1488_v11, %v1488_v11  ;;  %v933_v25 = vsel %vm250_vm0, %v1488_v11, 0.0 }
 0x10f   : > { %848 = vst.msk [vmem:[%s1747_s23 + $0xa0] sm:$0xff] %vm250_vm0, %v609_v13  ;;  %v931_v17 = vsel %vm250_vm0, %v609_v13, 0.0  ;;  %v1045_v18 = vmul.f32 %v609_v13, %v609_v13  ;;  %v1950_v59 = vpop.f32.mrb[20].mxu1 }
 0x110   : > { %v932_v21 = vadd.f32 %v931_v17, %v930_v14  ;;  %v1127_v23 = vadd.f32 %v1126_v15, %v1125_v12  ;;  %v1130_v33 = vsel %vm250_vm0, %v1046_v16, 0.0  ;;  %881 = vst.msk [vmem:[%s1747_s23 + $0x1a8] sm:$0xff] %vm250_vm0, %v1950_v59  ;;  %v1955_v62 = vpop.f32.mrb[21].mxu1 }
 0x111   : > { %v1128_v26 = vsel %vm250_vm0, %v1045_v18, 0.0  ;;  %v1491_v28 = vpop.f32.mrb[22].mxu0  ;;  %880 = vst.msk [vmem:[%s1747_s23 + $0x1a0] sm:$0xff] %vm250_vm0, %v1955_v62 }
 0x112   : > { %v1129_v29 = vadd.f32 %v1128_v26, %v1127_v23  ;;  %851 = vst.msk [vmem:[%s1747_s23 + $0xb8] sm:$0xff] %vm250_vm0, %v1491_v28  ;;  %v619_v31 = vpop.f32.mrb[23].mxu0  ;;  %v934_v32 = vadd.f32 %v933_v25, %v932_v21  ;;  %v1048_v34 = vmul.f32 %v1491_v28, %v1491_v28  ;;  %v937_v45 = vsel %vm250_vm0, %v1491_v28, 0.0 }
 0x113   : > { %850 = vst.msk [vmem:[%s1747_s23 + $0xb0] sm:$0xff] %vm250_vm0, %v619_v31  ;;  %v935_v36 = vsel %vm250_vm0, %v619_v31, 0.0  ;;  %v1047_v37 = vmul.f32 %v619_v31, %v619_v31  ;;  %v1968_v13 = vpop.f32.mrb[22].mxu1 }
 0x114   : > { %v936_v40 = vadd.f32 %v935_v36, %v934_v32  ;;  %v1131_v42 = vadd.f32 %v1130_v33, %v1129_v29  ;;  %v1134_v52 = vsel %vm250_vm0, %v1048_v34, 0.0  ;;  %883 = vst.msk [vmem:[%s1747_s23 + $0x1b8] sm:$0xff] %vm250_vm0, %v1968_v13  ;;  %v1973_v16 = vpop.f32.mrb[23].mxu1 }
 0x115   : > { %v1132_v46 = vsel %vm250_vm0, %v1047_v37, 0.0  ;;  %v1494_v47 = vpop.f32.mrb[24].mxu0  ;;  %882 = vst.msk [vmem:[%s1747_s23 + $0x1b0] sm:$0xff] %vm250_vm0, %v1973_v16 }
 0x116   : > { %v1133_v48 = vadd.f32 %v1132_v46, %v1131_v42  ;;  %853 = vst.msk [vmem:[%s1747_s23 + $0xc8] sm:$0xff] %vm250_vm0, %v1494_v47  ;;  %v629_v49 = vpop.f32.mrb[25].mxu0  ;;  %v938_v50 = vadd.f32 %v937_v45, %v936_v40  ;;  %v1050_v53 = vmul.f32 %v1494_v47, %v1494_v47  ;;  %v941_v63 = vsel %vm250_vm0, %v1494_v47, 0.0 }
 0x117   : > { %852 = vst.msk [vmem:[%s1747_s23 + $0xc0] sm:$0xff] %vm250_vm0, %v629_v49  ;;  %v939_v56 = vsel %vm250_vm0, %v629_v49, 0.0  ;;  %v1049_v57 = vmul.f32 %v629_v49, %v629_v49  ;;  %v1986_v33 = vpop.f32.mrb[24].mxu1  ;;  %v1057_v49 = vmul.f32 %v1775_v30, %v1775_v30 }
 0x118   : > { %v940_v60 = vadd.f32 %v939_v56, %v938_v50  ;;  %v1135_v61 = vadd.f32 %v1134_v52, %v1133_v48  ;;  %v1138_v9 = vsel %vm250_vm0, %v1050_v53, 0.0  ;;  %885 = vst.msk [vmem:[%s1747_s23 + $0x1c8] sm:$0xff] %vm250_vm0, %v1986_v33  ;;  %v1991_v37 = vpop.f32.mrb[25].mxu1 }
 0x119   : > { %v1136_v0 = vsel %vm250_vm0, %v1049_v57, 0.0  ;;  %v1497_v1 = vpop.f32.mrb[26].mxu0  ;;  %884 = vst.msk [vmem:[%s1747_s23 + $0x1c0] sm:$0xff] %vm250_vm0, %v1991_v37 }
 0x11a   : > { %v1137_v2 = vadd.f32 %v1136_v0, %v1135_v61  ;;  %855 = vst.msk [vmem:[%s1747_s23 + $0xd8] sm:$0xff] %vm250_vm0, %v1497_v1  ;;  %v639_v4 = vpop.f32.mrb[27].mxu0  ;;  %v942_v6 = vadd.f32 %v941_v63, %v940_v60  ;;  %v1052_v10 = vmul.f32 %v1497_v1, %v1497_v1  ;;  %v945_v17 = vsel %vm250_vm0, %v1497_v1, 0.0 }
 0x11b   : > { %854 = vst.msk [vmem:[%s1747_s23 + $0xd0] sm:$0xff] %vm250_vm0, %v639_v4  ;;  %v943_v11 = vsel %vm250_vm0, %v639_v4, 0.0  ;;  %v1051_v12 = vmul.f32 %v639_v4, %v639_v4  ;;  %v2006_v57 = vpop.f32.mrb[26].mxu1 }
 0x11c   : > { %v944_v14 = vadd.f32 %v943_v11, %v942_v6  ;;  %v1139_v15 = vadd.f32 %v1138_v9, %v1137_v2  ;;  %v1142_v28 = vsel %vm250_vm0, %v1052_v10, 0.0  ;;  %887 = vst.msk [vmem:[%s1747_s23 + $0x1d8] sm:$0xff] %vm250_vm0, %v2006_v57  ;;  %v2011_v63 = vpop.f32.mrb[27].mxu1  ;;  %v955_v2 = vsel %vm250_vm0, %v1775_v30, 0.0 }
 0x11d   : > { %v1140_v18 = vsel %vm250_vm0, %v1051_v12, 0.0  ;;  %v1500_v21 = vpop.f32.mrb[28].mxu0  ;;  %886 = vst.msk [vmem:[%s1747_s23 + $0x1d0] sm:$0xff] %vm250_vm0, %v2011_v63  ;;  %v1058_v10 = vmul.f32 %v1770_v27, %v1770_v27  ;;  %v1152_v11 = vsel %vm250_vm0, %v1057_v49, 0.0  ;;  %v1059_v12 = vmul.f32 %v1793_v44, %v1793_v44 }
 0x11e   : > { %v1141_v23 = vadd.f32 %v1140_v18, %v1139_v15  ;;  %857 = vst.msk [vmem:[%s1747_s23 + $0xe8] sm:$0xff] %vm250_vm0, %v1500_v21  ;;  %v649_v25 = vpop.f32.mrb[29].mxu0  ;;  %v946_v26 = vadd.f32 %v945_v17, %v944_v14  ;;  %v1054_v29 = vmul.f32 %v1500_v21, %v1500_v21  ;;  %v949_v40 = vsel %vm250_vm0, %v1500_v21, 0.0 }
 0x11f   : > { %856 = vst.msk [vmem:[%s1747_s23 + $0xe0] sm:$0xff] %vm250_vm0, %v649_v25  ;;  %v947_v31 = vsel %vm250_vm0, %v649_v25, 0.0  ;;  %v1053_v32 = vmul.f32 %v649_v25, %v649_v25  ;;  %v2026_v14 = vpop.f32.mrb[28].mxu1  ;;  %v957_v18 = vsel %vm250_vm0, %v1770_v27, 0.0  ;;  %v959_v21 = vsel %vm250_vm0, %v1793_v44, 0.0 }
 0x120   : > { %v948_v34 = vadd.f32 %v947_v31, %v946_v26  ;;  %v1143_v36 = vadd.f32 %v1142_v28, %v1141_v23  ;;  %v1146_v50 = vsel %vm250_vm0, %v1054_v29, 0.0  ;;  %889 = vst.msk [vmem:[%s1747_s23 + $0x1e8] sm:$0xff] %vm250_vm0, %v2026_v14  ;;  %v2031_v17 = vpop.f32.mrb[29].mxu1  ;;  %v1154_v26 = vsel %vm250_vm0, %v1058_v10, 0.0 }
 0x121   : > { %v1144_v42 = vsel %vm250_vm0, %v1053_v32, 0.0  ;;  %v1503_v45 = vpop.f32.mrb[30].mxu0  ;;  %888 = vst.msk [vmem:[%s1747_s23 + $0x1e0] sm:$0xff] %vm250_vm0, %v2031_v17  ;;  %v1060_v28 = vmul.f32 %v1788_v41, %v1788_v41  ;;  %v1156_v29 = vsel %vm250_vm0, %v1059_v12, 0.0  ;;  %v1061_v31 = vmul.f32 %v1811_v58, %v1811_v58 }
 0x122   : > { %v1145_v46 = vadd.f32 %v1144_v42, %v1143_v36  ;;  %859 = vst.msk [vmem:[%s1747_s23 + $0xf8] sm:$0xff] %vm250_vm0, %v1503_v45  ;;  %v659_v47 = vpop.f32.mrb[31].mxu0  ;;  %v950_v48 = vadd.f32 %v949_v40, %v948_v34  ;;  %v1056_v52 = vmul.f32 %v1503_v45, %v1503_v45  ;;  %v953_v0 = vsel %vm250_vm0, %v1503_v45, 0.0 }
 0x123   : > { %858 = vst.msk [vmem:[%s1747_s23 + $0xf0] sm:$0xff] %vm250_vm0, %v659_v47  ;;  %v951_v53 = vsel %vm250_vm0, %v659_v47, 0.0  ;;  %v1055_v56 = vmul.f32 %v659_v47, %v659_v47  ;;  %v2046_v27 = vpop.f32.mrb[30].mxu1  ;;  %v961_v36 = vsel %vm250_vm0, %v1788_v41, 0.0  ;;  %v963_v40 = vsel %vm250_vm0, %v1811_v58, 0.0 }
 0x124   : > { %v952_v60 = vadd.f32 %v951_v53, %v950_v48  ;;  %v1147_v61 = vadd.f32 %v1146_v50, %v1145_v46  ;;  %v1150_v9 = vsel %vm250_vm0, %v1056_v52, 0.0  ;;  %891 = vst.msk [vmem:[%s1747_s23 + $0x1f8] sm:$0xff] %vm250_vm0, %v2046_v27  ;;  %v2051_v44 = vpop.f32.mrb[31].mxu1  ;;  %v1158_v46 = vsel %vm250_vm0, %v1060_v28, 0.0 }
 0x125   : > { %v1148_v1 = vsel %vm250_vm0, %v1055_v56, 0.0  ;;  %890 = vst.msk [vmem:[%s1747_s23 + $0x1f0] sm:$0xff] %vm250_vm0, %v2051_v44  ;;  %v1062_v47 = vmul.f32 %v1806_v55, %v1806_v55  ;;  %v1160_v48 = vsel %vm250_vm0, %v1061_v31, 0.0  ;;  %v1063_v49 = vmul.f32 %v1829_v8, %v1829_v8 }
 0x126   : > { %v954_v4 = vadd.f32 %v953_v0, %v952_v60  ;;  %v1149_v6 = vadd.f32 %v1148_v1, %v1147_v61  ;;  %v965_v58 = vsel %vm250_vm0, %v1806_v55, 0.0  ;;  %v967_v52 = vsel %vm250_vm0, %v1829_v8, 0.0 }
 0x127   : > { %v1162_v60 = vsel %vm250_vm0, %v1062_v47, 0.0  ;;  %v1064_v61 = vmul.f32 %v1824_v5, %v1824_v5  ;;  %v1164_v0 = vsel %vm250_vm0, %v1063_v49, 0.0  ;;  %v1065_v1 = vmul.f32 %v1847_v22, %v1847_v22 }
 0x128   : > { %v1151_v15 = vadd.f32 %v1150_v9, %v1149_v6  ;;  %v956_v30 = vadd.f32 %v955_v2, %v954_v4  ;;  %v969_v55 = vsel %vm250_vm0, %v1824_v5, 0.0  ;;  %v971_v8 = vsel %vm250_vm0, %v1847_v22, 0.0 }
 0x129   : > { %v1166_v10 = vsel %vm250_vm0, %v1064_v61, 0.0  ;;  %v1168_v12 = vsel %vm250_vm0, %v1065_v1, 0.0  ;;  %v973_v5 = vsel %vm250_vm0, %v1842_v19, 0.0  ;;  %v975_v22 = vsel %vm250_vm0, %v1865_v38, 0.0 }
 0x12a   : > { %v1153_v23 = vadd.f32 %v1152_v11, %v1151_v15  ;;  %v958_v25 = vadd.f32 %v957_v18, %v956_v30  ;;  %v1066_v11 = vmul.f32 %v1842_v19, %v1842_v19  ;;  %v1067_v15 = vmul.f32 %v1865_v38, %v1865_v38 }
 0x12b   : > { %v977_v19 = vsel %vm250_vm0, %v1860_v35, 0.0  ;;  %v979_v38 = vsel %vm250_vm0, %v1883_v54, 0.0 }
 0x12c   : > { %v960_v32 = vadd.f32 %v959_v21, %v958_v25  ;;  %v1155_v34 = vadd.f32 %v1154_v26, %v1153_v23  ;;  %v1170_v25 = vsel %vm250_vm0, %v1066_v11, 0.0  ;;  %v1068_v26 = vmul.f32 %v1860_v35, %v1860_v35 }
 0x12d   : > { %v1172_v28 = vsel %vm250_vm0, %v1067_v15, 0.0  ;;  %v981_v35 = vsel %vm250_vm0, %v1878_v51, 0.0 }
 0x12e   : > { %v1157_v42 = vadd.f32 %v1156_v29, %v1155_v34  ;;  %v962_v45 = vadd.f32 %v961_v36, %v960_v32  ;;  %v1069_v29 = vmul.f32 %v1883_v54, %v1883_v54  ;;  %v983_v54 = vsel %vm250_vm0, %v1901_v7, 0.0 }
 0x130   : > { %v964_v50 = vadd.f32 %v963_v40, %v962_v45  ;;  %v1159_v41 = vadd.f32 %v1158_v46, %v1157_v42  ;;  %v1174_v40 = vsel %vm250_vm0, %v1068_v26, 0.0  ;;  %v1070_v42 = vmul.f32 %v1878_v51, %v1878_v51 }
 0x131   : > { %v1176_v45 = vsel %vm250_vm0, %v1069_v29, 0.0  ;;  %v1071_v46 = vmul.f32 %v1901_v7, %v1901_v7  ;;  %v985_v51 = vsel %vm250_vm0, %v1896_v3, 0.0  ;;  %v987_v7 = vsel %vm250_vm0, %v1919_v24, 0.0 }
 0x132   : > { %v1161_v53 = vadd.f32 %v1160_v48, %v1159_v41  ;;  %v966_v56 = vadd.f32 %v965_v58, %v964_v50  ;;  %v1178_v41 = vsel %vm250_vm0, %v1070_v42, 0.0  ;;  %v1072_v58 = vmul.f32 %v1896_v3, %v1896_v3 }
 0x133   : > { %v989_v3 = vsel %vm250_vm0, %v1914_v20, 0.0 }
 0x134   : > { %v968_v2 = vadd.f32 %v967_v52, %v966_v56  ;;  %v1163_v4 = vadd.f32 %v1162_v60, %v1161_v53  ;;  %v1180_v52 = vsel %vm250_vm0, %v1071_v46, 0.0  ;;  %v1073_v53 = vmul.f32 %v1919_v24, %v1919_v24 }
 0x135   : > { %v1182_v1 = vsel %vm250_vm0, %v1072_v58, 0.0  ;;  %v991_v24 = vsel %vm250_vm0, %v1937_v43, 0.0 }
 0x136   : > { %v1165_v6 = vadd.f32 %v1164_v0, %v1163_v4  ;;  %v970_v9 = vadd.f32 %v969_v55, %v968_v2  ;;  %v1074_v2 = vmul.f32 %v1914_v20, %v1914_v20  ;;  %v1184_v4 = vsel %vm250_vm0, %v1073_v53, 0.0 }
 0x137   : > { %v1075_v55 = vmul.f32 %v1937_v43, %v1937_v43  ;;  %v993_v20 = vsel %vm250_vm0, %v1932_v39, 0.0  ;;  %v995_v43 = vsel %vm250_vm0, %v1955_v62, 0.0 }
 0x138   : > { %v972_v30 = vadd.f32 %v971_v8, %v970_v9  ;;  %v1167_v18 = vadd.f32 %v1166_v10, %v1165_v6  ;;  %v1186_v11 = vsel %vm250_vm0, %v1074_v2, 0.0 }
 0x139   : > { %v1188_v15 = vsel %vm250_vm0, %v1075_v55, 0.0 }
 0x13a   : > { %v1169_v21 = vadd.f32 %v1168_v12, %v1167_v18  ;;  %v974_v23 = vadd.f32 %v973_v5, %v972_v30  ;;  %v1076_v12 = vmul.f32 %v1932_v39, %v1932_v39  ;;  %v1077_v30 = vmul.f32 %v1955_v62, %v1955_v62 }
 0x13b   : > { %v997_v39 = vsel %vm250_vm0, %v1950_v59, 0.0  ;;  %v999_v62 = vsel %vm250_vm0, %v1973_v16, 0.0 }
 0x13c   : > { %v976_v31 = vadd.f32 %v975_v22, %v974_v23  ;;  %v1171_v32 = vadd.f32 %v1170_v25, %v1169_v21  ;;  %v1190_v23 = vsel %vm250_vm0, %v1076_v12, 0.0  ;;  %v1078_v25 = vmul.f32 %v1950_v59, %v1950_v59 }
 0x13d   : > { %v1192_v26 = vsel %vm250_vm0, %v1077_v30, 0.0  ;;  %v1001_v59 = vsel %vm250_vm0, %v1968_v13, 0.0 }
 0x13e   : > { %v1173_v34 = vadd.f32 %v1172_v28, %v1171_v32  ;;  %v978_v36 = vadd.f32 %v977_v19, %v976_v31  ;;  %v1079_v28 = vmul.f32 %v1973_v16, %v1973_v16  ;;  %v1003_v16 = vsel %vm250_vm0, %v1991_v37, 0.0 }
 0x140   : > { %v980_v47 = vadd.f32 %v979_v38, %v978_v36  ;;  %v1175_v48 = vadd.f32 %v1174_v40, %v1173_v34  ;;  %v1194_v38 = vsel %vm250_vm0, %v1078_v25, 0.0  ;;  %v1080_v34 = vmul.f32 %v1968_v13, %v1968_v13 }
 0x141   : > { %v1196_v36 = vsel %vm250_vm0, %v1079_v28, 0.0  ;;  %v1081_v40 = vmul.f32 %v1991_v37, %v1991_v37  ;;  %v1005_v13 = vsel %vm250_vm0, %v1986_v33, 0.0  ;;  %v1007_v37 = vsel %vm250_vm0, %v2011_v63, 0.0 }
 0x142   : > { %v1177_v49 = vadd.f32 %v1176_v45, %v1175_v48  ;;  %v982_v50 = vadd.f32 %v981_v35, %v980_v47  ;;  %v1198_v48 = vsel %vm250_vm0, %v1080_v34, 0.0  ;;  %v1082_v35 = vmul.f32 %v1986_v33, %v1986_v33 }
 0x143   : > { %v1009_v33 = vsel %vm250_vm0, %v2006_v57, 0.0 }
 0x144   : > { %v984_v56 = vadd.f32 %v983_v54, %v982_v50  ;;  %v1179_v60 = vadd.f32 %v1178_v41, %v1177_v49  ;;  %v1200_v54 = vsel %vm250_vm0, %v1081_v40, 0.0  ;;  %v1083_v49 = vmul.f32 %v2011_v63, %v2011_v63 }
 0x145   : > { %v1202_v53 = vsel %vm250_vm0, %v1082_v35, 0.0  ;;  %v1011_v63 = vsel %vm250_vm0, %v2031_v17, 0.0 }
 0x146   : > { %v1181_v61 = vadd.f32 %v1180_v52, %v1179_v60  ;;  %v986_v0 = vadd.f32 %v985_v51, %v984_v56  ;;  %v1084_v56 = vmul.f32 %v2006_v57, %v2006_v57  ;;  %v1204_v60 = vsel %vm250_vm0, %v1083_v49, 0.0 }
 0x147   : > { %v1085_v51 = vmul.f32 %v2031_v17, %v2031_v17  ;;  %v1013_v57 = vsel %vm250_vm0, %v2026_v14, 0.0  ;;  %v1015_v17 = vsel %vm250_vm0, %v2051_v44, 0.0 }
 0x148   : > { %v988_v8 = vadd.f32 %v987_v7, %v986_v0  ;;  %v1183_v6 = vadd.f32 %v1182_v1, %v1181_v61  ;;  %v1206_v2 = vsel %vm250_vm0, %v1084_v56, 0.0 }
 0x149   : > { %v1208_v55 = vsel %vm250_vm0, %v1085_v51, 0.0 }
 0x14a   : > { %v1185_v9 = vadd.f32 %v1184_v4, %v1183_v6  ;;  %v990_v10 = vadd.f32 %v989_v3, %v988_v8  ;;  %v1086_v4 = vmul.f32 %v2026_v14, %v2026_v14  ;;  %v1087_v8 = vmul.f32 %v2051_v44, %v2051_v44 }
 0x14c   : > { %v992_v18 = vadd.f32 %v991_v24, %v990_v10  ;;  %v1187_v5 = vadd.f32 %v1186_v11, %v1185_v9  ;;  %v1210_v10 = vsel %vm250_vm0, %v1086_v4, 0.0  ;;  %v1088_v11 = vmul.f32 %v2046_v27, %v2046_v27 }
 0x14d   : > { %v1212_v12 = vsel %vm250_vm0, %v1087_v8, 0.0 }
 0x14e   : > { %v1189_v22 = vadd.f32 %v1188_v15, %v1187_v5  ;;  %v994_v21 = vadd.f32 %v993_v20, %v992_v18  ;;  %v1017_v18 = vsel %vm250_vm0, %v2046_v27, 0.0  ;;  %v1214_v20 = vsel %vm250_vm0, %v1088_v11, 0.0 }
 0x150   : > { %v996_v29 = vadd.f32 %v995_v43, %v994_v21  ;;  %v1191_v31 = vadd.f32 %v1190_v23, %v1189_v22 }
 0x152   : > { %v1193_v32 = vadd.f32 %v1192_v26, %v1191_v31  ;;  %v998_v19 = vadd.f32 %v997_v39, %v996_v29 }
 0x154   : > { %v1000_v42 = vadd.f32 %v999_v62, %v998_v19  ;;  %v1195_v45 = vadd.f32 %v1194_v38, %v1193_v32 }
 0x156   : > { %v1197_v46 = vadd.f32 %v1196_v36, %v1195_v45  ;;  %v1002_v47 = vadd.f32 %v1001_v59, %v1000_v42 }
 0x158   : > { %v1004_v50 = vadd.f32 %v1003_v16, %v1002_v47  ;;  %v1199_v41 = vadd.f32 %v1198_v48, %v1197_v46 }
 0x15a   : > { %v1201_v58 = vadd.f32 %v1200_v54, %v1199_v41  ;;  %v1006_v52 = vadd.f32 %v1005_v13, %v1004_v50 }
 0x15c   : > { %v1008_v7 = vadd.f32 %v1007_v37, %v1006_v52  ;;  %v1203_v61 = vadd.f32 %v1202_v53, %v1201_v58 }
 0x15e   : > { %v1205_v0 = vadd.f32 %v1204_v60, %v1203_v61  ;;  %v1010_v1 = vadd.f32 %v1009_v33, %v1008_v7 }
 0x160   : > { %v1012_v6 = vadd.f32 %v1011_v63, %v1010_v1  ;;  %v1207_v3 = vadd.f32 %v1206_v2, %v1205_v0 }
 0x162   : > { %v1209_v24 = vadd.f32 %v1208_v55, %v1207_v3  ;;  %v1014_v9 = vadd.f32 %v1013_v57, %v1012_v6 }
 0x164   : > { %v1016_v15 = vadd.f32 %v1015_v17, %v1014_v9  ;;  %v1211_v30 = vadd.f32 %v1210_v10, %v1209_v24 }
 0x166   : > { %v1018_v5 = vadd.f32 %v1017_v18, %v1016_v15  ;;  %v1213_v14 = vadd.f32 %v1212_v12, %v1211_v30 }
 0x168   : > { %v1019_v44 = vrot.slane %v1018_v5, 4  ;;  %v1215_v43 = vadd.f32 %v1214_v20, %v1213_v14 }
 0x16a   : > { %v1020_v22 = vadd.f32 %v1019_v44, %v1018_v5  ;;  %v1216_v21 = vrot.slane %v1215_v43, 4 }
 0x16c   : > { %v1021_v23 = vrot.slane %v1020_v22, 2  ;;  %v1217_v25 = vadd.f32 %v1216_v21, %v1215_v43 }
 0x16e   : > { %v1022_v26 = vadd.f32 %v1021_v23, %v1020_v22  ;;  %v1218_v28 = vrot.slane %v1217_v25, 2 }
 0x170   : > { %v1023_v29 = vrot.slane %v1022_v26, 1  ;;  %v1219_v31 = vadd.f32 %v1218_v28, %v1217_v25 }
 0x172   : > { %v1220_v39 = vrot.slane %v1219_v31, 1  ;;  %v1024_v27 = vadd.f32 %v1023_v29, %v1022_v26 }
 0x174   : > { %v1221_v62 = vadd.f32 %v1220_v39, %v1219_v31 }
 0x176   : > { %v1223_v32 = vsel %vm1222_vm1, %v1024_v27, %v1221_v62 }
 0x177   : > { %1225 = vst.msk [vmem:[%s184_s27] sm:$0x3] %vm1224_vm2, %v1223_v32 }
 0x178 PF: > { %s14_s12 = sadd.s32 1, %s1568_s12  }
 0x179   : > { %p11_p5 = scmp.ge.s32.totalorder %s14_s12, 6  }
 0x17b   :  { %13 = sbr.rel (!%p11_p5) target bundleno = 1 (0x1), region = 70 }

// kernel: base_up_block_forward.4
= control target key start
LH: loop header
LB: loop body
LE: loop exit
PB: predicated region body
PF: predicated region fallthrough
CT: control target
= control target key end

     0   :  { %s19218_s18 = smov 0   ;;  %s22582_s0 = inlined_call_operand.vmem [shape: f32[2,32,32,8], index: 0, kind: input, shape index: {}]   ;;  %s22583_s1 = inlined_call_operand.vmem [shape: f32[1,8], index: 1, kind: input, shape index: {}]   ;;  %s22584_s2 = inlined_call_operand.vmem [shape: f32[1,8], index: 2, kind: input, shape index: {}]   ;;  %s22585_s3 = inlined_call_operand.vmem [shape: f32[9,8,4], index: 3, kind: input, shape index: {}]   ;;  %s22586_s4 = inlined_call_operand.vmem [shape: f32[2,32,32,4], index: 4, kind: output, shape index: {0}]   ;;  %s22587_s5 = inlined_call_operand.vmem [shape: f32[2,2,4], index: 5, kind: output, shape index: {1}]  }
   0x1 LB: > { %s14055_s19 = sadd.s32 4294967295, %s19185_s18   ;;  %p14059_p0 = scmp.ge.s32.totalorder %s19185_s18, 1  ;;  %s19185_s18 = sphi %s19218_s18, %s16_s18  }
   0x2   : > { %p190_p1 = scmp.lt.s32.totalorder %s19185_s18, 3 }
   0x4   : > { %p191_p2 = pnand %p14059_p0, %p190_p1 }
   0x6   : > { %194 = sbr.rel (%p191_p2) target bundleno = 1492 (0x5d4), region = 36 }
   0xd   : > { %v19229_v0 = vld [vmem:[%s22585_s3 + $0x8] sm:$0xff]  ;;  %vm1018_vm0 = vcmask 64512   ;;  %vm1023_vm1 = vcmask 58368   ;;  %v19234_v1 = vld [vmem:[%s22585_s3 + $0x20] sm:$0xff]  ;;  %p19238_p3 = scmp.lt.s32.totalorder %s14055_s19, 1  ;;  %v19187_v2 = vmov 0.0  }
   0xe   : > { %16392 = vmatprep.subr.mxu1 %v19229_v0  ;;  %1019 = vst.msk [vmem:[#allocation2] sm:$0xff] %vm1018_vm0, %v19187_v2  ;;  %1020 = vst.msk [vmem:[#allocation2 + $0x8] sm:$0xff] %vm1018_vm0, %v19187_v2  ;;  %17168 = vmatprep.subr.mxu0 %v19234_v1  ;;  %v1447_v3 = vld [vmem:[%s22585_s3] sm:$0xff]  ;;  %v19598_v4 = vld [vmem:[%s22585_s3 + $0x28] sm:$0xff] }
   0xf   : > { %1021 = vst.msk [vmem:[#allocation2 + $0x10] sm:$0xff] %vm1018_vm0, %v19187_v2  ;;  %1022 = vst.msk [vmem:[#allocation2 + $0x18] sm:$0xff] %vm1018_vm0, %v19187_v2  ;;  %16393 = vmatpush3.msra.mxu1 %v19229_v0  ;;  %17169 = vmatpush3.msra.mxu0 %v19234_v1  ;;  %s22635_s19 = smov (!%p19238_p3, %s14055_s19), 1  ;;  %v19605_v5 = vld [vmem:[%s22583_s1] ss:$0 sm:$0xff] }
  0x10   : > { %1025 = vst.msk [vmem:[#allocation2 + $0x28] sm:$0xff] %vm1018_vm0, %v19187_v2  ;;  %1026 = vst.msk [vmem:[#allocation2 + $0x30] sm:$0xff] %vm1018_vm0, %v19187_v2  ;;  %16586 = vmatprep.subr.mxu1 %v1447_v3  ;;  %17362 = vmatprep.subr.mxu0 %v19598_v4  ;;  %s15229_s29 = sshll.u32 %s22635_s19, 10  ;;  %v19617_v6 = vld [vmem:[%s22584_s2] ss:$0 sm:$0xff] }
  0x11   : > { %1027 = vst.msk [vmem:[#allocation2 + $0x38] sm:$0xff] %vm1018_vm0, %v19187_v2  ;;  %1028 = vst.msk [vmem:[#allocation2 + $0x40] sm:$0xff] %vm1018_vm0, %v19187_v2  ;;  %s19612_s9 = scalar_lea.vmem %s22582_s0, %s15229_s29  ;;  %s21959_s14 = scalar_lea.vmem %s22586_s4, %s15229_s29 }
  0x12   : > { %1030 = vst.msk [vmem:[#allocation2 + $0x50] sm:$0xff] %vm1018_vm0, %v19187_v2  ;;  %1031 = vst.msk [vmem:[#allocation2 + $0x58] sm:$0xff] %vm1018_vm0, %v19187_v2  ;;  %v236_v7 = vld [vmem:[%s19612_s9] sm:$0xff]  ;;  %v237_v8 = vld [vmem:[%s19612_s9 + $0x8] sm:$0xff]  ;;  %s14064_s29 = sshll.u32 %s22635_s19, 1 }
  0x13   : > { %1032 = vst.msk [vmem:[#allocation2 + $0x60] sm:$0xff] %vm1018_vm0, %v19187_v2  ;;  %1033 = vst.msk [vmem:[#allocation2 + $0x68] sm:$0xff] %vm1018_vm0, %v19187_v2  ;;  %v238_v9 = vld [vmem:[%s19612_s9 + $0x10] sm:$0xff]  ;;  %v371_v10 = vmul.f32 %v19605_v5, %v236_v7  ;;  %v372_v11 = vmul.f32 %v19605_v5, %v237_v8  ;;  %v239_v13 = vld [vmem:[%s19612_s9 + $0x18] sm:$0xff]  ;;  %s235_s17 = scalar_lea.vmem %s22587_s5, %s14064_s29 }
  0x14   : > { %1035 = vst.msk [vmem:[#allocation2 + $0x78] sm:$0xff] %vm1018_vm0, %v19187_v2  ;;  %1036 = vst.msk [vmem:[#allocation2 + $0x80] sm:$0xff] %vm1018_vm0, %v19187_v2  ;;  %v373_v12 = vmul.f32 %v19605_v5, %v238_v9  ;;  %v240_v14 = vld [vmem:[%s19612_s9 + $0x20] sm:$0xff]  ;;  %v241_v15 = vld [vmem:[%s19612_s9 + $0x28] sm:$0xff]  ;;  %v374_v19 = vmul.f32 %v19605_v5, %v239_v13 }
  0x15   : > { %1037 = vst.msk [vmem:[#allocation2 + $0x88] sm:$0xff] %vm1018_vm0, %v19187_v2  ;;  %1038 = vst.msk [vmem:[#allocation2 + $0x90] sm:$0xff] %vm1018_vm0, %v19187_v2  ;;  %v1448_v16 = vld [vmem:[#allocation2 + $0x1] sm:$0xff]  ;;  %v375_v20 = vmul.f32 %v19605_v5, %v240_v14  ;;  %v376_v21 = vmul.f32 %v19605_v5, %v241_v15  ;;  %v506_v22 = vadd.f32 %v19617_v6, %v371_v10  ;;  %v242_v25 = vld [vmem:[%s19612_s9 + $0x30] sm:$0xff] }
  0x16   : > { %1040 = vst.msk [vmem:[#allocation2 + $0xa0] sm:$0xff] %vm1018_vm0, %v19187_v2  ;;  %1041 = vst.msk [vmem:[#allocation2 + $0xa8] sm:$0xff] %vm1018_vm0, %v19187_v2  ;;  %v1449_v17 = vld [vmem:[#allocation2 + $0x9] sm:$0xff]  ;;  %v1450_v18 = vld [vmem:[#allocation2 + $0x11] sm:$0xff]  ;;  %16394 = vmatprep.mubr.msk.f32.mxu1 %vm1018_vm0, %v1448_v16  ;;  %v507_v23 = vadd.f32 %v19617_v6, %v372_v11  ;;  %v508_v24 = vadd.f32 %v19617_v6, %v373_v12  ;;  %v509_v27 = vadd.f32 %v19617_v6, %v374_v19 }
  0x17   : > { %1042 = vst.msk [vmem:[#allocation2 + $0xb0] sm:$0xff] %vm1018_vm0, %v19187_v2  ;;  %1043 = vst.msk [vmem:[#allocation2 + $0xb8] sm:$0xff] %vm1018_vm0, %v19187_v2  ;;  %16395 = vmatmul.mubr.msk.f32.vlgmr.msra.gmra.mrb[0].mxu1 %vm1018_vm0, %v1449_v17  ;;  %v510_v28 = vadd.f32 %v19617_v6, %v375_v20  ;;  %v511_v29 = vadd.f32 %v19617_v6, %v376_v21  ;;  %v377_v30 = vmul.f32 %v19605_v5, %v242_v25  ;;  %v243_v31 = vld [vmem:[%s19612_s9 + $0x38] sm:$0xff]  ;;  %v244_v32 = vld [vmem:[%s19612_s9 + $0x40] sm:$0xff] }
  0x18   : > { %1045 = vst.msk [vmem:[#allocation2 + $0xc8] sm:$0xff] %vm1018_vm0, %v19187_v2  ;;  %1046 = vst.msk [vmem:[#allocation2 + $0xd0] sm:$0xff] %vm1018_vm0, %v19187_v2  ;;  %16397 = vmatprep.mubr.msk.f32.mxu1 %vm1018_vm0, %v1450_v18  ;;  %vm634_vm2 = vcmp.ge.f32.partialorder %v506_v22, 0.0  ;;  %v762_v33 = vmul.f32 0.01, %v506_v22  ;;  %vm635_vm3 = vcmp.ge.f32.partialorder %v507_v23, 0.0  ;;  %16587 = vmatpush3.msra.mxu1 %v1447_v3  ;;  %v378_v48 = vmul.f32 %v19605_v5, %v243_v31 }
  0x19   : > { %1047 = vst.msk [vmem:[#allocation2 + $0xd8] sm:$0xff] %vm1018_vm0, %v19187_v2  ;;  %1048 = vst.msk [vmem:[#allocation2 + $0xe0] sm:$0xff] %vm1018_vm0, %v19187_v2  ;;  %v763_v34 = vmul.f32 0.01, %v507_v23  ;;  %vm636_vm4 = vcmp.ge.f32.partialorder %v508_v24, 0.0  ;;  %vm637_vm5 = vcmp.ge.f32.partialorder %v509_v27, 0.0  ;;  %v512_v47 = vadd.f32 %v19617_v6, %v377_v30 }
  0x1a   : > { %1050 = vst.msk [vmem:[#allocation2 + $0xf0] sm:$0xff] %vm1018_vm0, %v19187_v2  ;;  %1051 = vst.msk [vmem:[#allocation2 + $0xf8] sm:$0xff] %vm1018_vm0, %v19187_v2  ;;  %v764_v35 = vmul.f32 0.01, %v508_v24  ;;  %v765_v36 = vmul.f32 0.01, %v509_v27  ;;  %v890_v37 = vsel %vm634_vm2, %v506_v22, %v762_v33  ;;  %v379_v49 = vmul.f32 %v19605_v5, %v244_v32 }
  0x1b   : > { %1052 = vst.msk [vmem:[#allocation2 + $0x100] sm:$0xff] %vm1018_vm0, %v19187_v2  ;;  %1053 = vst.msk [vmem:[#allocation2 + $0x108] sm:$0xff] %vm1018_vm0, %v19187_v2  ;;  %v891_v38 = vsel %vm635_vm3, %v507_v23, %v763_v34  ;;  %vm638_vm6 = vcmp.ge.f32.partialorder %v510_v28, 0.0  ;;  %v766_v39 = vmul.f32 0.01, %v510_v28  ;;  %v245_v40 = vld [vmem:[%s19612_s9 + $0x48] sm:$0xff]  ;;  %v513_v56 = vadd.f32 %v19617_v6, %v378_v48 }
  0x1c   : > { %1055 = vst.msk [vmem:[#allocation2 + $0x118] sm:$0xff] %vm1018_vm0, %v19187_v2  ;;  %1056 = vst.msk [vmem:[#allocation2 + $0x120] sm:$0xff] %vm1018_vm0, %v19187_v2  ;;  %v246_v41 = vld [vmem:[%s19612_s9 + $0x50] sm:$0xff]  ;;  %v247_v42 = vld [vmem:[%s19612_s9 + $0x58] sm:$0xff]  ;;  %v892_v43 = vsel %vm636_vm4, %v508_v24, %v764_v35  ;;  %v893_v44 = vsel %vm637_vm5, %v509_v27, %v765_v36  ;;  %vm639_vm7 = vcmp.ge.f32.partialorder %v511_v29, 0.0  ;;  %v380_v52 = vmul.f32 %v19605_v5, %v245_v40 }
  0x1d   : > { %1057 = vst.msk [vmem:[#allocation2 + $0x128] sm:$0xff] %vm1018_vm0, %v19187_v2  ;;  %1058 = vst.msk [vmem:[#allocation2 + $0x130] sm:$0xff] %vm1018_vm0, %v19187_v2  ;;  %v767_v45 = vmul.f32 0.01, %v511_v29  ;;  %v894_v46 = vsel %vm638_vm6, %v510_v28, %v766_v39  ;;  %v248_v50 = vld [vmem:[%s19612_s9 + $0x60] sm:$0xff]  ;;  %v381_v53 = vmul.f32 %v19605_v5, %v246_v41  ;;  %v382_v54 = vmul.f32 %v19605_v5, %v247_v42  ;;  %v249_v0 = vld [vmem:[%s19612_s9 + $0x68] sm:$0xff] }
  0x1e   : > { %1060 = vst.msk [vmem:[#allocation2 + $0x140] sm:$0xff] %vm1018_vm0, %v19187_v2  ;;  %1061 = vst.msk [vmem:[#allocation2 + $0x148] sm:$0xff] %vm1018_vm0, %v19187_v2  ;;  %vm640_vm8 = vcmp.ge.f32.partialorder %v512_v47, 0.0  ;;  %v768_v55 = vmul.f32 0.01, %v512_v47  ;;  %v514_v57 = vadd.f32 %v19617_v6, %v379_v49  ;;  %v515_v58 = vadd.f32 %v19617_v6, %v380_v52  ;;  %v250_v1 = vld [vmem:[%s19612_s9 + $0x70] sm:$0xff] }
  0x1f   : > { %1062 = vst.msk [vmem:[#allocation2 + $0x150] sm:$0xff] %vm1018_vm0, %v19187_v2  ;;  %1063 = vst.msk [vmem:[#allocation2 + $0x158] sm:$0xff] %vm1018_vm0, %v19187_v2  ;;  %v895_v51 = vsel %vm639_vm7, %v511_v29, %v767_v45  ;;  %v516_v59 = vadd.f32 %v19617_v6, %v381_v53  ;;  %v517_v60 = vadd.f32 %v19617_v6, %v382_v54  ;;  %vm641_vm9 = vcmp.ge.f32.partialorder %v513_v56, 0.0  ;;  %v251_v12 = vld [vmem:[%s19612_s9 + $0x78] sm:$0xff]  ;;  %v252_v18 = vld [vmem:[%s19612_s9 + $0x80] sm:$0xff] }
  0x20   : > { %1065 = vst.msk [vmem:[#allocation2 + $0x168] sm:$0xff] %vm1018_vm0, %v19187_v2  ;;  %1066 = vst.msk [vmem:[#allocation2 + $0x170] sm:$0xff] %vm1018_vm0, %v19187_v2  ;;  %v383_v61 = vmul.f32 %v19605_v5, %v248_v50  ;;  %v896_v62 = vsel %vm640_vm8, %v512_v47, %v768_v55  ;;  %v769_v63 = vmul.f32 0.01, %v513_v56  ;;  %vm642_vm10 = vcmp.ge.f32.partialorder %v514_v57, 0.0  ;;  %v253_v19 = vld [vmem:[%s19612_s9 + $0x88] sm:$0xff] }
  0x21   : > { %1067 = vst.msk [vmem:[#allocation2 + $0x178] sm:$0xff] %vm1018_vm0, %v19187_v2  ;;  %1068 = vst.msk [vmem:[#allocation2 + $0x180] sm:$0xff] %vm1018_vm0, %v19187_v2  ;;  %vm643_vm11 = vcmp.ge.f32.partialorder %v515_v58, 0.0  ;;  %v771_v3 = vmul.f32 0.01, %v515_v58  ;;  %vm644_vm12 = vcmp.ge.f32.partialorder %v516_v59, 0.0  ;;  %v384_v17 = vmul.f32 %v19605_v5, %v249_v0 }
  0x22   : > { %1070 = vst.msk [vmem:[#allocation2 + $0x190] sm:$0xff] %vm1018_vm0, %v19187_v2  ;;  %1071 = vst.msk [vmem:[#allocation2 + $0x198] sm:$0xff] %vm1018_vm0, %v19187_v2  ;;  %v897_v9 = vsel %vm641_vm9, %v513_v56, %v769_v63  ;;  %v772_v10 = vmul.f32 0.01, %v516_v59  ;;  %vm645_vm13 = vcmp.ge.f32.partialorder %v517_v60, 0.0  ;;  %v518_v11 = vadd.f32 %v19617_v6, %v383_v61  ;;  %v254_v23 = vld [vmem:[%s19612_s9 + $0x90] sm:$0xff] }
  0x23   : > { %1072 = vst.msk [vmem:[#allocation2 + $0x1a0] sm:$0xff] %vm1018_vm0, %v19187_v2  ;;  %1073 = vst.msk [vmem:[#allocation2 + $0x1a8] sm:$0xff] %vm1018_vm0, %v19187_v2  ;;  %v899_v15 = vsel %vm643_vm11, %v515_v58, %v771_v3  ;;  %v773_v16 = vmul.f32 0.01, %v517_v60  ;;  %v385_v22 = vmul.f32 %v19605_v5, %v250_v1  ;;  %v386_v27 = vmul.f32 %v19605_v5, %v251_v12  ;;  %v258_v48 = vld [vmem:[%s19612_s9 + $0xb0] sm:$0xff]  ;;  %v259_v52 = vld [vmem:[%s19612_s9 + $0xb8] sm:$0xff] }
  0x24   : > { %1075 = vst.msk [vmem:[#allocation2 + $0x1b8] sm:$0xff] %vm1018_vm0, %v19187_v2  ;;  %1076 = vst.msk [vmem:[#allocation2 + $0x1c0] sm:$0xff] %vm1018_vm0, %v19187_v2  ;;  %v900_v20 = vsel %vm644_vm12, %v516_v59, %v772_v10  ;;  %vm646_vm14 = vcmp.ge.f32.partialorder %v518_v11, 0.0  ;;  %v774_v21 = vmul.f32 0.01, %v518_v11  ;;  %v387_v30 = vmul.f32 %v19605_v5, %v252_v18  ;;  %v262_v10 = vld [vmem:[%s19612_s9 + $0xd0] sm:$0xff] }
  0x25   : > { %1077 = vst.msk [vmem:[#allocation2 + $0x1c8] sm:$0xff] %vm1018_vm0, %v19187_v2  ;;  %1078 = vst.msk [vmem:[#allocation2 + $0x1d0] sm:$0xff] %vm1018_vm0, %v19187_v2  ;;  %v901_v25 = vsel %vm645_vm13, %v517_v60, %v773_v16  ;;  %v388_v31 = vmul.f32 %v19605_v5, %v253_v19  ;;  %v521_v33 = vadd.f32 %v19617_v6, %v386_v27 }
  0x26   : > { %1080 = vst.msk [vmem:[#allocation2 + $0x1e0] sm:$0xff] %vm1018_vm0, %v19187_v2  ;;  %1081 = vst.msk [vmem:[#allocation2 + $0x1e8] sm:$0xff] %vm1018_vm0, %v19187_v2  ;;  %v902_v29 = vsel %vm646_vm14, %v518_v11, %v774_v21  ;;  %v389_v34 = vmul.f32 %v19605_v5, %v254_v23  ;;  %v522_v36 = vadd.f32 %v19617_v6, %v387_v30  ;;  %v264_v23 = vld [vmem:[%s19612_s9 + $0xe0] sm:$0xff]  ;;  %v14840_v30 = vld [vmem:[%s22585_s3 + $0x30] sm:$0xff] }
  0x27   : > { %1082 = vst.msk [vmem:[#allocation2 + $0x1f0] sm:$0xff] %vm1018_vm0, %v19187_v2  ;;  %1083 = vst.msk [vmem:[#allocation2 + $0x1f8] sm:$0xff] %vm1018_vm0, %v19187_v2  ;;  %vm649_vm2 = vcmp.ge.f32.partialorder %v521_v33, 0.0  ;;  %v777_v41 = vmul.f32 0.01, %v521_v33  ;;  %v393_v61 = vmul.f32 %v19605_v5, %v258_v48  ;;  %v269_v48 = vld [vmem:[%s19612_s9 + $0x108] sm:$0xff] }
  0x28   : > { %1085 = vst.msk [vmem:[#allocation2 + $0x208] sm:$0xff] %vm1018_vm0, %v19187_v2  ;;  %1086 = vst.msk [vmem:[#allocation2 + $0x210] sm:$0xff] %vm1018_vm0, %v19187_v2  ;;  %v524_v42 = vadd.f32 %v19617_v6, %v389_v34  ;;  %vm650_vm3 = vcmp.ge.f32.partialorder %v522_v36, 0.0  ;;  %v778_v47 = vmul.f32 0.01, %v522_v36  ;;  %v399_v34 = vmul.f32 %v19605_v5, %v264_v23  ;;  %v277_v23 = vld [vmem:[%s19612_s9 + $0x148] sm:$0xff] }
  0x29   : > { %1087 = vst.msk [vmem:[#allocation2 + $0x218] sm:$0xff] %vm1018_vm0, %v19187_v2  ;;  %1088 = vst.msk [vmem:[#allocation2 + $0x220] sm:$0xff] %vm1018_vm0, %v19187_v2  ;;  %v905_v49 = vsel %vm649_vm2, %v521_v33, %v777_v41 }
  0x2a   : > { %1090 = vst.msk [vmem:[#allocation2 + $0x230] sm:$0xff] %vm1018_vm0, %v19187_v2  ;;  %1091 = vst.msk [vmem:[#allocation2 + $0x238] sm:$0xff] %vm1018_vm0, %v19187_v2  ;;  %vm652_vm5 = vcmp.ge.f32.partialorder %v524_v42, 0.0  ;;  %v906_v53 = vsel %vm650_vm3, %v522_v36, %v778_v47  ;;  %v780_v54 = vmul.f32 0.01, %v524_v42  ;;  %v534_v41 = vadd.f32 %v19617_v6, %v399_v34 }
  0x2b   : > { %1092 = vst.msk [vmem:[#allocation2 + $0x240] sm:$0xff] %vm1018_vm0, %v19187_v2  ;;  %1093 = vst.msk [vmem:[#allocation2 + $0x248] sm:$0xff] %vm1018_vm0, %v19187_v2 }
  0x2c   : > { %1095 = vst.msk [vmem:[#allocation2 + $0x258] sm:$0xff] %vm1018_vm0, %v19187_v2  ;;  %1096 = vst.msk [vmem:[#allocation2 + $0x260] sm:$0xff] %vm1018_vm0, %v19187_v2  ;;  %v908_v63 = vsel %vm652_vm5, %v524_v42, %v780_v54 }
  0x2d   : > { %1097 = vst.msk [vmem:[#allocation2 + $0x268] sm:$0xff] %vm1018_vm0, %v19187_v2  ;;  %1098 = vst.msk [vmem:[#allocation2 + $0x270] sm:$0xff] %vm1018_vm0, %v19187_v2 }
  0x2e   : > { %1100 = vst.msk [vmem:[#allocation2 + $0x280] sm:$0xff] %vm1018_vm0, %v19187_v2  ;;  %1101 = vst.msk [vmem:[#allocation2 + $0x288] sm:$0xff] %vm1018_vm0, %v19187_v2 }
  0x2f   : > { %1102 = vst.msk [vmem:[#allocation2 + $0x290] sm:$0xff] %vm1018_vm0, %v19187_v2  ;;  %1103 = vst.msk [vmem:[#allocation2 + $0x298] sm:$0xff] %vm1018_vm0, %v19187_v2 }
  0x30   : > { %1105 = vst.msk [vmem:[#allocation2 + $0x2a8] sm:$0xff] %vm1018_vm0, %v19187_v2  ;;  %1106 = vst.msk [vmem:[#allocation2 + $0x2b0] sm:$0xff] %vm1018_vm0, %v19187_v2 }
  0x31   : > { %1107 = vst.msk [vmem:[#allocation2 + $0x2b8] sm:$0xff] %vm1018_vm0, %v19187_v2  ;;  %1108 = vst.msk [vmem:[#allocation2 + $0x2c0] sm:$0xff] %vm1018_vm0, %v19187_v2 }
  0x32   : > { %1110 = vst.msk [vmem:[#allocation2 + $0x2d0] sm:$0xff] %vm1018_vm0, %v19187_v2  ;;  %1111 = vst.msk [vmem:[#allocation2 + $0x2d8] sm:$0xff] %vm1018_vm0, %v19187_v2 }
  0x33   : > { %1112 = vst.msk [vmem:[#allocation2 + $0x2e0] sm:$0xff] %vm1018_vm0, %v19187_v2  ;;  %1113 = vst.msk [vmem:[#allocation2 + $0x2e8] sm:$0xff] %vm1018_vm0, %v19187_v2 }
  0x34   : > { %1115 = vst.msk [vmem:[#allocation2 + $0x2f8] sm:$0xff] %vm1018_vm0, %v19187_v2  ;;  %1116 = vst.msk [vmem:[#allocation2 + $0x300] sm:$0xff] %vm1018_vm0, %v19187_v2 }
  0x35   : > { %1117 = vst.msk [vmem:[#allocation2 + $0x308] sm:$0xff] %vm1018_vm0, %v19187_v2  ;;  %1118 = vst.msk [vmem:[#allocation2 + $0x310] sm:$0xff] %vm1018_vm0, %v19187_v2 }
  0x36   : > { %1120 = vst.msk [vmem:[#allocation2 + $0x320] sm:$0xff] %vm1018_vm0, %v19187_v2  ;;  %1121 = vst.msk [vmem:[#allocation2 + $0x328] sm:$0xff] %vm1018_vm0, %v19187_v2 }
  0x37   : > { %1122 = vst.msk [vmem:[#allocation2 + $0x330] sm:$0xff] %vm1018_vm0, %v19187_v2  ;;  %1123 = vst.msk [vmem:[#allocation2 + $0x338] sm:$0xff] %vm1018_vm0, %v19187_v2 }
  0x38   : > { %1125 = vst.msk [vmem:[#allocation2 + $0x348] sm:$0xff] %vm1018_vm0, %v19187_v2  ;;  %1126 = vst.msk [vmem:[#allocation2 + $0x350] sm:$0xff] %vm1018_vm0, %v19187_v2 }
  0x39   : > { %1127 = vst.msk [vmem:[#allocation2 + $0x358] sm:$0xff] %vm1018_vm0, %v19187_v2  ;;  %1128 = vst.msk [vmem:[#allocation2 + $0x360] sm:$0xff] %vm1018_vm0, %v19187_v2 }
  0x3a   : > { %1130 = vst.msk [vmem:[#allocation2 + $0x370] sm:$0xff] %vm1018_vm0, %v19187_v2  ;;  %1131 = vst.msk [vmem:[#allocation2 + $0x378] sm:$0xff] %vm1018_vm0, %v19187_v2 }
  0x3b   : > { %1132 = vst.msk [vmem:[#allocation2 + $0x380] sm:$0xff] %vm1018_vm0, %v19187_v2  ;;  %1133 = vst.msk [vmem:[#allocation2 + $0x388] sm:$0xff] %vm1018_vm0, %v19187_v2 }
  0x3c   : > { %1135 = vst.msk [vmem:[#allocation2 + $0x398] sm:$0xff] %vm1018_vm0, %v19187_v2  ;;  %1136 = vst.msk [vmem:[#allocation2 + $0x3a0] sm:$0xff] %vm1018_vm0, %v19187_v2 }
  0x3d   : > { %1137 = vst.msk [vmem:[#allocation2 + $0x3a8] sm:$0xff] %vm1018_vm0, %v19187_v2  ;;  %1138 = vst.msk [vmem:[#allocation2 + $0x3b0] sm:$0xff] %vm1018_vm0, %v19187_v2 }
  0x3e   : > { %1140 = vst.msk [vmem:[#allocation2 + $0x3c0] sm:$0xff] %vm1018_vm0, %v19187_v2  ;;  %1141 = vst.msk [vmem:[#allocation2 + $0x3c8] sm:$0xff] %vm1018_vm0, %v19187_v2 }
  0x3f   : > { %1142 = vst.msk [vmem:[#allocation2 + $0x3d0] sm:$0xff] %vm1018_vm0, %v19187_v2  ;;  %1143 = vst.msk [vmem:[#allocation2 + $0x3d8] sm:$0xff] %vm1018_vm0, %v19187_v2 }
  0x40   : > { %1145 = vst.msk [vmem:[#allocation2 + $0x3e8] sm:$0xff] %vm1018_vm0, %v19187_v2  ;;  %1146 = vst.msk [vmem:[#allocation2 + $0x3f0] sm:$0xff] %vm1018_vm0, %v19187_v2 }
  0x41   : > { %1147 = vst.msk [vmem:[#allocation2 + $0x3f8] sm:$0xff] %vm1018_vm0, %v19187_v2  ;;  %1148 = vst.msk [vmem:[#allocation2 + $0x400] sm:$0xff] %vm1018_vm0, %v19187_v2 }
  0x42   : > { %1150 = vst.msk [vmem:[#allocation2 + $0x410] sm:$0xff] %vm1018_vm0, %v19187_v2  ;;  %1151 = vst.msk [vmem:[#allocation2 + $0x418] sm:$0xff] %vm1018_vm0, %v19187_v2 }
  0x43   : > { %1152 = vst.msk [vmem:[#allocation2 + $0x420] sm:$0xff] %vm1018_vm0, %v19187_v2  ;;  %1153 = vst.msk [vmem:[#allocation2 + $0x428] sm:$0xff] %vm1018_vm0, %v19187_v2 }
  0x44   : > { %1155 = vst.msk [vmem:[#allocation2 + $0x438] sm:$0xff] %vm1018_vm0, %v19187_v2  ;;  %1156 = vst.msk [vmem:[#allocation2 + $0x440] sm:$0xff] %vm1018_vm0, %v19187_v2 }
  0x45   : > { %1157 = vst.msk [vmem:[#allocation2 + $0x448] sm:$0xff] %vm1018_vm0, %v19187_v2  ;;  %1158 = vst.msk [vmem:[#allocation2 + $0x450] sm:$0xff] %vm1018_vm0, %v19187_v2 }
  0x46   : > { %1160 = vst.msk [vmem:[#allocation2 + $0x460] sm:$0xff] %vm1018_vm0, %v19187_v2  ;;  %1161 = vst.msk [vmem:[#allocation2 + $0x468] sm:$0xff] %vm1018_vm0, %v19187_v2 }
  0x47   : > { %1162 = vst.msk [vmem:[#allocation2 + $0x470] sm:$0xff] %vm1018_vm0, %v19187_v2  ;;  %1163 = vst.msk [vmem:[#allocation2 + $0x478] sm:$0xff] %vm1018_vm0, %v19187_v2 }
  0x48   : > { %1165 = vst.msk [vmem:[#allocation2 + $0x488] sm:$0xff] %vm1018_vm0, %v19187_v2  ;;  %1166 = vst.msk [vmem:[#allocation2 + $0x490] sm:$0xff] %vm1018_vm0, %v19187_v2 }
  0x49   : > { %1167 = vst.msk [vmem:[#allocation2 + $0x498] sm:$0xff] %vm1018_vm0, %v19187_v2  ;;  %1168 = vst.msk [vmem:[#allocation2 + $0x4a0] sm:$0xff] %vm1018_vm0, %v19187_v2 }
  0x4a   : > { %1170 = vst.msk [vmem:[#allocation2 + $0x4b0] sm:$0xff] %vm1018_vm0, %v19187_v2  ;;  %1171 = vst.msk [vmem:[#allocation2 + $0x4b8] sm:$0xff] %vm1018_vm0, %v19187_v2 }
  0x4b   : > { %1172 = vst.msk [vmem:[#allocation2 + $0x4c0] sm:$0xff] %vm1018_vm0, %v19187_v2  ;;  %1173 = vst.msk [vmem:[#allocation2 + $0x4c8] sm:$0xff] %vm1018_vm0, %v19187_v2 }
  0x4c   : > { %1175 = vst.msk [vmem:[#allocation2 + $0x4d8] sm:$0xff] %vm1018_vm0, %v19187_v2  ;;  %1176 = vst.msk [vmem:[#allocation2 + $0x4e0] sm:$0xff] %vm1018_vm0, %v19187_v2 }
  0x4d   : > { %1177 = vst.msk [vmem:[#allocation2 + $0x4e8] sm:$0xff] %vm1018_vm0, %v19187_v2  ;;  %1178 = vst.msk [vmem:[#allocation2 + $0x4f0] sm:$0xff] %vm1018_vm0, %v19187_v2 }
  0x4e   : > { %1180 = vst.msk [vmem:[#allocation2 + $0x500] sm:$0xff] %vm1018_vm0, %v19187_v2  ;;  %1181 = vst.msk [vmem:[#allocation2 + $0x508] sm:$0xff] %vm1018_vm0, %v19187_v2 }
  0x4f   : > { %1182 = vst.msk [vmem:[#allocation2 + $0x510] sm:$0xff] %vm1018_vm0, %v19187_v2  ;;  %1183 = vst.msk [vmem:[#allocation2 + $0x518] sm:$0xff] %vm1018_vm0, %v19187_v2 }
  0x50   : > { %1185 = vst.msk [vmem:[#allocation2 + $0x528] sm:$0xff] %vm1018_vm0, %v19187_v2  ;;  %1186 = vst.msk [vmem:[#allocation2 + $0x530] sm:$0xff] %vm1018_vm0, %v19187_v2 }
  0x51   : > { %1187 = vst.msk [vmem:[#allocation2 + $0x538] sm:$0xff] %vm1018_vm0, %v19187_v2  ;;  %1188 = vst.msk [vmem:[#allocation2 + $0x540] sm:$0xff] %vm1018_vm0, %v19187_v2 }
  0x52   : > { %1024 = vst.msk [vmem:[#allocation2 + $0x20] sm:$0x3] %vm1023_vm1, %v19187_v2  ;;  %1029 = vst.msk [vmem:[#allocation2 + $0x48] sm:$0x3] %vm1023_vm1, %v19187_v2 }
  0x53   : > { %1034 = vst.msk [vmem:[#allocation2 + $0x70] sm:$0x3] %vm1023_vm1, %v19187_v2  ;;  %1039 = vst.msk [vmem:[#allocation2 + $0x98] sm:$0x3] %vm1023_vm1, %v19187_v2 }
  0x54   : > { %1044 = vst.msk [vmem:[#allocation2 + $0xc0] sm:$0x3] %vm1023_vm1, %v19187_v2  ;;  %1049 = vst.msk [vmem:[#allocation2 + $0xe8] sm:$0x3] %vm1023_vm1, %v19187_v2 }
  0x55   : > { %1054 = vst.msk [vmem:[#allocation2 + $0x110] sm:$0x3] %vm1023_vm1, %v19187_v2  ;;  %1059 = vst.msk [vmem:[#allocation2 + $0x138] sm:$0x3] %vm1023_vm1, %v19187_v2 }
  0x56   : > { %1064 = vst.msk [vmem:[#allocation2 + $0x160] sm:$0x3] %vm1023_vm1, %v19187_v2  ;;  %1069 = vst.msk [vmem:[#allocation2 + $0x188] sm:$0x3] %vm1023_vm1, %v19187_v2 }
  0x57   : > { %1074 = vst.msk [vmem:[#allocation2 + $0x1b0] sm:$0x3] %vm1023_vm1, %v19187_v2  ;;  %1079 = vst.msk [vmem:[#allocation2 + $0x1d8] sm:$0x3] %vm1023_vm1, %v19187_v2 }
  0x58   : > { %1084 = vst.msk [vmem:[#allocation2 + $0x200] sm:$0x3] %vm1023_vm1, %v19187_v2  ;;  %1089 = vst.msk [vmem:[#allocation2 + $0x228] sm:$0x3] %vm1023_vm1, %v19187_v2 }
  0x59   : > { %1094 = vst.msk [vmem:[#allocation2 + $0x250] sm:$0x3] %vm1023_vm1, %v19187_v2  ;;  %1099 = vst.msk [vmem:[#allocation2 + $0x278] sm:$0x3] %vm1023_vm1, %v19187_v2  ;;  %v1451_v26 = vld [vmem:[#allocation2 + $0x19] sm:$0xff] }
  0x5a   : > { %1104 = vst.msk [vmem:[#allocation2 + $0x2a0] sm:$0x3] %vm1023_vm1, %v19187_v2  ;;  %1109 = vst.msk [vmem:[#allocation2 + $0x2c8] sm:$0x3] %vm1023_vm1, %v19187_v2  ;;  %16398 = vmatmul.mubr.msk.f32.gmra.mrb[2].mxu1 %vm1018_vm0, %v1451_v26  ;;  %v519_v26 = vadd.f32 %v19617_v6, %v384_v17  ;;  %v263_v17 = vld [vmem:[%s19612_s9 + $0xd8] sm:$0xff] }
  0x5b   : > { %1114 = vst.msk [vmem:[#allocation2 + $0x2f0] sm:$0x3] %vm1023_vm1, %v19187_v2  ;;  %1119 = vst.msk [vmem:[#allocation2 + $0x318] sm:$0x3] %vm1023_vm1, %v19187_v2 }
  0x5c   : > { %1124 = vst.msk [vmem:[#allocation2 + $0x340] sm:$0x3] %vm1023_vm1, %v19187_v2  ;;  %1129 = vst.msk [vmem:[#allocation2 + $0x368] sm:$0x3] %vm1023_vm1, %v19187_v2  ;;  %vm647_vm15 = vcmp.ge.f32.partialorder %v519_v26, 0.0 }
  0x5d   : > { %1134 = vst.msk [vmem:[#allocation2 + $0x390] sm:$0x3] %vm1023_vm1, %v19187_v2  ;;  %1139 = vst.msk [vmem:[#allocation2 + $0x3b8] sm:$0x3] %vm1023_vm1, %v19187_v2  ;;  %v775_v32 = vmul.f32 0.01, %v519_v26 }
  0x5e   : > { %1144 = vst.msk [vmem:[#allocation2 + $0x3e0] sm:$0x3] %vm1023_vm1, %v19187_v2  ;;  %1149 = vst.msk [vmem:[#allocation2 + $0x408] sm:$0x3] %vm1023_vm1, %v19187_v2 }
  0x5f   : > { %1154 = vst.msk [vmem:[#allocation2 + $0x430] sm:$0x3] %vm1023_vm1, %v19187_v2  ;;  %1159 = vst.msk [vmem:[#allocation2 + $0x458] sm:$0x3] %vm1023_vm1, %v19187_v2  ;;  %v903_v40 = vsel %vm647_vm15, %v519_v26, %v775_v32  ;;  %v397_v26 = vmul.f32 %v19605_v5, %v262_v10  ;;  %vm662_vm15 = vcmp.ge.f32.partialorder %v534_v41, 0.0 }
  0x60   : > { %1164 = vst.msk [vmem:[#allocation2 + $0x480] sm:$0x3] %vm1023_vm1, %v19187_v2  ;;  %1169 = vst.msk [vmem:[#allocation2 + $0x4a8] sm:$0x3] %vm1023_vm1, %v19187_v2 }
  0x61   : > { %1174 = vst.msk [vmem:[#allocation2 + $0x4d0] sm:$0x3] %vm1023_vm1, %v19187_v2  ;;  %1179 = vst.msk [vmem:[#allocation2 + $0x4f8] sm:$0x3] %vm1023_vm1, %v19187_v2  ;;  %v532_v33 = vadd.f32 %v19617_v6, %v397_v26 }
  0x62   : > { %1184 = vst.msk [vmem:[#allocation2 + $0x520] sm:$0x3] %vm1023_vm1, %v19187_v2  ;;  %1189 = vst.msk [vmem:[#allocation2 + $0x548] sm:$0x3] %vm1023_vm1, %v19187_v2  ;;  %v770_v2 = vmul.f32 0.01, %v514_v57 }
  0x63   : > { %1191 = vst.msk [vmem:[#allocation2 + $0x29] sm:$0xff] %vm1018_vm0, %v890_v37  ;;  %1192 = vst.msk [vmem:[#allocation2 + $0x31] sm:$0xff] %vm1018_vm0, %v891_v38  ;;  %v523_v37 = vadd.f32 %v19617_v6, %v388_v31  ;;  %v255_v38 = vld [vmem:[%s19612_s9 + $0x98] sm:$0xff]  ;;  %vm660_vm13 = vcmp.ge.f32.partialorder %v532_v33, 0.0 }
  0x64   : > { %1193 = vst.msk [vmem:[#allocation2 + $0x39] sm:$0xff] %vm1018_vm0, %v892_v43  ;;  %1194 = vst.msk [vmem:[#allocation2 + $0x41] sm:$0xff] %vm1018_vm0, %v893_v44  ;;  %v898_v14 = vsel %vm642_vm10, %v514_v57, %v770_v2  ;;  %v256_v43 = vld [vmem:[%s19612_s9 + $0xa0] sm:$0xff]  ;;  %v257_v44 = vld [vmem:[%s19612_s9 + $0xa8] sm:$0xff]  ;;  %v394_v2 = vmul.f32 %v19605_v5, %v259_v52 }
  0x65   : > { %1195 = vst.msk [vmem:[#allocation2 + $0x51] sm:$0xff] %vm1018_vm0, %v894_v46  ;;  %1196 = vst.msk [vmem:[#allocation2 + $0x59] sm:$0xff] %vm1018_vm0, %v895_v51  ;;  %vm651_vm4 = vcmp.ge.f32.partialorder %v523_v37, 0.0  ;;  %v779_v50 = vmul.f32 0.01, %v523_v37  ;;  %v390_v51 = vmul.f32 %v19605_v5, %v255_v38  ;;  %v391_v55 = vmul.f32 %v19605_v5, %v256_v43  ;;  %v260_v57 = vld [vmem:[%s19612_s9 + $0xc0] sm:$0xff] }
  0x66   : > { %1197 = vst.msk [vmem:[#allocation2 + $0x61] sm:$0xff] %vm1018_vm0, %v896_v62  ;;  %1198 = vst.msk [vmem:[#allocation2 + $0x69] sm:$0xff] %vm1018_vm0, %v897_v9  ;;  %v392_v56 = vmul.f32 %v19605_v5, %v257_v44  ;;  %v261_v9 = vld [vmem:[%s19612_s9 + $0xc8] sm:$0xff]  ;;  %v529_v16 = vadd.f32 %v19617_v6, %v394_v2  ;;  %v267_v43 = vld [vmem:[%s19612_s9 + $0xf8] sm:$0xff] }
  0x67   : > { %1199 = vst.msk [vmem:[#allocation2 + $0x79] sm:$0xff] %vm1018_vm0, %v898_v14  ;;  %1200 = vst.msk [vmem:[#allocation2 + $0x81] sm:$0xff] %vm1018_vm0, %v899_v15  ;;  %v907_v59 = vsel %vm651_vm4, %v523_v37, %v779_v50  ;;  %v525_v60 = vadd.f32 %v19617_v6, %v390_v51  ;;  %v526_v0 = vadd.f32 %v19617_v6, %v391_v55  ;;  %v268_v44 = vld [vmem:[%s19612_s9 + $0x100] sm:$0xff]  ;;  %v790_v51 = vmul.f32 0.01, %v534_v41 }
  0x68   : > { %1201 = vst.msk [vmem:[#allocation2 + $0x89] sm:$0xff] %vm1018_vm0, %v900_v20  ;;  %1202 = vst.msk [vmem:[#allocation2 + $0x91] sm:$0xff] %vm1018_vm0, %v901_v25  ;;  %v527_v1 = vadd.f32 %v19617_v6, %v392_v56  ;;  %vm657_vm10 = vcmp.ge.f32.partialorder %v529_v16, 0.0  ;;  %v785_v25 = vmul.f32 0.01, %v529_v16  ;;  %v402_v56 = vmul.f32 %v19605_v5, %v267_v43  ;;  %v279_v43 = vld [vmem:[%s19612_s9 + $0x158] sm:$0xff] }
  0x69   : > { %1203 = vst.msk [vmem:[#allocation2 + $0xa1] sm:$0xff] %vm1018_vm0, %v902_v29  ;;  %1204 = vst.msk [vmem:[#allocation2 + $0xa9] sm:$0xff] %vm1018_vm0, %v903_v40  ;;  %vm653_vm6 = vcmp.ge.f32.partialorder %v525_v60, 0.0  ;;  %v781_v3 = vmul.f32 0.01, %v525_v60  ;;  %vm654_vm7 = vcmp.ge.f32.partialorder %v526_v0, 0.0  ;;  %v398_v29 = vmul.f32 %v19605_v5, %v263_v17 }
  0x6a   : > { %v1452_v7 = vld [vmem:[#allocation2 + $0x29] sm:$0xff]  ;;  %v1453_v8 = vld [vmem:[#allocation2 + $0x31] sm:$0xff]  ;;  %1206 = vst.msk [vmem:[#allocation2 + $0xb9] sm:$0xff] %vm1018_vm0, %v905_v49  ;;  %1207 = vst.msk [vmem:[#allocation2 + $0xc9] sm:$0xff] %vm1018_vm0, %v906_v53  ;;  %v782_v11 = vmul.f32 0.01, %v526_v0  ;;  %v913_v32 = vsel %vm657_vm10, %v529_v16, %v785_v25 }
  0x6b   : > { %16400 = vmatprep.mubr.msk.f32.mxu1 %vm1018_vm0, %v1452_v7  ;;  %17170 = vmatprep.mubr.msk.f32.mxu0 %vm1018_vm0, %v1452_v7  ;;  %v1454_v13 = vld [vmem:[#allocation2 + $0x39] sm:$0xff]  ;;  %v1455_v24 = vld [vmem:[#allocation2 + $0x41] sm:$0xff]  ;;  %1208 = vst.msk [vmem:[#allocation2 + $0xd1] sm:$0xff] %vm1018_vm0, %v907_v59  ;;  %1209 = vst.msk [vmem:[#allocation2 + $0xd9] sm:$0xff] %vm1018_vm0, %v908_v63  ;;  %v528_v7 = vadd.f32 %v19617_v6, %v393_v61  ;;  %vm655_vm8 = vcmp.ge.f32.partialorder %v527_v1, 0.0  ;;  %v909_v14 = vsel %vm653_vm6, %v525_v60, %v781_v3 }
  0x6c   : > { %16401 = vmatmul.mubr.msk.f32.gmra.mrb[4].mxu1 %vm1018_vm0, %v1453_v8  ;;  %17171 = vmatmul.mubr.msk.f32.vlgmr.msra.gmra.mrb[0].mxu0 %vm1018_vm0, %v1453_v8  ;;  %v1456_v28 = vld [vmem:[#allocation2 + $0x51] sm:$0xff]  ;;  %v1457_v39 = vld [vmem:[#allocation2 + $0x59] sm:$0xff]  ;;  %v395_v8 = vmul.f32 %v19605_v5, %v260_v57  ;;  %v783_v12 = vmul.f32 0.01, %v527_v1  ;;  %1210 = vst.msk [vmem:[#allocation2 + $0xe1] sm:$0xff] %vm1018_vm0, %v909_v14  ;;  %v910_v19 = vsel %vm654_vm7, %v526_v0, %v782_v11  ;;  %1214 = vst.msk [vmem:[#allocation2 + $0x109] sm:$0xff] %vm1018_vm0, %v913_v32 }
  0x6d   : > { %17363 = vmatpush3.msra.mxu0 %v19598_v4  ;;  %16403 = vmatprep.mubr.msk.f32.mxu1 %vm1018_vm0, %v1454_v13  ;;  %v520_v4 = vadd.f32 %v19617_v6, %v385_v22  ;;  %v1458_v45 = vld [vmem:[#allocation2 + $0x61] sm:$0xff]  ;;  %v1459_v58 = vld [vmem:[#allocation2 + $0x69] sm:$0xff]  ;;  %vm656_vm9 = vcmp.ge.f32.partialorder %v528_v7, 0.0  ;;  %v784_v15 = vmul.f32 0.01, %v528_v7  ;;  %v396_v22 = vmul.f32 %v19605_v5, %v261_v9  ;;  %1211 = vst.msk [vmem:[#allocation2 + $0xf1] sm:$0xff] %vm1018_vm0, %v910_v19 }
  0x6e   : > { %17173 = vmatprep.mubr.msk.f32.mxu0 %vm1018_vm0, %v1454_v13  ;;  %v1460_v62 = vld [vmem:[#allocation2 + $0x79] sm:$0xff]  ;;  %v1461_v13 = vld [vmem:[#allocation2 + $0x81] sm:$0xff]  ;;  %v911_v20 = vsel %vm655_vm8, %v527_v1, %v783_v12  ;;  %v530_v21 = vadd.f32 %v19617_v6, %v395_v8  ;;  %17556 = vmatprep.subr.mxu0 %v14840_v30  ;;  %v788_v40 = vmul.f32 0.01, %v532_v33  ;;  %v403_v57 = vmul.f32 %v19605_v5, %v268_v44  ;;  %v274_v17 = vld [vmem:[%s19612_s9 + $0x130] sm:$0xff] }
  0x6f   : > { %vm648_vm1 = vcmp.ge.f32.partialorder %v520_v4, 0.0  ;;  %v776_v35 = vmul.f32 0.01, %v520_v4  ;;  %v1462_v18 = vld [vmem:[#allocation2 + $0x89] sm:$0xff]  ;;  %1212 = vst.msk [vmem:[#allocation2 + $0xf9] sm:$0xff] %vm1018_vm0, %v911_v20  ;;  %v1463_v31 = vld [vmem:[#allocation2 + $0x91] sm:$0xff]  ;;  %v918_v59 = vsel %vm662_vm15, %v534_v41, %v790_v51  ;;  %v404_v61 = vmul.f32 %v19605_v5, %v269_v48 }
  0x70   : > { %16404 = vmatmul.mubr.msk.f32.gmra.mrb[6].mxu1 %vm1018_vm0, %v1455_v24  ;;  %17174 = vmatmul.mubr.msk.f32.gmra.mrb[2].mxu0 %vm1018_vm0, %v1455_v24  ;;  %v912_v24 = vsel %vm656_vm9, %v528_v7, %v784_v15  ;;  %vm658_vm11 = vcmp.ge.f32.partialorder %v530_v21, 0.0  ;;  %v786_v27 = vmul.f32 0.01, %v530_v21  ;;  %v1464_v36 = vld [vmem:[#allocation2 + $0xa1] sm:$0xff]  ;;  %v1465_v49 = vld [vmem:[#allocation2 + $0xa9] sm:$0xff]  ;;  %v916_v50 = vsel %vm660_vm13, %v532_v33, %v788_v40  ;;  %1219 = vst.msk [vmem:[#allocation2 + $0x141] sm:$0xff] %vm1018_vm0, %v918_v59 }
  0x71   : > { %16406 = vmatprep.mubr.msk.f32.mxu1 %vm1018_vm0, %v1456_v28  ;;  %17176 = vmatprep.mubr.msk.f32.mxu0 %vm1018_vm0, %v1456_v28  ;;  %v904_v46 = vsel %vm648_vm1, %v520_v4, %v776_v35  ;;  %1213 = vst.msk [vmem:[#allocation2 + $0x101] sm:$0xff] %vm1018_vm0, %v912_v24  ;;  %v531_v28 = vadd.f32 %v19617_v6, %v396_v22  ;;  %v265_v4 = vld [vmem:[%s19612_s9 + $0xe8] sm:$0xff]  ;;  %v266_v35 = vld [vmem:[%s19612_s9 + $0xf0] sm:$0xff]  ;;  %1217 = vst.msk [vmem:[#allocation2 + $0x129] sm:$0xff] %vm1018_vm0, %v916_v50 }
  0x72   : > { %1205 = vst.msk [vmem:[#allocation2 + $0xb1] sm:$0xff] %vm1018_vm0, %v904_v46  ;;  %v914_v37 = vsel %vm658_vm11, %v530_v21, %v786_v27  ;;  %v400_v42 = vmul.f32 %v19605_v5, %v265_v4  ;;  %v401_v47 = vmul.f32 %v19605_v5, %v266_v35  ;;  %v537_v63 = vadd.f32 %v19617_v6, %v402_v56  ;;  %v1467_v1 = vld [vmem:[#allocation2 + $0xb9] sm:$0xff]  ;;  %v1468_v10 = vld [vmem:[#allocation2 + $0xc9] sm:$0xff]  ;;  %v1469_v24 = vld [vmem:[#allocation2 + $0xd1] sm:$0xff] }
  0x73   : > { %vm659_vm12 = vcmp.ge.f32.partialorder %v531_v28, 0.0  ;;  %v787_v38 = vmul.f32 0.01, %v531_v28  ;;  %1215 = vst.msk [vmem:[#allocation2 + $0x119] sm:$0xff] %vm1018_vm0, %v914_v37  ;;  %v538_v0 = vadd.f32 %v19617_v6, %v403_v57  ;;  %v539_v3 = vadd.f32 %v19617_v6, %v404_v61  ;;  %v271_v8 = vld [vmem:[%s19612_s9 + $0x118] sm:$0xff]  ;;  %v272_v9 = vld [vmem:[%s19612_s9 + $0x120] sm:$0xff] }
  0x74   : > { %16407 = vmatmul.mubr.msk.f32.gmra.mrb[8].mxu1 %vm1018_vm0, %v1457_v39  ;;  %17177 = vmatmul.mubr.msk.f32.gmra.mrb[4].mxu0 %vm1018_vm0, %v1457_v39  ;;  %v533_v39 = vadd.f32 %v19617_v6, %v398_v29  ;;  %v535_v52 = vadd.f32 %v19617_v6, %v400_v42  ;;  %v536_v55 = vadd.f32 %v19617_v6, %v401_v47  ;;  %vm665_vm3 = vcmp.ge.f32.partialorder %v537_v63, 0.0  ;;  %v275_v21 = vld [vmem:[%s19612_s9 + $0x138] sm:$0xff]  ;;  %v276_v22 = vld [vmem:[%s19612_s9 + $0x140] sm:$0xff]  ;;  %v278_v42 = vld [vmem:[%s19612_s9 + $0x150] sm:$0xff] }
  0x75   : > { %16409 = vmatprep.mubr.msk.f32.mxu1 %vm1018_vm0, %v1458_v45  ;;  %17179 = vmatprep.mubr.msk.f32.mxu0 %vm1018_vm0, %v1458_v45  ;;  %v915_v45 = vsel %vm659_vm12, %v531_v28, %v787_v38  ;;  %v793_v12 = vmul.f32 0.01, %v537_v63  ;;  %vm666_vm4 = vcmp.ge.f32.partialorder %v538_v0, 0.0  ;;  %v794_v14 = vmul.f32 0.01, %v538_v0  ;;  %v1470_v28 = vld [vmem:[#allocation2 + $0xd9] sm:$0xff] }
  0x76   : > { %vm661_vm14 = vcmp.ge.f32.partialorder %v533_v39, 0.0  ;;  %v789_v46 = vmul.f32 0.01, %v533_v39  ;;  %1216 = vst.msk [vmem:[#allocation2 + $0x121] sm:$0xff] %vm1018_vm0, %v915_v45  ;;  %vm663_vm1 = vcmp.ge.f32.partialorder %v535_v52, 0.0  ;;  %vm664_vm2 = vcmp.ge.f32.partialorder %v536_v55, 0.0 }
  0x77   : > { %v791_v60 = vmul.f32 0.01, %v535_v52  ;;  %vm667_vm5 = vcmp.ge.f32.partialorder %v539_v3, 0.0  ;;  %v795_v15 = vmul.f32 0.01, %v539_v3  ;;  %v406_v19 = vmul.f32 %v19605_v5, %v271_v8  ;;  %v1471_v38 = vld [vmem:[#allocation2 + $0xe1] sm:$0xff] }
  0x78   : > { %16410 = vmatmul.mubr.msk.f32.gmra.mrb[10].mxu1 %vm1018_vm0, %v1459_v58  ;;  %17180 = vmatmul.mubr.msk.f32.gmra.mrb[6].mxu0 %vm1018_vm0, %v1459_v58  ;;  %v917_v54 = vsel %vm661_vm14, %v533_v39, %v789_v46  ;;  %v270_v58 = vld [vmem:[%s19612_s9 + $0x110] sm:$0xff]  ;;  %v407_v20 = vmul.f32 %v19605_v5, %v272_v9  ;;  %v922_v25 = vsel %vm666_vm4, %v538_v0, %v794_v14  ;;  %v281_v50 = vld [vmem:[%s19612_s9 + $0x168] sm:$0xff]  ;;  %v284_v9 = vld [vmem:[%s19612_s9 + $0x180] sm:$0xff] }
  0x79   : > { %16412 = vmatprep.mubr.msk.f32.mxu1 %vm1018_vm0, %v1460_v62  ;;  %17182 = vmatprep.mubr.msk.f32.mxu0 %vm1018_vm0, %v1460_v62  ;;  %v1466_v53 = vld [vmem:[#allocation2 + $0xb1] sm:$0xff]  ;;  %1218 = vst.msk [vmem:[#allocation2 + $0x131] sm:$0xff] %vm1018_vm0, %v917_v54  ;;  %v792_v62 = vmul.f32 0.01, %v536_v55  ;;  %v919_v2 = vsel %vm663_vm1, %v535_v52, %v791_v60  ;;  %v405_v7 = vmul.f32 %v19605_v5, %v270_v58  ;;  %1223 = vst.msk [vmem:[#allocation2 + $0x169] sm:$0xff] %vm1018_vm0, %v922_v25  ;;  %v1474_v60 = vld [vmem:[#allocation2 + $0x101] sm:$0xff] }
  0x7a   : > { %1220 = vst.msk [vmem:[#allocation2 + $0x149] sm:$0xff] %vm1018_vm0, %v919_v2  ;;  %v923_v26 = vsel %vm667_vm5, %v539_v3, %v795_v15  ;;  %v541_v29 = vadd.f32 %v19617_v6, %v406_v19  ;;  %v542_v4 = vadd.f32 %v19617_v6, %v407_v20  ;;  %v410_v33 = vmul.f32 %v19605_v5, %v275_v21  ;;  %v1472_v44 = vld [vmem:[#allocation2 + $0xf1] sm:$0xff] }
  0x7b   : > { %v920_v11 = vsel %vm664_vm2, %v536_v55, %v792_v62  ;;  %v540_v16 = vadd.f32 %v19617_v6, %v405_v7  ;;  %1224 = vst.msk [vmem:[#allocation2 + $0x171] sm:$0xff] %vm1018_vm0, %v923_v26  ;;  %v411_v34 = vmul.f32 %v19605_v5, %v276_v22  ;;  %v412_v35 = vmul.f32 %v19605_v5, %v277_v23  ;;  %v282_v54 = vld [vmem:[%s19612_s9 + $0x170] sm:$0xff]  ;;  %v1473_v55 = vld [vmem:[#allocation2 + $0xf9] sm:$0xff] }
  0x7c   : > { %16413 = vmatmul.mubr.msk.f32.gmra.mrb[12].mxu1 %vm1018_vm0, %v1461_v13  ;;  %17183 = vmatmul.mubr.msk.f32.gmra.mrb[8].mxu0 %vm1018_vm0, %v1461_v13  ;;  %v273_v13 = vld [vmem:[%s19612_s9 + $0x128] sm:$0xff]  ;;  %1221 = vst.msk [vmem:[#allocation2 + $0x151] sm:$0xff] %vm1018_vm0, %v920_v11  ;;  %vm669_vm7 = vcmp.ge.f32.partialorder %v541_v29, 0.0  ;;  %vm670_vm8 = vcmp.ge.f32.partialorder %v542_v4, 0.0  ;;  %v798_v37 = vmul.f32 0.01, %v542_v4  ;;  %v545_v41 = vadd.f32 %v19617_v6, %v410_v33 }
  0x7d   : > { %16415 = vmatprep.mubr.msk.f32.mxu1 %vm1018_vm0, %v1462_v18  ;;  %17185 = vmatprep.mubr.msk.f32.mxu0 %vm1018_vm0, %v1462_v18  ;;  %v921_v18 = vsel %vm665_vm3, %v537_v63, %v793_v12  ;;  %vm668_vm6 = vcmp.ge.f32.partialorder %v540_v16, 0.0  ;;  %v796_v27 = vmul.f32 0.01, %v540_v16  ;;  %v408_v30 = vmul.f32 %v19605_v5, %v273_v13  ;;  %v1475_v13 = vld [vmem:[#allocation2 + $0x109] sm:$0xff] }
  0x7e   : > { %1222 = vst.msk [vmem:[#allocation2 + $0x159] sm:$0xff] %vm1018_vm0, %v921_v18  ;;  %v926_v46 = vsel %vm670_vm8, %v542_v4, %v798_v37  ;;  %v546_v47 = vadd.f32 %v19617_v6, %v411_v34  ;;  %v547_v48 = vadd.f32 %v19617_v6, %v412_v35  ;;  %vm673_vm11 = vcmp.ge.f32.partialorder %v545_v41, 0.0  ;;  %v1476_v18 = vld [vmem:[#allocation2 + $0x119] sm:$0xff]  ;;  %v286_v21 = vld [vmem:[%s19612_s9 + $0x190] sm:$0xff] }
  0x7f   : > { %v924_v32 = vsel %vm668_vm6, %v540_v16, %v796_v27  ;;  %v543_v39 = vadd.f32 %v19617_v6, %v408_v30  ;;  %1227 = vst.msk [vmem:[#allocation2 + $0x191] sm:$0xff] %vm1018_vm0, %v926_v46  ;;  %v413_v62 = vmul.f32 %v19605_v5, %v278_v42  ;;  %v414_v63 = vmul.f32 %v19605_v5, %v279_v43  ;;  %v287_v27 = vld [vmem:[%s19612_s9 + $0x198] sm:$0xff] }
  0x80   : > { %16416 = vmatmul.mubr.msk.f32.gmra.mrb[14].mxu1 %vm1018_vm0, %v1463_v31  ;;  %17186 = vmatmul.mubr.msk.f32.gmra.mrb[10].mxu0 %vm1018_vm0, %v1463_v31  ;;  %v409_v31 = vmul.f32 %v19605_v5, %v274_v17  ;;  %1225 = vst.msk [vmem:[#allocation2 + $0x179] sm:$0xff] %vm1018_vm0, %v924_v32  ;;  %vm674_vm12 = vcmp.ge.f32.partialorder %v546_v47, 0.0  ;;  %vm675_vm13 = vcmp.ge.f32.partialorder %v547_v48, 0.0  ;;  %v802_v58 = vmul.f32 0.01, %v546_v47  ;;  %v285_v17 = vld [vmem:[%s19612_s9 + $0x188] sm:$0xff] }
  0x81   : > { %16418 = vmatprep.mubr.msk.f32.mxu1 %vm1018_vm0, %v1464_v36  ;;  %17188 = vmatprep.mubr.msk.f32.mxu0 %vm1018_vm0, %v1464_v36  ;;  %v797_v36 = vmul.f32 0.01, %v541_v29  ;;  %vm671_vm9 = vcmp.ge.f32.partialorder %v543_v39, 0.0  ;;  %v799_v51 = vmul.f32 0.01, %v543_v39  ;;  %v416_v7 = vmul.f32 %v19605_v5, %v281_v50  ;;  %v1478_v32 = vld [vmem:[#allocation2 + $0x129] sm:$0xff] }
  0x82   : > { %v544_v40 = vadd.f32 %v19617_v6, %v409_v31  ;;  %v803_v59 = vmul.f32 0.01, %v547_v48  ;;  %v930_v2 = vsel %vm674_vm12, %v546_v47, %v802_v58  ;;  %v417_v8 = vmul.f32 %v19605_v5, %v282_v54  ;;  %v288_v31 = vld [vmem:[%s19612_s9 + $0x1a0] sm:$0xff]  ;;  %v1479_v43 = vld [vmem:[#allocation2 + $0x131] sm:$0xff]  ;;  %v289_v47 = vld [vmem:[%s19612_s9 + $0x1a8] sm:$0xff] }
  0x83   : > { %v925_v45 = vsel %vm669_vm7, %v541_v29, %v797_v36  ;;  %v927_v56 = vsel %vm671_vm9, %v543_v39, %v799_v51  ;;  %1231 = vst.msk [vmem:[#allocation2 + $0x1b9] sm:$0xff] %vm1018_vm0, %v930_v2  ;;  %v549_v11 = vadd.f32 %v19617_v6, %v414_v63  ;;  %v551_v14 = vadd.f32 %v19617_v6, %v416_v7  ;;  %v292_v54 = vld [vmem:[%s19612_s9 + $0x1c0] sm:$0xff]  ;;  %v1481_v63 = vld [vmem:[#allocation2 + $0x149] sm:$0xff] }
  0x84   : > { %16419 = vmatmul.mubr.msk.f32.gmra.mrb[16].mxu1 %vm1018_vm0, %v1465_v49  ;;  %17189 = vmatmul.mubr.msk.f32.gmra.mrb[12].mxu0 %vm1018_vm0, %v1465_v49  ;;  %v280_v49 = vld [vmem:[%s19612_s9 + $0x160] sm:$0xff]  ;;  %1226 = vst.msk [vmem:[#allocation2 + $0x181] sm:$0xff] %vm1018_vm0, %v925_v45  ;;  %vm672_vm10 = vcmp.ge.f32.partialorder %v544_v40, 0.0  ;;  %v800_v52 = vmul.f32 0.01, %v544_v40  ;;  %1228 = vst.msk [vmem:[#allocation2 + $0x199] sm:$0xff] %vm1018_vm0, %v927_v56  ;;  %v931_v3 = vsel %vm675_vm13, %v547_v48, %v803_v59 }
  0x85   : > { %16421 = vmatprep.mubr.msk.f32.mxu1 %vm1018_vm0, %v1466_v53  ;;  %17191 = vmatprep.mubr.msk.f32.mxu0 %vm1018_vm0, %v1466_v53  ;;  %v801_v53 = vmul.f32 0.01, %v545_v41  ;;  %v415_v0 = vmul.f32 %v19605_v5, %v280_v49  ;;  %1232 = vst.msk [vmem:[#allocation2 + $0x1c1] sm:$0xff] %vm1018_vm0, %v931_v3  ;;  %v552_v15 = vadd.f32 %v19617_v6, %v417_v8  ;;  %vm677_vm15 = vcmp.ge.f32.partialorder %v549_v11, 0.0  ;;  %v290_v48 = vld [vmem:[%s19612_s9 + $0x1b0] sm:$0xff]  ;;  %v1480_v49 = vld [vmem:[#allocation2 + $0x141] sm:$0xff] }
  0x86   : > { %v928_v57 = vsel %vm672_vm10, %v544_v40, %v800_v52  ;;  %v419_v20 = vmul.f32 %v19605_v5, %v284_v9  ;;  %v805_v22 = vmul.f32 0.01, %v549_v11  ;;  %vm679_vm2 = vcmp.ge.f32.partialorder %v551_v14, 0.0  ;;  %v1482_v3 = vld [vmem:[#allocation2 + $0x151] sm:$0xff] }
  0x87   : > { %1229 = vst.msk [vmem:[#allocation2 + $0x1a1] sm:$0xff] %vm1018_vm0, %v928_v57  ;;  %v929_v61 = vsel %vm673_vm11, %v545_v41, %v801_v53  ;;  %v550_v12 = vadd.f32 %v19617_v6, %v415_v0  ;;  %v807_v25 = vmul.f32 0.01, %v551_v14  ;;  %vm680_vm3 = vcmp.ge.f32.partialorder %v552_v15, 0.0  ;;  %v291_v53 = vld [vmem:[%s19612_s9 + $0x1b8] sm:$0xff] }
  0x88   : > { %16422 = vmatmul.mubr.msk.f32.gmra.mrb[18].mxu1 %vm1018_vm0, %v1467_v1  ;;  %17192 = vmatmul.mubr.msk.f32.gmra.mrb[14].mxu0 %vm1018_vm0, %v1467_v1  ;;  %v283_v1 = vld [vmem:[%s19612_s9 + $0x178] sm:$0xff]  ;;  %1230 = vst.msk [vmem:[#allocation2 + $0x1a9] sm:$0xff] %vm1018_vm0, %v929_v61  ;;  %v808_v26 = vmul.f32 0.01, %v552_v15  ;;  %v933_v29 = vsel %vm677_vm15, %v549_v11, %v805_v22  ;;  %v554_v35 = vadd.f32 %v19617_v6, %v419_v20  ;;  %v294_v61 = vld [vmem:[%s19612_s9 + $0x1d0] sm:$0xff] }
  0x89   : > { %16424 = vmatprep.mubr.msk.f32.mxu1 %vm1018_vm0, %v1468_v10  ;;  %17194 = vmatprep.mubr.msk.f32.mxu0 %vm1018_vm0, %v1468_v10  ;;  %v548_v10 = vadd.f32 %v19617_v6, %v413_v62  ;;  %v418_v16 = vmul.f32 %v19605_v5, %v283_v1  ;;  %vm678_vm1 = vcmp.ge.f32.partialorder %v550_v12, 0.0  ;;  %v806_v23 = vmul.f32 0.01, %v550_v12  ;;  %1234 = vst.msk [vmem:[#allocation2 + $0x1d1] sm:$0xff] %vm1018_vm0, %v933_v29  ;;  %v295_v62 = vld [vmem:[%s19612_s9 + $0x1d8] sm:$0xff] }
  0x8a   : > { %v935_v33 = vsel %vm679_vm2, %v551_v14, %v807_v25  ;;  %v936_v34 = vsel %vm680_vm3, %v552_v15, %v808_v26  ;;  %v420_v36 = vmul.f32 %v19605_v5, %v285_v17  ;;  %v422_v39 = vmul.f32 %v19605_v5, %v287_v27 }
  0x8b   : > { %vm676_vm14 = vcmp.ge.f32.partialorder %v548_v10, 0.0  ;;  %v804_v19 = vmul.f32 0.01, %v548_v10  ;;  %v934_v4 = vsel %vm678_vm1, %v550_v12, %v806_v23  ;;  %v553_v30 = vadd.f32 %v19617_v6, %v418_v16  ;;  %1236 = vst.msk [vmem:[#allocation2 + $0x1e9] sm:$0xff] %vm1018_vm0, %v935_v33  ;;  %1237 = vst.msk [vmem:[#allocation2 + $0x1f1] sm:$0xff] %vm1018_vm0, %v936_v34  ;;  %v300_v33 = vld [vmem:[%s19612_s9 + $0x200] sm:$0xff] }
  0x8c   : > { %16425 = vmatmul.mubr.msk.f32.gmra.mrb[20].mxu1 %vm1018_vm0, %v1469_v24  ;;  %17195 = vmatmul.mubr.msk.f32.gmra.mrb[16].mxu0 %vm1018_vm0, %v1469_v24  ;;  %1235 = vst.msk [vmem:[#allocation2 + $0x1e1] sm:$0xff] %vm1018_vm0, %v934_v4  ;;  %vm682_vm5 = vcmp.ge.f32.partialorder %v554_v35, 0.0  ;;  %v810_v40 = vmul.f32 0.01, %v554_v35  ;;  %v555_v41 = vadd.f32 %v19617_v6, %v420_v36  ;;  %v423_v42 = vmul.f32 %v19605_v5, %v288_v31  ;;  %v19946_v4 = vld [vmem:[%s22584_s2] ss:$0 sm:$0xff] }
  0x8d   : > { %16427 = vmatprep.mubr.msk.f32.mxu1 %vm1018_vm0, %v1470_v28  ;;  %17197 = vmatprep.mubr.msk.f32.mxu0 %vm1018_vm0, %v1470_v28  ;;  %v932_v24 = vsel %vm676_vm14, %v548_v10, %v804_v19  ;;  %v1477_v28 = vld [vmem:[#allocation2 + $0x121] sm:$0xff]  ;;  %vm681_vm4 = vcmp.ge.f32.partialorder %v553_v30, 0.0  ;;  %v809_v37 = vmul.f32 0.01, %v553_v30  ;;  %v557_v46 = vadd.f32 %v19617_v6, %v422_v39  ;;  %v298_v31 = vld [vmem:[%s19612_s9 + $0x1f0] sm:$0xff] }
  0x8e   : > { %1233 = vst.msk [vmem:[#allocation2 + $0x1c9] sm:$0xff] %vm1018_vm0, %v932_v24  ;;  %v938_v50 = vsel %vm682_vm5, %v554_v35, %v810_v40  ;;  %vm683_vm6 = vcmp.ge.f32.partialorder %v555_v41, 0.0  ;;  %v811_v51 = vmul.f32 0.01, %v555_v41  ;;  %v558_v52 = vadd.f32 %v19617_v6, %v423_v42  ;;  %v296_v24 = vld [vmem:[%s19612_s9 + $0x1e0] sm:$0xff]  ;;  %v1485_v34 = vld [vmem:[#allocation2 + $0x171] sm:$0xff] }
  0x8f   : > { %1239 = vst.msk [vmem:[#allocation2 + $0x209] sm:$0xff] %vm1018_vm0, %v938_v50  ;;  %vm685_vm8 = vcmp.ge.f32.partialorder %v557_v46, 0.0  ;;  %v813_v56 = vmul.f32 0.01, %v557_v46  ;;  %v424_v59 = vmul.f32 %v19605_v5, %v289_v47  ;;  %v425_v2 = vmul.f32 %v19605_v5, %v290_v48  ;;  %v301_v39 = vld [vmem:[%s19612_s9 + $0x208] sm:$0xff]  ;;  %v1486_v40 = vld [vmem:[#allocation2 + $0x179] sm:$0xff] }
  0x90   : > { %16428 = vmatmul.mubr.msk.f32.gmra.mrb[22].mxu1 %vm1018_vm0, %v1471_v38  ;;  %17198 = vmatmul.mubr.msk.f32.gmra.mrb[18].mxu0 %vm1018_vm0, %v1471_v38  ;;  %v421_v38 = vmul.f32 %v19605_v5, %v286_v21  ;;  %v939_v57 = vsel %vm683_vm6, %v555_v41, %v811_v51  ;;  %vm686_vm9 = vcmp.ge.f32.partialorder %v558_v52, 0.0  ;;  %v814_v58 = vmul.f32 0.01, %v558_v52  ;;  %v1484_v21 = vld [vmem:[#allocation2 + $0x169] sm:$0xff]  ;;  %v1487_v51 = vld [vmem:[#allocation2 + $0x181] sm:$0xff] }
  0x91   : > { %16430 = vmatprep.mubr.msk.f32.mxu1 %vm1018_vm0, %v1472_v44  ;;  %17200 = vmatprep.mubr.msk.f32.mxu0 %vm1018_vm0, %v1472_v44  ;;  %v937_v44 = vsel %vm681_vm4, %v553_v30, %v809_v37  ;;  %1240 = vst.msk [vmem:[#allocation2 + $0x211] sm:$0xff] %vm1018_vm0, %v939_v57  ;;  %v941_v1 = vsel %vm685_vm8, %v557_v46, %v813_v56  ;;  %v19960_v37 = vld [vmem:[%s22583_s1] ss:$0 sm:$0xff] }
  0x92   : > { %v556_v45 = vadd.f32 %v19617_v6, %v421_v38  ;;  %1238 = vst.msk [vmem:[#allocation2 + $0x1f9] sm:$0xff] %vm1018_vm0, %v937_v44  ;;  %1242 = vst.msk [vmem:[#allocation2 + $0x221] sm:$0xff] %vm1018_vm0, %v941_v1  ;;  %v942_v7 = vsel %vm686_vm9, %v558_v52, %v814_v58  ;;  %v559_v8 = vadd.f32 %v19617_v6, %v424_v59  ;;  %v302_v59 = vld [vmem:[%s19612_s9 + $0x210] sm:$0xff] }
  0x93   : > { %v426_v9 = vmul.f32 %v19605_v5, %v291_v53  ;;  %v427_v10 = vmul.f32 %v19605_v5, %v292_v54  ;;  %1243 = vst.msk [vmem:[#allocation2 + $0x231] sm:$0xff] %vm1018_vm0, %v942_v7  ;;  %v560_v11 = vadd.f32 %v19617_v6, %v425_v2  ;;  %v430_v14 = vmul.f32 %v19605_v5, %v295_v62  ;;  %v306_v7 = vld [vmem:[%s19612_s9 + $0x230] sm:$0xff] }
  0x94   : > { %16431 = vmatmul.mubr.msk.f32.gmra.mrb[24].mxu1 %vm1018_vm0, %v1473_v55  ;;  %17201 = vmatmul.mubr.msk.f32.gmra.mrb[20].mxu0 %vm1018_vm0, %v1473_v55  ;;  %vm684_vm7 = vcmp.ge.f32.partialorder %v556_v45, 0.0  ;;  %v812_v55 = vmul.f32 0.01, %v556_v45  ;;  %vm687_vm10 = vcmp.ge.f32.partialorder %v559_v8, 0.0  ;;  %v815_v15 = vmul.f32 0.01, %v559_v8 }
  0x95   : > { %16433 = vmatprep.mubr.msk.f32.mxu1 %vm1018_vm0, %v1474_v60  ;;  %17203 = vmatprep.mubr.msk.f32.mxu0 %vm1018_vm0, %v1474_v60  ;;  %v293_v60 = vld [vmem:[%s19612_s9 + $0x1c8] sm:$0xff]  ;;  %v561_v16 = vadd.f32 %v19617_v6, %v426_v9  ;;  %v562_v17 = vadd.f32 %v19617_v6, %v427_v10  ;;  %vm688_vm11 = vcmp.ge.f32.partialorder %v560_v11, 0.0  ;;  %v816_v19 = vmul.f32 0.01, %v560_v11 }
  0x96   : > { %v940_v0 = vsel %vm684_vm7, %v556_v45, %v812_v55  ;;  %v428_v12 = vmul.f32 %v19605_v5, %v293_v60  ;;  %v943_v22 = vsel %vm687_vm10, %v559_v8, %v815_v15  ;;  %v565_v30 = vadd.f32 %v19946_v4, %v430_v14  ;;  %v1488_v55 = vld [vmem:[#allocation2 + $0x191] sm:$0xff]  ;;  %v1489_v8 = vld [vmem:[#allocation2 + $0x199] sm:$0xff] }
  0x97   : > { %1241 = vst.msk [vmem:[#allocation2 + $0x219] sm:$0xff] %vm1018_vm0, %v940_v0  ;;  %vm689_vm12 = vcmp.ge.f32.partialorder %v561_v16, 0.0  ;;  %v817_v23 = vmul.f32 0.01, %v561_v16  ;;  %vm690_vm13 = vcmp.ge.f32.partialorder %v562_v17, 0.0  ;;  %1244 = vst.msk [vmem:[#allocation2 + $0x239] sm:$0xff] %vm1018_vm0, %v943_v22  ;;  %v944_v25 = vsel %vm688_vm11, %v560_v11, %v816_v19 }
  0x98   : > { %16434 = vmatmul.mubr.msk.f32.gmra.mrb[26].mxu1 %vm1018_vm0, %v1475_v13  ;;  %17204 = vmatmul.mubr.msk.f32.gmra.mrb[22].mxu0 %vm1018_vm0, %v1475_v13  ;;  %v429_v13 = vmul.f32 %v19605_v5, %v294_v61  ;;  %v563_v5 = vadd.f32 %v19617_v6, %v428_v12  ;;  %v818_v26 = vmul.f32 0.01, %v562_v17  ;;  %1245 = vst.msk [vmem:[#allocation2 + $0x241] sm:$0xff] %vm1018_vm0, %v944_v25  ;;  %vm693_vm1 = vcmp.ge.f32.partialorder %v565_v30, 0.0  ;;  %v303_v60 = vld [vmem:[%s19612_s9 + $0x218] sm:$0xff]  ;;  %v305_v0 = vld [vmem:[%s19612_s9 + $0x228] sm:$0xff] }
  0x99   : > { %16436 = vmatprep.mubr.msk.f32.mxu1 %vm1018_vm0, %v1476_v18  ;;  %17206 = vmatprep.mubr.msk.f32.mxu0 %vm1018_vm0, %v1476_v18  ;;  %v1483_v18 = vld [vmem:[#allocation2 + $0x159] sm:$0xff]  ;;  %v431_v38 = vmul.f32 %v19960_v37, %v296_v24  ;;  %v821_v42 = vmul.f32 0.01, %v565_v30  ;;  %v433_v45 = vmul.f32 %v19960_v37, %v298_v31  ;;  %v435_v47 = vmul.f32 %v19960_v37, %v300_v33  ;;  %v1491_v25 = vld [vmem:[#allocation2 + $0x1a9] sm:$0xff] }
  0x9a   : > { %v564_v20 = vadd.f32 %v19617_v6, %v429_v13  ;;  %vm691_vm14 = vcmp.ge.f32.partialorder %v563_v5, 0.0  ;;  %v819_v27 = vmul.f32 0.01, %v563_v5  ;;  %v945_v6 = vsel %vm689_vm12, %v561_v16, %v817_v23  ;;  %v307_v12 = vld [vmem:[%s19612_s9 + $0x238] sm:$0xff]  ;;  %v1490_v13 = vld [vmem:[#allocation2 + $0x1a1] sm:$0xff] }
  0x9b   : > { %1246 = vst.msk [vmem:[#allocation2 + $0x249] sm:$0xff] %vm1018_vm0, %v945_v6  ;;  %v946_v35 = vsel %vm690_vm13, %v562_v17, %v818_v26  ;;  %v566_v44 = vadd.f32 %v19946_v4, %v431_v38  ;;  %v949_v48 = vsel %vm693_vm1, %v565_v30, %v821_v42  ;;  %v436_v50 = vmul.f32 %v19960_v37, %v301_v39  ;;  %v308_v24 = vld [vmem:[%s19612_s9 + $0x240] sm:$0xff] }
  0x9c   : > { %16437 = vmatmul.mubr.msk.f32.gmra.mrb[28].mxu1 %vm1018_vm0, %v1477_v28  ;;  %17207 = vmatmul.mubr.msk.f32.gmra.mrb[24].mxu0 %vm1018_vm0, %v1477_v28  ;;  %v297_v28 = vld [vmem:[%s19612_s9 + $0x1e8] sm:$0xff]  ;;  %vm692_vm15 = vcmp.ge.f32.partialorder %v564_v20, 0.0  ;;  %v820_v29 = vmul.f32 0.01, %v564_v20  ;;  %v947_v36 = vsel %vm691_vm14, %v563_v5, %v819_v27  ;;  %1247 = vst.msk [vmem:[#allocation2 + $0x259] sm:$0xff] %vm1018_vm0, %v946_v35  ;;  %1250 = vst.msk [vmem:[#allocation2 + $0x271] sm:$0xff] %vm1018_vm0, %v949_v48 }
  0x9d   : > { %16439 = vmatprep.mubr.msk.f32.mxu1 %vm1018_vm0, %v1478_v32  ;;  %17209 = vmatprep.mubr.msk.f32.mxu0 %vm1018_vm0, %v1478_v32  ;;  %v299_v32 = vld [vmem:[%s19612_s9 + $0x1f8] sm:$0xff]  ;;  %1248 = vst.msk [vmem:[#allocation2 + $0x261] sm:$0xff] %vm1018_vm0, %v947_v36  ;;  %vm694_vm2 = vcmp.ge.f32.partialorder %v566_v44, 0.0  ;;  %v822_v52 = vmul.f32 0.01, %v566_v44  ;;  %v568_v53 = vadd.f32 %v19946_v4, %v433_v45  ;;  %v570_v57 = vadd.f32 %v19946_v4, %v435_v47  ;;  %v1493_v42 = vld [vmem:[#allocation2 + $0x1c1] sm:$0xff] }
  0x9e   : > { %v948_v41 = vsel %vm692_vm15, %v564_v20, %v820_v29  ;;  %v434_v46 = vmul.f32 %v19960_v37, %v299_v32  ;;  %v571_v58 = vadd.f32 %v19946_v4, %v436_v50  ;;  %v437_v11 = vmul.f32 %v19960_v37, %v302_v59  ;;  %v1492_v26 = vld [vmem:[#allocation2 + $0x1b9] sm:$0xff]  ;;  %v309_v29 = vld [vmem:[%s19612_s9 + $0x248] sm:$0xff]  ;;  %v314_v59 = vld [vmem:[%s19612_s9 + $0x270] sm:$0xff] }
  0x9f   : > { %1249 = vst.msk [vmem:[#allocation2 + $0x269] sm:$0xff] %vm1018_vm0, %v948_v41  ;;  %v950_v61 = vsel %vm694_vm2, %v566_v44, %v822_v52  ;;  %vm696_vm4 = vcmp.ge.f32.partialorder %v568_v53, 0.0  ;;  %v824_v62 = vmul.f32 0.01, %v568_v53  ;;  %vm698_vm6 = vcmp.ge.f32.partialorder %v570_v57, 0.0  ;;  %v312_v41 = vld [vmem:[%s19612_s9 + $0x260] sm:$0xff] }
  0xa0   : > { %16440 = vmatmul.mubr.msk.f32.gmra.mrb[30].mxu1 %vm1018_vm0, %v1479_v43  ;;  %17210 = vmatmul.mubr.msk.f32.gmra.mrb[26].mxu0 %vm1018_vm0, %v1479_v43  ;;  %v432_v43 = vmul.f32 %v19960_v37, %v297_v28  ;;  %v569_v54 = vadd.f32 %v19946_v4, %v434_v46  ;;  %1251 = vst.msk [vmem:[#allocation2 + $0x281] sm:$0xff] %vm1018_vm0, %v950_v61  ;;  %vm699_vm7 = vcmp.ge.f32.partialorder %v571_v58, 0.0  ;;  %v827_v10 = vmul.f32 0.01, %v571_v58  ;;  %v313_v46 = vld [vmem:[%s19612_s9 + $0x268] sm:$0xff] }
  0xa1   : > { %16442 = vmatprep.mubr.msk.f32.mxu1 %vm1018_vm0, %v1480_v49  ;;  %17212 = vmatprep.mubr.msk.f32.mxu0 %vm1018_vm0, %v1480_v49  ;;  %v952_v9 = vsel %vm696_vm4, %v568_v53, %v824_v62  ;;  %v438_v16 = vmul.f32 %v19960_v37, %v303_v60  ;;  %v572_v19 = vadd.f32 %v19946_v4, %v437_v11  ;;  %v1494_v47 = vld [vmem:[#allocation2 + $0x1c9] sm:$0xff]  ;;  %v1496_v62 = vld [vmem:[#allocation2 + $0x1e1] sm:$0xff] }
  0xa2   : > { %v567_v49 = vadd.f32 %v19946_v4, %v432_v43  ;;  %vm697_vm5 = vcmp.ge.f32.partialorder %v569_v54, 0.0  ;;  %v825_v2 = vmul.f32 0.01, %v569_v54  ;;  %1253 = vst.msk [vmem:[#allocation2 + $0x291] sm:$0xff] %vm1018_vm0, %v952_v9  ;;  %v440_v5 = vmul.f32 %v19960_v37, %v305_v0  ;;  %v315_v9 = vld [vmem:[%s19612_s9 + $0x278] sm:$0xff]  ;;  %v317_v11 = vld [vmem:[%s19612_s9 + $0x288] sm:$0xff] }
  0xa3   : > { %v441_v20 = vmul.f32 %v19960_v37, %v306_v7  ;;  %v442_v23 = vmul.f32 %v19960_v37, %v307_v12  ;;  %vm700_vm8 = vcmp.ge.f32.partialorder %v572_v19, 0.0  ;;  %v828_v27 = vmul.f32 0.01, %v572_v19 }
  0xa4   : > { %16443 = vmatmul.mubr.msk.f32.gmra.mrb[32].mxu1 %vm1018_vm0, %v1481_v63  ;;  %17213 = vmatmul.mubr.msk.f32.gmra.mrb[28].mxu0 %vm1018_vm0, %v1481_v63  ;;  %vm695_vm3 = vcmp.ge.f32.partialorder %v567_v49, 0.0  ;;  %v823_v56 = vmul.f32 0.01, %v567_v49  ;;  %v304_v63 = vld [vmem:[%s19612_s9 + $0x220] sm:$0xff]  ;;  %v953_v14 = vsel %vm697_vm5, %v569_v54, %v825_v2  ;;  %v575_v28 = vadd.f32 %v19946_v4, %v440_v5 }
  0xa5   : > { %16445 = vmatprep.mubr.msk.f32.mxu1 %vm1018_vm0, %v1482_v3  ;;  %17215 = vmatprep.mubr.msk.f32.mxu0 %vm1018_vm0, %v1482_v3  ;;  %v826_v3 = vmul.f32 0.01, %v570_v57  ;;  %v439_v17 = vmul.f32 %v19960_v37, %v304_v63  ;;  %1254 = vst.msk [vmem:[#allocation2 + $0x299] sm:$0xff] %vm1018_vm0, %v953_v14  ;;  %v576_v6 = vadd.f32 %v19946_v4, %v441_v20  ;;  %v1497_v14 = vld [vmem:[#allocation2 + $0x1e9] sm:$0xff] }
  0xa6   : > { %v951_v1 = vsel %vm695_vm3, %v567_v49, %v823_v56  ;;  %v956_v32 = vsel %vm700_vm8, %v572_v19, %v828_v27  ;;  %vm703_vm11 = vcmp.ge.f32.partialorder %v575_v28, 0.0  ;;  %v831_v33 = vmul.f32 0.01, %v575_v28 }
  0xa7   : > { %1252 = vst.msk [vmem:[#allocation2 + $0x289] sm:$0xff] %vm1018_vm0, %v951_v1  ;;  %v954_v15 = vsel %vm698_vm6, %v570_v57, %v826_v3  ;;  %v574_v22 = vadd.f32 %v19946_v4, %v439_v17  ;;  %vm704_vm12 = vcmp.ge.f32.partialorder %v576_v6, 0.0  ;;  %1257 = vst.msk [vmem:[#allocation2 + $0x2b9] sm:$0xff] %vm1018_vm0, %v956_v32  ;;  %v832_v38 = vmul.f32 0.01, %v576_v6 }
  0xa8   : > { %16446 = vmatmul.mubr.msk.f32.gmra.mrb[34].mxu1 %vm1018_vm0, %v1483_v18  ;;  %17216 = vmatmul.mubr.msk.f32.gmra.mrb[30].mxu0 %vm1018_vm0, %v1483_v18  ;;  %1255 = vst.msk [vmem:[#allocation2 + $0x2a9] sm:$0xff] %vm1018_vm0, %v954_v15  ;;  %v955_v18 = vsel %vm699_vm7, %v571_v58, %v827_v10  ;;  %v577_v39 = vadd.f32 %v19946_v4, %v442_v23  ;;  %v316_v10 = vld [vmem:[%s19612_s9 + $0x280] sm:$0xff]  ;;  %v319_v23 = vld [vmem:[%s19612_s9 + $0x298] sm:$0xff] }
  0xa9   : > { %16448 = vmatprep.mubr.msk.f32.mxu1 %vm1018_vm0, %v1484_v21  ;;  %17218 = vmatprep.mubr.msk.f32.mxu0 %vm1018_vm0, %v1484_v21  ;;  %1256 = vst.msk [vmem:[#allocation2 + $0x2b1] sm:$0xff] %vm1018_vm0, %v955_v18  ;;  %v573_v21 = vadd.f32 %v19946_v4, %v438_v16  ;;  %vm702_vm10 = vcmp.ge.f32.partialorder %v574_v22, 0.0  ;;  %v830_v31 = vmul.f32 0.01, %v574_v22  ;;  %v959_v43 = vsel %vm703_vm11, %v575_v28, %v831_v33  ;;  %v1498_v18 = vld [vmem:[#allocation2 + $0x1f1] sm:$0xff] }
  0xaa   : > { %v443_v44 = vmul.f32 %v19960_v37, %v308_v24  ;;  %v444_v45 = vmul.f32 %v19960_v37, %v309_v29  ;;  %1260 = vst.msk [vmem:[#allocation2 + $0x2d9] sm:$0xff] %vm1018_vm0, %v959_v43  ;;  %v960_v48 = vsel %vm704_vm12, %v576_v6, %v832_v38  ;;  %vm705_vm13 = vcmp.ge.f32.partialorder %v577_v39, 0.0  ;;  %v1499_v29 = vld [vmem:[#allocation2 + $0x1f9] sm:$0xff] }
  0xab   : > { %vm701_vm9 = vcmp.ge.f32.partialorder %v573_v21, 0.0  ;;  %v829_v30 = vmul.f32 0.01, %v573_v21  ;;  %v958_v36 = vsel %vm702_vm10, %v574_v22, %v830_v31  ;;  %v833_v49 = vmul.f32 0.01, %v577_v39  ;;  %1261 = vst.msk [vmem:[#allocation2 + $0x2e1] sm:$0xff] %vm1018_vm0, %v960_v48 }
  0xac   : > { %16449 = vmatmul.mubr.msk.f32.gmra.mrb[36].mxu1 %vm1018_vm0, %v1485_v34  ;;  %17219 = vmatmul.mubr.msk.f32.gmra.mrb[32].mxu0 %vm1018_vm0, %v1485_v34  ;;  %v310_v34 = vld [vmem:[%s19612_s9 + $0x250] sm:$0xff]  ;;  %1259 = vst.msk [vmem:[#allocation2 + $0x2d1] sm:$0xff] %vm1018_vm0, %v958_v36  ;;  %v579_v52 = vadd.f32 %v19946_v4, %v444_v45  ;;  %v447_v54 = vmul.f32 %v19960_v37, %v312_v41  ;;  %v321_v41 = vld [vmem:[%s19612_s9 + $0x2a8] sm:$0xff] }
  0xad   : > { %16451 = vmatprep.mubr.msk.f32.mxu1 %vm1018_vm0, %v1486_v40  ;;  %17221 = vmatprep.mubr.msk.f32.mxu0 %vm1018_vm0, %v1486_v40  ;;  %v957_v35 = vsel %vm701_vm9, %v573_v21, %v829_v30  ;;  %v311_v40 = vld [vmem:[%s19612_s9 + $0x258] sm:$0xff]  ;;  %v445_v50 = vmul.f32 %v19960_v37, %v310_v34  ;;  %v961_v56 = vsel %vm705_vm13, %v577_v39, %v833_v49  ;;  %v318_v22 = vld [vmem:[%s19612_s9 + $0x290] sm:$0xff]  ;;  %v320_v34 = vld [vmem:[%s19612_s9 + $0x2a0] sm:$0xff] }
  0xae   : > { %1258 = vst.msk [vmem:[#allocation2 + $0x2c1] sm:$0xff] %vm1018_vm0, %v957_v35  ;;  %v446_v53 = vmul.f32 %v19960_v37, %v311_v40  ;;  %v448_v58 = vmul.f32 %v19960_v37, %v313_v46  ;;  %1262 = vst.msk [vmem:[#allocation2 + $0x2e9] sm:$0xff] %vm1018_vm0, %v961_v56  ;;  %vm707_vm15 = vcmp.ge.f32.partialorder %v579_v52, 0.0  ;;  %v835_v61 = vmul.f32 0.01, %v579_v52  ;;  %v1500_v30 = vld [vmem:[#allocation2 + $0x209] sm:$0xff] }
  0xaf   : > { %v580_v57 = vadd.f32 %v19946_v4, %v445_v50  ;;  %v582_v1 = vadd.f32 %v19946_v4, %v447_v54  ;;  %v450_v5 = vmul.f32 %v19960_v37, %v315_v9  ;;  %v451_v20 = vmul.f32 %v19960_v37, %v316_v10  ;;  %v323_v46 = vld [vmem:[%s19612_s9 + $0x2b8] sm:$0xff]  ;;  %v325_v48 = vld [vmem:[%s19612_s9 + $0x2c8] sm:$0xff] }
  0xb0   : > { %16452 = vmatmul.mubr.msk.f32.gmra.mrb[38].mxu1 %vm1018_vm0, %v1487_v51  ;;  %17222 = vmatmul.mubr.msk.f32.gmra.mrb[34].mxu0 %vm1018_vm0, %v1487_v51  ;;  %v578_v51 = vadd.f32 %v19946_v4, %v443_v44  ;;  %v581_v0 = vadd.f32 %v19946_v4, %v446_v53  ;;  %v963_v3 = vsel %vm707_vm15, %v579_v52, %v835_v61  ;;  %v1501_v49 = vld [vmem:[#allocation2 + $0x211] sm:$0xff]  ;;  %v1502_v52 = vld [vmem:[#allocation2 + $0x219] sm:$0xff] }
  0xb1   : > { %16454 = vmatprep.mubr.msk.f32.mxu1 %vm1018_vm0, %v1488_v55  ;;  %17224 = vmatprep.mubr.msk.f32.mxu0 %vm1018_vm0, %v1488_v55  ;;  %v1495_v55 = vld [vmem:[#allocation2 + $0x1d1] sm:$0xff]  ;;  %vm708_vm1 = vcmp.ge.f32.partialorder %v580_v57, 0.0  ;;  %v836_v63 = vmul.f32 0.01, %v580_v57  ;;  %v583_v7 = vadd.f32 %v19946_v4, %v448_v58  ;;  %1264 = vst.msk [vmem:[#allocation2 + $0x301] sm:$0xff] %vm1018_vm0, %v963_v3  ;;  %vm710_vm3 = vcmp.ge.f32.partialorder %v582_v1, 0.0 }
  0xb2   : > { %vm706_vm14 = vcmp.ge.f32.partialorder %v578_v51, 0.0  ;;  %v834_v60 = vmul.f32 0.01, %v578_v51  ;;  %vm709_vm2 = vcmp.ge.f32.partialorder %v581_v0, 0.0  ;;  %v838_v15 = vmul.f32 0.01, %v582_v1 }
  0xb3   : > { %v964_v12 = vsel %vm708_vm1, %v580_v57, %v836_v63  ;;  %vm711_vm4 = vcmp.ge.f32.partialorder %v583_v7, 0.0  ;;  %v839_v16 = vmul.f32 0.01, %v583_v7  ;;  %v452_v21 = vmul.f32 %v19960_v37, %v317_v11  ;;  %v1504_v9 = vld [vmem:[#allocation2 + $0x231] sm:$0xff] }
  0xb4   : > { %16455 = vmatmul.mubr.msk.f32.gmra.mrb[40].mxu1 %vm1018_vm0, %v1489_v8  ;;  %17225 = vmatmul.mubr.msk.f32.gmra.mrb[36].mxu0 %vm1018_vm0, %v1489_v8  ;;  %v962_v2 = vsel %vm706_vm14, %v578_v51, %v834_v60  ;;  %v449_v8 = vmul.f32 %v19960_v37, %v314_v59  ;;  %1265 = vst.msk [vmem:[#allocation2 + $0x309] sm:$0xff] %vm1018_vm0, %v964_v12 }
  0xb5   : > { %16457 = vmatprep.mubr.msk.f32.mxu1 %vm1018_vm0, %v1490_v13  ;;  %17227 = vmatprep.mubr.msk.f32.mxu0 %vm1018_vm0, %v1490_v13  ;;  %1263 = vst.msk [vmem:[#allocation2 + $0x2f9] sm:$0xff] %vm1018_vm0, %v962_v2  ;;  %v837_v13 = vmul.f32 0.01, %v581_v0  ;;  %v966_v24 = vsel %vm710_vm3, %v582_v1, %v838_v15  ;;  %v585_v27 = vadd.f32 %v19946_v4, %v450_v5  ;;  %v331_v5 = vld [vmem:[%s19612_s9 + $0x2f8] sm:$0xff] }
  0xb6   : > { %v584_v17 = vadd.f32 %v19946_v4, %v449_v8  ;;  %1267 = vst.msk [vmem:[#allocation2 + $0x321] sm:$0xff] %vm1018_vm0, %v966_v24  ;;  %v586_v28 = vadd.f32 %v19946_v4, %v451_v20  ;;  %v587_v6 = vadd.f32 %v19946_v4, %v452_v21  ;;  %v453_v32 = vmul.f32 %v19960_v37, %v318_v22  ;;  %v327_v8 = vld [vmem:[%s19612_s9 + $0x2d8] sm:$0xff] }
  0xb7   : > { %v965_v19 = vsel %vm709_vm2, %v581_v0, %v837_v13  ;;  %v454_v33 = vmul.f32 %v19960_v37, %v319_v23  ;;  %vm713_vm6 = vcmp.ge.f32.partialorder %v585_v27, 0.0  ;;  %v841_v35 = vmul.f32 0.01, %v585_v27  ;;  %v1503_v0 = vld [vmem:[#allocation2 + $0x221] sm:$0xff]  ;;  %v1505_v20 = vld [vmem:[#allocation2 + $0x239] sm:$0xff] }
  0xb8   : > { %16458 = vmatmul.mubr.msk.f32.gmra.mrb[42].mxu1 %vm1018_vm0, %v1491_v25  ;;  %17228 = vmatmul.mubr.msk.f32.gmra.mrb[38].mxu0 %vm1018_vm0, %v1491_v25  ;;  %1266 = vst.msk [vmem:[#allocation2 + $0x311] sm:$0xff] %vm1018_vm0, %v965_v19  ;;  %v967_v25 = vsel %vm711_vm4, %v583_v7, %v839_v16  ;;  %vm712_vm5 = vcmp.ge.f32.partialorder %v584_v17, 0.0  ;;  %vm714_vm7 = vcmp.ge.f32.partialorder %v586_v28, 0.0  ;;  %v842_v36 = vmul.f32 0.01, %v586_v28  ;;  %v326_v7 = vld [vmem:[%s19612_s9 + $0x2d0] sm:$0xff] }
  0xb9   : > { %16460 = vmatprep.mubr.msk.f32.mxu1 %vm1018_vm0, %v1492_v26  ;;  %17230 = vmatprep.mubr.msk.f32.mxu0 %vm1018_vm0, %v1492_v26  ;;  %v840_v26 = vmul.f32 0.01, %v584_v17  ;;  %1268 = vst.msk [vmem:[#allocation2 + $0x329] sm:$0xff] %vm1018_vm0, %v967_v25  ;;  %vm715_vm8 = vcmp.ge.f32.partialorder %v587_v6, 0.0  ;;  %v843_v38 = vmul.f32 0.01, %v587_v6  ;;  %v588_v39 = vadd.f32 %v19946_v4, %v453_v32 }
  0xba   : > { %v589_v40 = vadd.f32 %v19946_v4, %v454_v33  ;;  %v969_v43 = vsel %vm713_vm6, %v585_v27, %v841_v35  ;;  %v970_v44 = vsel %vm714_vm7, %v586_v28, %v842_v36  ;;  %v455_v45 = vmul.f32 %v19960_v37, %v320_v34  ;;  %v328_v13 = vld [vmem:[%s19612_s9 + $0x2e0] sm:$0xff]  ;;  %v330_v19 = vld [vmem:[%s19612_s9 + $0x2f0] sm:$0xff] }
  0xbb   : > { %v968_v31 = vsel %vm712_vm5, %v584_v17, %v840_v26  ;;  %1270 = vst.msk [vmem:[#allocation2 + $0x339] sm:$0xff] %vm1018_vm0, %v969_v43  ;;  %1271 = vst.msk [vmem:[#allocation2 + $0x349] sm:$0xff] %vm1018_vm0, %v970_v44  ;;  %v971_v50 = vsel %vm715_vm8, %v587_v6, %v843_v38  ;;  %vm716_vm9 = vcmp.ge.f32.partialorder %v588_v39, 0.0  ;;  %v844_v51 = vmul.f32 0.01, %v588_v39  ;;  %v1506_v25 = vld [vmem:[#allocation2 + $0x241] sm:$0xff] }
  0xbc   : > { %16461 = vmatmul.mubr.msk.f32.gmra.mrb[44].mxu1 %vm1018_vm0, %v1493_v42  ;;  %17231 = vmatmul.mubr.msk.f32.gmra.mrb[40].mxu0 %vm1018_vm0, %v1493_v42  ;;  %1269 = vst.msk [vmem:[#allocation2 + $0x331] sm:$0xff] %vm1018_vm0, %v968_v31  ;;  %v322_v42 = vld [vmem:[%s19612_s9 + $0x2b0] sm:$0xff]  ;;  %vm717_vm10 = vcmp.ge.f32.partialorder %v589_v40, 0.0  ;;  %1272 = vst.msk [vmem:[#allocation2 + $0x351] sm:$0xff] %vm1018_vm0, %v971_v50  ;;  %v845_v53 = vmul.f32 0.01, %v589_v40  ;;  %v590_v54 = vadd.f32 %v19946_v4, %v455_v45 }
  0xbd   : > { %16463 = vmatprep.mubr.msk.f32.mxu1 %vm1018_vm0, %v1494_v47  ;;  %17233 = vmatprep.mubr.msk.f32.mxu0 %vm1018_vm0, %v1494_v47  ;;  %v324_v47 = vld [vmem:[%s19612_s9 + $0x2c0] sm:$0xff]  ;;  %v457_v56 = vmul.f32 %v19960_v37, %v322_v42  ;;  %v972_v57 = vsel %vm716_vm9, %v588_v39, %v844_v51  ;;  %v458_v58 = vmul.f32 %v19960_v37, %v323_v46  ;;  %v1507_v38 = vld [vmem:[#allocation2 + $0x249] sm:$0xff]  ;;  %v335_v46 = vld [vmem:[%s19612_s9 + $0x318] sm:$0xff] }
  0xbe   : > { %v459_v59 = vmul.f32 %v19960_v37, %v324_v47  ;;  %v460_v60 = vmul.f32 %v19960_v37, %v325_v48  ;;  %1273 = vst.msk [vmem:[#allocation2 + $0x359] sm:$0xff] %vm1018_vm0, %v972_v57  ;;  %v973_v61 = vsel %vm717_vm10, %v589_v40, %v845_v53  ;;  %vm718_vm11 = vcmp.ge.f32.partialorder %v590_v54, 0.0  ;;  %v332_v36 = vld [vmem:[%s19612_s9 + $0x300] sm:$0xff]  ;;  %v333_v42 = vld [vmem:[%s19612_s9 + $0x308] sm:$0xff]  ;;  %v334_v43 = vld [vmem:[%s19612_s9 + $0x310] sm:$0xff] }
  0xbf   : > { %1274 = vst.msk [vmem:[#allocation2 + $0x361] sm:$0xff] %vm1018_vm0, %v973_v61  ;;  %v592_v1 = vadd.f32 %v19946_v4, %v457_v56  ;;  %v593_v2 = vadd.f32 %v19946_v4, %v458_v58  ;;  %v461_v24 = vmul.f32 %v19960_v37, %v326_v7  ;;  %v462_v27 = vmul.f32 %v19960_v37, %v327_v8  ;;  %v1508_v44 = vld [vmem:[#allocation2 + $0x259] sm:$0xff] }
  0xc0   : > { %16464 = vmatmul.mubr.msk.f32.gmra.mrb[46].mxu1 %vm1018_vm0, %v1495_v55  ;;  %17234 = vmatmul.mubr.msk.f32.gmra.mrb[42].mxu0 %vm1018_vm0, %v1495_v55  ;;  %v456_v55 = vmul.f32 %v19960_v37, %v321_v41  ;;  %v594_v3 = vadd.f32 %v19946_v4, %v459_v59  ;;  %v595_v12 = vadd.f32 %v19946_v4, %v460_v60  ;;  %v336_v50 = vld [vmem:[%s19612_s9 + $0x320] sm:$0xff]  ;;  %v338_v59 = vld [vmem:[%s19612_s9 + $0x330] sm:$0xff] }
  0xc1   : > { %16466 = vmatprep.mubr.msk.f32.mxu1 %vm1018_vm0, %v1496_v62  ;;  %17236 = vmatprep.mubr.msk.f32.mxu0 %vm1018_vm0, %v1496_v62  ;;  %v846_v62 = vmul.f32 0.01, %v590_v54  ;;  %vm720_vm13 = vcmp.ge.f32.partialorder %v592_v1, 0.0  ;;  %v848_v15 = vmul.f32 0.01, %v592_v1  ;;  %vm721_vm14 = vcmp.ge.f32.partialorder %v593_v2, 0.0 }
  0xc2   : > { %v591_v63 = vadd.f32 %v19946_v4, %v456_v55  ;;  %v849_v16 = vmul.f32 0.01, %v593_v2  ;;  %vm722_vm15 = vcmp.ge.f32.partialorder %v594_v3, 0.0  ;;  %vm723_vm1 = vcmp.ge.f32.partialorder %v595_v12, 0.0  ;;  %v1509_v55 = vld [vmem:[#allocation2 + $0x261] sm:$0xff]  ;;  %v1510_v60 = vld [vmem:[#allocation2 + $0x269] sm:$0xff] }
  0xc3   : > { %v974_v10 = vsel %vm718_vm11, %v590_v54, %v846_v62  ;;  %v976_v21 = vsel %vm720_vm13, %v592_v1, %v848_v15  ;;  %v851_v23 = vmul.f32 0.01, %v595_v12  ;;  %v463_v28 = vmul.f32 %v19960_v37, %v328_v13  ;;  %v337_v54 = vld [vmem:[%s19612_s9 + $0x328] sm:$0xff] }
  0xc4   : > { %16467 = vmatmul.mubr.msk.f32.gmra.mrb[48].mxu1 %vm1018_vm0, %v1497_v14  ;;  %17237 = vmatmul.mubr.msk.f32.gmra.mrb[44].mxu0 %vm1018_vm0, %v1497_v14  ;;  %vm719_vm12 = vcmp.ge.f32.partialorder %v591_v63, 0.0  ;;  %v847_v11 = vmul.f32 0.01, %v591_v63  ;;  %v329_v14 = vld [vmem:[%s19612_s9 + $0x2e8] sm:$0xff]  ;;  %1275 = vst.msk [vmem:[#allocation2 + $0x371] sm:$0xff] %vm1018_vm0, %v974_v10  ;;  %v977_v22 = vsel %vm721_vm14, %v593_v2, %v849_v16  ;;  %1277 = vst.msk [vmem:[#allocation2 + $0x381] sm:$0xff] %vm1018_vm0, %v976_v21 }
  0xc5   : > { %16469 = vmatprep.mubr.msk.f32.mxu1 %vm1018_vm0, %v1498_v18  ;;  %17239 = vmatprep.mubr.msk.f32.mxu0 %vm1018_vm0, %v1498_v18  ;;  %v850_v18 = vmul.f32 0.01, %v594_v3  ;;  %1278 = vst.msk [vmem:[#allocation2 + $0x389] sm:$0xff] %vm1018_vm0, %v977_v22  ;;  %v464_v6 = vmul.f32 %v19960_v37, %v329_v14  ;;  %v465_v31 = vmul.f32 %v19960_v37, %v330_v19  ;;  %v339_v16 = vld [vmem:[%s19612_s9 + $0x338] sm:$0xff] }
  0xc6   : > { %v975_v17 = vsel %vm719_vm12, %v591_v63, %v847_v11  ;;  %v466_v32 = vmul.f32 %v19960_v37, %v331_v5  ;;  %v597_v33 = vadd.f32 %v19946_v4, %v462_v27  ;;  %v598_v34 = vadd.f32 %v19946_v4, %v463_v28  ;;  %v1511_v11 = vld [vmem:[#allocation2 + $0x271] sm:$0xff] }
  0xc7   : > { %1276 = vst.msk [vmem:[#allocation2 + $0x379] sm:$0xff] %vm1018_vm0, %v975_v17  ;;  %v978_v26 = vsel %vm722_vm15, %v594_v3, %v850_v18  ;;  %v599_v35 = vadd.f32 %v19946_v4, %v464_v6  ;;  %v600_v40 = vadd.f32 %v19946_v4, %v465_v31  ;;  %v467_v58 = vmul.f32 %v19960_v37, %v332_v36 }
  0xc8   : > { %16470 = vmatmul.mubr.msk.f32.gmra.mrb[50].mxu1 %vm1018_vm0, %v1499_v29  ;;  %17240 = vmatmul.mubr.msk.f32.gmra.mrb[46].mxu0 %vm1018_vm0, %v1499_v29  ;;  %1279 = vst.msk [vmem:[#allocation2 + $0x399] sm:$0xff] %vm1018_vm0, %v978_v26  ;;  %v979_v29 = vsel %vm723_vm1, %v595_v12, %v851_v23  ;;  %v601_v41 = vadd.f32 %v19946_v4, %v466_v32  ;;  %vm725_vm3 = vcmp.ge.f32.partialorder %v597_v33, 0.0  ;;  %v853_v45 = vmul.f32 0.01, %v597_v33  ;;  %v1512_v12 = vld [vmem:[#allocation2 + $0x281] sm:$0xff]  ;;  %v1513_v26 = vld [vmem:[#allocation2 + $0x289] sm:$0xff] }
  0xc9   : > { %16472 = vmatprep.mubr.msk.f32.mxu1 %vm1018_vm0, %v1500_v30  ;;  %17242 = vmatprep.mubr.msk.f32.mxu0 %vm1018_vm0, %v1500_v30  ;;  %v596_v30 = vadd.f32 %v19946_v4, %v461_v24  ;;  %1280 = vst.msk [vmem:[#allocation2 + $0x3a1] sm:$0xff] %vm1018_vm0, %v979_v29  ;;  %vm726_vm4 = vcmp.ge.f32.partialorder %v598_v34, 0.0  ;;  %vm727_vm5 = vcmp.ge.f32.partialorder %v599_v35, 0.0  ;;  %v854_v48 = vmul.f32 0.01, %v598_v34  ;;  %v342_v29 = vld [vmem:[%s19612_s9 + $0x350] sm:$0xff] }
  0xca   : > { %vm728_vm6 = vcmp.ge.f32.partialorder %v600_v40, 0.0  ;;  %v981_v51 = vsel %vm725_vm3, %v597_v33, %v853_v45  ;;  %vm729_vm7 = vcmp.ge.f32.partialorder %v601_v41, 0.0  ;;  %v857_v53 = vmul.f32 0.01, %v601_v41 }
  0xcb   : > { %vm724_vm2 = vcmp.ge.f32.partialorder %v596_v30, 0.0  ;;  %v852_v39 = vmul.f32 0.01, %v596_v30  ;;  %1282 = vst.msk [vmem:[#allocation2 + $0x3b1] sm:$0xff] %vm1018_vm0, %v981_v51  ;;  %v982_v56 = vsel %vm726_vm4, %v598_v34, %v854_v48  ;;  %v468_v63 = vmul.f32 %v19960_v37, %v333_v42  ;;  %v344_v42 = vld [vmem:[%s19612_s9 + $0x360] sm:$0xff]  ;;  %v7797_v48 = vld [vmem:[#allocation2 + $0x2a] sm:$0xff] }
  0xcc   : > { %16473 = vmatmul.mubr.msk.f32.gmra.mrb[52].mxu1 %vm1018_vm0, %v1501_v49  ;;  %17243 = vmatmul.mubr.msk.f32.gmra.mrb[48].mxu0 %vm1018_vm0, %v1501_v49  ;;  %v855_v49 = vmul.f32 0.01, %v599_v35  ;;  %1283 = vst.msk [vmem:[#allocation2 + $0x3c1] sm:$0xff] %vm1018_vm0, %v982_v56  ;;  %v985_v62 = vsel %vm729_vm7, %v601_v41, %v857_v53  ;;  %v602_v1 = vadd.f32 %v19946_v4, %v467_v58  ;;  %v346_v56 = vld [vmem:[%s19612_s9 + $0x370] sm:$0xff] }
  0xcd   : > { %16475 = vmatprep.mubr.msk.f32.mxu1 %vm1018_vm0, %v1502_v52  ;;  %17245 = vmatprep.mubr.msk.f32.mxu0 %vm1018_vm0, %v1502_v52  ;;  %v980_v47 = vsel %vm724_vm2, %v596_v30, %v852_v39  ;;  %v856_v52 = vmul.f32 0.01, %v600_v40  ;;  %1286 = vst.msk [vmem:[#allocation2 + $0x3d9] sm:$0xff] %vm1018_vm0, %v985_v62  ;;  %v470_v2 = vmul.f32 %v19960_v37, %v335_v46  ;;  %v1514_v30 = vld [vmem:[#allocation2 + $0x291] sm:$0xff] }
  0xce   : > { %1281 = vst.msk [vmem:[#allocation2 + $0x3a9] sm:$0xff] %vm1018_vm0, %v980_v47  ;;  %v983_v57 = vsel %vm727_vm5, %v599_v35, %v855_v49  ;;  %v471_v3 = vmul.f32 %v19960_v37, %v336_v50  ;;  %v472_v7 = vmul.f32 %v19960_v37, %v337_v54  ;;  %v603_v8 = vadd.f32 %v19946_v4, %v468_v63  ;;  %v1516_v47 = vld [vmem:[#allocation2 + $0x2a9] sm:$0xff]  ;;  %v1517_v62 = vld [vmem:[#allocation2 + $0x2b1] sm:$0xff] }
  0xcf   : > { %1284 = vst.msk [vmem:[#allocation2 + $0x3c9] sm:$0xff] %vm1018_vm0, %v983_v57  ;;  %v984_v61 = vsel %vm728_vm6, %v600_v40, %v856_v52  ;;  %v473_v10 = vmul.f32 %v19960_v37, %v338_v59  ;;  %vm730_vm8 = vcmp.ge.f32.partialorder %v602_v1, 0.0  ;;  %v858_v13 = vmul.f32 0.01, %v602_v1  ;;  %v345_v52 = vld [vmem:[%s19612_s9 + $0x368] sm:$0xff]  ;;  %v7798_v57 = vld [vmem:[#allocation2 + $0x32] sm:$0xff] }
  0xd0   : > { %16476 = vmatmul.mubr.msk.f32.gmra.mrb[54].mxu1 %vm1018_vm0, %v1503_v0  ;;  %17246 = vmatmul.mubr.msk.f32.gmra.mrb[50].mxu0 %vm1018_vm0, %v1503_v0  ;;  %v469_v0 = vmul.f32 %v19960_v37, %v334_v43  ;;  %1285 = vst.msk [vmem:[#allocation2 + $0x3d1] sm:$0xff] %vm1018_vm0, %v984_v61  ;;  %v605_v14 = vadd.f32 %v19946_v4, %v470_v2  ;;  %vm731_vm9 = vcmp.ge.f32.partialorder %v603_v8, 0.0  ;;  %v859_v17 = vmul.f32 0.01, %v603_v8  ;;  %v1515_v43 = vld [vmem:[#allocation2 + $0x299] sm:$0xff] }
  0xd1   : > { %16478 = vmatprep.mubr.msk.f32.mxu1 %vm1018_vm0, %v1504_v9  ;;  %17248 = vmatprep.mubr.msk.f32.mxu0 %vm1018_vm0, %v1504_v9  ;;  %v606_v15 = vadd.f32 %v19946_v4, %v471_v3  ;;  %v986_v19 = vsel %vm730_vm8, %v602_v1, %v858_v13  ;;  %v607_v24 = vadd.f32 %v19946_v4, %v472_v7  ;;  %v347_v61 = vld [vmem:[%s19612_s9 + $0x378] sm:$0xff]  ;;  %v348_v2 = vld [vmem:[%s19612_s9 + $0x380] sm:$0xff]  ;;  %v20241_v3 = vld [vmem:[%s22585_s3 + $0x10] sm:$0xff] }
  0xd2   : > { %v604_v9 = vadd.f32 %v19946_v4, %v469_v0  ;;  %vm733_vm11 = vcmp.ge.f32.partialorder %v605_v14, 0.0  ;;  %v861_v5 = vmul.f32 0.01, %v605_v14  ;;  %1287 = vst.msk [vmem:[#allocation2 + $0x3e9] sm:$0xff] %vm1018_vm0, %v986_v19  ;;  %v987_v21 = vsel %vm731_vm9, %v603_v8, %v859_v17  ;;  %v1518_v7 = vld [vmem:[#allocation2 + $0x2b9] sm:$0xff]  ;;  %16780 = vmatprep.subr.mxu1 %v20241_v3  ;;  %v350_v19 = vld [vmem:[%s19612_s9 + $0x390] sm:$0xff] }
  0xd3   : > { %vm734_vm12 = vcmp.ge.f32.partialorder %v606_v15, 0.0  ;;  %v862_v23 = vmul.f32 0.01, %v606_v15  ;;  %1288 = vst.msk [vmem:[#allocation2 + $0x3f1] sm:$0xff] %vm1018_vm0, %v987_v21  ;;  %v608_v28 = vadd.f32 %v19946_v4, %v473_v10  ;;  %v474_v6 = vmul.f32 %v19960_v37, %v339_v16  ;;  %v7800_v21 = vld [vmem:[#allocation2 + $0x42] sm:$0xff] }
  0xd4   : > { %16479 = vmatmul.mubr.msk.f32.gmra.mrb[56].mxu1 %vm1018_vm0, %v1505_v20  ;;  %17249 = vmatmul.mubr.msk.f32.gmra.mrb[52].mxu0 %vm1018_vm0, %v1505_v20  ;;  %vm732_vm10 = vcmp.ge.f32.partialorder %v604_v9, 0.0  ;;  %v860_v18 = vmul.f32 0.01, %v604_v9  ;;  %v340_v20 = vld [vmem:[%s19612_s9 + $0x340] sm:$0xff]  ;;  %v989_v27 = vsel %vm733_vm11, %v605_v14, %v861_v5  ;;  %vm735_vm13 = vcmp.ge.f32.partialorder %v607_v24, 0.0  ;;  %v19175_v5 = vld [vmem:[%s22585_s3 + $0x30] sm:$0xff] }
  0xd5   : > { %16481 = vmatprep.mubr.msk.f32.mxu1 %vm1018_vm0, %v1506_v25  ;;  %17251 = vmatprep.mubr.msk.f32.mxu0 %vm1018_vm0, %v1506_v25  ;;  %v341_v25 = vld [vmem:[%s19612_s9 + $0x348] sm:$0xff]  ;;  %1290 = vst.msk [vmem:[#allocation2 + $0x401] sm:$0xff] %vm1018_vm0, %v989_v27  ;;  %v990_v31 = vsel %vm734_vm12, %v606_v15, %v862_v23  ;;  %v863_v32 = vmul.f32 0.01, %v607_v24  ;;  %v475_v33 = vmul.f32 %v19960_v37, %v340_v20  ;;  %vm736_vm14 = vcmp.ge.f32.partialorder %v608_v28, 0.0 }
  0xd6   : > { %v988_v22 = vsel %vm732_vm10, %v604_v9, %v860_v18  ;;  %1291 = vst.msk [vmem:[#allocation2 + $0x411] sm:$0xff] %vm1018_vm0, %v990_v31  ;;  %v864_v34 = vmul.f32 0.01, %v608_v28  ;;  %v609_v35 = vadd.f32 %v19946_v4, %v474_v6  ;;  %v476_v36 = vmul.f32 %v19960_v37, %v341_v25  ;;  %v349_v15 = vld [vmem:[%s19612_s9 + $0x388] sm:$0xff]  ;;  %v1520_v25 = vld [vmem:[#allocation2 + $0x2d1] sm:$0xff] }
  0xd7   : > { %1289 = vst.msk [vmem:[#allocation2 + $0x3f9] sm:$0xff] %vm1018_vm0, %v988_v22  ;;  %v991_v39 = vsel %vm735_vm13, %v607_v24, %v863_v32  ;;  %v610_v40 = vadd.f32 %v19946_v4, %v475_v33  ;;  %v477_v41 = vmul.f32 %v19960_v37, %v342_v29  ;;  %v480_v1 = vmul.f32 %v19960_v37, %v345_v52  ;;  %v1519_v20 = vld [vmem:[#allocation2 + $0x2c1] sm:$0xff]  ;;  %v351_v29 = vld [vmem:[%s19612_s9 + $0x398] sm:$0xff] }
  0xd8   : > { %16482 = vmatmul.mubr.msk.f32.gmra.mrb[58].mxu1 %vm1018_vm0, %v1507_v38  ;;  %17252 = vmatmul.mubr.msk.f32.gmra.mrb[54].mxu0 %vm1018_vm0, %v1507_v38  ;;  %v343_v38 = vld [vmem:[%s19612_s9 + $0x358] sm:$0xff]  ;;  %1292 = vst.msk [vmem:[#allocation2 + $0x419] sm:$0xff] %vm1018_vm0, %v991_v39  ;;  %vm737_vm15 = vcmp.ge.f32.partialorder %v609_v35, 0.0  ;;  %v865_v45 = vmul.f32 0.01, %v609_v35  ;;  %v611_v46 = vadd.f32 %v19946_v4, %v476_v36  ;;  %v481_v10 = vmul.f32 %v19960_v37, %v346_v56  ;;  %v352_v33 = vld [vmem:[%s19612_s9 + $0x3a0] sm:$0xff] }
  0xd9   : > { %16484 = vmatprep.mubr.msk.f32.mxu1 %vm1018_vm0, %v1508_v44  ;;  %17254 = vmatprep.mubr.msk.f32.mxu0 %vm1018_vm0, %v1508_v44  ;;  %v992_v44 = vsel %vm736_vm14, %v608_v28, %v864_v34  ;;  %vm738_vm1 = vcmp.ge.f32.partialorder %v610_v40, 0.0  ;;  %v866_v49 = vmul.f32 0.01, %v610_v40  ;;  %v612_v50 = vadd.f32 %v19946_v4, %v477_v41  ;;  %v1521_v39 = vld [vmem:[#allocation2 + $0x2d9] sm:$0xff] }
  0xda   : > { %1293 = vst.msk [vmem:[#allocation2 + $0x421] sm:$0xff] %vm1018_vm0, %v992_v44  ;;  %v478_v51 = vmul.f32 %v19960_v37, %v343_v38  ;;  %v993_v53 = vsel %vm737_vm15, %v609_v35, %v865_v45  ;;  %vm739_vm2 = vcmp.ge.f32.partialorder %v611_v46, 0.0  ;;  %v867_v54 = vmul.f32 0.01, %v611_v46  ;;  %v353_v38 = vld [vmem:[%s19612_s9 + $0x3a8] sm:$0xff]  ;;  %v354_v44 = vld [vmem:[%s19612_s9 + $0x3b0] sm:$0xff] }
  0xdb   : > { %1294 = vst.msk [vmem:[#allocation2 + $0x429] sm:$0xff] %vm1018_vm0, %v993_v53  ;;  %v994_v58 = vsel %vm738_vm1, %v610_v40, %v866_v49  ;;  %vm740_vm3 = vcmp.ge.f32.partialorder %v612_v50, 0.0  ;;  %v868_v59 = vmul.f32 0.01, %v612_v50  ;;  %v615_v13 = vadd.f32 %v19946_v4, %v480_v1  ;;  %v7802_v40 = vld [vmem:[#allocation2 + $0x5a] sm:$0xff] }
  0xdc   : > { %16485 = vmatmul.mubr.msk.f32.gmra.mrb[60].mxu1 %vm1018_vm0, %v1509_v55  ;;  %17255 = vmatmul.mubr.msk.f32.gmra.mrb[56].mxu0 %vm1018_vm0, %v1509_v55  ;;  %v479_v55 = vmul.f32 %v19960_v37, %v344_v42  ;;  %1295 = vst.msk [vmem:[#allocation2 + $0x439] sm:$0xff] %vm1018_vm0, %v994_v58  ;;  %v995_v63 = vsel %vm739_vm2, %v611_v46, %v867_v54  ;;  %v1522_v45 = vld [vmem:[#allocation2 + $0x2e1] sm:$0xff]  ;;  %v355_v53 = vld [vmem:[%s19612_s9 + $0x3b8] sm:$0xff]  ;;  %v20299_v56 = vld [vmem:[%s22583_s1] ss:$0 sm:$0xff] }
  0xdd   : > { %16487 = vmatprep.mubr.msk.f32.mxu1 %vm1018_vm0, %v1510_v60  ;;  %17257 = vmatprep.mubr.msk.f32.mxu0 %vm1018_vm0, %v1510_v60  ;;  %v613_v60 = vadd.f32 %v19946_v4, %v478_v51  ;;  %1296 = vst.msk [vmem:[#allocation2 + $0x441] sm:$0xff] %vm1018_vm0, %v995_v63  ;;  %v996_v8 = vsel %vm740_vm3, %v612_v50, %v868_v59  ;;  %vm743_vm6 = vcmp.ge.f32.partialorder %v615_v13, 0.0  ;;  %v871_v23 = vmul.f32 0.01, %v615_v13  ;;  %v7803_v46 = vld [vmem:[#allocation2 + $0x62] sm:$0xff]  ;;  %v7804_v59 = vld [vmem:[#allocation2 + $0x6a] sm:$0xff] }
  0xde   : > { %v614_v0 = vadd.f32 %v19946_v4, %v479_v55  ;;  %1297 = vst.msk [vmem:[#allocation2 + $0x449] sm:$0xff] %vm1018_vm0, %v996_v8  ;;  %v482_v14 = vmul.f32 %v19960_v37, %v347_v61  ;;  %v616_v17 = vadd.f32 %v19946_v4, %v481_v10  ;;  %v483_v18 = vmul.f32 %v19960_v37, %v348_v2  ;;  %v356_v58 = vld [vmem:[%s19612_s9 + $0x3c0] sm:$0xff]  ;;  %v357_v8 = vld [vmem:[%s19612_s9 + $0x3c8] sm:$0xff] }
  0xdf   : > { %vm741_vm4 = vcmp.ge.f32.partialorder %v613_v60, 0.0  ;;  %v869_v9 = vmul.f32 0.01, %v613_v60  ;;  %v484_v6 = vmul.f32 %v19960_v37, %v349_v15  ;;  %v485_v32 = vmul.f32 %v19960_v37, %v350_v19  ;;  %v1524_v63 = vld [vmem:[#allocation2 + $0x2f9] sm:$0xff] }
  0xe0   : > { %16488 = vmatmul.mubr.msk.f32.gmra.mrb[62].mxu1 %vm1018_vm0, %v1511_v11  ;;  %17258 = vmatmul.mubr.msk.f32.gmra.mrb[58].mxu0 %vm1018_vm0, %v1511_v11  ;;  %v7799_v11 = vld [vmem:[#allocation2 + $0x3a] sm:$0xff]  ;;  %vm742_vm5 = vcmp.ge.f32.partialorder %v614_v0, 0.0  ;;  %v617_v24 = vadd.f32 %v19946_v4, %v482_v14  ;;  %vm744_vm7 = vcmp.ge.f32.partialorder %v616_v17, 0.0  ;;  %v872_v27 = vmul.f32 0.01, %v616_v17 }
  0xe1   : > { %16490 = vmatprep.mubr.msk.f32.mxu1 %vm1018_vm0, %v1512_v12  ;;  %17260 = vmatprep.mubr.msk.f32.mxu0 %vm1018_vm0, %v1512_v12  ;;  %v870_v12 = vmul.f32 0.01, %v614_v0  ;;  %v997_v16 = vsel %vm741_vm4, %v613_v60, %v869_v9  ;;  %v618_v28 = vadd.f32 %v19946_v4, %v483_v18  ;;  %v619_v36 = vadd.f32 %v19946_v4, %v484_v6  ;;  %v7806_v18 = vld [vmem:[#allocation2 + $0x82] sm:$0xff] }
  0xe2   : > { %1298 = vst.msk [vmem:[#allocation2 + $0x451] sm:$0xff] %vm1018_vm0, %v997_v16  ;;  %vm745_vm8 = vcmp.ge.f32.partialorder %v617_v24, 0.0  ;;  %v873_v31 = vmul.f32 0.01, %v617_v24  ;;  %v1000_v34 = vsel %vm744_vm7, %v616_v17, %v872_v27  ;;  %v620_v42 = vadd.f32 %v19946_v4, %v485_v32  ;;  %v20288_v4 = vld [vmem:[%s22584_s2] ss:$0 sm:$0xff] }
  0xe3   : > { %v998_v22 = vsel %vm742_vm5, %v614_v0, %v870_v12  ;;  %vm746_vm9 = vcmp.ge.f32.partialorder %v618_v28, 0.0  ;;  %v874_v35 = vmul.f32 0.01, %v618_v28  ;;  %1301 = vst.msk [vmem:[#allocation2 + $0x471] sm:$0xff] %vm1018_vm0, %v1000_v34  ;;  %vm747_vm10 = vcmp.ge.f32.partialorder %v619_v36, 0.0  ;;  %v7805_v0 = vld [vmem:[#allocation2 + $0x7a] sm:$0xff] }
  0xe4   : > { %16491 = vmatmul.mubr.msk.f32.gmra.mrb[64].mxu1 %vm1018_vm0, %v1513_v26  ;;  %17261 = vmatmul.mubr.msk.f32.gmra.mrb[60].mxu0 %vm1018_vm0, %v1513_v26  ;;  %v7801_v26 = vld [vmem:[#allocation2 + $0x52] sm:$0xff]  ;;  %1299 = vst.msk [vmem:[#allocation2 + $0x461] sm:$0xff] %vm1018_vm0, %v998_v22  ;;  %v1001_v41 = vsel %vm745_vm8, %v617_v24, %v873_v31  ;;  %v487_v49 = vmul.f32 %v19960_v37, %v352_v33  ;;  %vm748_vm11 = vcmp.ge.f32.partialorder %v620_v42, 0.0  ;;  %v876_v50 = vmul.f32 0.01, %v620_v42  ;;  %v1525_v17 = vld [vmem:[#allocation2 + $0x301] sm:$0xff] }
  0xe5   : > { %16493 = vmatprep.mubr.msk.f32.mxu1 %vm1018_vm0, %v1514_v30  ;;  %17263 = vmatprep.mubr.msk.f32.mxu0 %vm1018_vm0, %v1514_v30  ;;  %v999_v30 = vsel %vm743_vm6, %v615_v13, %v871_v23  ;;  %1302 = vst.msk [vmem:[#allocation2 + $0x479] sm:$0xff] %vm1018_vm0, %v1001_v41  ;;  %v488_v52 = vmul.f32 %v19960_v37, %v353_v38  ;;  %v358_v12 = vld [vmem:[%s19612_s9 + $0x3d0] sm:$0xff]  ;;  %v359_v16 = vld [vmem:[%s19612_s9 + $0x3d8] sm:$0xff] }
  0xe6   : > { %1300 = vst.msk [vmem:[#allocation2 + $0x469] sm:$0xff] %vm1018_vm0, %v999_v30  ;;  %v622_v55 = vadd.f32 %v20288_v4, %v487_v49  ;;  %v1004_v60 = vsel %vm748_vm11, %v620_v42, %v876_v50  ;;  %v7807_v22 = vld [vmem:[#allocation2 + $0x8a] sm:$0xff]  ;;  %v7808_v31 = vld [vmem:[#allocation2 + $0x92] sm:$0xff]  ;;  %vm13967_vm11 = vcmask 25600  }
  0xe7   : > { %1305 = vst.msk [vmem:[#allocation2 + $0x499] sm:$0xff] %vm1018_vm0, %v1004_v60  ;;  %v1527_v30 = vld [vmem:[#allocation2 + $0x311] sm:$0xff]  ;;  %v1529_v42 = vld [vmem:[#allocation2 + $0x329] sm:$0xff]  ;;  %v7818_v60 = vld [vmem:[#allocation2 + $0xfa] sm:$0xff] }
  0xe8   : > { %16494 = vmatmul.mubr.msk.f32.gmra.mrb[66].mxu1 %vm1018_vm0, %v1515_v43  ;;  %17264 = vmatmul.mubr.msk.f32.gmra.mrb[62].mxu0 %vm1018_vm0, %v1515_v43  ;;  %v486_v43 = vmul.f32 %v19960_v37, %v351_v29  ;;  %v1523_v37 = vld [vmem:[#allocation2 + $0x2e9] sm:$0xff]  ;;  %vm750_vm13 = vcmp.ge.f32.partialorder %v622_v55, 0.0  ;;  %v878_v1 = vmul.f32 0.01, %v622_v55 }
  0xe9   : > { %16496 = vmatprep.mubr.msk.f32.mxu1 %vm1018_vm0, %v1516_v47  ;;  %17364 = vmatprep.mubr.msk.f32.mxu0 %vm1018_vm0, %v7797_v48  ;;  %v1002_v47 = vsel %vm746_vm9, %v618_v28, %v874_v35  ;;  %v875_v48 = vmul.f32 0.01, %v619_v36  ;;  %v494_v28 = vmul.f32 %v20299_v56, %v359_v16  ;;  %v1528_v35 = vld [vmem:[#allocation2 + $0x321] sm:$0xff]  ;;  %v1532_v49 = vld [vmem:[#allocation2 + $0x349] sm:$0xff] }
  0xea   : > { %1303 = vst.msk [vmem:[#allocation2 + $0x489] sm:$0xff] %vm1018_vm0, %v1002_v47  ;;  %v621_v51 = vadd.f32 %v20288_v4, %v486_v43  ;;  %v1006_v13 = vsel %vm750_vm13, %v622_v55, %v878_v1  ;;  %v7810_v43 = vld [vmem:[#allocation2 + $0xaa] sm:$0xff]  ;;  %v1531_v47 = vld [vmem:[#allocation2 + $0x339] sm:$0xff]  ;;  %v1535_v55 = vld [vmem:[#allocation2 + $0x361] sm:$0xff] }
  0xeb   : > { %v1003_v54 = vsel %vm747_vm10, %v619_v36, %v875_v48  ;;  %1307 = vst.msk [vmem:[#allocation2 + $0x4b1] sm:$0xff] %vm1018_vm0, %v1006_v13  ;;  %v629_v34 = vadd.f32 %v20288_v4, %v494_v28  ;;  %v7809_v36 = vld [vmem:[#allocation2 + $0xa2] sm:$0xff]  ;;  %v7812_v48 = vld [vmem:[#allocation2 + $0xba] sm:$0xff]  ;;  %v7813_v50 = vld [vmem:[#allocation2 + $0xca] sm:$0xff]  ;;  %vm13186_vm10 = vcmask 31744  }
  0xec   : > { %16497 = vmatmul.mubr.msk.f32.gmra.mrb[68].mxu1 %vm1018_vm0, %v1517_v62  ;;  %17365 = vmatmul.mubr.msk.f32.vlgmr.msra.gmra.mrb[0].mxu0 %vm1018_vm0, %v7798_v57  ;;  %v489_v57 = vmul.f32 %v20299_v56, %v354_v44  ;;  %1304 = vst.msk [vmem:[#allocation2 + $0x491] sm:$0xff] %vm1018_vm0, %v1003_v54  ;;  %vm749_vm12 = vcmp.ge.f32.partialorder %v621_v51, 0.0  ;;  %v877_v61 = vmul.f32 0.01, %v621_v51  ;;  %v623_v62 = vadd.f32 %v20288_v4, %v488_v52  ;;  %v7814_v52 = vld [vmem:[#allocation2 + $0xd2] sm:$0xff]  ;;  %v7815_v54 = vld [vmem:[#allocation2 + $0xda] sm:$0xff] }
  0xed   : > { %17557 = vmatpush3.msra.mxu0 %v19175_v5  ;;  %16499 = vmatprep.mubr.msk.f32.mxu1 %vm1018_vm0, %v1518_v7  ;;  %v490_v7 = vmul.f32 %v20299_v56, %v355_v53  ;;  %vm757_vm5 = vcmp.ge.f32.partialorder %v629_v34, 0.0  ;;  %v1534_v53 = vld [vmem:[#allocation2 + $0x359] sm:$0xff]  ;;  %v1544_v13 = vld [vmem:[#allocation2 + $0x3c1] sm:$0xff]  ;;  %v7826_v16 = vld [vmem:[#allocation2 + $0x14a] sm:$0xff] }
  0xee   : > { %17367 = vmatprep.mubr.msk.f32.mxu0 %vm1018_vm0, %v7799_v11  ;;  %v624_v2 = vadd.f32 %v20288_v4, %v489_v57  ;;  %v1005_v9 = vsel %vm749_vm12, %v621_v51, %v877_v61  ;;  %vm751_vm14 = vcmp.ge.f32.partialorder %v623_v62, 0.0  ;;  %v879_v10 = vmul.f32 0.01, %v623_v62  ;;  %v1533_v51 = vld [vmem:[#allocation2 + $0x351] sm:$0xff]  ;;  %v7816_v57 = vld [vmem:[#allocation2 + $0xe2] sm:$0xff]  ;;  %v1540_v1 = vld [vmem:[#allocation2 + $0x399] sm:$0xff] }
  0xef   : > { %v491_v11 = vmul.f32 %v20299_v56, %v356_v58  ;;  %1306 = vst.msk [vmem:[#allocation2 + $0x4a1] sm:$0xff] %vm1018_vm0, %v1005_v9  ;;  %v625_v15 = vadd.f32 %v20288_v4, %v490_v7  ;;  %v1536_v58 = vld [vmem:[#allocation2 + $0x371] sm:$0xff]  ;;  %v1538_v61 = vld [vmem:[#allocation2 + $0x381] sm:$0xff]  ;;  %v1542_v9 = vld [vmem:[#allocation2 + $0x3a9] sm:$0xff] }
  0xf0   : > { %16500 = vmatmul.mubr.msk.f32.gmra.mrb[70].mxu1 %vm1018_vm0, %v1519_v20  ;;  %17368 = vmatmul.mubr.msk.f32.gmra.mrb[2].mxu0 %vm1018_vm0, %v7800_v21  ;;  %vm752_vm15 = vcmp.ge.f32.partialorder %v624_v2, 0.0  ;;  %v880_v14 = vmul.f32 0.01, %v624_v2  ;;  %v1007_v19 = vsel %vm751_vm14, %v623_v62, %v879_v10  ;;  %v492_v20 = vmul.f32 %v20299_v56, %v357_v8  ;;  %v1526_v21 = vld [vmem:[#allocation2 + $0x309] sm:$0xff]  ;;  %v1541_v7 = vld [vmem:[#allocation2 + $0x3a1] sm:$0xff]  ;;  %v1552_v28 = vld [vmem:[#allocation2 + $0x411] sm:$0xff] }
  0xf1   : > { %16502 = vmatprep.mubr.msk.f32.mxu1 %vm1018_vm0, %v1520_v25  ;;  %17370 = vmatprep.mubr.msk.f32.mxu0 %vm1018_vm0, %v7801_v26  ;;  %v626_v5 = vadd.f32 %v20288_v4, %v491_v11  ;;  %1308 = vst.msk [vmem:[#allocation2 + $0x4b9] sm:$0xff] %vm1018_vm0, %v1007_v19  ;;  %vm753_vm1 = vcmp.ge.f32.partialorder %v625_v15, 0.0  ;;  %v881_v24 = vmul.f32 0.01, %v625_v15  ;;  %v493_v25 = vmul.f32 %v20299_v56, %v358_v12  ;;  %v7819_v62 = vld [vmem:[#allocation2 + $0x102] sm:$0xff]  ;;  %v7823_v10 = vld [vmem:[#allocation2 + $0x12a] sm:$0xff] }
  0xf2   : > { %v1008_v23 = vsel %vm752_vm15, %v624_v2, %v880_v14  ;;  %v627_v27 = vadd.f32 %v20288_v4, %v492_v20  ;;  %v7821_v2 = vld [vmem:[#allocation2 + $0x11a] sm:$0xff]  ;;  %v7822_v8 = vld [vmem:[#allocation2 + $0x122] sm:$0xff]  ;;  %v1543_v11 = vld [vmem:[#allocation2 + $0x3b1] sm:$0xff] }
  0xf3   : > { %1309 = vst.msk [vmem:[#allocation2 + $0x4c1] sm:$0xff] %vm1018_vm0, %v1008_v23  ;;  %vm754_vm2 = vcmp.ge.f32.partialorder %v626_v5, 0.0  ;;  %v882_v26 = vmul.f32 0.01, %v626_v5  ;;  %v1009_v6 = vsel %vm753_vm1, %v625_v15, %v881_v24  ;;  %v628_v29 = vadd.f32 %v20288_v4, %v493_v25  ;;  %v7824_v12 = vld [vmem:[#allocation2 + $0x132] sm:$0xff]  ;;  %v7825_v14 = vld [vmem:[#allocation2 + $0x142] sm:$0xff] }
  0xf4   : > { %16503 = vmatmul.mubr.msk.f32.gmra.mrb[72].mxu1 %vm1018_vm0, %v1521_v39  ;;  %17371 = vmatmul.mubr.msk.f32.gmra.mrb[4].mxu0 %vm1018_vm0, %v7802_v40  ;;  %1310 = vst.msk [vmem:[#allocation2 + $0x4c9] sm:$0xff] %vm1018_vm0, %v1009_v6  ;;  %vm755_vm3 = vcmp.ge.f32.partialorder %v627_v27, 0.0  ;;  %v883_v33 = vmul.f32 0.01, %v627_v27  ;;  %v885_v40 = vmul.f32 0.01, %v629_v34 }
  0xf5   : > { %16505 = vmatprep.mubr.msk.f32.mxu1 %vm1018_vm0, %v1522_v45  ;;  %17373 = vmatprep.mubr.msk.f32.mxu0 %vm1018_vm0, %v7803_v46  ;;  %v1010_v32 = vsel %vm754_vm2, %v626_v5, %v882_v26  ;;  %vm756_vm4 = vcmp.ge.f32.partialorder %v628_v29, 0.0  ;;  %v884_v38 = vmul.f32 0.01, %v628_v29  ;;  %v1530_v45 = vld [vmem:[#allocation2 + $0x331] sm:$0xff]  ;;  %v1545_v15 = vld [vmem:[#allocation2 + $0x3c9] sm:$0xff]  ;;  %v1547_v19 = vld [vmem:[#allocation2 + $0x3d9] sm:$0xff] }
  0xf6   : > { %1311 = vst.msk [vmem:[#allocation2 + $0x4d9] sm:$0xff] %vm1018_vm0, %v1010_v32  ;;  %v1011_v39 = vsel %vm755_vm3, %v627_v27, %v883_v33  ;;  %v1013_v44 = vsel %vm757_vm5, %v629_v34, %v885_v40  ;;  %v7811_v46 = vld [vmem:[#allocation2 + $0xb2] sm:$0xff]  ;;  %v7828_v5 = vld [vmem:[#allocation2 + $0x15a] sm:$0xff]  ;;  %v1548_v20 = vld [vmem:[#allocation2 + $0x3e9] sm:$0xff] }
  0xf7   : > { %1312 = vst.msk [vmem:[#allocation2 + $0x4e1] sm:$0xff] %vm1018_vm0, %v1011_v39  ;;  %v1012_v41 = vsel %vm756_vm4, %v628_v29, %v884_v38  ;;  %1314 = vst.msk [vmem:[#allocation2 + $0x4f1] sm:$0xff] %vm1018_vm0, %v1013_v44  ;;  %v7830_v23 = vld [vmem:[#allocation2 + $0x172] sm:$0xff]  ;;  %v7831_v25 = vld [vmem:[#allocation2 + $0x17a] sm:$0xff] }
  0xf8   : > { %16506 = vmatmul.mubr.msk.f32.gmra.mrb[74].mxu1 %vm1018_vm0, %v1523_v37  ;;  %17374 = vmatmul.mubr.msk.f32.gmra.mrb[6].mxu0 %vm1018_vm0, %v7804_v59  ;;  %1313 = vst.msk [vmem:[#allocation2 + $0x4e9] sm:$0xff] %vm1018_vm0, %v1012_v41  ;;  %v7817_v37 = vld [vmem:[#allocation2 + $0xf2] sm:$0xff]  ;;  %v1551_v26 = vld [vmem:[#allocation2 + $0x401] sm:$0xff]  ;;  %v1555_v33 = vld [vmem:[#allocation2 + $0x429] sm:$0xff] }
  0xf9   : > { %16508 = vmatprep.mubr.msk.f32.mxu1 %vm1018_vm0, %v1524_v63  ;;  %17376 = vmatprep.mubr.msk.f32.mxu0 %vm1018_vm0, %v7805_v0  ;;  %v1537_v59 = vld [vmem:[#allocation2 + $0x379] sm:$0xff]  ;;  %v1539_v63 = vld [vmem:[#allocation2 + $0x389] sm:$0xff]  ;;  %v1557_v38 = vld [vmem:[#allocation2 + $0x441] sm:$0xff] }
  0xfa   : > { %v7820_v0 = vld [vmem:[#allocation2 + $0x10a] sm:$0xff]  ;;  %v1550_v24 = vld [vmem:[#allocation2 + $0x3f9] sm:$0xff]  ;;  %v7832_v27 = vld [vmem:[#allocation2 + $0x182] sm:$0xff] }
  0xfb   : > { %v7833_v6 = vld [vmem:[#allocation2 + $0x192] sm:$0xff]  ;;  %v7835_v32 = vld [vmem:[#allocation2 + $0x1a2] sm:$0xff]  ;;  %v7836_v34 = vld [vmem:[#allocation2 + $0x1aa] sm:$0xff] }
  0xfc   : > { %16509 = vmatmul.mubr.msk.f32.gmra.mrb[76].mxu1 %vm1018_vm0, %v1525_v17  ;;  %17377 = vmatmul.mubr.msk.f32.gmra.mrb[8].mxu0 %vm1018_vm0, %v7806_v18  ;;  %v1546_v17 = vld [vmem:[#allocation2 + $0x3d1] sm:$0xff]  ;;  %v1553_v29 = vld [vmem:[#allocation2 + $0x419] sm:$0xff]  ;;  %v7838_v39 = vld [vmem:[#allocation2 + $0x1c2] sm:$0xff] }
  0xfd   : > { %16511 = vmatprep.mubr.msk.f32.mxu1 %vm1018_vm0, %v1526_v21  ;;  %17379 = vmatprep.mubr.msk.f32.mxu0 %vm1018_vm0, %v7807_v22  ;;  %v7827_v18 = vld [vmem:[#allocation2 + $0x152] sm:$0xff]  ;;  %v7829_v21 = vld [vmem:[#allocation2 + $0x16a] sm:$0xff]  ;;  %v1560_v44 = vld [vmem:[#allocation2 + $0x461] sm:$0xff] }
  0xfe   : > { %v1549_v22 = vld [vmem:[#allocation2 + $0x3f1] sm:$0xff]  ;;  %v1558_v40 = vld [vmem:[#allocation2 + $0x449] sm:$0xff] }
  0xff   : > { %v7839_v41 = vld [vmem:[#allocation2 + $0x1ca] sm:$0xff] }
 0x100   : > { %16512 = vmatmul.mubr.msk.f32.gmra.mrb[78].mxu1 %vm1018_vm0, %v1527_v30  ;;  %17380 = vmatmul.mubr.msk.f32.gmra.mrb[10].mxu0 %vm1018_vm0, %v7808_v31  ;;  %v7834_v30 = vld [vmem:[#allocation2 + $0x19a] sm:$0xff] }
 0x101   : > { %16514 = vmatprep.mubr.msk.f32.mxu1 %vm1018_vm0, %v1528_v35  ;;  %17382 = vmatprep.mubr.msk.f32.mxu0 %vm1018_vm0, %v7809_v36  ;;  %v1554_v31 = vld [vmem:[#allocation2 + $0x421] sm:$0xff]  ;;  %v1556_v35 = vld [vmem:[#allocation2 + $0x439] sm:$0xff] }
 0x102   : > { %v7837_v36 = vld [vmem:[#allocation2 + $0x1ba] sm:$0xff] }
 0x104   : > { %16515 = vmatmul.mubr.msk.f32.gmra.mrb[80].mxu1 %vm1018_vm0, %v1529_v42  ;;  %17383 = vmatmul.mubr.msk.f32.gmra.mrb[12].mxu0 %vm1018_vm0, %v7810_v43  ;;  %v1559_v42 = vld [vmem:[#allocation2 + $0x451] sm:$0xff] }
 0x105   : > { %16517 = vmatprep.mubr.msk.f32.mxu1 %vm1018_vm0, %v1530_v45  ;;  %17385 = vmatprep.mubr.msk.f32.mxu0 %vm1018_vm0, %v7811_v46  ;;  %v7840_v43 = vld [vmem:[#allocation2 + $0x1d2] sm:$0xff]  ;;  %v7841_v45 = vld [vmem:[#allocation2 + $0x1e2] sm:$0xff] }
 0x106   : > { %v1561_v46 = vld [vmem:[#allocation2 + $0x469] sm:$0xff] }
 0x108   : > { %16518 = vmatmul.mubr.msk.f32.gmra.mrb[82].mxu1 %vm1018_vm0, %v1531_v47  ;;  %17386 = vmatmul.mubr.msk.f32.gmra.mrb[14].mxu0 %vm1018_vm0, %v7812_v48  ;;  %v7842_v47 = vld [vmem:[#allocation2 + $0x1ea] sm:$0xff] }
 0x109   : > { %16520 = vmatprep.mubr.msk.f32.mxu1 %vm1018_vm0, %v1532_v49  ;;  %17388 = vmatprep.mubr.msk.f32.mxu0 %vm1018_vm0, %v7813_v50  ;;  %v1562_v48 = vld [vmem:[#allocation2 + $0x471] sm:$0xff]  ;;  %v1563_v50 = vld [vmem:[#allocation2 + $0x479] sm:$0xff] }
 0x10a   : > { %v7843_v49 = vld [vmem:[#allocation2 + $0x1f2] sm:$0xff] }
 0x10c   : > { %16521 = vmatmul.mubr.msk.f32.gmra.mrb[84].mxu1 %vm1018_vm0, %v1533_v51  ;;  %17389 = vmatmul.mubr.msk.f32.gmra.mrb[16].mxu0 %vm1018_vm0, %v7814_v52  ;;  %v7844_v51 = vld [vmem:[#allocation2 + $0x1fa] sm:$0xff]  ;;  %v1564_v52 = vld [vmem:[#allocation2 + $0x489] sm:$0xff] }
 0x10d   : > { %16523 = vmatprep.mubr.msk.f32.mxu1 %vm1018_vm0, %v1534_v53  ;;  %17391 = vmatprep.mubr.msk.f32.mxu0 %vm1018_vm0, %v7815_v54  ;;  %v7845_v53 = vld [vmem:[#allocation2 + $0x20a] sm:$0xff] }
 0x10e   : > { %v1565_v54 = vld [vmem:[#allocation2 + $0x491] sm:$0xff] }
 0x110   : > { %16524 = vmatmul.mubr.msk.f32.gmra.mrb[86].mxu1 %vm1018_vm0, %v1535_v55  ;;  %17392 = vmatmul.mubr.msk.f32.gmra.mrb[18].mxu0 %vm1018_vm0, %v7816_v57  ;;  %v7846_v55 = vld [vmem:[#allocation2 + $0x212] sm:$0xff] }
 0x111   : > { %16526 = vmatprep.mubr.msk.f32.mxu1 %vm1018_vm0, %v1536_v58  ;;  %17394 = vmatprep.mubr.msk.f32.mxu0 %vm1018_vm0, %v7817_v37  ;;  %v1566_v57 = vld [vmem:[#allocation2 + $0x499] sm:$0xff]  ;;  %v1567_v37 = vld [vmem:[#allocation2 + $0x4a1] sm:$0xff] }
 0x112   : > { %v7847_v58 = vld [vmem:[#allocation2 + $0x21a] sm:$0xff] }
 0x114   : > { %16527 = vmatmul.mubr.msk.f32.gmra.mrb[88].mxu1 %vm1018_vm0, %v1537_v59  ;;  %17395 = vmatmul.mubr.msk.f32.gmra.mrb[20].mxu0 %vm1018_vm0, %v7818_v60  ;;  %v7848_v59 = vld [vmem:[#allocation2 + $0x222] sm:$0xff]  ;;  %v1568_v60 = vld [vmem:[#allocation2 + $0x4b1] sm:$0xff] }
 0x115   : > { %16529 = vmatprep.mubr.msk.f32.mxu1 %vm1018_vm0, %v1538_v61  ;;  %17397 = vmatprep.mubr.msk.f32.mxu0 %vm1018_vm0, %v7819_v62  ;;  %v7849_v61 = vld [vmem:[#allocation2 + $0x232] sm:$0xff] }
 0x116   : > { %v1569_v62 = vld [vmem:[#allocation2 + $0x4b9] sm:$0xff] }
 0x118   : > { %16530 = vmatmul.mubr.msk.f32.gmra.mrb[90].mxu1 %vm1018_vm0, %v1539_v63  ;;  %17398 = vmatmul.mubr.msk.f32.gmra.mrb[22].mxu0 %vm1018_vm0, %v7820_v0  ;;  %v7850_v63 = vld [vmem:[#allocation2 + $0x23a] sm:$0xff] }
 0x119   : > { %16532 = vmatprep.mubr.msk.f32.mxu1 %vm1018_vm0, %v1540_v1  ;;  %17400 = vmatprep.mubr.msk.f32.mxu0 %vm1018_vm0, %v7821_v2  ;;  %v1570_v0 = vld [vmem:[#allocation2 + $0x4c1] sm:$0xff] }
 0x11a   : > { %v7851_v1 = vld [vmem:[#allocation2 + $0x242] sm:$0xff] }
 0x11b   : > { %v360_v2 = vld [vmem:[%s19612_s9 + $0x3e0] sm:$0xff] }
 0x11c   : > { %16533 = vmatmul.mubr.msk.f32.gmra.mrb[92].mxu1 %vm1018_vm0, %v1541_v7  ;;  %17401 = vmatmul.mubr.msk.f32.gmra.mrb[24].mxu0 %vm1018_vm0, %v7822_v8  ;;  %v361_v7 = vld [vmem:[%s19612_s9 + $0x3e8] sm:$0xff]  ;;  %v495_v8 = vmul.f32 %v20299_v56, %v360_v2 }
 0x11d   : > { %16535 = vmatprep.mubr.msk.f32.mxu1 %vm1018_vm0, %v1542_v9  ;;  %17403 = vmatprep.mubr.msk.f32.mxu0 %vm1018_vm0, %v7823_v10  ;;  %v496_v9 = vmul.f32 %v20299_v56, %v361_v7  ;;  %v362_v10 = vld [vmem:[%s19612_s9 + $0x3f0] sm:$0xff]  ;;  %v7873_v2 = vld [vmem:[#allocation2 + $0x322] sm:$0xff] }
 0x11e   : > { %v20523_v7 = vld [vmem:[#allocation2 + $0xa8] sm:$0xff] }
 0x120   : > { %16536 = vmatmul.mubr.msk.f32.gmra.mrb[94].mxu1 %vm1018_vm0, %v1543_v11  ;;  %17404 = vmatmul.mubr.msk.f32.gmra.mrb[26].mxu0 %vm1018_vm0, %v7824_v12  ;;  %v1571_v11 = vld [vmem:[#allocation2 + $0x4c9] sm:$0xff] }
 0x121   : > { %16538 = vmatprep.mubr.msk.f32.mxu1 %vm1018_vm0, %v1544_v13  ;;  %17406 = vmatprep.mubr.msk.f32.mxu0 %vm1018_vm0, %v7825_v14  ;;  %v7852_v12 = vld [vmem:[#allocation2 + $0x24a] sm:$0xff]  ;;  %v497_v13 = vmul.f32 %v20299_v56, %v362_v10  ;;  %v1572_v14 = vld [vmem:[#allocation2 + $0x4d9] sm:$0xff] }
 0x122   : > { %v7875_v10 = vld [vmem:[#allocation2 + $0x332] sm:$0xff] }
 0x124   : > { %16539 = vmatmul.mubr.msk.f32.gmra.mrb[96].mxu1 %vm1018_vm0, %v1545_v15  ;;  %17407 = vmatmul.mubr.msk.f32.gmra.mrb[28].mxu0 %vm1018_vm0, %v7826_v16  ;;  %v7853_v15 = vld [vmem:[#allocation2 + $0x25a] sm:$0xff]  ;;  %v630_v16 = vadd.f32 %v20288_v4, %v495_v8  ;;  %v7874_v8 = vld [vmem:[#allocation2 + $0x32a] sm:$0xff] }
 0x125   : > { %16541 = vmatprep.mubr.msk.f32.mxu1 %vm1018_vm0, %v1546_v17  ;;  %17409 = vmatprep.mubr.msk.f32.mxu0 %vm1018_vm0, %v7827_v18  ;;  %v631_v17 = vadd.f32 %v20288_v4, %v496_v9  ;;  %v632_v18 = vadd.f32 %v20288_v4, %v497_v13  ;;  %v20525_v9 = vld [vmem:[#allocation2 + $0xb0] sm:$0xff]  ;;  %v20535_v13 = vld [vmem:[#allocation2 + $0xc8] sm:$0xff] }
 0x126   : > { %vm758_vm6 = vcmp.ge.f32.partialorder %v630_v16, 0.0 }
 0x127   : > { %vm759_vm7 = vcmp.ge.f32.partialorder %v631_v17, 0.0  ;;  %vm760_vm8 = vcmp.ge.f32.partialorder %v632_v18, 0.0 }
 0x128   : > { %16542 = vmatmul.mubr.msk.f32.gmra.mrb[98].mxu1 %vm1018_vm0, %v1547_v19  ;;  %17410 = vmatmul.mubr.msk.f32.gmra.mrb[30].mxu0 %vm1018_vm0, %v7828_v5  ;;  %v363_v19 = vld [vmem:[%s19612_s9 + $0x3f8] sm:$0xff]  ;;  %v886_v5 = vmul.f32 0.01, %v630_v16 }
 0x129   : > { %16544 = vmatprep.mubr.msk.f32.mxu1 %vm1018_vm0, %v1548_v20  ;;  %17412 = vmatprep.mubr.msk.f32.mxu0 %vm1018_vm0, %v7829_v21  ;;  %v887_v20 = vmul.f32 0.01, %v631_v17  ;;  %v498_v21 = vmul.f32 %v20299_v56, %v363_v19  ;;  %v20553_v19 = vld [vmem:[#allocation2 + $0xe0] sm:$0xff] }
 0x12c   : > { %16545 = vmatmul.mubr.msk.f32.gmra.mrb[100].mxu1 %vm1018_vm0, %v1549_v22  ;;  %17413 = vmatmul.mubr.msk.f32.gmra.mrb[32].mxu0 %vm1018_vm0, %v7830_v23  ;;  %v1573_v22 = vld [vmem:[#allocation2 + $0x4e1] sm:$0xff] }
 0x12d   : > { %16547 = vmatprep.mubr.msk.f32.mxu1 %vm1018_vm0, %v1550_v24  ;;  %17415 = vmatprep.mubr.msk.f32.mxu0 %vm1018_vm0, %v7831_v25  ;;  %v7854_v23 = vld [vmem:[#allocation2 + $0x262] sm:$0xff]  ;;  %v888_v24 = vmul.f32 0.01, %v632_v18 }
 0x12e   : > { %v1574_v25 = vld [vmem:[#allocation2 + $0x4e9] sm:$0xff] }
 0x12f   : > { %v1016_v56 = vsel %vm760_vm8, %v632_v18, %v888_v24  ;;  %v7879_v18 = vld [vmem:[#allocation2 + $0x35a] sm:$0xff] }
 0x130   : > { %16548 = vmatmul.mubr.msk.f32.gmra.mrb[102].mxu1 %vm1018_vm0, %v1551_v26  ;;  %17416 = vmatmul.mubr.msk.f32.gmra.mrb[34].mxu0 %vm1018_vm0, %v7832_v27  ;;  %v7855_v26 = vld [vmem:[#allocation2 + $0x26a] sm:$0xff]  ;;  %v1014_v27 = vsel %vm758_vm6, %v630_v16, %v886_v5  ;;  %1317 = vst.msk [vmem:[#allocation2 + $0x511] sm:$0xff] %vm1018_vm0, %v1016_v56  ;;  %v7878_v16 = vld [vmem:[#allocation2 + $0x352] sm:$0xff]  ;;  %v7880_v5 = vld [vmem:[#allocation2 + $0x362] sm:$0xff] }
 0x131   : > { %16550 = vmatprep.mubr.msk.f32.mxu1 %vm1018_vm0, %v1552_v28  ;;  %17418 = vmatprep.mubr.msk.f32.mxu0 %vm1018_vm0, %v7833_v6  ;;  %v1015_v28 = vsel %vm759_vm7, %v631_v17, %v887_v20  ;;  %v633_v6 = vadd.f32 %v20288_v4, %v498_v21  ;;  %1315 = vst.msk [vmem:[#allocation2 + $0x501] sm:$0xff] %vm1018_vm0, %v1014_v27  ;;  %v1319_v4 = vld [vmem:[#allocation2] sm:$0xff]  ;;  %v20545_v17 = vld [vmem:[#allocation2 + $0xd8] sm:$0xff]  ;;  %v20555_v20 = vld [vmem:[#allocation2 + $0xf0] sm:$0xff] }
 0x132   : > { %1316 = vst.msk [vmem:[#allocation2 + $0x509] sm:$0xff] %vm1018_vm0, %v1015_v28  ;;  %v7881_v21 = vld [vmem:[#allocation2 + $0x372] sm:$0xff]  ;;  %v20565_v24 = vld [vmem:[#allocation2 + $0x100] sm:$0xff]  ;;  %v7884_v27 = vld [vmem:[#allocation2 + $0x38a] sm:$0xff] }
 0x133   : > { %vm761_vm9 = vcmp.ge.f32.partialorder %v633_v6, 0.0  ;;  %v20575_v28 = vld [vmem:[#allocation2 + $0x118] sm:$0xff]  ;;  %v20583_v56 = vld [vmem:[#allocation2 + $0x120] sm:$0xff] }
 0x134   : > { %16551 = vmatmul.mubr.msk.f32.gmra.mrb[104].mxu1 %vm1018_vm0, %v1553_v29  ;;  %17419 = vmatmul.mubr.msk.f32.gmra.mrb[36].mxu0 %vm1018_vm0, %v7834_v30  ;;  %v889_v29 = vmul.f32 0.01, %v633_v6  ;;  %v1575_v30 = vld [vmem:[#allocation2 + $0x4f1] sm:$0xff] }
 0x135   : > { %16553 = vmatprep.mubr.msk.f32.mxu1 %vm1018_vm0, %v1554_v31  ;;  %17421 = vmatprep.mubr.msk.f32.mxu0 %vm1018_vm0, %v7835_v32  ;;  %v7856_v31 = vld [vmem:[#allocation2 + $0x272] sm:$0xff]  ;;  %v7857_v32 = vld [vmem:[#allocation2 + $0x282] sm:$0xff] }
 0x138   : > { %16554 = vmatmul.mubr.msk.f32.gmra.mrb[106].mxu1 %vm1018_vm0, %v1555_v33  ;;  %17422 = vmatmul.mubr.msk.f32.gmra.mrb[38].mxu0 %vm1018_vm0, %v7836_v34  ;;  %v1017_v33 = vsel %vm761_vm9, %v633_v6, %v889_v29  ;;  %v1320_v34 = vld [vmem:[#allocation2 + $0x8] sm:$0xff]  ;;  %v7885_v6 = vld [vmem:[#allocation2 + $0x39a] sm:$0xff] }
 0x139   : > { %16556 = vmatprep.mubr.msk.f32.mxu1 %vm1018_vm0, %v1556_v35  ;;  %17424 = vmatprep.mubr.msk.f32.mxu0 %vm1018_vm0, %v7837_v36  ;;  %1318 = vst.msk [vmem:[#allocation2 + $0x519] sm:$0xff] %vm1018_vm0, %v1017_v33  ;;  %v7858_v35 = vld [vmem:[#allocation2 + $0x28a] sm:$0xff]  ;;  %v7886_v29 = vld [vmem:[#allocation2 + $0x3a2] sm:$0xff] }
 0x13a   : > { %v1321_v36 = vld [vmem:[#allocation2 + $0x10] sm:$0xff]  ;;  %v20595_v33 = vld [vmem:[#allocation2 + $0x140] sm:$0xff] }
 0x13c   : > { %16557 = vmatmul.mubr.msk.f32.gmra.mrb[108].mxu1 %vm1018_vm0, %v1557_v38  ;;  %17425 = vmatmul.mubr.msk.f32.gmra.mrb[40].mxu0 %vm1018_vm0, %v7838_v39  ;;  %v7859_v38 = vld [vmem:[#allocation2 + $0x292] sm:$0xff] }
 0x13d   : > { %16559 = vmatprep.mubr.msk.f32.mxu1 %vm1018_vm0, %v1558_v40  ;;  %17427 = vmatprep.mubr.msk.f32.mxu0 %vm1018_vm0, %v7839_v41  ;;  %v1322_v39 = vld [vmem:[#allocation2 + $0x18] sm:$0xff]  ;;  %v1323_v41 = vld [vmem:[#allocation2 + $0x28] sm:$0xff] }
 0x13e   : > { %v7860_v40 = vld [vmem:[#allocation2 + $0x29a] sm:$0xff] }
 0x140   : > { %16560 = vmatmul.mubr.msk.f32.gmra.mrb[110].mxu1 %vm1018_vm0, %v1559_v42  ;;  %17428 = vmatmul.mubr.msk.f32.gmra.mrb[42].mxu0 %vm1018_vm0, %v7840_v43  ;;  %v7861_v42 = vld [vmem:[#allocation2 + $0x2aa] sm:$0xff] }
 0x141   : > { %16562 = vmatprep.mubr.msk.f32.mxu1 %vm1018_vm0, %v1560_v44  ;;  %17430 = vmatprep.mubr.msk.f32.mxu0 %vm1018_vm0, %v7841_v45  ;;  %v1324_v43 = vld [vmem:[#allocation2 + $0x30] sm:$0xff]  ;;  %v20469_v45 = vld [vmem:[%s22585_s3 + $0x38] sm:$0xff] }
 0x142   : > { %v7862_v44 = vld [vmem:[#allocation2 + $0x2b2] sm:$0xff]  ;;  %17750 = vmatprep.subr.mxu0 %v20469_v45 }
 0x144   : > { %16563 = vmatmul.mubr.msk.f32.gmra.mrb[112].mxu1 %vm1018_vm0, %v1561_v46  ;;  %17431 = vmatmul.mubr.msk.f32.gmra.mrb[44].mxu0 %vm1018_vm0, %v7842_v47  ;;  %v1325_v46 = vld [vmem:[#allocation2 + $0x38] sm:$0xff] }
 0x145   : > { %16565 = vmatprep.mubr.msk.f32.mxu1 %vm1018_vm0, %v1562_v48  ;;  %17433 = vmatprep.mubr.msk.f32.mxu0 %vm1018_vm0, %v7843_v49  ;;  %v7863_v47 = vld [vmem:[#allocation2 + $0x2ba] sm:$0xff]  ;;  %v7864_v48 = vld [vmem:[#allocation2 + $0x2c2] sm:$0xff]  ;;  %v20476_v49 = vld [vmem:[#allocation2 + $0x50] sm:$0xff] }
 0x148   : > { %16566 = vmatmul.mubr.msk.f32.gmra.mrb[114].mxu1 %vm1018_vm0, %v1563_v50  ;;  %17434 = vmatmul.mubr.msk.f32.gmra.mrb[46].mxu0 %vm1018_vm0, %v7844_v51  ;;  %v7865_v50 = vld [vmem:[#allocation2 + $0x2d2] sm:$0xff] }
 0x149   : > { %16568 = vmatprep.mubr.msk.f32.mxu1 %vm1018_vm0, %v1564_v52  ;;  %17436 = vmatprep.mubr.msk.f32.mxu0 %vm1018_vm0, %v7845_v53  ;;  %v20483_v51 = vld [vmem:[#allocation2 + $0x58] sm:$0xff]  ;;  %v20485_v53 = vld [vmem:[#allocation2 + $0x60] sm:$0xff] }
 0x14a   : > { %v7866_v52 = vld [vmem:[#allocation2 + $0x2da] sm:$0xff] }
 0x14c   : > { %16569 = vmatmul.mubr.msk.f32.gmra.mrb[116].mxu1 %vm1018_vm0, %v1565_v54  ;;  %17437 = vmatmul.mubr.msk.f32.gmra.mrb[48].mxu0 %vm1018_vm0, %v7846_v55  ;;  %v7867_v54 = vld [vmem:[#allocation2 + $0x2e2] sm:$0xff] }
 0x14d   : > { %16571 = vmatprep.mubr.msk.f32.mxu1 %vm1018_vm0, %v1566_v57  ;;  %17439 = vmatprep.mubr.msk.f32.mxu0 %vm1018_vm0, %v7847_v58  ;;  %v20493_v55 = vld [vmem:[#allocation2 + $0x68] sm:$0xff]  ;;  %v20495_v58 = vld [vmem:[#allocation2 + $0x78] sm:$0xff] }
 0x14e   : > { %v7868_v57 = vld [vmem:[#allocation2 + $0x2ea] sm:$0xff] }
 0x150   : > { %16572 = vmatmul.mubr.msk.f32.gmra.mrb[118].mxu1 %vm1018_vm0, %v1567_v37  ;;  %17440 = vmatmul.mubr.msk.f32.gmra.mrb[50].mxu0 %vm1018_vm0, %v7848_v59  ;;  %v7869_v37 = vld [vmem:[#allocation2 + $0x2fa] sm:$0xff] }
 0x151   : > { %16574 = vmatprep.mubr.msk.f32.mxu1 %vm1018_vm0, %v1568_v60  ;;  %17442 = vmatprep.mubr.msk.f32.mxu0 %vm1018_vm0, %v7849_v61  ;;  %v20503_v59 = vld [vmem:[#allocation2 + $0x80] sm:$0xff]  ;;  %v20505_v61 = vld [vmem:[#allocation2 + $0x88] sm:$0xff] }
 0x152   : > { %v7870_v60 = vld [vmem:[#allocation2 + $0x302] sm:$0xff] }
 0x154   : > { %16575 = vmatmul.mubr.msk.f32.gmra.mrb[120].mxu1 %vm1018_vm0, %v1569_v62  ;;  %17443 = vmatmul.mubr.msk.f32.gmra.mrb[52].mxu0 %vm1018_vm0, %v7850_v63  ;;  %v7871_v62 = vld [vmem:[#allocation2 + $0x30a] sm:$0xff] }
 0x155   : > { %16577 = vmatprep.mubr.msk.f32.mxu1 %vm1018_vm0, %v1570_v0  ;;  %17445 = vmatprep.mubr.msk.f32.mxu0 %vm1018_vm0, %v7851_v1  ;;  %v20513_v63 = vld [vmem:[#allocation2 + $0x90] sm:$0xff]  ;;  %v20515_v1 = vld [vmem:[#allocation2 + $0xa0] sm:$0xff] }
 0x156   : > { %v7872_v0 = vld [vmem:[#allocation2 + $0x312] sm:$0xff] }
 0x158   : > { %16578 = vmatmul.mubr.msk.f32.gmra.mrb[122].mxu1 %vm1018_vm0, %v1571_v11  ;;  %17446 = vmatmul.mubr.msk.f32.gmra.mrb[54].mxu0 %vm1018_vm0, %v7852_v12  ;;  %v20533_v11 = vld [vmem:[#allocation2 + $0xb8] sm:$0xff] }
 0x159   : > { %16580 = vmatprep.mubr.msk.f32.mxu1 %vm1018_vm0, %v1572_v14  ;;  %17448 = vmatprep.mubr.msk.f32.mxu0 %vm1018_vm0, %v7853_v15  ;;  %v7876_v12 = vld [vmem:[#allocation2 + $0x33a] sm:$0xff]  ;;  %v7877_v14 = vld [vmem:[#allocation2 + $0x34a] sm:$0xff] }
 0x15a   : > { %v20543_v15 = vld [vmem:[#allocation2 + $0xd0] sm:$0xff] }
 0x15c   : > { %16581 = vmatmul.mubr.msk.f32.gmra.mrb[124].mxu1 %vm1018_vm0, %v1573_v22  ;;  %17449 = vmatmul.mubr.msk.f32.gmra.mrb[56].mxu0 %vm1018_vm0, %v7854_v23  ;;  %v20563_v22 = vld [vmem:[#allocation2 + $0xf8] sm:$0xff] }
 0x15d   : > { %16583 = vmatprep.mubr.msk.f32.mxu1 %vm1018_vm0, %v1574_v25  ;;  %17451 = vmatprep.mubr.msk.f32.mxu0 %vm1018_vm0, %v7855_v26  ;;  %v7882_v23 = vld [vmem:[#allocation2 + $0x37a] sm:$0xff]  ;;  %v7883_v25 = vld [vmem:[#allocation2 + $0x382] sm:$0xff] }
 0x15e   : > { %v20573_v26 = vld [vmem:[#allocation2 + $0x108] sm:$0xff] }
 0x160   : > { %16584 = vmatmul.mubr.msk.f32.gmra.mrb[126].mxu1 %vm1018_vm0, %v1575_v30  ;;  %17452 = vmatmul.mubr.msk.f32.gmra.mrb[58].mxu0 %vm1018_vm0, %v7856_v31  ;;  %v20585_v30 = vld [vmem:[#allocation2 + $0x128] sm:$0xff] }
 0x161   : > { %16588 = vmatprep.mubr.msk.f32.mxu1 %vm1018_vm0, %v1319_v4  ;;  %17454 = vmatprep.mubr.msk.f32.mxu0 %vm1018_vm0, %v7857_v32  ;;  %v7887_v31 = vld [vmem:[#allocation2 + $0x3aa] sm:$0xff]  ;;  %v7888_v32 = vld [vmem:[#allocation2 + $0x3b2] sm:$0xff] }
 0x162   : > { %v20593_v4 = vld [vmem:[#allocation2 + $0x130] sm:$0xff] }
 0x164   : > { %16589 = vmatmul.mubr.msk.f32.vlgmr.msra.gmra.mrb[0].mxu1 %vm1018_vm0, %v1320_v34  ;;  %17455 = vmatmul.mubr.msk.f32.gmra.mrb[60].mxu0 %vm1018_vm0, %v7858_v35  ;;  %v7889_v34 = vld [vmem:[#allocation2 + $0x3c2] sm:$0xff] }
 0x165   : > { %16591 = vmatprep.mubr.msk.f32.mxu1 %vm1018_vm0, %v1321_v36  ;;  %17457 = vmatprep.mubr.msk.f32.mxu0 %vm1018_vm0, %v7859_v38  ;;  %v20603_v35 = vld [vmem:[#allocation2 + $0x148] sm:$0xff]  ;;  %v20605_v38 = vld [vmem:[#allocation2 + $0x150] sm:$0xff] }
 0x166   : > { %16781 = vmatpush3.msra.mxu1 %v20241_v3  ;;  %v1326_v3 = vld [vmem:[#allocation2 + $0x40] sm:$0xff]  ;;  %v7890_v36 = vld [vmem:[#allocation2 + $0x3ca] sm:$0xff] }
 0x168   : > { %16592 = vmatmul.mubr.msk.f32.gmra.mrb[2].mxu1 %vm1018_vm0, %v1322_v39  ;;  %17458 = vmatmul.mubr.msk.f32.gmra.mrb[62].mxu0 %vm1018_vm0, %v7860_v40  ;;  %v7891_v39 = vld [vmem:[#allocation2 + $0x3d2] sm:$0xff] }
 0x169   : > { %16594 = vmatprep.mubr.msk.f32.mxu1 %vm1018_vm0, %v1323_v41  ;;  %17460 = vmatprep.mubr.msk.f32.mxu0 %vm1018_vm0, %v7861_v42  ;;  %v20613_v40 = vld [vmem:[#allocation2 + $0x158] sm:$0xff]  ;;  %v20615_v42 = vld [vmem:[#allocation2 + $0x168] sm:$0xff] }
 0x16a   : > { %v7892_v41 = vld [vmem:[#allocation2 + $0x3da] sm:$0xff] }
 0x16c   : > { %16595 = vmatmul.mubr.msk.f32.gmra.mrb[4].mxu1 %vm1018_vm0, %v1324_v43  ;;  %17461 = vmatmul.mubr.msk.f32.gmra.mrb[64].mxu0 %vm1018_vm0, %v7862_v44  ;;  %v7893_v43 = vld [vmem:[#allocation2 + $0x3ea] sm:$0xff] }
 0x16d   : > { %16597 = vmatprep.mubr.msk.f32.mxu1 %vm1018_vm0, %v1325_v46  ;;  %17463 = vmatprep.mubr.msk.f32.mxu0 %vm1018_vm0, %v7863_v47  ;;  %v20623_v44 = vld [vmem:[#allocation2 + $0x170] sm:$0xff]  ;;  %v20625_v47 = vld [vmem:[#allocation2 + $0x178] sm:$0xff] }
 0x16e   : > { %v7894_v46 = vld [vmem:[#allocation2 + $0x3f2] sm:$0xff] }
 0x170   : > { %16598 = vmatmul.mubr.msk.f32.gmra.mrb[6].mxu1 %vm1018_vm0, %v1326_v3  ;;  %17464 = vmatmul.mubr.msk.f32.gmra.mrb[66].mxu0 %vm1018_vm0, %v7864_v48  ;;  %v7895_v3 = vld [vmem:[#allocation2 + $0x3fa] sm:$0xff] }
 0x171   : > { %16600 = vmatprep.mubr.msk.f32.mxu1 %vm1018_vm0, %v20476_v49  ;;  %17466 = vmatprep.mubr.msk.f32.mxu0 %vm1018_vm0, %v7865_v50  ;;  %v20633_v48 = vld [vmem:[#allocation2 + $0x180] sm:$0xff] }
 0x172   : > { %v7896_v50 = vld [vmem:[#allocation2 + $0x402] sm:$0xff] }
 0x174   : > { %16601 = vmatmul.mubr.msk.f32.gmra.mrb[8].mxu1 %vm1018_vm0, %v20483_v51  ;;  %17467 = vmatmul.mubr.msk.f32.gmra.mrb[68].mxu0 %vm1018_vm0, %v7866_v52  ;;  %v20635_v52 = vld [vmem:[#allocation2 + $0x190] sm:$0xff] }
 0x175   : > { %16603 = vmatprep.mubr.msk.f32.mxu1 %vm1018_vm0, %v20485_v53  ;;  %17469 = vmatprep.mubr.msk.f32.mxu0 %vm1018_vm0, %v7867_v54  ;;  %v7897_v54 = vld [vmem:[#allocation2 + $0x412] sm:$0xff] }
 0x178   : > { %16604 = vmatmul.mubr.msk.f32.gmra.mrb[10].mxu1 %vm1018_vm0, %v20493_v55  ;;  %17470 = vmatmul.mubr.msk.f32.gmra.mrb[70].mxu0 %vm1018_vm0, %v7868_v57  ;;  %v20643_v57 = vld [vmem:[#allocation2 + $0x198] sm:$0xff] }
 0x179   : > { %16606 = vmatprep.mubr.msk.f32.mxu1 %vm1018_vm0, %v20495_v58  ;;  %17472 = vmatprep.mubr.msk.f32.mxu0 %vm1018_vm0, %v7869_v37  ;;  %v7898_v37 = vld [vmem:[#allocation2 + $0x41a] sm:$0xff] }
 0x17c   : > { %16607 = vmatmul.mubr.msk.f32.gmra.mrb[12].mxu1 %vm1018_vm0, %v20503_v59  ;;  %17473 = vmatmul.mubr.msk.f32.gmra.mrb[72].mxu0 %vm1018_vm0, %v7870_v60  ;;  %v20645_v60 = vld [vmem:[#allocation2 + $0x1a0] sm:$0xff] }
 0x17d   : > { %16609 = vmatprep.mubr.msk.f32.mxu1 %vm1018_vm0, %v20505_v61  ;;  %17475 = vmatprep.mubr.msk.f32.mxu0 %vm1018_vm0, %v7871_v62  ;;  %v7899_v62 = vld [vmem:[#allocation2 + $0x422] sm:$0xff] }
 0x180   : > { %16610 = vmatmul.mubr.msk.f32.gmra.mrb[14].mxu1 %vm1018_vm0, %v20513_v63  ;;  %17476 = vmatmul.mubr.msk.f32.gmra.mrb[74].mxu0 %vm1018_vm0, %v7872_v0  ;;  %v20653_v0 = vld [vmem:[#allocation2 + $0x1a8] sm:$0xff] }
 0x181   : > { %16612 = vmatprep.mubr.msk.f32.mxu1 %vm1018_vm0, %v20515_v1  ;;  %17478 = vmatprep.mubr.msk.f32.mxu0 %vm1018_vm0, %v7873_v2  ;;  %v7900_v2 = vld [vmem:[#allocation2 + $0x42a] sm:$0xff] }
 0x184   : > { %16613 = vmatmul.mubr.msk.f32.gmra.mrb[16].mxu1 %vm1018_vm0, %v20523_v7  ;;  %17479 = vmatmul.mubr.msk.f32.gmra.mrb[76].mxu0 %vm1018_vm0, %v7874_v8  ;;  %v20655_v8 = vld [vmem:[#allocation2 + $0x1b8] sm:$0xff] }
 0x185   : > { %16615 = vmatprep.mubr.msk.f32.mxu1 %vm1018_vm0, %v20525_v9  ;;  %17481 = vmatprep.mubr.msk.f32.mxu0 %vm1018_vm0, %v7875_v10  ;;  %v7901_v10 = vld [vmem:[#allocation2 + $0x43a] sm:$0xff] }
 0x188   : > { %16616 = vmatmul.mubr.msk.f32.gmra.mrb[18].mxu1 %vm1018_vm0, %v20533_v11  ;;  %17482 = vmatmul.mubr.msk.f32.gmra.mrb[78].mxu0 %vm1018_vm0, %v7876_v12  ;;  %v20663_v12 = vld [vmem:[#allocation2 + $0x1c0] sm:$0xff] }
 0x189   : > { %16618 = vmatprep.mubr.msk.f32.mxu1 %vm1018_vm0, %v20535_v13  ;;  %17484 = vmatprep.mubr.msk.f32.mxu0 %vm1018_vm0, %v7877_v14  ;;  %v7902_v14 = vld [vmem:[#allocation2 + $0x442] sm:$0xff] }
 0x18c   : > { %16619 = vmatmul.mubr.msk.f32.gmra.mrb[20].mxu1 %vm1018_vm0, %v20543_v15  ;;  %17485 = vmatmul.mubr.msk.f32.gmra.mrb[80].mxu0 %vm1018_vm0, %v7878_v16  ;;  %v20665_v16 = vld [vmem:[#allocation2 + $0x1c8] sm:$0xff] }
 0x18d   : > { %16621 = vmatprep.mubr.msk.f32.mxu1 %vm1018_vm0, %v20545_v17  ;;  %17487 = vmatprep.mubr.msk.f32.mxu0 %vm1018_vm0, %v7879_v18  ;;  %v7903_v18 = vld [vmem:[#allocation2 + $0x44a] sm:$0xff] }
 0x190   : > { %16622 = vmatmul.mubr.msk.f32.gmra.mrb[22].mxu1 %vm1018_vm0, %v20553_v19  ;;  %17488 = vmatmul.mubr.msk.f32.gmra.mrb[82].mxu0 %vm1018_vm0, %v7880_v5  ;;  %v20673_v5 = vld [vmem:[#allocation2 + $0x1d0] sm:$0xff] }
 0x191   : > { %16624 = vmatprep.mubr.msk.f32.mxu1 %vm1018_vm0, %v20555_v20  ;;  %17490 = vmatprep.mubr.msk.f32.mxu0 %vm1018_vm0, %v7881_v21  ;;  %v7904_v21 = vld [vmem:[#allocation2 + $0x452] sm:$0xff] }
 0x194   : > { %16625 = vmatmul.mubr.msk.f32.gmra.mrb[24].mxu1 %vm1018_vm0, %v20563_v22  ;;  %17491 = vmatmul.mubr.msk.f32.gmra.mrb[84].mxu0 %vm1018_vm0, %v7882_v23  ;;  %v20675_v23 = vld [vmem:[#allocation2 + $0x1e0] sm:$0xff] }
 0x195   : > { %16627 = vmatprep.mubr.msk.f32.mxu1 %vm1018_vm0, %v20565_v24  ;;  %17493 = vmatprep.mubr.msk.f32.mxu0 %vm1018_vm0, %v7883_v25  ;;  %v7905_v25 = vld [vmem:[#allocation2 + $0x462] sm:$0xff] }
 0x198   : > { %16628 = vmatmul.mubr.msk.f32.gmra.mrb[26].mxu1 %vm1018_vm0, %v20573_v26  ;;  %17494 = vmatmul.mubr.msk.f32.gmra.mrb[86].mxu0 %vm1018_vm0, %v7884_v27  ;;  %v20683_v27 = vld [vmem:[#allocation2 + $0x1e8] sm:$0xff] }
 0x199   : > { %16630 = vmatprep.mubr.msk.f32.mxu1 %vm1018_vm0, %v20575_v28  ;;  %17496 = vmatprep.mubr.msk.f32.mxu0 %vm1018_vm0, %v7885_v6  ;;  %v7906_v6 = vld [vmem:[#allocation2 + $0x46a] sm:$0xff] }
 0x19c   : > { %16631 = vmatmul.mubr.msk.f32.gmra.mrb[28].mxu1 %vm1018_vm0, %v20583_v56  ;;  %17497 = vmatmul.mubr.msk.f32.gmra.mrb[88].mxu0 %vm1018_vm0, %v7886_v29  ;;  %v20685_v29 = vld [vmem:[#allocation2 + $0x1f0] sm:$0xff] }
 0x19d   : > { %16633 = vmatprep.mubr.msk.f32.mxu1 %vm1018_vm0, %v20585_v30  ;;  %17499 = vmatprep.mubr.msk.f32.mxu0 %vm1018_vm0, %v7887_v31  ;;  %v7907_v31 = vld [vmem:[#allocation2 + $0x472] sm:$0xff] }
 0x1a0   : > { %16634 = vmatmul.mubr.msk.f32.gmra.mrb[30].mxu1 %vm1018_vm0, %v20593_v4  ;;  %17500 = vmatmul.mubr.msk.f32.gmra.mrb[90].mxu0 %vm1018_vm0, %v7888_v32  ;;  %v20693_v32 = vld [vmem:[#allocation2 + $0x1f8] sm:$0xff] }
 0x1a1   : > { %16636 = vmatprep.mubr.msk.f32.mxu1 %vm1018_vm0, %v20595_v33  ;;  %17502 = vmatprep.mubr.msk.f32.mxu0 %vm1018_vm0, %v7889_v34  ;;  %v7908_v34 = vld [vmem:[#allocation2 + $0x47a] sm:$0xff] }
 0x1a4   : > { %16637 = vmatmul.mubr.msk.f32.gmra.mrb[32].mxu1 %vm1018_vm0, %v20603_v35  ;;  %17503 = vmatmul.mubr.msk.f32.gmra.mrb[92].mxu0 %vm1018_vm0, %v7890_v36  ;;  %v20695_v36 = vld [vmem:[#allocation2 + $0x208] sm:$0xff] }
 0x1a5   : > { %16639 = vmatprep.mubr.msk.f32.mxu1 %vm1018_vm0, %v20605_v38  ;;  %17505 = vmatprep.mubr.msk.f32.mxu0 %vm1018_vm0, %v7891_v39  ;;  %v7909_v39 = vld [vmem:[#allocation2 + $0x48a] sm:$0xff] }
 0x1a8   : > { %16640 = vmatmul.mubr.msk.f32.gmra.mrb[34].mxu1 %vm1018_vm0, %v20613_v40  ;;  %17506 = vmatmul.mubr.msk.f32.gmra.mrb[94].mxu0 %vm1018_vm0, %v7892_v41  ;;  %v20703_v41 = vld [vmem:[#allocation2 + $0x210] sm:$0xff] }
 0x1a9   : > { %16642 = vmatprep.mubr.msk.f32.mxu1 %vm1018_vm0, %v20615_v42  ;;  %17508 = vmatprep.mubr.msk.f32.mxu0 %vm1018_vm0, %v7893_v43  ;;  %v7910_v43 = vld [vmem:[#allocation2 + $0x492] sm:$0xff] }
 0x1ac   : > { %16643 = vmatmul.mubr.msk.f32.gmra.mrb[36].mxu1 %vm1018_vm0, %v20623_v44  ;;  %17509 = vmatmul.mubr.msk.f32.gmra.mrb[96].mxu0 %vm1018_vm0, %v7894_v46  ;;  %v20705_v46 = vld [vmem:[#allocation2 + $0x218] sm:$0xff] }
 0x1ad   : > { %16645 = vmatprep.mubr.msk.f32.mxu1 %vm1018_vm0, %v20625_v47  ;;  %17511 = vmatprep.mubr.msk.f32.mxu0 %vm1018_vm0, %v7895_v3  ;;  %v7911_v3 = vld [vmem:[#allocation2 + $0x49a] sm:$0xff] }
 0x1b0   : > { %16646 = vmatmul.mubr.msk.f32.gmra.mrb[38].mxu1 %vm1018_vm0, %v20633_v48  ;;  %17512 = vmatmul.mubr.msk.f32.gmra.mrb[98].mxu0 %vm1018_vm0, %v7896_v50  ;;  %v20713_v50 = vld [vmem:[#allocation2 + $0x220] sm:$0xff] }
 0x1b1   : > { %16648 = vmatprep.mubr.msk.f32.mxu1 %vm1018_vm0, %v20635_v52  ;;  %17514 = vmatprep.mubr.msk.f32.mxu0 %vm1018_vm0, %v7897_v54  ;;  %v7912_v54 = vld [vmem:[#allocation2 + $0x4a2] sm:$0xff] }
 0x1b4   : > { %16649 = vmatmul.mubr.msk.f32.gmra.mrb[40].mxu1 %vm1018_vm0, %v20643_v57  ;;  %17515 = vmatmul.mubr.msk.f32.gmra.mrb[100].mxu0 %vm1018_vm0, %v7898_v37  ;;  %v20715_v37 = vld [vmem:[#allocation2 + $0x230] sm:$0xff] }
 0x1b5   : > { %16651 = vmatprep.mubr.msk.f32.mxu1 %vm1018_vm0, %v20645_v60  ;;  %17517 = vmatprep.mubr.msk.f32.mxu0 %vm1018_vm0, %v7899_v62  ;;  %v7913_v62 = vld [vmem:[#allocation2 + $0x4b2] sm:$0xff] }
 0x1b8   : > { %16652 = vmatmul.mubr.msk.f32.gmra.mrb[42].mxu1 %vm1018_vm0, %v20653_v0  ;;  %17518 = vmatmul.mubr.msk.f32.gmra.mrb[102].mxu0 %vm1018_vm0, %v7900_v2  ;;  %v20723_v2 = vld [vmem:[#allocation2 + $0x238] sm:$0xff] }
 0x1b9   : > { %16654 = vmatprep.mubr.msk.f32.mxu1 %vm1018_vm0, %v20655_v8  ;;  %17520 = vmatprep.mubr.msk.f32.mxu0 %vm1018_vm0, %v7901_v10  ;;  %v7914_v10 = vld [vmem:[#allocation2 + $0x4ba] sm:$0xff] }
 0x1bc   : > { %16655 = vmatmul.mubr.msk.f32.gmra.mrb[44].mxu1 %vm1018_vm0, %v20663_v12  ;;  %17521 = vmatmul.mubr.msk.f32.gmra.mrb[104].mxu0 %vm1018_vm0, %v7902_v14  ;;  %v20725_v14 = vld [vmem:[#allocation2 + $0x240] sm:$0xff] }
 0x1bd   : > { %16657 = vmatprep.mubr.msk.f32.mxu1 %vm1018_vm0, %v20665_v16  ;;  %17523 = vmatprep.mubr.msk.f32.mxu0 %vm1018_vm0, %v7903_v18  ;;  %v7915_v18 = vld [vmem:[#allocation2 + $0x4c2] sm:$0xff] }
 0x1c0   : > { %16658 = vmatmul.mubr.msk.f32.gmra.mrb[46].mxu1 %vm1018_vm0, %v20673_v5  ;;  %17524 = vmatmul.mubr.msk.f32.gmra.mrb[106].mxu0 %vm1018_vm0, %v7904_v21  ;;  %v20733_v21 = vld [vmem:[#allocation2 + $0x248] sm:$0xff] }
 0x1c1   : > { %16660 = vmatprep.mubr.msk.f32.mxu1 %vm1018_vm0, %v20675_v23  ;;  %17526 = vmatprep.mubr.msk.f32.mxu0 %vm1018_vm0, %v7905_v25  ;;  %v7916_v25 = vld [vmem:[#allocation2 + $0x4ca] sm:$0xff] }
 0x1c4   : > { %16661 = vmatmul.mubr.msk.f32.gmra.mrb[48].mxu1 %vm1018_vm0, %v20683_v27  ;;  %17527 = vmatmul.mubr.msk.f32.gmra.mrb[108].mxu0 %vm1018_vm0, %v7906_v6  ;;  %v20735_v6 = vld [vmem:[#allocation2 + $0x258] sm:$0xff] }
 0x1c5   : > { %16663 = vmatprep.mubr.msk.f32.mxu1 %vm1018_vm0, %v20685_v29  ;;  %17529 = vmatprep.mubr.msk.f32.mxu0 %vm1018_vm0, %v7907_v31  ;;  %v7917_v31 = vld [vmem:[#allocation2 + $0x4da] sm:$0xff] }
 0x1c8   : > { %16664 = vmatmul.mubr.msk.f32.gmra.mrb[50].mxu1 %vm1018_vm0, %v20693_v32  ;;  %17530 = vmatmul.mubr.msk.f32.gmra.mrb[110].mxu0 %vm1018_vm0, %v7908_v34  ;;  %v20743_v34 = vld [vmem:[#allocation2 + $0x260] sm:$0xff] }
 0x1c9   : > { %16666 = vmatprep.mubr.msk.f32.mxu1 %vm1018_vm0, %v20695_v36  ;;  %17532 = vmatprep.mubr.msk.f32.mxu0 %vm1018_vm0, %v7909_v39  ;;  %v7918_v39 = vld [vmem:[#allocation2 + $0x4e2] sm:$0xff] }
 0x1cc   : > { %16667 = vmatmul.mubr.msk.f32.gmra.mrb[52].mxu1 %vm1018_vm0, %v20703_v41  ;;  %17533 = vmatmul.mubr.msk.f32.gmra.mrb[112].mxu0 %vm1018_vm0, %v7910_v43  ;;  %v20745_v43 = vld [vmem:[#allocation2 + $0x268] sm:$0xff] }
 0x1cd   : > { %16669 = vmatprep.mubr.msk.f32.mxu1 %vm1018_vm0, %v20705_v46  ;;  %17535 = vmatprep.mubr.msk.f32.mxu0 %vm1018_vm0, %v7911_v3  ;;  %v7919_v3 = vld [vmem:[#allocation2 + $0x4ea] sm:$0xff] }
 0x1d0   : > { %16670 = vmatmul.mubr.msk.f32.gmra.mrb[54].mxu1 %vm1018_vm0, %v20713_v50  ;;  %17536 = vmatmul.mubr.msk.f32.gmra.mrb[114].mxu0 %vm1018_vm0, %v7912_v54  ;;  %v20753_v54 = vld [vmem:[#allocation2 + $0x270] sm:$0xff] }
 0x1d1   : > { %16672 = vmatprep.mubr.msk.f32.mxu1 %vm1018_vm0, %v20715_v37  ;;  %17538 = vmatprep.mubr.msk.f32.mxu0 %vm1018_vm0, %v7913_v62  ;;  %v7920_v62 = vld [vmem:[#allocation2 + $0x4f2] sm:$0xff] }
 0x1d4   : > { %16673 = vmatmul.mubr.msk.f32.gmra.mrb[56].mxu1 %vm1018_vm0, %v20723_v2  ;;  %17539 = vmatmul.mubr.msk.f32.gmra.mrb[116].mxu0 %vm1018_vm0, %v7914_v10  ;;  %v20755_v10 = vld [vmem:[#allocation2 + $0x280] sm:$0xff] }
 0x1d5   : > { %16675 = vmatprep.mubr.msk.f32.mxu1 %vm1018_vm0, %v20725_v14  ;;  %17541 = vmatprep.mubr.msk.f32.mxu0 %vm1018_vm0, %v7915_v18  ;;  %22594 = vst [vmem:[#allocation3_spill] sm:$0xff] %v20755_v10  ;;  %v7921_v18 = vld [vmem:[#allocation2 + $0x502] sm:$0xff] }
 0x1d8   : > { %16676 = vmatmul.mubr.msk.f32.gmra.mrb[58].mxu1 %vm1018_vm0, %v20733_v21  ;;  %17542 = vmatmul.mubr.msk.f32.gmra.mrb[118].mxu0 %vm1018_vm0, %v7916_v25  ;;  %v20763_v25 = vld [vmem:[#allocation2 + $0x288] sm:$0xff] }
 0x1d9   : > { %16678 = vmatprep.mubr.msk.f32.mxu1 %vm1018_vm0, %v20735_v6  ;;  %17544 = vmatprep.mubr.msk.f32.mxu0 %vm1018_vm0, %v7917_v31  ;;  %v7922_v31 = vld [vmem:[#allocation2 + $0x50a] sm:$0xff] }
 0x1dc   : > { %16679 = vmatmul.mubr.msk.f32.gmra.mrb[60].mxu1 %vm1018_vm0, %v20743_v34  ;;  %17545 = vmatmul.mubr.msk.f32.gmra.mrb[120].mxu0 %vm1018_vm0, %v7918_v39  ;;  %v20765_v39 = vld [vmem:[#allocation2 + $0x290] sm:$0xff] }
 0x1dd   : > { %16681 = vmatprep.mubr.msk.f32.mxu1 %vm1018_vm0, %v20745_v43  ;;  %17547 = vmatprep.mubr.msk.f32.mxu0 %vm1018_vm0, %v7919_v3  ;;  %22595 = vst [vmem:[#allocation4_spill] sm:$0xff] %v20765_v39  ;;  %v7923_v3 = vld [vmem:[#allocation2 + $0x512] sm:$0xff] }
 0x1e0   : > { %16682 = vmatmul.mubr.msk.f32.gmra.mrb[62].mxu1 %vm1018_vm0, %v20753_v54  ;;  %17548 = vmatmul.mubr.msk.f32.gmra.mrb[122].mxu0 %vm1018_vm0, %v7920_v62  ;;  %v20773_v62 = vld [vmem:[#allocation2 + $0x298] sm:$0xff] }
 0x1e1   : > { %16684 = vmatprep.mubr.msk.f32.mxu1 %vm1018_vm0, %v20755_v10  ;;  %17550 = vmatprep.mubr.msk.f32.mxu0 %vm1018_vm0, %v7921_v18  ;;  %v7924_v10 = vld [vmem:[#allocation2 + $0x51a] sm:$0xff]  ;;  %v20775_v18 = vld [vmem:[#allocation2 + $0x2a8] sm:$0xff] }
 0x1e4   : > { %16685 = vmatmul.mubr.msk.f32.gmra.mrb[64].mxu1 %vm1018_vm0, %v20763_v25  ;;  %17551 = vmatmul.mubr.msk.f32.gmra.mrb[124].mxu0 %vm1018_vm0, %v7922_v31  ;;  %v20784_v31 = vld [vmem:[#allocation2 + $0x2b0] sm:$0xff] }
 0x1e5   : > { %16687 = vmatprep.mubr.msk.f32.mxu1 %vm1018_vm0, %v20765_v39  ;;  %17553 = vmatprep.mubr.msk.f32.mxu0 %vm1018_vm0, %v7923_v3  ;;  %v20789_v3 = vld [vmem:[%s22585_s3 + $0x18] sm:$0xff] }
 0x1e6   : > { %v20791_v39 = vld [vmem:[#allocation2 + $0x2b8] sm:$0xff]  ;;  %16974 = vmatprep.subr.mxu1 %v20789_v3 }
 0x1e8   : > { %16688 = vmatmul.mubr.msk.f32.gmra.mrb[66].mxu1 %vm1018_vm0, %v20773_v62  ;;  %17554 = vmatmul.mubr.msk.f32.gmra.mrb[126].mxu0 %vm1018_vm0, %v7924_v10  ;;  %v20805_v10 = vld [vmem:[#allocation2 + $0x2d0] sm:$0xff] }
 0x1e9   : > { %16690 = vmatprep.mubr.msk.f32.mxu1 %vm1018_vm0, %v20775_v18  ;;  %17558 = vmatprep.mubr.msk.f32.mxu0 %vm1018_vm0, %v20476_v49  ;;  %v20801_v49 = vld [vmem:[#allocation2 + $0x2c0] sm:$0xff] }
 0x1ec   : > { %16691 = vmatmul.mubr.msk.f32.gmra.mrb[68].mxu1 %vm1018_vm0, %v20784_v31  ;;  %17559 = vmatmul.mubr.msk.f32.vlgmr.msra.gmra.mrb[0].mxu0 %vm1018_vm0, %v20483_v51  ;;  %v20817_v51 = vld [vmem:[#allocation2 + $0x2e0] sm:$0xff] }
 0x1ed   : > { %17751 = vmatpush3.msra.mxu0 %v20469_v45  ;;  %16693 = vmatprep.mubr.msk.f32.mxu1 %vm1018_vm0, %v20791_v39  ;;  %v20815_v45 = vld [vmem:[#allocation2 + $0x2d8] sm:$0xff] }
 0x1ee   : > { %17561 = vmatprep.mubr.msk.f32.mxu0 %vm1018_vm0, %v20485_v53  ;;  %v20827_v53 = vld [vmem:[#allocation2 + $0x2e8] sm:$0xff] }
 0x1f0   : > { %16694 = vmatmul.mubr.msk.f32.gmra.mrb[70].mxu1 %vm1018_vm0, %v20801_v49  ;;  %17562 = vmatmul.mubr.msk.f32.gmra.mrb[2].mxu0 %vm1018_vm0, %v20493_v55  ;;  %v20829_v55 = vld [vmem:[#allocation2 + $0x2f8] sm:$0xff] }
 0x1f1   : > { %16696 = vmatprep.mubr.msk.f32.mxu1 %vm1018_vm0, %v20805_v10  ;;  %17564 = vmatprep.mubr.msk.f32.mxu0 %vm1018_vm0, %v20495_v58  ;;  %v20839_v58 = vld [vmem:[#allocation2 + $0x300] sm:$0xff] }
 0x1f4   : > { %16697 = vmatmul.mubr.msk.f32.gmra.mrb[72].mxu1 %vm1018_vm0, %v20815_v45  ;;  %17565 = vmatmul.mubr.msk.f32.gmra.mrb[4].mxu0 %vm1018_vm0, %v20503_v59  ;;  %v20841_v59 = vld [vmem:[#allocation2 + $0x308] sm:$0xff] }
 0x1f5   : > { %16699 = vmatprep.mubr.msk.f32.mxu1 %vm1018_vm0, %v20817_v51  ;;  %17567 = vmatprep.mubr.msk.f32.mxu0 %vm1018_vm0, %v20505_v61  ;;  %v20851_v61 = vld [vmem:[#allocation2 + $0x310] sm:$0xff] }
 0x1f8   : > { %16700 = vmatmul.mubr.msk.f32.gmra.mrb[74].mxu1 %vm1018_vm0, %v20827_v53  ;;  %17568 = vmatmul.mubr.msk.f32.gmra.mrb[6].mxu0 %vm1018_vm0, %v20513_v63  ;;  %v20853_v63 = vld [vmem:[#allocation2 + $0x320] sm:$0xff] }
 0x1f9   : > { %16702 = vmatprep.mubr.msk.f32.mxu1 %vm1018_vm0, %v20829_v55  ;;  %17570 = vmatprep.mubr.msk.f32.mxu0 %vm1018_vm0, %v20515_v1  ;;  %v20863_v1 = vld [vmem:[#allocation2 + $0x328] sm:$0xff] }
 0x1fc   : > { %16703 = vmatmul.mubr.msk.f32.gmra.mrb[76].mxu1 %vm1018_vm0, %v20839_v58  ;;  %17571 = vmatmul.mubr.msk.f32.gmra.mrb[8].mxu0 %vm1018_vm0, %v20523_v7  ;;  %v20865_v7 = vld [vmem:[#allocation2 + $0x330] sm:$0xff] }
 0x1fd   : > { %16705 = vmatprep.mubr.msk.f32.mxu1 %vm1018_vm0, %v20841_v59  ;;  %17573 = vmatprep.mubr.msk.f32.mxu0 %vm1018_vm0, %v20525_v9  ;;  %v20875_v9 = vld [vmem:[#allocation2 + $0x338] sm:$0xff] }
 0x200   : > { %16706 = vmatmul.mubr.msk.f32.gmra.mrb[78].mxu1 %vm1018_vm0, %v20851_v61  ;;  %17574 = vmatmul.mubr.msk.f32.gmra.mrb[10].mxu0 %vm1018_vm0, %v20533_v11  ;;  %v20877_v11 = vld [vmem:[#allocation2 + $0x348] sm:$0xff] }
 0x201   : > { %16708 = vmatprep.mubr.msk.f32.mxu1 %vm1018_vm0, %v20853_v63  ;;  %17576 = vmatprep.mubr.msk.f32.mxu0 %vm1018_vm0, %v20535_v13  ;;  %v20887_v13 = vld [vmem:[#allocation2 + $0x350] sm:$0xff] }
 0x204   : > { %16709 = vmatmul.mubr.msk.f32.gmra.mrb[80].mxu1 %vm1018_vm0, %v20863_v1  ;;  %17577 = vmatmul.mubr.msk.f32.gmra.mrb[12].mxu0 %vm1018_vm0, %v20543_v15  ;;  %v20889_v15 = vld [vmem:[#allocation2 + $0x358] sm:$0xff] }
 0x205   : > { %16711 = vmatprep.mubr.msk.f32.mxu1 %vm1018_vm0, %v20865_v7  ;;  %17579 = vmatprep.mubr.msk.f32.mxu0 %vm1018_vm0, %v20545_v17  ;;  %v20899_v17 = vld [vmem:[#allocation2 + $0x360] sm:$0xff] }
 0x208   : > { %16712 = vmatmul.mubr.msk.f32.gmra.mrb[82].mxu1 %vm1018_vm0, %v20875_v9  ;;  %17580 = vmatmul.mubr.msk.f32.gmra.mrb[14].mxu0 %vm1018_vm0, %v20553_v19  ;;  %v20901_v19 = vld [vmem:[#allocation2 + $0x370] sm:$0xff] }
 0x209   : > { %16714 = vmatprep.mubr.msk.f32.mxu1 %vm1018_vm0, %v20877_v11  ;;  %17582 = vmatprep.mubr.msk.f32.mxu0 %vm1018_vm0, %v20555_v20  ;;  %v20911_v20 = vld [vmem:[#allocation2 + $0x378] sm:$0xff] }
 0x20c   : > { %16715 = vmatmul.mubr.msk.f32.gmra.mrb[84].mxu1 %vm1018_vm0, %v20887_v13  ;;  %17583 = vmatmul.mubr.msk.f32.gmra.mrb[16].mxu0 %vm1018_vm0, %v20563_v22  ;;  %v20913_v22 = vld [vmem:[#allocation2 + $0x380] sm:$0xff] }
 0x20d   : > { %16717 = vmatprep.mubr.msk.f32.mxu1 %vm1018_vm0, %v20889_v15  ;;  %17585 = vmatprep.mubr.msk.f32.mxu0 %vm1018_vm0, %v20565_v24  ;;  %v20923_v24 = vld [vmem:[#allocation2 + $0x388] sm:$0xff] }
 0x210   : > { %16718 = vmatmul.mubr.msk.f32.gmra.mrb[86].mxu1 %vm1018_vm0, %v20899_v17  ;;  %17586 = vmatmul.mubr.msk.f32.gmra.mrb[18].mxu0 %vm1018_vm0, %v20573_v26  ;;  %v20925_v26 = vld [vmem:[#allocation2 + $0x398] sm:$0xff] }
 0x211   : > { %16720 = vmatprep.mubr.msk.f32.mxu1 %vm1018_vm0, %v20901_v19  ;;  %17588 = vmatprep.mubr.msk.f32.mxu0 %vm1018_vm0, %v20575_v28  ;;  %v20935_v28 = vld [vmem:[#allocation2 + $0x3a0] sm:$0xff] }
 0x214   : > { %16721 = vmatmul.mubr.msk.f32.gmra.mrb[88].mxu1 %vm1018_vm0, %v20911_v20  ;;  %17589 = vmatmul.mubr.msk.f32.gmra.mrb[20].mxu0 %vm1018_vm0, %v20583_v56  ;;  %v20937_v56 = vld [vmem:[#allocation2 + $0x3a8] sm:$0xff] }
 0x215   : > { %16723 = vmatprep.mubr.msk.f32.mxu1 %vm1018_vm0, %v20913_v22  ;;  %17591 = vmatprep.mubr.msk.f32.mxu0 %vm1018_vm0, %v20585_v30  ;;  %v20947_v30 = vld [vmem:[#allocation2 + $0x3b0] sm:$0xff] }
 0x218   : > { %16724 = vmatmul.mubr.msk.f32.gmra.mrb[90].mxu1 %vm1018_vm0, %v20923_v24  ;;  %17592 = vmatmul.mubr.msk.f32.gmra.mrb[22].mxu0 %vm1018_vm0, %v20593_v4  ;;  %v20949_v4 = vld [vmem:[#allocation2 + $0x3c0] sm:$0xff] }
 0x219   : > { %16726 = vmatprep.mubr.msk.f32.mxu1 %vm1018_vm0, %v20925_v26  ;;  %17594 = vmatprep.mubr.msk.f32.mxu0 %vm1018_vm0, %v20595_v33  ;;  %v20959_v33 = vld [vmem:[#allocation2 + $0x3c8] sm:$0xff] }
 0x21c   : > { %16727 = vmatmul.mubr.msk.f32.gmra.mrb[92].mxu1 %vm1018_vm0, %v20935_v28  ;;  %17595 = vmatmul.mubr.msk.f32.gmra.mrb[24].mxu0 %vm1018_vm0, %v20603_v35  ;;  %v20961_v35 = vld [vmem:[#allocation2 + $0x3d0] sm:$0xff] }
 0x21d   : > { %16729 = vmatprep.mubr.msk.f32.mxu1 %vm1018_vm0, %v20937_v56  ;;  %17597 = vmatprep.mubr.msk.f32.mxu0 %vm1018_vm0, %v20605_v38  ;;  %v20971_v38 = vld [vmem:[#allocation2 + $0x3d8] sm:$0xff] }
 0x220   : > { %16730 = vmatmul.mubr.msk.f32.gmra.mrb[94].mxu1 %vm1018_vm0, %v20947_v30  ;;  %17598 = vmatmul.mubr.msk.f32.gmra.mrb[26].mxu0 %vm1018_vm0, %v20613_v40  ;;  %v20973_v40 = vld [vmem:[#allocation2 + $0x3e8] sm:$0xff] }
 0x221   : > { %16732 = vmatprep.mubr.msk.f32.mxu1 %vm1018_vm0, %v20949_v4  ;;  %17600 = vmatprep.mubr.msk.f32.mxu0 %vm1018_vm0, %v20615_v42  ;;  %v20983_v42 = vld [vmem:[#allocation2 + $0x3f0] sm:$0xff] }
 0x224   : > { %16733 = vmatmul.mubr.msk.f32.gmra.mrb[96].mxu1 %vm1018_vm0, %v20959_v33  ;;  %17601 = vmatmul.mubr.msk.f32.gmra.mrb[28].mxu0 %vm1018_vm0, %v20623_v44  ;;  %v20985_v44 = vld [vmem:[#allocation2 + $0x3f8] sm:$0xff] }
 0x225   : > { %16735 = vmatprep.mubr.msk.f32.mxu1 %vm1018_vm0, %v20961_v35  ;;  %17603 = vmatprep.mubr.msk.f32.mxu0 %vm1018_vm0, %v20625_v47  ;;  %v20995_v47 = vld [vmem:[#allocation2 + $0x400] sm:$0xff] }
 0x228   : > { %16736 = vmatmul.mubr.msk.f32.gmra.mrb[98].mxu1 %vm1018_vm0, %v20971_v38  ;;  %17604 = vmatmul.mubr.msk.f32.gmra.mrb[30].mxu0 %vm1018_vm0, %v20633_v48  ;;  %v20997_v48 = vld [vmem:[#allocation2 + $0x410] sm:$0xff] }
 0x229   : > { %16738 = vmatprep.mubr.msk.f32.mxu1 %vm1018_vm0, %v20973_v40  ;;  %17606 = vmatprep.mubr.msk.f32.mxu0 %vm1018_vm0, %v20635_v52  ;;  %v21007_v52 = vld [vmem:[#allocation2 + $0x418] sm:$0xff] }
 0x22c   : > { %16739 = vmatmul.mubr.msk.f32.gmra.mrb[100].mxu1 %vm1018_vm0, %v20983_v42  ;;  %17607 = vmatmul.mubr.msk.f32.gmra.mrb[32].mxu0 %vm1018_vm0, %v20643_v57  ;;  %v21009_v57 = vld [vmem:[#allocation2 + $0x420] sm:$0xff] }
 0x22d   : > { %16741 = vmatprep.mubr.msk.f32.mxu1 %vm1018_vm0, %v20985_v44  ;;  %17609 = vmatprep.mubr.msk.f32.mxu0 %vm1018_vm0, %v20645_v60  ;;  %v21019_v60 = vld [vmem:[#allocation2 + $0x428] sm:$0xff] }
 0x230   : > { %16742 = vmatmul.mubr.msk.f32.gmra.mrb[102].mxu1 %vm1018_vm0, %v20995_v47  ;;  %17610 = vmatmul.mubr.msk.f32.gmra.mrb[34].mxu0 %vm1018_vm0, %v20653_v0  ;;  %v21021_v0 = vld [vmem:[#allocation2 + $0x438] sm:$0xff] }
 0x231   : > { %16744 = vmatprep.mubr.msk.f32.mxu1 %vm1018_vm0, %v20997_v48  ;;  %17612 = vmatprep.mubr.msk.f32.mxu0 %vm1018_vm0, %v20655_v8  ;;  %v21031_v8 = vld [vmem:[#allocation2 + $0x440] sm:$0xff] }
 0x234   : > { %16745 = vmatmul.mubr.msk.f32.gmra.mrb[104].mxu1 %vm1018_vm0, %v21007_v52  ;;  %17613 = vmatmul.mubr.msk.f32.gmra.mrb[36].mxu0 %vm1018_vm0, %v20663_v12  ;;  %v21033_v12 = vld [vmem:[#allocation2 + $0x448] sm:$0xff] }
 0x235   : > { %16747 = vmatprep.mubr.msk.f32.mxu1 %vm1018_vm0, %v21009_v57  ;;  %17615 = vmatprep.mubr.msk.f32.mxu0 %vm1018_vm0, %v20665_v16  ;;  %v21043_v16 = vld [vmem:[#allocation2 + $0x450] sm:$0xff] }
 0x238   : > { %16748 = vmatmul.mubr.msk.f32.gmra.mrb[106].mxu1 %vm1018_vm0, %v21019_v60  ;;  %17616 = vmatmul.mubr.msk.f32.gmra.mrb[38].mxu0 %vm1018_vm0, %v20673_v5  ;;  %v21045_v5 = vld [vmem:[#allocation2 + $0x460] sm:$0xff] }
 0x239   : > { %16750 = vmatprep.mubr.msk.f32.mxu1 %vm1018_vm0, %v21021_v0  ;;  %17618 = vmatprep.mubr.msk.f32.mxu0 %vm1018_vm0, %v20675_v23  ;;  %v21055_v23 = vld [vmem:[#allocation2 + $0x468] sm:$0xff] }
 0x23c   : > { %16751 = vmatmul.mubr.msk.f32.gmra.mrb[108].mxu1 %vm1018_vm0, %v21031_v8  ;;  %17619 = vmatmul.mubr.msk.f32.gmra.mrb[40].mxu0 %vm1018_vm0, %v20683_v27  ;;  %v21057_v27 = vld [vmem:[#allocation2 + $0x470] sm:$0xff] }
 0x23d   : > { %16753 = vmatprep.mubr.msk.f32.mxu1 %vm1018_vm0, %v21033_v12  ;;  %17621 = vmatprep.mubr.msk.f32.mxu0 %vm1018_vm0, %v20685_v29  ;;  %v21067_v29 = vld [vmem:[#allocation2 + $0x478] sm:$0xff] }
 0x240   : > { %16754 = vmatmul.mubr.msk.f32.gmra.mrb[110].mxu1 %vm1018_vm0, %v21043_v16  ;;  %17622 = vmatmul.mubr.msk.f32.gmra.mrb[42].mxu0 %vm1018_vm0, %v20693_v32  ;;  %v21069_v32 = vld [vmem:[#allocation2 + $0x488] sm:$0xff] }
 0x241   : > { %16756 = vmatprep.mubr.msk.f32.mxu1 %vm1018_vm0, %v21045_v5  ;;  %17624 = vmatprep.mubr.msk.f32.mxu0 %vm1018_vm0, %v20695_v36  ;;  %v21079_v36 = vld [vmem:[#allocation2 + $0x490] sm:$0xff] }
 0x244   : > { %16757 = vmatmul.mubr.msk.f32.gmra.mrb[112].mxu1 %vm1018_vm0, %v21055_v23  ;;  %17625 = vmatmul.mubr.msk.f32.gmra.mrb[44].mxu0 %vm1018_vm0, %v20703_v41  ;;  %v21081_v41 = vld [vmem:[#allocation2 + $0x498] sm:$0xff] }
 0x245   : > { %16759 = vmatprep.mubr.msk.f32.mxu1 %vm1018_vm0, %v21057_v27  ;;  %17627 = vmatprep.mubr.msk.f32.mxu0 %vm1018_vm0, %v20705_v46  ;;  %v21091_v46 = vld [vmem:[#allocation2 + $0x4a0] sm:$0xff] }
 0x248   : > { %16760 = vmatmul.mubr.msk.f32.gmra.mrb[114].mxu1 %vm1018_vm0, %v21067_v29  ;;  %17628 = vmatmul.mubr.msk.f32.gmra.mrb[46].mxu0 %vm1018_vm0, %v20713_v50  ;;  %v21093_v50 = vld [vmem:[#allocation2 + $0x4b0] sm:$0xff] }
 0x249   : > { %16762 = vmatprep.mubr.msk.f32.mxu1 %vm1018_vm0, %v21069_v32  ;;  %17630 = vmatprep.mubr.msk.f32.mxu0 %vm1018_vm0, %v20715_v37  ;;  %v21103_v37 = vld [vmem:[#allocation2 + $0x4b8] sm:$0xff] }
 0x24c   : > { %16763 = vmatmul.mubr.msk.f32.gmra.mrb[116].mxu1 %vm1018_vm0, %v21079_v36  ;;  %17631 = vmatmul.mubr.msk.f32.gmra.mrb[48].mxu0 %vm1018_vm0, %v20723_v2  ;;  %v21105_v2 = vld [vmem:[#allocation2 + $0x4c0] sm:$0xff] }
 0x24d   : > { %16765 = vmatprep.mubr.msk.f32.mxu1 %vm1018_vm0, %v21081_v41  ;;  %17633 = vmatprep.mubr.msk.f32.mxu0 %vm1018_vm0, %v20725_v14  ;;  %22596 = vst [vmem:[#allocation5_spill] sm:$0xff] %v21105_v2  ;;  %v21115_v14 = vld [vmem:[#allocation2 + $0x4c8] sm:$0xff] }
 0x250   : > { %16766 = vmatmul.mubr.msk.f32.gmra.mrb[118].mxu1 %vm1018_vm0, %v21091_v46  ;;  %17634 = vmatmul.mubr.msk.f32.gmra.mrb[50].mxu0 %vm1018_vm0, %v20733_v21  ;;  %v21117_v21 = vld [vmem:[#allocation2 + $0x4d8] sm:$0xff] }
 0x251   : > { %16768 = vmatprep.mubr.msk.f32.mxu1 %vm1018_vm0, %v21093_v50  ;;  %17636 = vmatprep.mubr.msk.f32.mxu0 %vm1018_vm0, %v20735_v6  ;;  %22597 = vst [vmem:[#allocation6_spill] sm:$0xff] %v21117_v21  ;;  %v22598_v6 = vld [vmem:[#allocation3_spill] sm:$0xff] }
 0x254   : > { %16769 = vmatmul.mubr.msk.f32.gmra.mrb[120].mxu1 %vm1018_vm0, %v21103_v37  ;;  %17637 = vmatmul.mubr.msk.f32.gmra.mrb[52].mxu0 %vm1018_vm0, %v20743_v34  ;;  %v21127_v34 = vld [vmem:[#allocation2 + $0x4e0] sm:$0xff] }
 0x255   : > { %16771 = vmatprep.mubr.msk.f32.mxu1 %vm1018_vm0, %v21105_v2  ;;  %17639 = vmatprep.mubr.msk.f32.mxu0 %vm1018_vm0, %v20745_v43  ;;  %v21129_v2 = vld [vmem:[#allocation2 + $0x4e8] sm:$0xff]  ;;  %v22599_v43 = vld [vmem:[#allocation4_spill] sm:$0xff] }
 0x258   : > { %16772 = vmatmul.mubr.msk.f32.gmra.mrb[122].mxu1 %vm1018_vm0, %v21115_v14  ;;  %17640 = vmatmul.mubr.msk.f32.gmra.mrb[54].mxu0 %vm1018_vm0, %v20753_v54  ;;  %v21139_v54 = vld [vmem:[#allocation2 + $0x4f0] sm:$0xff] }
 0x259   : > { %16774 = vmatprep.mubr.msk.f32.mxu1 %vm1018_vm0, %v21117_v21  ;;  %17642 = vmatprep.mubr.msk.f32.mxu0 %vm1018_vm0, %v22598_v6  ;;  %22600 = vst [vmem:[#allocation3_spill] sm:$0xff] %v21139_v54  ;;  %v3756_v21 = vld [vmem:[#allocation2 + $0x2] sm:$0xff]  ;;  %v3758_v6 = vld [vmem:[#allocation2 + $0x12] sm:$0xff] }
 0x25c   : > { %16775 = vmatmul.mubr.msk.f32.gmra.mrb[124].mxu1 %vm1018_vm0, %v21127_v34  ;;  %17643 = vmatmul.mubr.msk.f32.gmra.mrb[56].mxu0 %vm1018_vm0, %v20763_v25  ;;  %v3757_v25 = vld [vmem:[#allocation2 + $0xa] sm:$0xff] }
 0x25d   : > { %16777 = vmatprep.mubr.msk.f32.mxu1 %vm1018_vm0, %v21129_v2  ;;  %17645 = vmatprep.mubr.msk.f32.mxu0 %vm1018_vm0, %v22599_v43  ;;  %v3759_v43 = vld [vmem:[#allocation2 + $0x1a] sm:$0xff] }
 0x260   : > { %16778 = vmatmul.mubr.msk.f32.gmra.mrb[126].mxu1 %vm1018_vm0, %v21139_v54  ;;  %17646 = vmatmul.mubr.msk.f32.gmra.mrb[58].mxu0 %vm1018_vm0, %v20773_v62  ;;  %v3760_v54 = vld [vmem:[#allocation2 + $0x2a] sm:$0xff]  ;;  %v21158_v62 = vld [vmem:[%s22585_s3 + $0x20] sm:$0xff] }
 0x261   : > { %16782 = vmatprep.mubr.msk.f32.mxu1 %vm1018_vm0, %v3756_v21  ;;  %17648 = vmatprep.mubr.msk.f32.mxu0 %vm1018_vm0, %v20775_v18  ;;  %v21170_v18 = vld [vmem:[%s22585_s3 + $0x40] sm:$0xff] }
 0x262   : > { %17944 = vmatprep.subr.mxu0 %v21170_v18  ;;  %v3766_v21 = vld [vmem:[#allocation2 + $0x62] sm:$0xff] }
 0x264   : > { %16783 = vmatmul.mubr.msk.f32.vlgmr.msra.gmra.mrb[0].mxu1 %vm1018_vm0, %v3757_v25  ;;  %17649 = vmatmul.mubr.msk.f32.gmra.mrb[60].mxu0 %vm1018_vm0, %v20784_v31  ;;  %v3762_v31 = vld [vmem:[#allocation2 + $0x3a] sm:$0xff]  ;;  %v3814_v25 = vld [vmem:[#allocation2 + $0x242] sm:$0xff] }
 0x265   : > { %16785 = vmatprep.mubr.msk.f32.mxu1 %vm1018_vm0, %v3758_v6  ;;  %17651 = vmatprep.mubr.msk.f32.mxu0 %vm1018_vm0, %v20791_v39  ;;  %v3761_v39 = vld [vmem:[#allocation2 + $0x32] sm:$0xff]  ;;  %v3816_v6 = vld [vmem:[#allocation2 + $0x25a] sm:$0xff] }
 0x266   : > { %16975 = vmatpush3.msra.mxu1 %v20789_v3  ;;  %v3763_v3 = vld [vmem:[#allocation2 + $0x42] sm:$0xff] }
 0x267   : > { %18138 = vmatprep.subr.mxu1 %v21158_v62 }
 0x268   : > { %16786 = vmatmul.mubr.msk.f32.gmra.mrb[2].mxu1 %vm1018_vm0, %v3759_v43  ;;  %17652 = vmatmul.mubr.msk.f32.gmra.mrb[62].mxu0 %vm1018_vm0, %v20801_v49  ;;  %v3764_v49 = vld [vmem:[#allocation2 + $0x52] sm:$0xff] }
 0x269   : > { %16788 = vmatprep.mubr.msk.f32.mxu1 %vm1018_vm0, %v3760_v54  ;;  %17654 = vmatprep.mubr.msk.f32.mxu0 %vm1018_vm0, %v20805_v10  ;;  %v3765_v10 = vld [vmem:[#allocation2 + $0x5a] sm:$0xff]  ;;  %v3812_v54 = vld [vmem:[#allocation2 + $0x232] sm:$0xff] }
 0x26a   : > { %v22603_v43 = vld [vmem:[#allocation3_spill] sm:$0xff] }
 0x26c   : > { %16789 = vmatmul.mubr.msk.f32.gmra.mrb[4].mxu1 %vm1018_vm0, %v3761_v39  ;;  %17655 = vmatmul.mubr.msk.f32.gmra.mrb[64].mxu0 %vm1018_vm0, %v20815_v45  ;;  %v3767_v45 = vld [vmem:[#allocation2 + $0x6a] sm:$0xff]  ;;  %v3817_v39 = vld [vmem:[#allocation2 + $0x262] sm:$0xff] }
 0x26d   : > { %16791 = vmatprep.mubr.msk.f32.mxu1 %vm1018_vm0, %v3762_v31  ;;  %17657 = vmatprep.mubr.msk.f32.mxu0 %vm1018_vm0, %v20817_v51  ;;  %v3768_v51 = vld [vmem:[#allocation2 + $0x7a] sm:$0xff]  ;;  %v9266_v31 = vld [vmem:[#allocation2 + $0x508] sm:$0xff] }
 0x270   : > { %16792 = vmatmul.mubr.msk.f32.gmra.mrb[6].mxu1 %vm1018_vm0, %v3763_v3  ;;  %17658 = vmatmul.mubr.msk.f32.gmra.mrb[66].mxu0 %vm1018_vm0, %v20827_v53  ;;  %v3769_v53 = vld [vmem:[#allocation2 + $0x82] sm:$0xff]  ;;  %v9267_v3 = vld [vmem:[#allocation2 + $0x510] sm:$0xff] }
 0x271   : > { %16794 = vmatprep.mubr.msk.f32.mxu1 %vm1018_vm0, %v3764_v49  ;;  %17660 = vmatprep.mubr.msk.f32.mxu0 %vm1018_vm0, %v20829_v55  ;;  %v3770_v55 = vld [vmem:[#allocation2 + $0x8a] sm:$0xff]  ;;  %v9268_v49 = vld [vmem:[#allocation2 + $0x518] sm:$0xff] }
 0x274   : > { %16795 = vmatmul.mubr.msk.f32.gmra.mrb[8].mxu1 %vm1018_vm0, %v3765_v10  ;;  %17661 = vmatmul.mubr.msk.f32.gmra.mrb[68].mxu0 %vm1018_vm0, %v20839_v58  ;;  %v3771_v58 = vld [vmem:[#allocation2 + $0x92] sm:$0xff]  ;;  %v3820_v10 = vld [vmem:[#allocation2 + $0x282] sm:$0xff] }
 0x275   : > { %16797 = vmatprep.mubr.msk.f32.mxu1 %vm1018_vm0, %v3766_v21  ;;  %17663 = vmatprep.mubr.msk.f32.mxu0 %vm1018_vm0, %v20841_v59  ;;  %v3772_v59 = vld [vmem:[#allocation2 + $0xa2] sm:$0xff] }
 0x276   : > { %v9269_v21 = vld [vmem:[#allocation2 + $0x528] sm:$0xff] }
 0x278   : > { %16798 = vmatmul.mubr.msk.f32.gmra.mrb[10].mxu1 %vm1018_vm0, %v3767_v45  ;;  %17664 = vmatmul.mubr.msk.f32.gmra.mrb[70].mxu0 %vm1018_vm0, %v20851_v61  ;;  %v3773_v61 = vld [vmem:[#allocation2 + $0xaa] sm:$0xff] }
 0x279   : > { %16800 = vmatprep.mubr.msk.f32.mxu1 %vm1018_vm0, %v3768_v51  ;;  %17666 = vmatprep.mubr.msk.f32.mxu0 %vm1018_vm0, %v20853_v63  ;;  %v3774_v63 = vld [vmem:[#allocation2 + $0xb2] sm:$0xff]  ;;  %v3821_v45 = vld [vmem:[#allocation2 + $0x28a] sm:$0xff] }
 0x27a   : > { %v9270_v51 = vld [vmem:[#allocation2 + $0x530] sm:$0xff] }
 0x27c   : > { %16801 = vmatmul.mubr.msk.f32.gmra.mrb[12].mxu1 %vm1018_vm0, %v3769_v53  ;;  %17667 = vmatmul.mubr.msk.f32.gmra.mrb[72].mxu0 %vm1018_vm0, %v20863_v1  ;;  %v3775_v1 = vld [vmem:[#allocation2 + $0xba] sm:$0xff]  ;;  %v3822_v53 = vld [vmem:[#allocation2 + $0x292] sm:$0xff] }
 0x27d   : > { %16803 = vmatprep.mubr.msk.f32.mxu1 %vm1018_vm0, %v3770_v55  ;;  %17669 = vmatprep.mubr.msk.f32.mxu0 %vm1018_vm0, %v20865_v7  ;;  %v3776_v7 = vld [vmem:[#allocation2 + $0xca] sm:$0xff]  ;;  %v9271_v55 = vld [vmem:[#allocation2 + $0x538] sm:$0xff] }
 0x280   : > { %16804 = vmatmul.mubr.msk.f32.gmra.mrb[14].mxu1 %vm1018_vm0, %v3771_v58  ;;  %17670 = vmatmul.mubr.msk.f32.gmra.mrb[74].mxu0 %vm1018_vm0, %v20875_v9  ;;  %v3777_v9 = vld [vmem:[#allocation2 + $0xd2] sm:$0xff]  ;;  %v3823_v58 = vld [vmem:[#allocation2 + $0x29a] sm:$0xff] }
 0x281   : > { %16806 = vmatprep.mubr.msk.f32.mxu1 %vm1018_vm0, %v3772_v59  ;;  %17672 = vmatprep.mubr.msk.f32.mxu0 %vm1018_vm0, %v20877_v11  ;;  %v3778_v11 = vld [vmem:[#allocation2 + $0xda] sm:$0xff] }
 0x282   : > { %v9272_v59 = vld [vmem:[#allocation2 + $0x540] sm:$0xff] }
 0x284   : > { %16807 = vmatmul.mubr.msk.f32.gmra.mrb[16].mxu1 %vm1018_vm0, %v3773_v61  ;;  %17673 = vmatmul.mubr.msk.f32.gmra.mrb[76].mxu0 %vm1018_vm0, %v20887_v13  ;;  %v3779_v13 = vld [vmem:[#allocation2 + $0xe2] sm:$0xff]  ;;  %v3824_v61 = vld [vmem:[#allocation2 + $0x2aa] sm:$0xff] }
 0x285   : > { %16809 = vmatprep.mubr.msk.f32.mxu1 %vm1018_vm0, %v3774_v63  ;;  %17675 = vmatprep.mubr.msk.f32.mxu0 %vm1018_vm0, %v20889_v15  ;;  %v3780_v15 = vld [vmem:[#allocation2 + $0xf2] sm:$0xff] }
 0x286   : > { %v10492_v63 = vld [vmem:[#allocation2 + $0x51] sm:$0xff] }
 0x288   : > { %16810 = vmatmul.mubr.msk.f32.gmra.mrb[18].mxu1 %vm1018_vm0, %v3775_v1  ;;  %17676 = vmatmul.mubr.msk.f32.gmra.mrb[78].mxu0 %vm1018_vm0, %v20899_v17  ;;  %v3781_v17 = vld [vmem:[#allocation2 + $0xfa] sm:$0xff]  ;;  %v3825_v1 = vld [vmem:[#allocation2 + $0x2b2] sm:$0xff] }
 0x289   : > { %16812 = vmatprep.mubr.msk.f32.mxu1 %vm1018_vm0, %v3776_v7  ;;  %17678 = vmatprep.mubr.msk.f32.mxu0 %vm1018_vm0, %v20901_v19  ;;  %v3782_v19 = vld [vmem:[#allocation2 + $0x102] sm:$0xff]  ;;  %v10493_v7 = vld [vmem:[#allocation2 + $0x59] sm:$0xff] }
 0x28c   : > { %16813 = vmatmul.mubr.msk.f32.gmra.mrb[20].mxu1 %vm1018_vm0, %v3777_v9  ;;  %17679 = vmatmul.mubr.msk.f32.gmra.mrb[80].mxu0 %vm1018_vm0, %v20911_v20  ;;  %v3783_v20 = vld [vmem:[#allocation2 + $0x10a] sm:$0xff]  ;;  %v3826_v9 = vld [vmem:[#allocation2 + $0x2ba] sm:$0xff] }
 0x28d   : > { %16815 = vmatprep.mubr.msk.f32.mxu1 %vm1018_vm0, %v3778_v11  ;;  %17681 = vmatprep.mubr.msk.f32.mxu0 %vm1018_vm0, %v20913_v22  ;;  %v3784_v22 = vld [vmem:[#allocation2 + $0x11a] sm:$0xff] }
 0x28e   : > { %v10494_v11 = vld [vmem:[#allocation2 + $0x61] sm:$0xff] }
 0x290   : > { %16816 = vmatmul.mubr.msk.f32.gmra.mrb[22].mxu1 %vm1018_vm0, %v3779_v13  ;;  %17682 = vmatmul.mubr.msk.f32.gmra.mrb[82].mxu0 %vm1018_vm0, %v20923_v24  ;;  %v3785_v24 = vld [vmem:[#allocation2 + $0x122] sm:$0xff] }
 0x291   : > { %16818 = vmatprep.mubr.msk.f32.mxu1 %vm1018_vm0, %v3780_v15  ;;  %17684 = vmatprep.mubr.msk.f32.mxu0 %vm1018_vm0, %v20925_v26  ;;  %v3786_v26 = vld [vmem:[#allocation2 + $0x12a] sm:$0xff]  ;;  %v3827_v13 = vld [vmem:[#allocation2 + $0x2c2] sm:$0xff] }
 0x292   : > { %v10495_v15 = vld [vmem:[#allocation2 + $0x69] sm:$0xff] }
 0x294   : > { %16819 = vmatmul.mubr.msk.f32.gmra.mrb[24].mxu1 %vm1018_vm0, %v3781_v17  ;;  %17685 = vmatmul.mubr.msk.f32.gmra.mrb[84].mxu0 %vm1018_vm0, %v20935_v28  ;;  %v3787_v28 = vld [vmem:[#allocation2 + $0x132] sm:$0xff] }
 0x295   : > { %16821 = vmatprep.mubr.msk.f32.mxu1 %vm1018_vm0, %v3782_v19  ;;  %17687 = vmatprep.mubr.msk.f32.mxu0 %vm1018_vm0, %v20937_v56  ;;  %v3788_v56 = vld [vmem:[#allocation2 + $0x142] sm:$0xff]  ;;  %v3828_v17 = vld [vmem:[#allocation2 + $0x2d2] sm:$0xff] }
 0x296   : > { %v10496_v19 = vld [vmem:[#allocation2 + $0x79] sm:$0xff] }
 0x298   : > { %16822 = vmatmul.mubr.msk.f32.gmra.mrb[26].mxu1 %vm1018_vm0, %v3783_v20  ;;  %17688 = vmatmul.mubr.msk.f32.gmra.mrb[86].mxu0 %vm1018_vm0, %v20947_v30  ;;  %v3789_v30 = vld [vmem:[#allocation2 + $0x14a] sm:$0xff]  ;;  %v3829_v20 = vld [vmem:[#allocation2 + $0x2da] sm:$0xff] }
 0x299   : > { %16824 = vmatprep.mubr.msk.f32.mxu1 %vm1018_vm0, %v3784_v22  ;;  %17690 = vmatprep.mubr.msk.f32.mxu0 %vm1018_vm0, %v20949_v4  ;;  %v3790_v4 = vld [vmem:[#allocation2 + $0x152] sm:$0xff]  ;;  %v10497_v22 = vld [vmem:[#allocation2 + $0x81] sm:$0xff] }
 0x29c   : > { %16825 = vmatmul.mubr.msk.f32.gmra.mrb[28].mxu1 %vm1018_vm0, %v3785_v24  ;;  %17691 = vmatmul.mubr.msk.f32.gmra.mrb[88].mxu0 %vm1018_vm0, %v20959_v33  ;;  %v3791_v33 = vld [vmem:[#allocation2 + $0x15a] sm:$0xff]  ;;  %v3830_v24 = vld [vmem:[#allocation2 + $0x2e2] sm:$0xff] }
 0x29d   : > { %16827 = vmatprep.mubr.msk.f32.mxu1 %vm1018_vm0, %v3786_v26  ;;  %17693 = vmatprep.mubr.msk.f32.mxu0 %vm1018_vm0, %v20961_v35  ;;  %v3792_v35 = vld [vmem:[#allocation2 + $0x16a] sm:$0xff] }
 0x29e   : > { %v3831_v26 = vld [vmem:[#allocation2 + $0x2ea] sm:$0xff] }
 0x2a0   : > { %16828 = vmatmul.mubr.msk.f32.gmra.mrb[30].mxu1 %vm1018_vm0, %v3787_v28  ;;  %17694 = vmatmul.mubr.msk.f32.gmra.mrb[90].mxu0 %vm1018_vm0, %v20971_v38  ;;  %v3793_v38 = vld [vmem:[#allocation2 + $0x172] sm:$0xff] }
 0x2a1   : > { %16830 = vmatprep.mubr.msk.f32.mxu1 %vm1018_vm0, %v3788_v56  ;;  %17696 = vmatprep.mubr.msk.f32.mxu0 %vm1018_vm0, %v20973_v40  ;;  %v3794_v40 = vld [vmem:[#allocation2 + $0x17a] sm:$0xff]  ;;  %v10499_v28 = vld [vmem:[#allocation2 + $0x91] sm:$0xff] }
 0x2a2   : > { %v3832_v56 = vld [vmem:[#allocation2 + $0x2fa] sm:$0xff] }
 0x2a4   : > { %16831 = vmatmul.mubr.msk.f32.gmra.mrb[32].mxu1 %vm1018_vm0, %v3789_v30  ;;  %17697 = vmatmul.mubr.msk.f32.gmra.mrb[92].mxu0 %vm1018_vm0, %v20983_v42  ;;  %v3795_v42 = vld [vmem:[#allocation2 + $0x182] sm:$0xff] }
 0x2a5   : > { %16833 = vmatprep.mubr.msk.f32.mxu1 %vm1018_vm0, %v3790_v4  ;;  %17699 = vmatprep.mubr.msk.f32.mxu0 %vm1018_vm0, %v20985_v44  ;;  %v3796_v44 = vld [vmem:[#allocation2 + $0x192] sm:$0xff]  ;;  %v10500_v30 = vld [vmem:[#allocation2 + $0xa1] sm:$0xff] }
 0x2a6   : > { %v3833_v4 = vld [vmem:[#allocation2 + $0x302] sm:$0xff] }
 0x2a8   : > { %16834 = vmatmul.mubr.msk.f32.gmra.mrb[34].mxu1 %vm1018_vm0, %v3791_v33  ;;  %17700 = vmatmul.mubr.msk.f32.gmra.mrb[94].mxu0 %vm1018_vm0, %v20995_v47  ;;  %v3797_v47 = vld [vmem:[#allocation2 + $0x19a] sm:$0xff]  ;;  %v10501_v33 = vld [vmem:[#allocation2 + $0xa9] sm:$0xff] }
 0x2a9   : > { %16836 = vmatprep.mubr.msk.f32.mxu1 %vm1018_vm0, %v3792_v35  ;;  %17702 = vmatprep.mubr.msk.f32.mxu0 %vm1018_vm0, %v20997_v48  ;;  %v3798_v48 = vld [vmem:[#allocation2 + $0x1a2] sm:$0xff]  ;;  %v3834_v35 = vld [vmem:[#allocation2 + $0x30a] sm:$0xff] }
 0x2ac   : > { %16837 = vmatmul.mubr.msk.f32.gmra.mrb[36].mxu1 %vm1018_vm0, %v3793_v38  ;;  %17703 = vmatmul.mubr.msk.f32.gmra.mrb[96].mxu0 %vm1018_vm0, %v21007_v52  ;;  %v3799_v52 = vld [vmem:[#allocation2 + $0x1aa] sm:$0xff] }
 0x2ad   : > { %16839 = vmatprep.mubr.msk.f32.mxu1 %vm1018_vm0, %v3794_v40  ;;  %17705 = vmatprep.mubr.msk.f32.mxu0 %vm1018_vm0, %v21009_v57  ;;  %v3800_v57 = vld [vmem:[#allocation2 + $0x1ba] sm:$0xff]  ;;  %v10502_v38 = vld [vmem:[#allocation2 + $0xb1] sm:$0xff] }
 0x2ae   : > { %v3835_v40 = vld [vmem:[#allocation2 + $0x312] sm:$0xff] }
 0x2b0   : > { %16840 = vmatmul.mubr.msk.f32.gmra.mrb[38].mxu1 %vm1018_vm0, %v3795_v42  ;;  %17706 = vmatmul.mubr.msk.f32.gmra.mrb[98].mxu0 %vm1018_vm0, %v21019_v60  ;;  %v3801_v60 = vld [vmem:[#allocation2 + $0x1c2] sm:$0xff]  ;;  %v10503_v42 = vld [vmem:[#allocation2 + $0xb9] sm:$0xff] }
 0x2b1   : > { %16842 = vmatprep.mubr.msk.f32.mxu1 %vm1018_vm0, %v3796_v44  ;;  %17708 = vmatprep.mubr.msk.f32.mxu0 %vm1018_vm0, %v21021_v0  ;;  %v3802_v0 = vld [vmem:[#allocation2 + $0x1ca] sm:$0xff]  ;;  %v3836_v44 = vld [vmem:[#allocation2 + $0x322] sm:$0xff] }
 0x2b4   : > { %16843 = vmatmul.mubr.msk.f32.gmra.mrb[40].mxu1 %vm1018_vm0, %v3797_v47  ;;  %17709 = vmatmul.mubr.msk.f32.gmra.mrb[100].mxu0 %vm1018_vm0, %v21031_v8  ;;  %v3803_v8 = vld [vmem:[#allocation2 + $0x1d2] sm:$0xff]  ;;  %v10504_v47 = vld [vmem:[#allocation2 + $0xc9] sm:$0xff] }
 0x2b5   : > { %16845 = vmatprep.mubr.msk.f32.mxu1 %vm1018_vm0, %v3798_v48  ;;  %17711 = vmatprep.mubr.msk.f32.mxu0 %vm1018_vm0, %v21033_v12  ;;  %v3804_v12 = vld [vmem:[#allocation2 + $0x1e2] sm:$0xff]  ;;  %v3837_v48 = vld [vmem:[#allocation2 + $0x32a] sm:$0xff] }
 0x2b8   : > { %16846 = vmatmul.mubr.msk.f32.gmra.mrb[42].mxu1 %vm1018_vm0, %v3799_v52  ;;  %17712 = vmatmul.mubr.msk.f32.gmra.mrb[102].mxu0 %vm1018_vm0, %v21043_v16  ;;  %v3805_v16 = vld [vmem:[#allocation2 + $0x1ea] sm:$0xff] }
 0x2b9   : > { %16848 = vmatprep.mubr.msk.f32.mxu1 %vm1018_vm0, %v3800_v57  ;;  %17714 = vmatprep.mubr.msk.f32.mxu0 %vm1018_vm0, %v21045_v5  ;;  %v3806_v5 = vld [vmem:[#allocation2 + $0x1f2] sm:$0xff] }
 0x2ba   : > { %v10505_v52 = vld [vmem:[#allocation2 + $0xd1] sm:$0xff] }
 0x2bb   : > { %v3838_v57 = vld [vmem:[#allocation2 + $0x332] sm:$0xff] }
 0x2bc   : > { %16849 = vmatmul.mubr.msk.f32.gmra.mrb[44].mxu1 %vm1018_vm0, %v3801_v60  ;;  %17715 = vmatmul.mubr.msk.f32.gmra.mrb[104].mxu0 %vm1018_vm0, %v21055_v23  ;;  %v3807_v23 = vld [vmem:[#allocation2 + $0x1fa] sm:$0xff] }
 0x2bd   : > { %16851 = vmatprep.mubr.msk.f32.mxu1 %vm1018_vm0, %v3802_v0  ;;  %17717 = vmatprep.mubr.msk.f32.mxu0 %vm1018_vm0, %v21057_v27  ;;  %v3808_v27 = vld [vmem:[#allocation2 + $0x20a] sm:$0xff]  ;;  %v10506_v60 = vld [vmem:[#allocation2 + $0xd9] sm:$0xff] }
 0x2be   : > { %v3839_v0 = vld [vmem:[#allocation2 + $0x33a] sm:$0xff] }
 0x2c0   : > { %16852 = vmatmul.mubr.msk.f32.gmra.mrb[46].mxu1 %vm1018_vm0, %v3803_v8  ;;  %17718 = vmatmul.mubr.msk.f32.gmra.mrb[106].mxu0 %vm1018_vm0, %v21067_v29  ;;  %v3809_v29 = vld [vmem:[#allocation2 + $0x212] sm:$0xff]  ;;  %v10507_v8 = vld [vmem:[#allocation2 + $0xe1] sm:$0xff] }
 0x2c1   : > { %16854 = vmatprep.mubr.msk.f32.mxu1 %vm1018_vm0, %v3804_v12  ;;  %17720 = vmatprep.mubr.msk.f32.mxu0 %vm1018_vm0, %v21069_v32  ;;  %v3810_v32 = vld [vmem:[#allocation2 + $0x21a] sm:$0xff]  ;;  %v3840_v12 = vld [vmem:[#allocation2 + $0x34a] sm:$0xff] }
 0x2c4   : > { %16855 = vmatmul.mubr.msk.f32.gmra.mrb[48].mxu1 %vm1018_vm0, %v3805_v16  ;;  %17721 = vmatmul.mubr.msk.f32.gmra.mrb[108].mxu0 %vm1018_vm0, %v21079_v36  ;;  %v22601_v36 = vld [vmem:[#allocation5_spill] sm:$0xff]  ;;  %v10508_v16 = vld [vmem:[#allocation2 + $0xf1] sm:$0xff] }
 0x2c5   : > { %16857 = vmatprep.mubr.msk.f32.mxu1 %vm1018_vm0, %v3806_v5  ;;  %17723 = vmatprep.mubr.msk.f32.mxu0 %vm1018_vm0, %v21081_v41  ;;  %v3811_v41 = vld [vmem:[#allocation2 + $0x222] sm:$0xff]  ;;  %v3841_v5 = vld [vmem:[#allocation2 + $0x352] sm:$0xff] }
 0x2c8   : > { %16858 = vmatmul.mubr.msk.f32.gmra.mrb[50].mxu1 %vm1018_vm0, %v3807_v23  ;;  %17724 = vmatmul.mubr.msk.f32.gmra.mrb[110].mxu0 %vm1018_vm0, %v21091_v46  ;;  %v22602_v46 = vld [vmem:[#allocation6_spill] sm:$0xff]  ;;  %v10509_v23 = vld [vmem:[#allocation2 + $0xf9] sm:$0xff] }
 0x2c9   : > { %16860 = vmatprep.mubr.msk.f32.mxu1 %vm1018_vm0, %v3808_v27  ;;  %17726 = vmatprep.mubr.msk.f32.mxu0 %vm1018_vm0, %v21093_v50  ;;  %v3813_v50 = vld [vmem:[#allocation2 + $0x23a] sm:$0xff] }
 0x2ca   : > { %v3842_v27 = vld [vmem:[#allocation2 + $0x35a] sm:$0xff] }
 0x2cc   : > { %16861 = vmatmul.mubr.msk.f32.gmra.mrb[52].mxu1 %vm1018_vm0, %v3809_v29  ;;  %17727 = vmatmul.mubr.msk.f32.gmra.mrb[112].mxu0 %vm1018_vm0, %v21103_v37  ;;  %v3815_v37 = vld [vmem:[#allocation2 + $0x24a] sm:$0xff]  ;;  %v10510_v29 = vld [vmem:[#allocation2 + $0x101] sm:$0xff] }
 0x2cd   : > { %16863 = vmatprep.mubr.msk.f32.mxu1 %vm1018_vm0, %v3810_v32  ;;  %17729 = vmatprep.mubr.msk.f32.mxu0 %vm1018_vm0, %v22601_v36  ;;  %v3843_v32 = vld [vmem:[#allocation2 + $0x362] sm:$0xff] }
 0x2ce   : > { %v10511_v36 = vld [vmem:[#allocation2 + $0x109] sm:$0xff] }
 0x2d0   : > { %16864 = vmatmul.mubr.msk.f32.gmra.mrb[54].mxu1 %vm1018_vm0, %v3811_v41  ;;  %17730 = vmatmul.mubr.msk.f32.gmra.mrb[114].mxu0 %vm1018_vm0, %v21115_v14  ;;  %v9265_v14 = vld [vmem:[#allocation2 + $0x500] sm:$0xff]  ;;  %v3844_v41 = vld [vmem:[#allocation2 + $0x372] sm:$0xff] }
 0x2d1   : > { %16866 = vmatprep.mubr.msk.f32.mxu1 %vm1018_vm0, %v3812_v54  ;;  %17732 = vmatprep.mubr.msk.f32.mxu0 %vm1018_vm0, %v22602_v46  ;;  %v10512_v54 = vld [vmem:[#allocation2 + $0x119] sm:$0xff] }
 0x2d2   : > { %v3845_v46 = vld [vmem:[#allocation2 + $0x37a] sm:$0xff] }
 0x2d4   : > { %16867 = vmatmul.mubr.msk.f32.gmra.mrb[56].mxu1 %vm1018_vm0, %v3813_v50  ;;  %17733 = vmatmul.mubr.msk.f32.gmra.mrb[116].mxu0 %vm1018_vm0, %v21127_v34  ;;  %v3818_v34 = vld [vmem:[#allocation2 + $0x26a] sm:$0xff]  ;;  %v10513_v50 = vld [vmem:[#allocation2 + $0x121] sm:$0xff] }
 0x2d5   : > { %16869 = vmatprep.mubr.msk.f32.mxu1 %vm1018_vm0, %v3814_v25  ;;  %17735 = vmatprep.mubr.msk.f32.mxu0 %vm1018_vm0, %v21129_v2  ;;  %v3819_v2 = vld [vmem:[#allocation2 + $0x272] sm:$0xff]  ;;  %v3846_v25 = vld [vmem:[#allocation2 + $0x382] sm:$0xff] }
 0x2d8   : > { %16870 = vmatmul.mubr.msk.f32.gmra.mrb[58].mxu1 %vm1018_vm0, %v3815_v37  ;;  %17736 = vmatmul.mubr.msk.f32.gmra.mrb[118].mxu0 %vm1018_vm0, %v22603_v43  ;;  %v10514_v37 = vld [vmem:[#allocation2 + $0x129] sm:$0xff]  ;;  %v3848_v43 = vld [vmem:[#allocation2 + $0x39a] sm:$0xff] }
 0x2d9   : > { %16872 = vmatprep.mubr.msk.f32.mxu1 %vm1018_vm0, %v3816_v6  ;;  %17738 = vmatprep.mubr.msk.f32.mxu0 %vm1018_vm0, %v9265_v14  ;;  %v3847_v6 = vld [vmem:[#allocation2 + $0x38a] sm:$0xff] }
 0x2da   : > { %v10515_v14 = vld [vmem:[#allocation2 + $0x131] sm:$0xff] }
 0x2dc   : > { %16873 = vmatmul.mubr.msk.f32.gmra.mrb[60].mxu1 %vm1018_vm0, %v3817_v39  ;;  %17739 = vmatmul.mubr.msk.f32.gmra.mrb[120].mxu0 %vm1018_vm0, %v9266_v31  ;;  %v10516_v39 = vld [vmem:[#allocation2 + $0x141] sm:$0xff] }
 0x2dd   : > { %16875 = vmatprep.mubr.msk.f32.mxu1 %vm1018_vm0, %v3818_v34  ;;  %17741 = vmatprep.mubr.msk.f32.mxu0 %vm1018_vm0, %v9267_v3  ;;  %v3849_v31 = vld [vmem:[#allocation2 + $0x3a2] sm:$0xff]  ;;  %v3850_v3 = vld [vmem:[#allocation2 + $0x3aa] sm:$0xff] }
 0x2de   : > { %v10517_v34 = vld [vmem:[#allocation2 + $0x149] sm:$0xff] }
 0x2e0   : > { %16876 = vmatmul.mubr.msk.f32.gmra.mrb[62].mxu1 %vm1018_vm0, %v3819_v2  ;;  %17742 = vmatmul.mubr.msk.f32.gmra.mrb[122].mxu0 %vm1018_vm0, %v9268_v49  ;;  %v10518_v2 = vld [vmem:[#allocation2 + $0x151] sm:$0xff] }
 0x2e1   : > { %16878 = vmatprep.mubr.msk.f32.mxu1 %vm1018_vm0, %v3820_v10  ;;  %17744 = vmatprep.mubr.msk.f32.mxu0 %vm1018_vm0, %v9269_v21  ;;  %v3851_v49 = vld [vmem:[#allocation2 + $0x3b2] sm:$0xff]  ;;  %v3852_v21 = vld [vmem:[#allocation2 + $0x3c2] sm:$0xff] }
 0x2e2   : > { %v10519_v10 = vld [vmem:[#allocation2 + $0x159] sm:$0xff] }
 0x2e4   : > { %16879 = vmatmul.mubr.msk.f32.gmra.mrb[64].mxu1 %vm1018_vm0, %v3821_v45  ;;  %17745 = vmatmul.mubr.msk.f32.gmra.mrb[124].mxu0 %vm1018_vm0, %v9270_v51  ;;  %v10520_v45 = vld [vmem:[#allocation2 + $0x169] sm:$0xff] }
 0x2e5   : > { %16881 = vmatprep.mubr.msk.f32.mxu1 %vm1018_vm0, %v3822_v53  ;;  %17747 = vmatprep.mubr.msk.f32.mxu0 %vm1018_vm0, %v9271_v55  ;;  %v3853_v51 = vld [vmem:[#allocation2 + $0x3ca] sm:$0xff]  ;;  %v3854_v55 = vld [vmem:[#allocation2 + $0x3d2] sm:$0xff] }
 0x2e6   : > { %v10521_v53 = vld [vmem:[#allocation2 + $0x171] sm:$0xff] }
 0x2e8   : > { %16882 = vmatmul.mubr.msk.f32.gmra.mrb[66].mxu1 %vm1018_vm0, %v3823_v58  ;;  %17748 = vmatmul.mubr.msk.f32.gmra.mrb[126].mxu0 %vm1018_vm0, %v9272_v59  ;;  %v10522_v58 = vld [vmem:[#allocation2 + $0x179] sm:$0xff] }
 0x2e9   : > { %16884 = vmatprep.mubr.msk.f32.mxu1 %vm1018_vm0, %v3824_v61  ;;  %17752 = vmatprep.mubr.msk.f32.mxu0 %vm1018_vm0, %v10492_v63  ;;  %v3855_v59 = vld [vmem:[#allocation2 + $0x3da] sm:$0xff]  ;;  %v3856_v63 = vld [vmem:[#allocation2 + $0x3ea] sm:$0xff] }
 0x2ea   : > { %v10523_v61 = vld [vmem:[#allocation2 + $0x181] sm:$0xff] }
 0x2ec   : > { %16885 = vmatmul.mubr.msk.f32.gmra.mrb[68].mxu1 %vm1018_vm0, %v3825_v1  ;;  %17753 = vmatmul.mubr.msk.f32.vlgmr.msra.gmra.mrb[0].mxu0 %vm1018_vm0, %v10493_v7  ;;  %v10524_v1 = vld [vmem:[#allocation2 + $0x191] sm:$0xff] }
 0x2ed   : > { %17945 = vmatpush3.msra.mxu0 %v21170_v18  ;;  %16887 = vmatprep.mubr.msk.f32.mxu1 %vm1018_vm0, %v3826_v9  ;;  %v10498_v18 = vld [vmem:[#allocation2 + $0x89] sm:$0xff]  ;;  %v3857_v7 = vld [vmem:[#allocation2 + $0x3f2] sm:$0xff] }
 0x2ee   : > { %17755 = vmatprep.mubr.msk.f32.mxu0 %vm1018_vm0, %v10494_v11  ;;  %v10525_v9 = vld [vmem:[#allocation2 + $0x199] sm:$0xff] }
 0x2ef   : > { %v3858_v11 = vld [vmem:[#allocation2 + $0x3fa] sm:$0xff] }
 0x2f0   : > { %16888 = vmatmul.mubr.msk.f32.gmra.mrb[70].mxu1 %vm1018_vm0, %v3827_v13  ;;  %17756 = vmatmul.mubr.msk.f32.gmra.mrb[2].mxu0 %vm1018_vm0, %v10495_v15  ;;  %v10526_v13 = vld [vmem:[#allocation2 + $0x1a1] sm:$0xff] }
 0x2f1   : > { %16890 = vmatprep.mubr.msk.f32.mxu1 %vm1018_vm0, %v3828_v17  ;;  %17758 = vmatprep.mubr.msk.f32.mxu0 %vm1018_vm0, %v10496_v19  ;;  %v3859_v15 = vld [vmem:[#allocation2 + $0x402] sm:$0xff]  ;;  %v3860_v19 = vld [vmem:[#allocation2 + $0x412] sm:$0xff] }
 0x2f2   : > { %v10527_v17 = vld [vmem:[#allocation2 + $0x1a9] sm:$0xff] }
 0x2f4   : > { %16891 = vmatmul.mubr.msk.f32.gmra.mrb[72].mxu1 %vm1018_vm0, %v3829_v20  ;;  %17759 = vmatmul.mubr.msk.f32.gmra.mrb[4].mxu0 %vm1018_vm0, %v10497_v22  ;;  %v10528_v20 = vld [vmem:[#allocation2 + $0x1b9] sm:$0xff] }
 0x2f5   : > { %16893 = vmatprep.mubr.msk.f32.mxu1 %vm1018_vm0, %v3830_v24  ;;  %17761 = vmatprep.mubr.msk.f32.mxu0 %vm1018_vm0, %v10498_v18  ;;  %v3861_v22 = vld [vmem:[#allocation2 + $0x41a] sm:$0xff]  ;;  %v3862_v18 = vld [vmem:[#allocation2 + $0x422] sm:$0xff] }
 0x2f6   : > { %v10529_v24 = vld [vmem:[#allocation2 + $0x1c1] sm:$0xff] }
 0x2f8   : > { %16894 = vmatmul.mubr.msk.f32.gmra.mrb[74].mxu1 %vm1018_vm0, %v3831_v26  ;;  %17762 = vmatmul.mubr.msk.f32.gmra.mrb[6].mxu0 %vm1018_vm0, %v10499_v28  ;;  %v10530_v26 = vld [vmem:[#allocation2 + $0x1c9] sm:$0xff] }
 0x2f9   : > { %16896 = vmatprep.mubr.msk.f32.mxu1 %vm1018_vm0, %v3832_v56  ;;  %17764 = vmatprep.mubr.msk.f32.mxu0 %vm1018_vm0, %v10500_v30  ;;  %v3863_v28 = vld [vmem:[#allocation2 + $0x42a] sm:$0xff]  ;;  %v3864_v30 = vld [vmem:[#allocation2 + $0x43a] sm:$0xff] }
 0x2fa   : > { %v10531_v56 = vld [vmem:[#allocation2 + $0x1d1] sm:$0xff] }
 0x2fc   : > { %16897 = vmatmul.mubr.msk.f32.gmra.mrb[76].mxu1 %vm1018_vm0, %v3833_v4  ;;  %17765 = vmatmul.mubr.msk.f32.gmra.mrb[8].mxu0 %vm1018_vm0, %v10501_v33  ;;  %v10532_v4 = vld [vmem:[#allocation2 + $0x1e1] sm:$0xff] }
 0x2fd   : > { %16899 = vmatprep.mubr.msk.f32.mxu1 %vm1018_vm0, %v3834_v35  ;;  %17767 = vmatprep.mubr.msk.f32.mxu0 %vm1018_vm0, %v10502_v38  ;;  %v3865_v33 = vld [vmem:[#allocation2 + $0x442] sm:$0xff]  ;;  %v3866_v38 = vld [vmem:[#allocation2 + $0x44a] sm:$0xff] }
 0x2fe   : > { %v10533_v35 = vld [vmem:[#allocation2 + $0x1e9] sm:$0xff] }
 0x300   : > { %16900 = vmatmul.mubr.msk.f32.gmra.mrb[78].mxu1 %vm1018_vm0, %v3835_v40  ;;  %17768 = vmatmul.mubr.msk.f32.gmra.mrb[10].mxu0 %vm1018_vm0, %v10503_v42  ;;  %v10534_v40 = vld [vmem:[#allocation2 + $0x1f1] sm:$0xff] }
 0x301   : > { %16902 = vmatprep.mubr.msk.f32.mxu1 %vm1018_vm0, %v3836_v44  ;;  %17770 = vmatprep.mubr.msk.f32.mxu0 %vm1018_vm0, %v10504_v47  ;;  %v3867_v42 = vld [vmem:[#allocation2 + $0x452] sm:$0xff]  ;;  %v3868_v47 = vld [vmem:[#allocation2 + $0x462] sm:$0xff] }
 0x302   : > { %v10535_v44 = vld [vmem:[#allocation2 + $0x1f9] sm:$0xff] }
 0x304   : > { %16903 = vmatmul.mubr.msk.f32.gmra.mrb[80].mxu1 %vm1018_vm0, %v3837_v48  ;;  %17771 = vmatmul.mubr.msk.f32.gmra.mrb[12].mxu0 %vm1018_vm0, %v10505_v52  ;;  %v10536_v48 = vld [vmem:[#allocation2 + $0x209] sm:$0xff] }
 0x305   : > { %16905 = vmatprep.mubr.msk.f32.mxu1 %vm1018_vm0, %v3838_v57  ;;  %17773 = vmatprep.mubr.msk.f32.mxu0 %vm1018_vm0, %v10506_v60  ;;  %v3869_v52 = vld [vmem:[#allocation2 + $0x46a] sm:$0xff]  ;;  %v3870_v60 = vld [vmem:[#allocation2 + $0x472] sm:$0xff] }
 0x306   : > { %v10537_v57 = vld [vmem:[#allocation2 + $0x211] sm:$0xff] }
 0x308   : > { %16906 = vmatmul.mubr.msk.f32.gmra.mrb[82].mxu1 %vm1018_vm0, %v3839_v0  ;;  %17774 = vmatmul.mubr.msk.f32.gmra.mrb[14].mxu0 %vm1018_vm0, %v10507_v8  ;;  %v10538_v0 = vld [vmem:[#allocation2 + $0x219] sm:$0xff] }
 0x309   : > { %16908 = vmatprep.mubr.msk.f32.mxu1 %vm1018_vm0, %v3840_v12  ;;  %17776 = vmatprep.mubr.msk.f32.mxu0 %vm1018_vm0, %v10508_v16  ;;  %v3871_v8 = vld [vmem:[#allocation2 + $0x47a] sm:$0xff]  ;;  %v3872_v16 = vld [vmem:[#allocation2 + $0x48a] sm:$0xff] }
 0x30a   : > { %v10539_v12 = vld [vmem:[#allocation2 + $0x221] sm:$0xff] }
 0x30c   : > { %16909 = vmatmul.mubr.msk.f32.gmra.mrb[84].mxu1 %vm1018_vm0, %v3841_v5  ;;  %17777 = vmatmul.mubr.msk.f32.gmra.mrb[16].mxu0 %vm1018_vm0, %v10509_v23  ;;  %v10540_v5 = vld [vmem:[#allocation2 + $0x231] sm:$0xff] }
 0x30d   : > { %16911 = vmatprep.mubr.msk.f32.mxu1 %vm1018_vm0, %v3842_v27  ;;  %17779 = vmatprep.mubr.msk.f32.mxu0 %vm1018_vm0, %v10510_v29  ;;  %v3873_v23 = vld [vmem:[#allocation2 + $0x492] sm:$0xff]  ;;  %v3874_v29 = vld [vmem:[#allocation2 + $0x49a] sm:$0xff] }
 0x30e   : > { %v10541_v27 = vld [vmem:[#allocation2 + $0x239] sm:$0xff] }
 0x310   : > { %16912 = vmatmul.mubr.msk.f32.gmra.mrb[86].mxu1 %vm1018_vm0, %v3843_v32  ;;  %17780 = vmatmul.mubr.msk.f32.gmra.mrb[18].mxu0 %vm1018_vm0, %v10511_v36  ;;  %v10542_v32 = vld [vmem:[#allocation2 + $0x241] sm:$0xff] }
 0x311   : > { %16914 = vmatprep.mubr.msk.f32.mxu1 %vm1018_vm0, %v3844_v41  ;;  %17782 = vmatprep.mubr.msk.f32.mxu0 %vm1018_vm0, %v10512_v54  ;;  %v3875_v36 = vld [vmem:[#allocation2 + $0x4a2] sm:$0xff]  ;;  %v3876_v54 = vld [vmem:[#allocation2 + $0x4b2] sm:$0xff] }
 0x312   : > { %v10543_v41 = vld [vmem:[#allocation2 + $0x249] sm:$0xff] }
 0x314   : > { %16915 = vmatmul.mubr.msk.f32.gmra.mrb[88].mxu1 %vm1018_vm0, %v3845_v46  ;;  %17783 = vmatmul.mubr.msk.f32.gmra.mrb[20].mxu0 %vm1018_vm0, %v10513_v50  ;;  %v10544_v46 = vld [vmem:[#allocation2 + $0x259] sm:$0xff] }
 0x315   : > { %16917 = vmatprep.mubr.msk.f32.mxu1 %vm1018_vm0, %v3846_v25  ;;  %17785 = vmatprep.mubr.msk.f32.mxu0 %vm1018_vm0, %v10514_v37  ;;  %v3877_v50 = vld [vmem:[#allocation2 + $0x4ba] sm:$0xff]  ;;  %v3878_v37 = vld [vmem:[#allocation2 + $0x4c2] sm:$0xff] }
 0x316   : > { %v10545_v25 = vld [vmem:[#allocation2 + $0x261] sm:$0xff] }
 0x318   : > { %16918 = vmatmul.mubr.msk.f32.gmra.mrb[90].mxu1 %vm1018_vm0, %v3847_v6  ;;  %17786 = vmatmul.mubr.msk.f32.gmra.mrb[22].mxu0 %vm1018_vm0, %v10515_v14  ;;  %v10546_v6 = vld [vmem:[#allocation2 + $0x269] sm:$0xff] }
 0x319   : > { %16920 = vmatprep.mubr.msk.f32.mxu1 %vm1018_vm0, %v3848_v43  ;;  %17788 = vmatprep.mubr.msk.f32.mxu0 %vm1018_vm0, %v10516_v39  ;;  %v3879_v14 = vld [vmem:[#allocation2 + $0x4ca] sm:$0xff]  ;;  %v3880_v39 = vld [vmem:[#allocation2 + $0x4da] sm:$0xff] }
 0x31a   : > { %v10547_v43 = vld [vmem:[#allocation2 + $0x271] sm:$0xff] }
 0x31c   : > { %16921 = vmatmul.mubr.msk.f32.gmra.mrb[92].mxu1 %vm1018_vm0, %v3849_v31  ;;  %17789 = vmatmul.mubr.msk.f32.gmra.mrb[24].mxu0 %vm1018_vm0, %v10517_v34  ;;  %v10548_v31 = vld [vmem:[#allocation2 + $0x281] sm:$0xff] }
 0x31d   : > { %16923 = vmatprep.mubr.msk.f32.mxu1 %vm1018_vm0, %v3850_v3  ;;  %17791 = vmatprep.mubr.msk.f32.mxu0 %vm1018_vm0, %v10518_v2  ;;  %v3881_v34 = vld [vmem:[#allocation2 + $0x4e2] sm:$0xff]  ;;  %v3882_v2 = vld [vmem:[#allocation2 + $0x4ea] sm:$0xff] }
 0x31e   : > { %v10549_v3 = vld [vmem:[#allocation2 + $0x289] sm:$0xff] }
 0x320   : > { %16924 = vmatmul.mubr.msk.f32.gmra.mrb[94].mxu1 %vm1018_vm0, %v3851_v49  ;;  %17792 = vmatmul.mubr.msk.f32.gmra.mrb[26].mxu0 %vm1018_vm0, %v10519_v10  ;;  %v10550_v49 = vld [vmem:[#allocation2 + $0x291] sm:$0xff] }
 0x321   : > { %16926 = vmatprep.mubr.msk.f32.mxu1 %vm1018_vm0, %v3852_v21  ;;  %17794 = vmatprep.mubr.msk.f32.mxu0 %vm1018_vm0, %v10520_v45  ;;  %v3883_v10 = vld [vmem:[#allocation2 + $0x4f2] sm:$0xff]  ;;  %v5103_v45 = vld [vmem:[#allocation2 + $0x28] sm:$0xff] }
 0x322   : > { %v10551_v21 = vld [vmem:[#allocation2 + $0x299] sm:$0xff] }
 0x324   : > { %16927 = vmatmul.mubr.msk.f32.gmra.mrb[96].mxu1 %vm1018_vm0, %v3853_v51  ;;  %17795 = vmatmul.mubr.msk.f32.gmra.mrb[28].mxu0 %vm1018_vm0, %v10521_v53  ;;  %v10552_v51 = vld [vmem:[#allocation2 + $0x2a9] sm:$0xff] }
 0x325   : > { %16929 = vmatprep.mubr.msk.f32.mxu1 %vm1018_vm0, %v3854_v55  ;;  %17797 = vmatprep.mubr.msk.f32.mxu0 %vm1018_vm0, %v10522_v58  ;;  %v5104_v53 = vld [vmem:[#allocation2 + $0x30] sm:$0xff]  ;;  %v5105_v58 = vld [vmem:[#allocation2 + $0x38] sm:$0xff] }
 0x326   : > { %v10553_v55 = vld [vmem:[#allocation2 + $0x2b1] sm:$0xff] }
 0x328   : > { %16930 = vmatmul.mubr.msk.f32.gmra.mrb[98].mxu1 %vm1018_vm0, %v3855_v59  ;;  %17798 = vmatmul.mubr.msk.f32.gmra.mrb[30].mxu0 %vm1018_vm0, %v10523_v61  ;;  %v10554_v59 = vld [vmem:[#allocation2 + $0x2b9] sm:$0xff] }
 0x329   : > { %16932 = vmatprep.mubr.msk.f32.mxu1 %vm1018_vm0, %v3856_v63  ;;  %17800 = vmatprep.mubr.msk.f32.mxu0 %vm1018_vm0, %v10524_v1  ;;  %v5106_v61 = vld [vmem:[#allocation2 + $0x40] sm:$0xff]  ;;  %v5107_v1 = vld [vmem:[#allocation2 + $0x50] sm:$0xff] }
 0x32a   : > { %v10555_v63 = vld [vmem:[#allocation2 + $0x2c1] sm:$0xff] }
 0x32c   : > { %16933 = vmatmul.mubr.msk.f32.gmra.mrb[100].mxu1 %vm1018_vm0, %v3857_v7  ;;  %17801 = vmatmul.mubr.msk.f32.gmra.mrb[32].mxu0 %vm1018_vm0, %v10525_v9  ;;  %v10556_v7 = vld [vmem:[#allocation2 + $0x2d1] sm:$0xff] }
 0x32d   : > { %16935 = vmatprep.mubr.msk.f32.mxu1 %vm1018_vm0, %v3858_v11  ;;  %17803 = vmatprep.mubr.msk.f32.mxu0 %vm1018_vm0, %v10526_v13  ;;  %v5108_v9 = vld [vmem:[#allocation2 + $0x58] sm:$0xff]  ;;  %v5109_v13 = vld [vmem:[#allocation2 + $0x60] sm:$0xff] }
 0x32e   : > { %v10557_v11 = vld [vmem:[#allocation2 + $0x2d9] sm:$0xff] }
 0x330   : > { %16936 = vmatmul.mubr.msk.f32.gmra.mrb[102].mxu1 %vm1018_vm0, %v3859_v15  ;;  %17804 = vmatmul.mubr.msk.f32.gmra.mrb[34].mxu0 %vm1018_vm0, %v10527_v17  ;;  %v10558_v15 = vld [vmem:[#allocation2 + $0x2e1] sm:$0xff]  ;;  %v10559_v17 = vld [vmem:[#allocation2 + $0x2e9] sm:$0xff] }
 0x331   : > { %16938 = vmatprep.mubr.msk.f32.mxu1 %vm1018_vm0, %v3860_v19  ;;  %17806 = vmatprep.mubr.msk.f32.mxu0 %vm1018_vm0, %v10528_v20  ;;  %v5111_v19 = vld [vmem:[#allocation2 + $0x78] sm:$0xff] }
 0x332   : > { %v10560_v20 = vld [vmem:[#allocation2 + $0x2f9] sm:$0xff] }
 0x334   : > { %16939 = vmatmul.mubr.msk.f32.gmra.mrb[104].mxu1 %vm1018_vm0, %v3861_v22  ;;  %17807 = vmatmul.mubr.msk.f32.gmra.mrb[36].mxu0 %vm1018_vm0, %v10529_v24  ;;  %v5112_v22 = vld [vmem:[#allocation2 + $0x80] sm:$0xff] }
 0x335   : > { %16941 = vmatprep.mubr.msk.f32.mxu1 %vm1018_vm0, %v3862_v18  ;;  %17809 = vmatprep.mubr.msk.f32.mxu0 %vm1018_vm0, %v10530_v26  ;;  %v10561_v24 = vld [vmem:[#allocation2 + $0x301] sm:$0xff]  ;;  %v10562_v26 = vld [vmem:[#allocation2 + $0x309] sm:$0xff] }
 0x336   : > { %v5113_v18 = vld [vmem:[#allocation2 + $0x88] sm:$0xff] }
 0x338   : > { %16942 = vmatmul.mubr.msk.f32.gmra.mrb[106].mxu1 %vm1018_vm0, %v3863_v28  ;;  %17810 = vmatmul.mubr.msk.f32.gmra.mrb[38].mxu0 %vm1018_vm0, %v10531_v56  ;;  %v5114_v28 = vld [vmem:[#allocation2 + $0x90] sm:$0xff] }
 0x339   : > { %16944 = vmatprep.mubr.msk.f32.mxu1 %vm1018_vm0, %v3864_v30  ;;  %17812 = vmatprep.mubr.msk.f32.mxu0 %vm1018_vm0, %v10532_v4  ;;  %v10563_v56 = vld [vmem:[#allocation2 + $0x311] sm:$0xff]  ;;  %v5115_v30 = vld [vmem:[#allocation2 + $0xa0] sm:$0xff] }
 0x33a   : > { %v10564_v4 = vld [vmem:[#allocation2 + $0x321] sm:$0xff] }
 0x33c   : > { %16945 = vmatmul.mubr.msk.f32.gmra.mrb[108].mxu1 %vm1018_vm0, %v3865_v33  ;;  %17813 = vmatmul.mubr.msk.f32.gmra.mrb[40].mxu0 %vm1018_vm0, %v10533_v35  ;;  %v5116_v33 = vld [vmem:[#allocation2 + $0xa8] sm:$0xff] }
 0x33d   : > { %16947 = vmatprep.mubr.msk.f32.mxu1 %vm1018_vm0, %v3866_v38  ;;  %17815 = vmatprep.mubr.msk.f32.mxu0 %vm1018_vm0, %v10534_v40  ;;  %v10565_v35 = vld [vmem:[#allocation2 + $0x329] sm:$0xff]  ;;  %v10566_v40 = vld [vmem:[#allocation2 + $0x331] sm:$0xff] }
 0x33e   : > { %v5117_v38 = vld [vmem:[#allocation2 + $0xb0] sm:$0xff] }
 0x340   : > { %16948 = vmatmul.mubr.msk.f32.gmra.mrb[110].mxu1 %vm1018_vm0, %v3867_v42  ;;  %17816 = vmatmul.mubr.msk.f32.gmra.mrb[42].mxu0 %vm1018_vm0, %v10535_v44  ;;  %v5118_v42 = vld [vmem:[#allocation2 + $0xb8] sm:$0xff] }
 0x341   : > { %16950 = vmatprep.mubr.msk.f32.mxu1 %vm1018_vm0, %v3868_v47  ;;  %17818 = vmatprep.mubr.msk.f32.mxu0 %vm1018_vm0, %v10536_v48  ;;  %v10567_v44 = vld [vmem:[#allocation2 + $0x339] sm:$0xff]  ;;  %v5119_v47 = vld [vmem:[#allocation2 + $0xc8] sm:$0xff] }
 0x342   : > { %v10568_v48 = vld [vmem:[#allocation2 + $0x349] sm:$0xff] }
 0x344   : > { %16951 = vmatmul.mubr.msk.f32.gmra.mrb[112].mxu1 %vm1018_vm0, %v3869_v52  ;;  %17819 = vmatmul.mubr.msk.f32.gmra.mrb[44].mxu0 %vm1018_vm0, %v10537_v57  ;;  %v5120_v52 = vld [vmem:[#allocation2 + $0xd0] sm:$0xff] }
 0x345   : > { %16953 = vmatprep.mubr.msk.f32.mxu1 %vm1018_vm0, %v3870_v60  ;;  %17821 = vmatprep.mubr.msk.f32.mxu0 %vm1018_vm0, %v10538_v0  ;;  %v10569_v57 = vld [vmem:[#allocation2 + $0x351] sm:$0xff]  ;;  %v10570_v0 = vld [vmem:[#allocation2 + $0x359] sm:$0xff] }
 0x346   : > { %v5121_v60 = vld [vmem:[#allocation2 + $0xd8] sm:$0xff] }
 0x348   : > { %16954 = vmatmul.mubr.msk.f32.gmra.mrb[114].mxu1 %vm1018_vm0, %v3871_v8  ;;  %17822 = vmatmul.mubr.msk.f32.gmra.mrb[46].mxu0 %vm1018_vm0, %v10539_v12  ;;  %v5122_v8 = vld [vmem:[#allocation2 + $0xe0] sm:$0xff] }
 0x349   : > { %16956 = vmatprep.mubr.msk.f32.mxu1 %vm1018_vm0, %v3872_v16  ;;  %17824 = vmatprep.mubr.msk.f32.mxu0 %vm1018_vm0, %v10540_v5  ;;  %v10571_v12 = vld [vmem:[#allocation2 + $0x361] sm:$0xff]  ;;  %v5123_v16 = vld [vmem:[#allocation2 + $0xf0] sm:$0xff] }
 0x34a   : > { %v10572_v5 = vld [vmem:[#allocation2 + $0x371] sm:$0xff] }
 0x34c   : > { %16957 = vmatmul.mubr.msk.f32.gmra.mrb[116].mxu1 %vm1018_vm0, %v3873_v23  ;;  %17825 = vmatmul.mubr.msk.f32.gmra.mrb[48].mxu0 %vm1018_vm0, %v10541_v27  ;;  %v5124_v23 = vld [vmem:[#allocation2 + $0xf8] sm:$0xff] }
 0x34d   : > { %16959 = vmatprep.mubr.msk.f32.mxu1 %vm1018_vm0, %v3874_v29  ;;  %17827 = vmatprep.mubr.msk.f32.mxu0 %vm1018_vm0, %v10542_v32  ;;  %v10573_v27 = vld [vmem:[#allocation2 + $0x379] sm:$0xff]  ;;  %v10574_v32 = vld [vmem:[#allocation2 + $0x381] sm:$0xff] }
 0x34e   : > { %v5125_v29 = vld [vmem:[#allocation2 + $0x100] sm:$0xff] }
 0x350   : > { %16960 = vmatmul.mubr.msk.f32.gmra.mrb[118].mxu1 %vm1018_vm0, %v3875_v36  ;;  %17828 = vmatmul.mubr.msk.f32.gmra.mrb[50].mxu0 %vm1018_vm0, %v10543_v41  ;;  %v5126_v36 = vld [vmem:[#allocation2 + $0x108] sm:$0xff] }
 0x351   : > { %16962 = vmatprep.mubr.msk.f32.mxu1 %vm1018_vm0, %v3876_v54  ;;  %17830 = vmatprep.mubr.msk.f32.mxu0 %vm1018_vm0, %v10544_v46  ;;  %v10575_v41 = vld [vmem:[#allocation2 + $0x389] sm:$0xff]  ;;  %v5127_v54 = vld [vmem:[#allocation2 + $0x118] sm:$0xff] }
 0x352   : > { %v10576_v46 = vld [vmem:[#allocation2 + $0x399] sm:$0xff] }
 0x354   : > { %16963 = vmatmul.mubr.msk.f32.gmra.mrb[120].mxu1 %vm1018_vm0, %v3877_v50  ;;  %17831 = vmatmul.mubr.msk.f32.gmra.mrb[52].mxu0 %vm1018_vm0, %v10545_v25  ;;  %v5128_v50 = vld [vmem:[#allocation2 + $0x120] sm:$0xff] }
 0x355   : > { %16965 = vmatprep.mubr.msk.f32.mxu1 %vm1018_vm0, %v3878_v37  ;;  %17833 = vmatprep.mubr.msk.f32.mxu0 %vm1018_vm0, %v10546_v6  ;;  %v10577_v25 = vld [vmem:[#allocation2 + $0x3a1] sm:$0xff]  ;;  %v10578_v6 = vld [vmem:[#allocation2 + $0x3a9] sm:$0xff] }
 0x356   : > { %v5129_v37 = vld [vmem:[#allocation2 + $0x128] sm:$0xff] }
 0x358   : > { %16966 = vmatmul.mubr.msk.f32.gmra.mrb[122].mxu1 %vm1018_vm0, %v3879_v14  ;;  %17834 = vmatmul.mubr.msk.f32.gmra.mrb[54].mxu0 %vm1018_vm0, %v10547_v43  ;;  %v5130_v14 = vld [vmem:[#allocation2 + $0x130] sm:$0xff] }
 0x359   : > { %16968 = vmatprep.mubr.msk.f32.mxu1 %vm1018_vm0, %v3880_v39  ;;  %17836 = vmatprep.mubr.msk.f32.mxu0 %vm1018_vm0, %v10548_v31  ;;  %v10579_v43 = vld [vmem:[#allocation2 + $0x3b1] sm:$0xff]  ;;  %v5131_v39 = vld [vmem:[#allocation2 + $0x140] sm:$0xff] }
 0x35a   : > { %v10580_v31 = vld [vmem:[#allocation2 + $0x3c1] sm:$0xff] }
 0x35c   : > { %16969 = vmatmul.mubr.msk.f32.gmra.mrb[124].mxu1 %vm1018_vm0, %v3881_v34  ;;  %17837 = vmatmul.mubr.msk.f32.gmra.mrb[56].mxu0 %vm1018_vm0, %v10549_v3  ;;  %v5132_v34 = vld [vmem:[#allocation2 + $0x148] sm:$0xff] }
 0x35d   : > { %16971 = vmatprep.mubr.msk.f32.mxu1 %vm1018_vm0, %v3882_v2  ;;  %17839 = vmatprep.mubr.msk.f32.mxu0 %vm1018_vm0, %v10550_v49  ;;  %v10581_v3 = vld [vmem:[#allocation2 + $0x3c9] sm:$0xff]  ;;  %v10582_v49 = vld [vmem:[#allocation2 + $0x3d1] sm:$0xff] }
 0x35e   : > { %v5133_v2 = vld [vmem:[#allocation2 + $0x150] sm:$0xff] }
 0x360   : > { %16972 = vmatmul.mubr.msk.f32.gmra.mrb[126].mxu1 %vm1018_vm0, %v3883_v10  ;;  %17840 = vmatmul.mubr.msk.f32.gmra.mrb[58].mxu0 %vm1018_vm0, %v10551_v21  ;;  %v5134_v10 = vld [vmem:[#allocation2 + $0x158] sm:$0xff] }
 0x361   : > { %16976 = vmatprep.mubr.msk.f32.mxu1 %vm1018_vm0, %v5103_v45  ;;  %17842 = vmatprep.mubr.msk.f32.mxu0 %vm1018_vm0, %v10552_v51  ;;  %v10583_v21 = vld [vmem:[#allocation2 + $0x3d9] sm:$0xff]  ;;  %v5135_v45 = vld [vmem:[#allocation2 + $0x168] sm:$0xff] }
 0x362   : > { %v10584_v51 = vld [vmem:[#allocation2 + $0x3e9] sm:$0xff] }
 0x364   : > { %16977 = vmatmul.mubr.msk.f32.vlgmr.msra.gmra.mrb[0].mxu1 %vm1018_vm0, %v5104_v53  ;;  %17843 = vmatmul.mubr.msk.f32.gmra.mrb[60].mxu0 %vm1018_vm0, %v10553_v55  ;;  %v5136_v53 = vld [vmem:[#allocation2 + $0x170] sm:$0xff] }
 0x365   : > { %16979 = vmatprep.mubr.msk.f32.mxu1 %vm1018_vm0, %v5105_v58  ;;  %17845 = vmatprep.mubr.msk.f32.mxu0 %vm1018_vm0, %v10554_v59  ;;  %v10585_v55 = vld [vmem:[#allocation2 + $0x3f1] sm:$0xff]  ;;  %v10586_v59 = vld [vmem:[#allocation2 + $0x3f9] sm:$0xff] }
 0x366   : > { %18139 = vmatpush3.msra.mxu1 %v21158_v62  ;;  %v5110_v62 = vld [vmem:[#allocation2 + $0x68] sm:$0xff]  ;;  %v5137_v58 = vld [vmem:[#allocation2 + $0x178] sm:$0xff] }
 0x368   : > { %16980 = vmatmul.mubr.msk.f32.gmra.mrb[2].mxu1 %vm1018_vm0, %v5106_v61  ;;  %17846 = vmatmul.mubr.msk.f32.gmra.mrb[62].mxu0 %vm1018_vm0, %v10555_v63  ;;  %v5138_v61 = vld [vmem:[#allocation2 + $0x180] sm:$0xff] }
 0x369   : > { %16982 = vmatprep.mubr.msk.f32.mxu1 %vm1018_vm0, %v5107_v1  ;;  %17848 = vmatprep.mubr.msk.f32.mxu0 %vm1018_vm0, %v10556_v7  ;;  %v10587_v63 = vld [vmem:[#allocation2 + $0x401] sm:$0xff]  ;;  %v5139_v1 = vld [vmem:[#allocation2 + $0x190] sm:$0xff] }
 0x36a   : > { %v10588_v7 = vld [vmem:[#allocation2 + $0x411] sm:$0xff] }
 0x36c   : > { %16983 = vmatmul.mubr.msk.f32.gmra.mrb[4].mxu1 %vm1018_vm0, %v5108_v9  ;;  %17849 = vmatmul.mubr.msk.f32.gmra.mrb[64].mxu0 %vm1018_vm0, %v10557_v11  ;;  %v5140_v9 = vld [vmem:[#allocation2 + $0x198] sm:$0xff] }
 0x36d   : > { %16985 = vmatprep.mubr.msk.f32.mxu1 %vm1018_vm0, %v5109_v13  ;;  %17851 = vmatprep.mubr.msk.f32.mxu0 %vm1018_vm0, %v10558_v15  ;;  %v10589_v11 = vld [vmem:[#allocation2 + $0x419] sm:$0xff]  ;;  %v10590_v15 = vld [vmem:[#allocation2 + $0x421] sm:$0xff] }
 0x36e   : > { %v5141_v13 = vld [vmem:[#allocation2 + $0x1a0] sm:$0xff] }
 0x370   : > { %16986 = vmatmul.mubr.msk.f32.gmra.mrb[6].mxu1 %vm1018_vm0, %v5110_v62  ;;  %17852 = vmatmul.mubr.msk.f32.gmra.mrb[66].mxu0 %vm1018_vm0, %v10559_v17  ;;  %v5142_v62 = vld [vmem:[#allocation2 + $0x1a8] sm:$0xff] }
 0x371   : > { %16988 = vmatprep.mubr.msk.f32.mxu1 %vm1018_vm0, %v5111_v19  ;;  %17854 = vmatprep.mubr.msk.f32.mxu0 %vm1018_vm0, %v10560_v20  ;;  %v10591_v17 = vld [vmem:[#allocation2 + $0x429] sm:$0xff]  ;;  %v5143_v19 = vld [vmem:[#allocation2 + $0x1b8] sm:$0xff] }
 0x372   : > { %v10592_v20 = vld [vmem:[#allocation2 + $0x439] sm:$0xff] }
 0x374   : > { %16989 = vmatmul.mubr.msk.f32.gmra.mrb[8].mxu1 %vm1018_vm0, %v5112_v22  ;;  %17855 = vmatmul.mubr.msk.f32.gmra.mrb[68].mxu0 %vm1018_vm0, %v10561_v24  ;;  %v5144_v22 = vld [vmem:[#allocation2 + $0x1c0] sm:$0xff] }
 0x375   : > { %16991 = vmatprep.mubr.msk.f32.mxu1 %vm1018_vm0, %v5113_v18  ;;  %17857 = vmatprep.mubr.msk.f32.mxu0 %vm1018_vm0, %v10562_v26  ;;  %v10593_v24 = vld [vmem:[#allocation2 + $0x441] sm:$0xff]  ;;  %v10594_v26 = vld [vmem:[#allocation2 + $0x449] sm:$0xff] }
 0x376   : > { %v5145_v18 = vld [vmem:[#allocation2 + $0x1c8] sm:$0xff] }
 0x378   : > { %16992 = vmatmul.mubr.msk.f32.gmra.mrb[10].mxu1 %vm1018_vm0, %v5114_v28  ;;  %17858 = vmatmul.mubr.msk.f32.gmra.mrb[70].mxu0 %vm1018_vm0, %v10563_v56  ;;  %v5146_v28 = vld [vmem:[#allocation2 + $0x1d0] sm:$0xff] }
 0x379   : > { %16994 = vmatprep.mubr.msk.f32.mxu1 %vm1018_vm0, %v5115_v30  ;;  %17860 = vmatprep.mubr.msk.f32.mxu0 %vm1018_vm0, %v10564_v4  ;;  %v10595_v56 = vld [vmem:[#allocation2 + $0x451] sm:$0xff]  ;;  %v5147_v30 = vld [vmem:[#allocation2 + $0x1e0] sm:$0xff] }
 0x37a   : > { %v10596_v4 = vld [vmem:[#allocation2 + $0x461] sm:$0xff] }
 0x37c   : > { %16995 = vmatmul.mubr.msk.f32.gmra.mrb[12].mxu1 %vm1018_vm0, %v5116_v33  ;;  %17861 = vmatmul.mubr.msk.f32.gmra.mrb[72].mxu0 %vm1018_vm0, %v10565_v35  ;;  %v5148_v33 = vld [vmem:[#allocation2 + $0x1e8] sm:$0xff] }
 0x37d   : > { %16997 = vmatprep.mubr.msk.f32.mxu1 %vm1018_vm0, %v5117_v38  ;;  %17863 = vmatprep.mubr.msk.f32.mxu0 %vm1018_vm0, %v10566_v40  ;;  %v10597_v35 = vld [vmem:[#allocation2 + $0x469] sm:$0xff]  ;;  %v10598_v40 = vld [vmem:[#allocation2 + $0x471] sm:$0xff] }
 0x37e   : > { %v5149_v38 = vld [vmem:[#allocation2 + $0x1f0] sm:$0xff] }
 0x380   : > { %16998 = vmatmul.mubr.msk.f32.gmra.mrb[14].mxu1 %vm1018_vm0, %v5118_v42  ;;  %17864 = vmatmul.mubr.msk.f32.gmra.mrb[74].mxu0 %vm1018_vm0, %v10567_v44  ;;  %v5150_v42 = vld [vmem:[#allocation2 + $0x1f8] sm:$0xff] }
 0x381   : > { %17000 = vmatprep.mubr.msk.f32.mxu1 %vm1018_vm0, %v5119_v47  ;;  %17866 = vmatprep.mubr.msk.f32.mxu0 %vm1018_vm0, %v10568_v48  ;;  %v10599_v44 = vld [vmem:[#allocation2 + $0x479] sm:$0xff]  ;;  %v5151_v47 = vld [vmem:[#allocation2 + $0x208] sm:$0xff] }
 0x382   : > { %v10600_v48 = vld [vmem:[#allocation2 + $0x489] sm:$0xff] }
 0x384   : > { %17001 = vmatmul.mubr.msk.f32.gmra.mrb[16].mxu1 %vm1018_vm0, %v5120_v52  ;;  %17867 = vmatmul.mubr.msk.f32.gmra.mrb[76].mxu0 %vm1018_vm0, %v10569_v57  ;;  %v5152_v52 = vld [vmem:[#allocation2 + $0x210] sm:$0xff] }
 0x385   : > { %17003 = vmatprep.mubr.msk.f32.mxu1 %vm1018_vm0, %v5121_v60  ;;  %17869 = vmatprep.mubr.msk.f32.mxu0 %vm1018_vm0, %v10570_v0  ;;  %v10601_v57 = vld [vmem:[#allocation2 + $0x491] sm:$0xff]  ;;  %v10602_v0 = vld [vmem:[#allocation2 + $0x499] sm:$0xff] }
 0x386   : > { %v5153_v60 = vld [vmem:[#allocation2 + $0x218] sm:$0xff] }
 0x388   : > { %17004 = vmatmul.mubr.msk.f32.gmra.mrb[18].mxu1 %vm1018_vm0, %v5122_v8  ;;  %17870 = vmatmul.mubr.msk.f32.gmra.mrb[78].mxu0 %vm1018_vm0, %v10571_v12  ;;  %v5154_v8 = vld [vmem:[#allocation2 + $0x220] sm:$0xff] }
 0x389   : > { %17006 = vmatprep.mubr.msk.f32.mxu1 %vm1018_vm0, %v5123_v16  ;;  %17872 = vmatprep.mubr.msk.f32.mxu0 %vm1018_vm0, %v10572_v5  ;;  %v10603_v12 = vld [vmem:[#allocation2 + $0x4a1] sm:$0xff]  ;;  %v5155_v16 = vld [vmem:[#allocation2 + $0x230] sm:$0xff] }
 0x38a   : > { %v10604_v5 = vld [vmem:[#allocation2 + $0x4b1] sm:$0xff] }
 0x38c   : > { %17007 = vmatmul.mubr.msk.f32.gmra.mrb[20].mxu1 %vm1018_vm0, %v5124_v23  ;;  %17873 = vmatmul.mubr.msk.f32.gmra.mrb[80].mxu0 %vm1018_vm0, %v10573_v27  ;;  %v5156_v23 = vld [vmem:[#allocation2 + $0x238] sm:$0xff] }
 0x38d   : > { %17009 = vmatprep.mubr.msk.f32.mxu1 %vm1018_vm0, %v5125_v29  ;;  %17875 = vmatprep.mubr.msk.f32.mxu0 %vm1018_vm0, %v10574_v32  ;;  %v10605_v27 = vld [vmem:[#allocation2 + $0x4b9] sm:$0xff]  ;;  %v10606_v32 = vld [vmem:[#allocation2 + $0x4c1] sm:$0xff] }
 0x38e   : > { %v5157_v29 = vld [vmem:[#allocation2 + $0x240] sm:$0xff] }
 0x390   : > { %17010 = vmatmul.mubr.msk.f32.gmra.mrb[22].mxu1 %vm1018_vm0, %v5126_v36  ;;  %17876 = vmatmul.mubr.msk.f32.gmra.mrb[82].mxu0 %vm1018_vm0, %v10575_v41  ;;  %v5158_v36 = vld [vmem:[#allocation2 + $0x248] sm:$0xff] }
 0x391   : > { %17012 = vmatprep.mubr.msk.f32.mxu1 %vm1018_vm0, %v5127_v54  ;;  %17878 = vmatprep.mubr.msk.f32.mxu0 %vm1018_vm0, %v10576_v46  ;;  %v10607_v41 = vld [vmem:[#allocation2 + $0x4c9] sm:$0xff]  ;;  %v5159_v54 = vld [vmem:[#allocation2 + $0x258] sm:$0xff] }
 0x392   : > { %v10608_v46 = vld [vmem:[#allocation2 + $0x4d9] sm:$0xff] }
 0x394   : > { %17013 = vmatmul.mubr.msk.f32.gmra.mrb[24].mxu1 %vm1018_vm0, %v5128_v50  ;;  %17879 = vmatmul.mubr.msk.f32.gmra.mrb[84].mxu0 %vm1018_vm0, %v10577_v25  ;;  %v5160_v50 = vld [vmem:[#allocation2 + $0x260] sm:$0xff] }
 0x395   : > { %17015 = vmatprep.mubr.msk.f32.mxu1 %vm1018_vm0, %v5129_v37  ;;  %17881 = vmatprep.mubr.msk.f32.mxu0 %vm1018_vm0, %v10578_v6  ;;  %v10609_v25 = vld [vmem:[#allocation2 + $0x4e1] sm:$0xff]  ;;  %v10610_v6 = vld [vmem:[#allocation2 + $0x4e9] sm:$0xff] }
 0x396   : > { %v5161_v37 = vld [vmem:[#allocation2 + $0x268] sm:$0xff] }
 0x398   : > { %17016 = vmatmul.mubr.msk.f32.gmra.mrb[26].mxu1 %vm1018_vm0, %v5130_v14  ;;  %17882 = vmatmul.mubr.msk.f32.gmra.mrb[86].mxu0 %vm1018_vm0, %v10579_v43  ;;  %v5162_v14 = vld [vmem:[#allocation2 + $0x270] sm:$0xff] }
 0x399   : > { %17018 = vmatprep.mubr.msk.f32.mxu1 %vm1018_vm0, %v5131_v39  ;;  %17884 = vmatprep.mubr.msk.f32.mxu0 %vm1018_vm0, %v10580_v31  ;;  %v10611_v43 = vld [vmem:[#allocation2 + $0x4f1] sm:$0xff]  ;;  %v5163_v39 = vld [vmem:[#allocation2 + $0x280] sm:$0xff] }
 0x39a   : > { %v10612_v31 = vld [vmem:[#allocation2 + $0x501] sm:$0xff] }
 0x39c   : > { %17019 = vmatmul.mubr.msk.f32.gmra.mrb[28].mxu1 %vm1018_vm0, %v5132_v34  ;;  %17885 = vmatmul.mubr.msk.f32.gmra.mrb[88].mxu0 %vm1018_vm0, %v10581_v3  ;;  %v5164_v34 = vld [vmem:[#allocation2 + $0x288] sm:$0xff] }
 0x39d   : > { %17021 = vmatprep.mubr.msk.f32.mxu1 %vm1018_vm0, %v5133_v2  ;;  %17887 = vmatprep.mubr.msk.f32.mxu0 %vm1018_vm0, %v10582_v49  ;;  %v10613_v3 = vld [vmem:[#allocation2 + $0x509] sm:$0xff]  ;;  %v10614_v49 = vld [vmem:[#allocation2 + $0x511] sm:$0xff] }
 0x39e   : > { %v5165_v2 = vld [vmem:[#allocation2 + $0x290] sm:$0xff] }
 0x3a0   : > { %17022 = vmatmul.mubr.msk.f32.gmra.mrb[30].mxu1 %vm1018_vm0, %v5134_v10  ;;  %17888 = vmatmul.mubr.msk.f32.gmra.mrb[90].mxu0 %vm1018_vm0, %v10583_v21  ;;  %v5166_v10 = vld [vmem:[#allocation2 + $0x298] sm:$0xff] }
 0x3a1   : > { %17024 = vmatprep.mubr.msk.f32.mxu1 %vm1018_vm0, %v5135_v45  ;;  %17890 = vmatprep.mubr.msk.f32.mxu0 %vm1018_vm0, %v10584_v51  ;;  %v10615_v21 = vld [vmem:[#allocation2 + $0x519] sm:$0xff]  ;;  %v5167_v45 = vld [vmem:[#allocation2 + $0x2a8] sm:$0xff] }
 0x3a2   : > { %v10616_v51 = vld [vmem:[#allocation2 + $0x529] sm:$0xff] }
 0x3a4   : > { %17025 = vmatmul.mubr.msk.f32.gmra.mrb[32].mxu1 %vm1018_vm0, %v5136_v53  ;;  %17891 = vmatmul.mubr.msk.f32.gmra.mrb[92].mxu0 %vm1018_vm0, %v10585_v55  ;;  %v5168_v53 = vld [vmem:[#allocation2 + $0x2b0] sm:$0xff] }
 0x3a5   : > { %17027 = vmatprep.mubr.msk.f32.mxu1 %vm1018_vm0, %v5137_v58  ;;  %17893 = vmatprep.mubr.msk.f32.mxu0 %vm1018_vm0, %v10586_v59  ;;  %v10617_v55 = vld [vmem:[#allocation2 + $0x531] sm:$0xff]  ;;  %v10618_v59 = vld [vmem:[#allocation2 + $0x539] sm:$0xff] }
 0x3a6   : > { %v5169_v58 = vld [vmem:[#allocation2 + $0x2b8] sm:$0xff] }
 0x3a8   : > { %17028 = vmatmul.mubr.msk.f32.gmra.mrb[34].mxu1 %vm1018_vm0, %v5138_v61  ;;  %17894 = vmatmul.mubr.msk.f32.gmra.mrb[94].mxu0 %vm1018_vm0, %v10587_v63  ;;  %v5170_v61 = vld [vmem:[#allocation2 + $0x2c0] sm:$0xff] }
 0x3a9   : > { %17030 = vmatprep.mubr.msk.f32.mxu1 %vm1018_vm0, %v5139_v1  ;;  %17896 = vmatprep.mubr.msk.f32.mxu0 %vm1018_vm0, %v10588_v7  ;;  %v10619_v63 = vld [vmem:[#allocation2 + $0x541] sm:$0xff]  ;;  %v5171_v1 = vld [vmem:[#allocation2 + $0x2d0] sm:$0xff] }
 0x3aa   : > { %v11839_v7 = vld [vmem:[#allocation2 + $0x52] sm:$0xff] }
 0x3ac   : > { %17031 = vmatmul.mubr.msk.f32.gmra.mrb[36].mxu1 %vm1018_vm0, %v5140_v9  ;;  %17897 = vmatmul.mubr.msk.f32.gmra.mrb[96].mxu0 %vm1018_vm0, %v10589_v11  ;;  %v5172_v9 = vld [vmem:[#allocation2 + $0x2d8] sm:$0xff] }
 0x3ad   : > { %17033 = vmatprep.mubr.msk.f32.mxu1 %vm1018_vm0, %v5141_v13  ;;  %17899 = vmatprep.mubr.msk.f32.mxu0 %vm1018_vm0, %v10590_v15  ;;  %v11840_v11 = vld [vmem:[#allocation2 + $0x5a] sm:$0xff]  ;;  %v11841_v15 = vld [vmem:[#allocation2 + $0x62] sm:$0xff] }
 0x3ae   : > { %v5173_v13 = vld [vmem:[#allocation2 + $0x2e0] sm:$0xff] }
 0x3b0   : > { %17034 = vmatmul.mubr.msk.f32.gmra.mrb[38].mxu1 %vm1018_vm0, %v5142_v62  ;;  %17900 = vmatmul.mubr.msk.f32.gmra.mrb[98].mxu0 %vm1018_vm0, %v10591_v17  ;;  %v5174_v62 = vld [vmem:[#allocation2 + $0x2e8] sm:$0xff] }
 0x3b1   : > { %17036 = vmatprep.mubr.msk.f32.mxu1 %vm1018_vm0, %v5143_v19  ;;  %17902 = vmatprep.mubr.msk.f32.mxu0 %vm1018_vm0, %v10592_v20  ;;  %v11842_v17 = vld [vmem:[#allocation2 + $0x6a] sm:$0xff]  ;;  %v5175_v19 = vld [vmem:[#allocation2 + $0x2f8] sm:$0xff] }
 0x3b2   : > { %v11843_v20 = vld [vmem:[#allocation2 + $0x7a] sm:$0xff] }
 0x3b4   : > { %17037 = vmatmul.mubr.msk.f32.gmra.mrb[40].mxu1 %vm1018_vm0, %v5144_v22  ;;  %17903 = vmatmul.mubr.msk.f32.gmra.mrb[100].mxu0 %vm1018_vm0, %v10593_v24  ;;  %v5176_v22 = vld [vmem:[#allocation2 + $0x300] sm:$0xff] }
 0x3b5   : > { %17039 = vmatprep.mubr.msk.f32.mxu1 %vm1018_vm0, %v5145_v18  ;;  %17905 = vmatprep.mubr.msk.f32.mxu0 %vm1018_vm0, %v10594_v26  ;;  %v11844_v24 = vld [vmem:[#allocation2 + $0x82] sm:$0xff]  ;;  %v11845_v26 = vld [vmem:[#allocation2 + $0x8a] sm:$0xff] }
 0x3b6   : > { %v5177_v18 = vld [vmem:[#allocation2 + $0x308] sm:$0xff] }
 0x3b8   : > { %17040 = vmatmul.mubr.msk.f32.gmra.mrb[42].mxu1 %vm1018_vm0, %v5146_v28  ;;  %17906 = vmatmul.mubr.msk.f32.gmra.mrb[102].mxu0 %vm1018_vm0, %v10595_v56  ;;  %v5178_v28 = vld [vmem:[#allocation2 + $0x310] sm:$0xff] }
 0x3b9   : > { %17042 = vmatprep.mubr.msk.f32.mxu1 %vm1018_vm0, %v5147_v30  ;;  %17908 = vmatprep.mubr.msk.f32.mxu0 %vm1018_vm0, %v10596_v4  ;;  %v11846_v56 = vld [vmem:[#allocation2 + $0x92] sm:$0xff]  ;;  %v5179_v30 = vld [vmem:[#allocation2 + $0x320] sm:$0xff] }
 0x3ba   : > { %v11847_v4 = vld [vmem:[#allocation2 + $0xa2] sm:$0xff] }
 0x3bc   : > { %17043 = vmatmul.mubr.msk.f32.gmra.mrb[44].mxu1 %vm1018_vm0, %v5148_v33  ;;  %17909 = vmatmul.mubr.msk.f32.gmra.mrb[104].mxu0 %vm1018_vm0, %v10597_v35  ;;  %v5180_v33 = vld [vmem:[#allocation2 + $0x328] sm:$0xff] }
 0x3bd   : > { %17045 = vmatprep.mubr.msk.f32.mxu1 %vm1018_vm0, %v5149_v38  ;;  %17911 = vmatprep.mubr.msk.f32.mxu0 %vm1018_vm0, %v10598_v40  ;;  %v11848_v35 = vld [vmem:[#allocation2 + $0xaa] sm:$0xff]  ;;  %v11849_v40 = vld [vmem:[#allocation2 + $0xb2] sm:$0xff] }
 0x3be   : > { %v5181_v38 = vld [vmem:[#allocation2 + $0x330] sm:$0xff] }
 0x3c0   : > { %17046 = vmatmul.mubr.msk.f32.gmra.mrb[46].mxu1 %vm1018_vm0, %v5150_v42  ;;  %17912 = vmatmul.mubr.msk.f32.gmra.mrb[106].mxu0 %vm1018_vm0, %v10599_v44  ;;  %v5182_v42 = vld [vmem:[#allocation2 + $0x338] sm:$0xff] }
 0x3c1   : > { %17048 = vmatprep.mubr.msk.f32.mxu1 %vm1018_vm0, %v5151_v47  ;;  %17914 = vmatprep.mubr.msk.f32.mxu0 %vm1018_vm0, %v10600_v48  ;;  %v11850_v44 = vld [vmem:[#allocation2 + $0xba] sm:$0xff]  ;;  %v5183_v47 = vld [vmem:[#allocation2 + $0x348] sm:$0xff] }
 0x3c2   : > { %v11851_v48 = vld [vmem:[#allocation2 + $0xca] sm:$0xff] }
 0x3c4   : > { %17049 = vmatmul.mubr.msk.f32.gmra.mrb[48].mxu1 %vm1018_vm0, %v5152_v52  ;;  %17915 = vmatmul.mubr.msk.f32.gmra.mrb[108].mxu0 %vm1018_vm0, %v10601_v57  ;;  %v5184_v52 = vld [vmem:[#allocation2 + $0x350] sm:$0xff] }
 0x3c5   : > { %17051 = vmatprep.mubr.msk.f32.mxu1 %vm1018_vm0, %v5153_v60  ;;  %17917 = vmatprep.mubr.msk.f32.mxu0 %vm1018_vm0, %v10602_v0  ;;  %v11852_v57 = vld [vmem:[#allocation2 + $0xd2] sm:$0xff]  ;;  %v11853_v0 = vld [vmem:[#allocation2 + $0xda] sm:$0xff] }
 0x3c6   : > { %v5185_v60 = vld [vmem:[#allocation2 + $0x358] sm:$0xff] }
 0x3c8   : > { %17052 = vmatmul.mubr.msk.f32.gmra.mrb[50].mxu1 %vm1018_vm0, %v5154_v8  ;;  %17918 = vmatmul.mubr.msk.f32.gmra.mrb[110].mxu0 %vm1018_vm0, %v10603_v12  ;;  %v5186_v8 = vld [vmem:[#allocation2 + $0x360] sm:$0xff] }
 0x3c9   : > { %17054 = vmatprep.mubr.msk.f32.mxu1 %vm1018_vm0, %v5155_v16  ;;  %17920 = vmatprep.mubr.msk.f32.mxu0 %vm1018_vm0, %v10604_v5  ;;  %v11854_v12 = vld [vmem:[#allocation2 + $0xe2] sm:$0xff]  ;;  %v5187_v16 = vld [vmem:[#allocation2 + $0x370] sm:$0xff] }
 0x3ca   : > { %v11855_v5 = vld [vmem:[#allocation2 + $0xf2] sm:$0xff] }
 0x3cc   : > { %17055 = vmatmul.mubr.msk.f32.gmra.mrb[52].mxu1 %vm1018_vm0, %v5156_v23  ;;  %17921 = vmatmul.mubr.msk.f32.gmra.mrb[112].mxu0 %vm1018_vm0, %v10605_v27  ;;  %v5188_v23 = vld [vmem:[#allocation2 + $0x378] sm:$0xff] }
 0x3cd   : > { %17057 = vmatprep.mubr.msk.f32.mxu1 %vm1018_vm0, %v5157_v29  ;;  %17923 = vmatprep.mubr.msk.f32.mxu0 %vm1018_vm0, %v10606_v32  ;;  %v11856_v27 = vld [vmem:[#allocation2 + $0xfa] sm:$0xff]  ;;  %v11857_v32 = vld [vmem:[#allocation2 + $0x102] sm:$0xff] }
 0x3ce   : > { %v5189_v29 = vld [vmem:[#allocation2 + $0x380] sm:$0xff] }
 0x3d0   : > { %17058 = vmatmul.mubr.msk.f32.gmra.mrb[54].mxu1 %vm1018_vm0, %v5158_v36  ;;  %17924 = vmatmul.mubr.msk.f32.gmra.mrb[114].mxu0 %vm1018_vm0, %v10607_v41  ;;  %v5190_v36 = vld [vmem:[#allocation2 + $0x388] sm:$0xff] }
 0x3d1   : > { %17060 = vmatprep.mubr.msk.f32.mxu1 %vm1018_vm0, %v5159_v54  ;;  %17926 = vmatprep.mubr.msk.f32.mxu0 %vm1018_vm0, %v10608_v46  ;;  %v11858_v41 = vld [vmem:[#allocation2 + $0x10a] sm:$0xff]  ;;  %v5191_v54 = vld [vmem:[#allocation2 + $0x398] sm:$0xff] }
 0x3d2   : > { %v11859_v46 = vld [vmem:[#allocation2 + $0x11a] sm:$0xff] }
 0x3d4   : > { %17061 = vmatmul.mubr.msk.f32.gmra.mrb[56].mxu1 %vm1018_vm0, %v5160_v50  ;;  %17927 = vmatmul.mubr.msk.f32.gmra.mrb[116].mxu0 %vm1018_vm0, %v10609_v25  ;;  %v5192_v50 = vld [vmem:[#allocation2 + $0x3a0] sm:$0xff] }
 0x3d5   : > { %17063 = vmatprep.mubr.msk.f32.mxu1 %vm1018_vm0, %v5161_v37  ;;  %17929 = vmatprep.mubr.msk.f32.mxu0 %vm1018_vm0, %v10610_v6  ;;  %v11860_v25 = vld [vmem:[#allocation2 + $0x122] sm:$0xff]  ;;  %v11861_v6 = vld [vmem:[#allocation2 + $0x12a] sm:$0xff] }
 0x3d6   : > { %v5193_v37 = vld [vmem:[#allocation2 + $0x3a8] sm:$0xff] }
 0x3d8   : > { %17064 = vmatmul.mubr.msk.f32.gmra.mrb[58].mxu1 %vm1018_vm0, %v5162_v14  ;;  %17930 = vmatmul.mubr.msk.f32.gmra.mrb[118].mxu0 %vm1018_vm0, %v10611_v43  ;;  %v5194_v14 = vld [vmem:[#allocation2 + $0x3b0] sm:$0xff] }
 0x3d9   : > { %17066 = vmatprep.mubr.msk.f32.mxu1 %vm1018_vm0, %v5163_v39  ;;  %17932 = vmatprep.mubr.msk.f32.mxu0 %vm1018_vm0, %v10612_v31  ;;  %v11862_v43 = vld [vmem:[#allocation2 + $0x132] sm:$0xff]  ;;  %v5195_v39 = vld [vmem:[#allocation2 + $0x3c0] sm:$0xff] }
 0x3da   : > { %v11863_v31 = vld [vmem:[#allocation2 + $0x142] sm:$0xff] }
 0x3dc   : > { %17067 = vmatmul.mubr.msk.f32.gmra.mrb[60].mxu1 %vm1018_vm0, %v5164_v34  ;;  %17933 = vmatmul.mubr.msk.f32.gmra.mrb[120].mxu0 %vm1018_vm0, %v10613_v3  ;;  %v5196_v34 = vld [vmem:[#allocation2 + $0x3c8] sm:$0xff] }
 0x3dd   : > { %17069 = vmatprep.mubr.msk.f32.mxu1 %vm1018_vm0, %v5165_v2  ;;  %17935 = vmatprep.mubr.msk.f32.mxu0 %vm1018_vm0, %v10614_v49  ;;  %v11864_v3 = vld [vmem:[#allocation2 + $0x14a] sm:$0xff]  ;;  %v11865_v49 = vld [vmem:[#allocation2 + $0x152] sm:$0xff] }
 0x3de   : > { %v5197_v2 = vld [vmem:[#allocation2 + $0x3d0] sm:$0xff] }
 0x3e0   : > { %17070 = vmatmul.mubr.msk.f32.gmra.mrb[62].mxu1 %vm1018_vm0, %v5166_v10  ;;  %17936 = vmatmul.mubr.msk.f32.gmra.mrb[122].mxu0 %vm1018_vm0, %v10615_v21  ;;  %v5198_v10 = vld [vmem:[#allocation2 + $0x3d8] sm:$0xff] }
 0x3e1   : > { %17072 = vmatprep.mubr.msk.f32.mxu1 %vm1018_vm0, %v5167_v45  ;;  %17938 = vmatprep.mubr.msk.f32.mxu0 %vm1018_vm0, %v10616_v51  ;;  %v11866_v21 = vld [vmem:[#allocation2 + $0x15a] sm:$0xff]  ;;  %v5199_v45 = vld [vmem:[#allocation2 + $0x3e8] sm:$0xff] }
 0x3e2   : > { %v11867_v51 = vld [vmem:[#allocation2 + $0x16a] sm:$0xff] }
 0x3e4   : > { %17073 = vmatmul.mubr.msk.f32.gmra.mrb[64].mxu1 %vm1018_vm0, %v5168_v53  ;;  %17939 = vmatmul.mubr.msk.f32.gmra.mrb[124].mxu0 %vm1018_vm0, %v10617_v55  ;;  %v5200_v53 = vld [vmem:[#allocation2 + $0x3f0] sm:$0xff] }
 0x3e5   : > { %17075 = vmatprep.mubr.msk.f32.mxu1 %vm1018_vm0, %v5169_v58  ;;  %17941 = vmatprep.mubr.msk.f32.mxu0 %vm1018_vm0, %v10618_v59  ;;  %v11868_v55 = vld [vmem:[#allocation2 + $0x172] sm:$0xff]  ;;  %v11869_v59 = vld [vmem:[#allocation2 + $0x17a] sm:$0xff] }
 0x3e6   : > { %v5201_v58 = vld [vmem:[#allocation2 + $0x3f8] sm:$0xff] }
 0x3e8   : > { %17076 = vmatmul.mubr.msk.f32.gmra.mrb[66].mxu1 %vm1018_vm0, %v5170_v61  ;;  %17942 = vmatmul.mubr.msk.f32.gmra.mrb[126].mxu0 %vm1018_vm0, %v10619_v63  ;;  %v5202_v61 = vld [vmem:[#allocation2 + $0x400] sm:$0xff] }
 0x3e9   : > { %17078 = vmatprep.mubr.msk.f32.mxu1 %vm1018_vm0, %v5171_v1  ;;  %17946 = vmatprep.mubr.msk.f32.mxu0 %vm1018_vm0, %v11839_v7  ;;  %v11870_v63 = vld [vmem:[#allocation2 + $0x182] sm:$0xff]  ;;  %v5203_v1 = vld [vmem:[#allocation2 + $0x410] sm:$0xff] }
 0x3ea   : > { %v11871_v7 = vld [vmem:[#allocation2 + $0x192] sm:$0xff] }
 0x3ec   : > { %17079 = vmatmul.mubr.msk.f32.gmra.mrb[68].mxu1 %vm1018_vm0, %v5172_v9  ;;  %17947 = vmatmul.mubr.msk.f32.vlgmr.msra.gmra.mrb[0].mxu0 %vm1018_vm0, %v11840_v11  ;;  %v5204_v9 = vld [vmem:[#allocation2 + $0x418] sm:$0xff] }
 0x3ed   : > { %17081 = vmatprep.mubr.msk.f32.mxu1 %vm1018_vm0, %v5173_v13  ;;  %17949 = vmatprep.mubr.msk.f32.mxu0 %vm1018_vm0, %v11841_v15  ;;  %v11872_v11 = vld [vmem:[#allocation2 + $0x19a] sm:$0xff]  ;;  %v11873_v15 = vld [vmem:[#allocation2 + $0x1a2] sm:$0xff] }
 0x3ee   : > { %v5205_v13 = vld [vmem:[#allocation2 + $0x420] sm:$0xff] }
 0x3f0   : > { %17082 = vmatmul.mubr.msk.f32.gmra.mrb[70].mxu1 %vm1018_vm0, %v5174_v62  ;;  %17950 = vmatmul.mubr.msk.f32.gmra.mrb[2].mxu0 %vm1018_vm0, %v11842_v17  ;;  %v5206_v62 = vld [vmem:[#allocation2 + $0x428] sm:$0xff] }
 0x3f1   : > { %17084 = vmatprep.mubr.msk.f32.mxu1 %vm1018_vm0, %v5175_v19  ;;  %17952 = vmatprep.mubr.msk.f32.mxu0 %vm1018_vm0, %v11843_v20  ;;  %v11874_v17 = vld [vmem:[#allocation2 + $0x1aa] sm:$0xff]  ;;  %v5207_v19 = vld [vmem:[#allocation2 + $0x438] sm:$0xff] }
 0x3f2   : > { %v11875_v20 = vld [vmem:[#allocation2 + $0x1ba] sm:$0xff] }
 0x3f4   : > { %17085 = vmatmul.mubr.msk.f32.gmra.mrb[72].mxu1 %vm1018_vm0, %v5176_v22  ;;  %17953 = vmatmul.mubr.msk.f32.gmra.mrb[4].mxu0 %vm1018_vm0, %v11844_v24  ;;  %v5208_v22 = vld [vmem:[#allocation2 + $0x440] sm:$0xff] }
 0x3f5   : > { %17087 = vmatprep.mubr.msk.f32.mxu1 %vm1018_vm0, %v5177_v18  ;;  %17955 = vmatprep.mubr.msk.f32.mxu0 %vm1018_vm0, %v11845_v26  ;;  %v11876_v24 = vld [vmem:[#allocation2 + $0x1c2] sm:$0xff]  ;;  %v11877_v26 = vld [vmem:[#allocation2 + $0x1ca] sm:$0xff] }
 0x3f6   : > { %v5209_v18 = vld [vmem:[#allocation2 + $0x448] sm:$0xff] }
 0x3f8   : > { %17088 = vmatmul.mubr.msk.f32.gmra.mrb[74].mxu1 %vm1018_vm0, %v5178_v28  ;;  %17956 = vmatmul.mubr.msk.f32.gmra.mrb[6].mxu0 %vm1018_vm0, %v11846_v56  ;;  %v5210_v28 = vld [vmem:[#allocation2 + $0x450] sm:$0xff] }
 0x3f9   : > { %17090 = vmatprep.mubr.msk.f32.mxu1 %vm1018_vm0, %v5179_v30  ;;  %17958 = vmatprep.mubr.msk.f32.mxu0 %vm1018_vm0, %v11847_v4  ;;  %v11878_v56 = vld [vmem:[#allocation2 + $0x1d2] sm:$0xff]  ;;  %v5211_v30 = vld [vmem:[#allocation2 + $0x460] sm:$0xff] }
 0x3fa   : > { %v11879_v4 = vld [vmem:[#allocation2 + $0x1e2] sm:$0xff] }
 0x3fc   : > { %17091 = vmatmul.mubr.msk.f32.gmra.mrb[76].mxu1 %vm1018_vm0, %v5180_v33  ;;  %17959 = vmatmul.mubr.msk.f32.gmra.mrb[8].mxu0 %vm1018_vm0, %v11848_v35 }
 0x3fd   : > { %17093 = vmatprep.mubr.msk.f32.mxu1 %vm1018_vm0, %v5181_v38  ;;  %17961 = vmatprep.mubr.msk.f32.mxu0 %vm1018_vm0, %v11849_v40  ;;  %v5212_v38 = vld [vmem:[#allocation2 + $0x468] sm:$0xff] }
 0x3fe   : > { %v11880_v40 = vld [vmem:[#allocation2 + $0x1ea] sm:$0xff] }
 0x400   : > { %17094 = vmatmul.mubr.msk.f32.gmra.mrb[78].mxu1 %vm1018_vm0, %v5182_v42  ;;  %17962 = vmatmul.mubr.msk.f32.gmra.mrb[10].mxu0 %vm1018_vm0, %v11850_v44  ;;  %v5213_v42 = vld [vmem:[#allocation2 + $0x470] sm:$0xff] }
 0x401   : > { %17096 = vmatprep.mubr.msk.f32.mxu1 %vm1018_vm0, %v5183_v47  ;;  %17964 = vmatprep.mubr.msk.f32.mxu0 %vm1018_vm0, %v11851_v48  ;;  %v11881_v44 = vld [vmem:[#allocation2 + $0x1f2] sm:$0xff] }
 0x404   : > { %17097 = vmatmul.mubr.msk.f32.gmra.mrb[80].mxu1 %vm1018_vm0, %v5184_v52  ;;  %17965 = vmatmul.mubr.msk.f32.gmra.mrb[12].mxu0 %vm1018_vm0, %v11852_v57  ;;  %v5214_v52 = vld [vmem:[#allocation2 + $0x478] sm:$0xff] }
 0x405   : > { %17099 = vmatprep.mubr.msk.f32.mxu1 %vm1018_vm0, %v5185_v60  ;;  %17967 = vmatprep.mubr.msk.f32.mxu0 %vm1018_vm0, %v11853_v0  ;;  %v11882_v57 = vld [vmem:[#allocation2 + $0x1fa] sm:$0xff]  ;;  %v5215_v60 = vld [vmem:[#allocation2 + $0x488] sm:$0xff] }
 0x406   : > { %v11883_v0 = vld [vmem:[#allocation2 + $0x20a] sm:$0xff] }
 0x408   : > { %17100 = vmatmul.mubr.msk.f32.gmra.mrb[82].mxu1 %vm1018_vm0, %v5186_v8  ;;  %17968 = vmatmul.mubr.msk.f32.gmra.mrb[14].mxu0 %vm1018_vm0, %v11854_v12 }
 0x409   : > { %17102 = vmatprep.mubr.msk.f32.mxu1 %vm1018_vm0, %v5187_v16  ;;  %17970 = vmatprep.mubr.msk.f32.mxu0 %vm1018_vm0, %v11855_v5  ;;  %v5216_v16 = vld [vmem:[#allocation2 + $0x490] sm:$0xff] }
 0x40a   : > { %v11884_v5 = vld [vmem:[#allocation2 + $0x212] sm:$0xff] }
 0x40c   : > { %17103 = vmatmul.mubr.msk.f32.gmra.mrb[84].mxu1 %vm1018_vm0, %v5188_v23  ;;  %17971 = vmatmul.mubr.msk.f32.gmra.mrb[16].mxu0 %vm1018_vm0, %v11856_v27  ;;  %v5217_v23 = vld [vmem:[#allocation2 + $0x498] sm:$0xff] }
 0x40d   : > { %17105 = vmatprep.mubr.msk.f32.mxu1 %vm1018_vm0, %v5189_v29  ;;  %17973 = vmatprep.mubr.msk.f32.mxu0 %vm1018_vm0, %v11857_v32  ;;  %v11885_v27 = vld [vmem:[#allocation2 + $0x21a] sm:$0xff] }
 0x410   : > { %17106 = vmatmul.mubr.msk.f32.gmra.mrb[86].mxu1 %vm1018_vm0, %v5190_v36  ;;  %17974 = vmatmul.mubr.msk.f32.gmra.mrb[18].mxu0 %vm1018_vm0, %v11858_v41  ;;  %v5218_v36 = vld [vmem:[#allocation2 + $0x4a0] sm:$0xff] }
 0x411   : > { %17108 = vmatprep.mubr.msk.f32.mxu1 %vm1018_vm0, %v5191_v54  ;;  %17976 = vmatprep.mubr.msk.f32.mxu0 %vm1018_vm0, %v11859_v46  ;;  %v11886_v41 = vld [vmem:[#allocation2 + $0x222] sm:$0xff]  ;;  %v5219_v54 = vld [vmem:[#allocation2 + $0x4b0] sm:$0xff] }
 0x412   : > { %v11887_v46 = vld [vmem:[#allocation2 + $0x232] sm:$0xff] }
 0x414   : > { %17109 = vmatmul.mubr.msk.f32.gmra.mrb[88].mxu1 %vm1018_vm0, %v5192_v50  ;;  %17977 = vmatmul.mubr.msk.f32.gmra.mrb[20].mxu0 %vm1018_vm0, %v11860_v25 }
 0x415   : > { %17111 = vmatprep.mubr.msk.f32.mxu1 %vm1018_vm0, %v5193_v37  ;;  %17979 = vmatprep.mubr.msk.f32.mxu0 %vm1018_vm0, %v11861_v6  ;;  %v5220_v37 = vld [vmem:[#allocation2 + $0x4b8] sm:$0xff] }
 0x416   : > { %v11888_v6 = vld [vmem:[#allocation2 + $0x23a] sm:$0xff] }
 0x418   : > { %17112 = vmatmul.mubr.msk.f32.gmra.mrb[90].mxu1 %vm1018_vm0, %v5194_v14  ;;  %17980 = vmatmul.mubr.msk.f32.gmra.mrb[22].mxu0 %vm1018_vm0, %v11862_v43  ;;  %v5221_v14 = vld [vmem:[#allocation2 + $0x4c0] sm:$0xff] }
 0x419   : > { %17114 = vmatprep.mubr.msk.f32.mxu1 %vm1018_vm0, %v5195_v39  ;;  %17982 = vmatprep.mubr.msk.f32.mxu0 %vm1018_vm0, %v11863_v31  ;;  %v11889_v43 = vld [vmem:[#allocation2 + $0x242] sm:$0xff] }
 0x41c   : > { %17115 = vmatmul.mubr.msk.f32.gmra.mrb[92].mxu1 %vm1018_vm0, %v5196_v34  ;;  %17983 = vmatmul.mubr.msk.f32.gmra.mrb[24].mxu0 %vm1018_vm0, %v11864_v3  ;;  %v5222_v34 = vld [vmem:[#allocation2 + $0x4c8] sm:$0xff] }
 0x41d   : > { %17117 = vmatprep.mubr.msk.f32.mxu1 %vm1018_vm0, %v5197_v2  ;;  %17985 = vmatprep.mubr.msk.f32.mxu0 %vm1018_vm0, %v11865_v49  ;;  %v11890_v3 = vld [vmem:[#allocation2 + $0x24a] sm:$0xff]  ;;  %v5223_v2 = vld [vmem:[#allocation2 + $0x4d8] sm:$0xff] }
 0x41e   : > { %v11891_v49 = vld [vmem:[#allocation2 + $0x25a] sm:$0xff] }
 0x420   : > { %17118 = vmatmul.mubr.msk.f32.gmra.mrb[94].mxu1 %vm1018_vm0, %v5198_v10  ;;  %17986 = vmatmul.mubr.msk.f32.gmra.mrb[26].mxu0 %vm1018_vm0, %v11866_v21 }
 0x421   : > { %17120 = vmatprep.mubr.msk.f32.mxu1 %vm1018_vm0, %v5199_v45  ;;  %17988 = vmatprep.mubr.msk.f32.mxu0 %vm1018_vm0, %v11867_v51  ;;  %v5224_v45 = vld [vmem:[#allocation2 + $0x4e0] sm:$0xff] }
 0x422   : > { %v11892_v51 = vld [vmem:[#allocation2 + $0x262] sm:$0xff] }
 0x424   : > { %17121 = vmatmul.mubr.msk.f32.gmra.mrb[96].mxu1 %vm1018_vm0, %v5200_v53  ;;  %17989 = vmatmul.mubr.msk.f32.gmra.mrb[28].mxu0 %vm1018_vm0, %v11868_v55  ;;  %v5225_v53 = vld [vmem:[#allocation2 + $0x4e8] sm:$0xff] }
 0x425   : > { %17123 = vmatprep.mubr.msk.f32.mxu1 %vm1018_vm0, %v5201_v58  ;;  %17991 = vmatprep.mubr.msk.f32.mxu0 %vm1018_vm0, %v11869_v59  ;;  %v11893_v55 = vld [vmem:[#allocation2 + $0x26a] sm:$0xff] }
 0x428   : > { %17124 = vmatmul.mubr.msk.f32.gmra.mrb[98].mxu1 %vm1018_vm0, %v5202_v61  ;;  %17992 = vmatmul.mubr.msk.f32.gmra.mrb[30].mxu0 %vm1018_vm0, %v11870_v63  ;;  %v5226_v61 = vld [vmem:[#allocation2 + $0x4f0] sm:$0xff] }
 0x429   : > { %17126 = vmatprep.mubr.msk.f32.mxu1 %vm1018_vm0, %v5203_v1  ;;  %17994 = vmatprep.mubr.msk.f32.mxu0 %vm1018_vm0, %v11871_v7  ;;  %v11894_v63 = vld [vmem:[#allocation2 + $0x272] sm:$0xff]  ;;  %v5227_v1 = vld [vmem:[#allocation2 + $0x500] sm:$0xff] }
 0x42a   : > { %v11895_v7 = vld [vmem:[#allocation2 + $0x282] sm:$0xff] }
 0x42c   : > { %17127 = vmatmul.mubr.msk.f32.gmra.mrb[100].mxu1 %vm1018_vm0, %v5204_v9  ;;  %17995 = vmatmul.mubr.msk.f32.gmra.mrb[32].mxu0 %vm1018_vm0, %v11872_v11 }
 0x42d   : > { %17129 = vmatprep.mubr.msk.f32.mxu1 %vm1018_vm0, %v5205_v13  ;;  %17997 = vmatprep.mubr.msk.f32.mxu0 %vm1018_vm0, %v11873_v15  ;;  %v5228_v13 = vld [vmem:[#allocation2 + $0x508] sm:$0xff] }
 0x42e   : > { %v11896_v15 = vld [vmem:[#allocation2 + $0x28a] sm:$0xff] }
 0x430   : > { %17130 = vmatmul.mubr.msk.f32.gmra.mrb[102].mxu1 %vm1018_vm0, %v5206_v62  ;;  %17998 = vmatmul.mubr.msk.f32.gmra.mrb[34].mxu0 %vm1018_vm0, %v11874_v17  ;;  %v5229_v62 = vld [vmem:[#allocation2 + $0x510] sm:$0xff] }
 0x431   : > { %17132 = vmatprep.mubr.msk.f32.mxu1 %vm1018_vm0, %v5207_v19  ;;  %18000 = vmatprep.mubr.msk.f32.mxu0 %vm1018_vm0, %v11875_v20  ;;  %v11897_v17 = vld [vmem:[#allocation2 + $0x292] sm:$0xff] }
 0x434   : > { %17133 = vmatmul.mubr.msk.f32.gmra.mrb[104].mxu1 %vm1018_vm0, %v5208_v22  ;;  %18001 = vmatmul.mubr.msk.f32.gmra.mrb[36].mxu0 %vm1018_vm0, %v11876_v24  ;;  %v5230_v22 = vld [vmem:[#allocation2 + $0x518] sm:$0xff] }
 0x435   : > { %17135 = vmatprep.mubr.msk.f32.mxu1 %vm1018_vm0, %v5209_v18  ;;  %18003 = vmatprep.mubr.msk.f32.mxu0 %vm1018_vm0, %v11877_v26  ;;  %v11898_v24 = vld [vmem:[#allocation2 + $0x29a] sm:$0xff]  ;;  %v6514_v18 = vld [vmem:[#allocation2 + $0x2a9] sm:$0xff] }
 0x436   : > { %v11899_v26 = vld [vmem:[#allocation2 + $0x2aa] sm:$0xff] }
 0x437   : > { %v21690_v33 = vpop.f32.mrb[0].mxu1 }
 0x438   : > { %v21692_v35 = vpop.f32.mrb[1].mxu1  ;;  %17136 = vmatmul.mubr.msk.f32.gmra.mrb[106].mxu1 %vm1018_vm0, %v5210_v28  ;;  %18004 = vmatmul.mubr.msk.f32.gmra.mrb[38].mxu0 %vm1018_vm0, %v11878_v56 }
 0x439   : > { %17138 = vmatprep.mubr.msk.f32.mxu1 %vm1018_vm0, %v5211_v30  ;;  %18006 = vmatprep.mubr.msk.f32.mxu0 %vm1018_vm0, %v11879_v4  ;;  %v6515_v30 = vld [vmem:[#allocation2 + $0x2b1] sm:$0xff] }
 0x43a   : > { %v11900_v4 = vld [vmem:[#allocation2 + $0x2b2] sm:$0xff] }
 0x43b   : > { %v21698_v47 = vpop.f32.mrb[2].mxu1 }
 0x43c   : > { %v21700_v48 = vpop.f32.mrb[3].mxu1  ;;  %17139 = vmatmul.mubr.msk.f32.gmra.mrb[108].mxu1 %vm1018_vm0, %v5212_v38  ;;  %18007 = vmatmul.mubr.msk.f32.gmra.mrb[40].mxu0 %vm1018_vm0, %v11880_v40  ;;  %v6516_v38 = vld [vmem:[#allocation2 + $0x2b9] sm:$0xff] }
 0x43d   : > { %17141 = vmatprep.mubr.msk.f32.mxu1 %vm1018_vm0, %v5213_v42  ;;  %18009 = vmatprep.mubr.msk.f32.mxu0 %vm1018_vm0, %v11881_v44  ;;  %v11901_v40 = vld [vmem:[#allocation2 + $0x2ba] sm:$0xff] }
 0x43f   : > { %v21706_v8 = vpop.f32.mrb[4].mxu1 }
 0x440   : > { %v21708_v12 = vpop.f32.mrb[5].mxu1  ;;  %17142 = vmatmul.mubr.msk.f32.gmra.mrb[110].mxu1 %vm1018_vm0, %v5214_v52  ;;  %18010 = vmatmul.mubr.msk.f32.gmra.mrb[42].mxu0 %vm1018_vm0, %v11882_v57  ;;  %v6517_v52 = vld [vmem:[#allocation2 + $0x2c1] sm:$0xff] }
 0x441   : > { %17144 = vmatprep.mubr.msk.f32.mxu1 %vm1018_vm0, %v5215_v60  ;;  %18012 = vmatprep.mubr.msk.f32.mxu0 %vm1018_vm0, %v11883_v0  ;;  %v11902_v57 = vld [vmem:[#allocation2 + $0x2c2] sm:$0xff]  ;;  %v6518_v60 = vld [vmem:[#allocation2 + $0x2d1] sm:$0xff] }
 0x442   : > { %v11903_v0 = vld [vmem:[#allocation2 + $0x2d2] sm:$0xff] }
 0x443   : > { %v21714_v29 = vpop.f32.mrb[6].mxu1 }
 0x444   : > { %v21716_v32 = vpop.f32.mrb[7].mxu1  ;;  %17145 = vmatmul.mubr.msk.f32.gmra.mrb[112].mxu1 %vm1018_vm0, %v5216_v16  ;;  %18013 = vmatmul.mubr.msk.f32.gmra.mrb[44].mxu0 %vm1018_vm0, %v11884_v5 }
 0x445   : > { %17147 = vmatprep.mubr.msk.f32.mxu1 %vm1018_vm0, %v5217_v23  ;;  %18015 = vmatprep.mubr.msk.f32.mxu0 %vm1018_vm0, %v11885_v27  ;;  %v6519_v23 = vld [vmem:[#allocation2 + $0x2d9] sm:$0xff] }
 0x446   : > { %v11904_v27 = vld [vmem:[#allocation2 + $0x2da] sm:$0xff] }
 0x447   : > { %v21722_v50 = vpop.f32.mrb[8].mxu1 }
 0x448   : > { %v21724_v25 = vpop.f32.mrb[9].mxu1  ;;  %17148 = vmatmul.mubr.msk.f32.gmra.mrb[114].mxu1 %vm1018_vm0, %v5218_v36  ;;  %18016 = vmatmul.mubr.msk.f32.gmra.mrb[46].mxu0 %vm1018_vm0, %v11886_v41  ;;  %v6520_v36 = vld [vmem:[#allocation2 + $0x2e1] sm:$0xff] }
 0x449   : > { %17150 = vmatprep.mubr.msk.f32.mxu1 %vm1018_vm0, %v5219_v54  ;;  %18018 = vmatprep.mubr.msk.f32.mxu0 %vm1018_vm0, %v11887_v46  ;;  %v11905_v41 = vld [vmem:[#allocation2 + $0x2e2] sm:$0xff] }
 0x44b   : > { %v21730_v39 = vpop.f32.mrb[10].mxu1 }
 0x44c   : > { %v21732_v31 = vpop.f32.mrb[11].mxu1  ;;  %17151 = vmatmul.mubr.msk.f32.gmra.mrb[116].mxu1 %vm1018_vm0, %v5220_v37  ;;  %18019 = vmatmul.mubr.msk.f32.gmra.mrb[48].mxu0 %vm1018_vm0, %v11888_v6  ;;  %v6521_v37 = vld [vmem:[#allocation2 + $0x2e9] sm:$0xff] }
 0x44d   : > { %17153 = vmatprep.mubr.msk.f32.mxu1 %vm1018_vm0, %v5221_v14  ;;  %18021 = vmatprep.mubr.msk.f32.mxu0 %vm1018_vm0, %v11889_v43  ;;  %v11906_v6 = vld [vmem:[#allocation2 + $0x2ea] sm:$0xff]  ;;  %v6522_v14 = vld [vmem:[#allocation2 + $0x2f9] sm:$0xff] }
 0x44e   : > { %v11907_v43 = vld [vmem:[#allocation2 + $0x2fa] sm:$0xff] }
 0x44f   : > { %v21738_v10 = vpop.f32.mrb[12].mxu1 }
 0x450   : > { %v21740_v21 = vpop.f32.mrb[13].mxu1  ;;  %17154 = vmatmul.mubr.msk.f32.gmra.mrb[118].mxu1 %vm1018_vm0, %v5222_v34  ;;  %18022 = vmatmul.mubr.msk.f32.gmra.mrb[50].mxu0 %vm1018_vm0, %v11890_v3 }
 0x451   : > { %17156 = vmatprep.mubr.msk.f32.mxu1 %vm1018_vm0, %v5223_v2  ;;  %18024 = vmatprep.mubr.msk.f32.mxu0 %vm1018_vm0, %v11891_v49  ;;  %v6523_v2 = vld [vmem:[#allocation2 + $0x301] sm:$0xff] }
 0x452   : > { %v11908_v49 = vld [vmem:[#allocation2 + $0x302] sm:$0xff] }
 0x453   : > { %v21746_v58 = vpop.f32.mrb[14].mxu1 }
 0x454   : > { %v21748_v59 = vpop.f32.mrb[15].mxu1  ;;  %17157 = vmatmul.mubr.msk.f32.gmra.mrb[120].mxu1 %vm1018_vm0, %v5224_v45  ;;  %18025 = vmatmul.mubr.msk.f32.gmra.mrb[52].mxu0 %vm1018_vm0, %v11892_v51  ;;  %v6524_v45 = vld [vmem:[#allocation2 + $0x309] sm:$0xff] }
 0x455   : > { %17159 = vmatprep.mubr.msk.f32.mxu1 %vm1018_vm0, %v5225_v53  ;;  %18027 = vmatprep.mubr.msk.f32.mxu0 %vm1018_vm0, %v11893_v55  ;;  %v11909_v51 = vld [vmem:[#allocation2 + $0x30a] sm:$0xff] }
 0x457   : > { %v21754_v9 = vpop.f32.mrb[16].mxu1 }
 0x458   : > { %v21756_v11 = vpop.f32.mrb[17].mxu1  ;;  %17160 = vmatmul.mubr.msk.f32.gmra.mrb[122].mxu1 %vm1018_vm0, %v5226_v61  ;;  %18028 = vmatmul.mubr.msk.f32.gmra.mrb[54].mxu0 %vm1018_vm0, %v11894_v63  ;;  %v6525_v61 = vld [vmem:[#allocation2 + $0x311] sm:$0xff] }
 0x459   : > { %17162 = vmatprep.mubr.msk.f32.mxu1 %vm1018_vm0, %v5227_v1  ;;  %18030 = vmatprep.mubr.msk.f32.mxu0 %vm1018_vm0, %v11895_v7  ;;  %v11910_v63 = vld [vmem:[#allocation2 + $0x312] sm:$0xff]  ;;  %v6526_v1 = vld [vmem:[#allocation2 + $0x321] sm:$0xff] }
 0x45a   : > { %v11911_v7 = vld [vmem:[#allocation2 + $0x322] sm:$0xff] }
 0x45b   : > { %v21762_v19 = vpop.f32.mrb[18].mxu1 }
 0x45c   : > { %v21764_v20 = vpop.f32.mrb[19].mxu1  ;;  %17163 = vmatmul.mubr.msk.f32.gmra.mrb[124].mxu1 %vm1018_vm0, %v5228_v13  ;;  %18031 = vmatmul.mubr.msk.f32.gmra.mrb[56].mxu0 %vm1018_vm0, %v11896_v15 }
 0x45d   : > { %17165 = vmatprep.mubr.msk.f32.mxu1 %vm1018_vm0, %v5229_v62  ;;  %18033 = vmatprep.mubr.msk.f32.mxu0 %vm1018_vm0, %v11897_v17  ;;  %v6527_v62 = vld [vmem:[#allocation2 + $0x329] sm:$0xff] }
 0x45e   : > { %v11912_v17 = vld [vmem:[#allocation2 + $0x32a] sm:$0xff] }
 0x45f   : > { %v21770_v28 = vpop.f32.mrb[20].mxu1 }
 0x460   : > { %v21772_v56 = vpop.f32.mrb[21].mxu1  ;;  %17166 = vmatmul.mubr.msk.f32.gmra.mrb[126].mxu1 %vm1018_vm0, %v5230_v22  ;;  %18034 = vmatmul.mubr.msk.f32.gmra.mrb[58].mxu0 %vm1018_vm0, %v11898_v24  ;;  %v6528_v22 = vld [vmem:[#allocation2 + $0x331] sm:$0xff] }
 0x461   : > { %17266 = vmatprep.mubr.msk.f32.mxu1 %vm1018_vm0, %v6514_v18  ;;  %18036 = vmatprep.mubr.msk.f32.mxu0 %vm1018_vm0, %v11899_v26  ;;  %v11913_v24 = vld [vmem:[#allocation2 + $0x332] sm:$0xff] }
 0x463   : > { %v21778_v42 = vpop.f32.mrb[22].mxu1 }
 0x464   : > { %v21780_v44 = vpop.f32.mrb[23].mxu1  ;;  %17267 = vmatmul.mubr.msk.f32.vlgmr.msra.gmra.mrb[64].mxu1 %vm1018_vm0, %v6515_v30  ;;  %18037 = vmatmul.mubr.msk.f32.gmra.mrb[60].mxu0 %vm1018_vm0, %v11900_v4  ;;  %v6529_v30 = vld [vmem:[#allocation2 + $0x339] sm:$0xff] }
 0x465   : > { %17269 = vmatprep.mubr.msk.f32.mxu1 %vm1018_vm0, %v6516_v38  ;;  %18039 = vmatprep.mubr.msk.f32.mxu0 %vm1018_vm0, %v11901_v40  ;;  %v11914_v4 = vld [vmem:[#allocation2 + $0x33a] sm:$0xff]  ;;  %v6530_v38 = vld [vmem:[#allocation2 + $0x349] sm:$0xff] }
 0x466   : > { %v11915_v40 = vld [vmem:[#allocation2 + $0x34a] sm:$0xff] }
 0x467   : > { %v21786_v16 = vpop.f32.mrb[24].mxu1 }
 0x468   : > { %v21788_v5 = vpop.f32.mrb[25].mxu1  ;;  %17270 = vmatmul.mubr.msk.f32.gmra.mrb[66].mxu1 %vm1018_vm0, %v6517_v52  ;;  %18040 = vmatmul.mubr.msk.f32.gmra.mrb[62].mxu0 %vm1018_vm0, %v11902_v57 }
 0x469   : > { %17272 = vmatprep.mubr.msk.f32.mxu1 %vm1018_vm0, %v6518_v60  ;;  %18042 = vmatprep.mubr.msk.f32.mxu0 %vm1018_vm0, %v11903_v0  ;;  %v6531_v60 = vld [vmem:[#allocation2 + $0x351] sm:$0xff] }
 0x46a   : > { %v11916_v0 = vld [vmem:[#allocation2 + $0x352] sm:$0xff] }
 0x46b   : > { %v21794_v54 = vpop.f32.mrb[26].mxu1 }
 0x46c   : > { %v21796_v46 = vpop.f32.mrb[27].mxu1  ;;  %17273 = vmatmul.mubr.msk.f32.gmra.mrb[68].mxu1 %vm1018_vm0, %v6519_v23  ;;  %18043 = vmatmul.mubr.msk.f32.gmra.mrb[64].mxu0 %vm1018_vm0, %v11904_v27  ;;  %v6532_v23 = vld [vmem:[#allocation2 + $0x359] sm:$0xff] }
 0x46d   : > { %17275 = vmatprep.mubr.msk.f32.mxu1 %vm1018_vm0, %v6520_v36  ;;  %18045 = vmatprep.mubr.msk.f32.mxu0 %vm1018_vm0, %v11905_v41  ;;  %v11917_v27 = vld [vmem:[#allocation2 + $0x35a] sm:$0xff] }
 0x46f   : > { %v21802_v34 = vpop.f32.mrb[28].mxu1 }
 0x470   : > { %v21804_v3 = vpop.f32.mrb[29].mxu1  ;;  %17276 = vmatmul.mubr.msk.f32.gmra.mrb[70].mxu1 %vm1018_vm0, %v6521_v37  ;;  %18046 = vmatmul.mubr.msk.f32.gmra.mrb[66].mxu0 %vm1018_vm0, %v11906_v6  ;;  %v6533_v37 = vld [vmem:[#allocation2 + $0x361] sm:$0xff] }
 0x471   : > { %17278 = vmatprep.mubr.msk.f32.mxu1 %vm1018_vm0, %v6522_v14  ;;  %18048 = vmatprep.mubr.msk.f32.mxu0 %vm1018_vm0, %v11907_v43  ;;  %v11918_v6 = vld [vmem:[#allocation2 + $0x362] sm:$0xff]  ;;  %v6534_v14 = vld [vmem:[#allocation2 + $0x371] sm:$0xff] }
 0x472   : > { %v11919_v43 = vld [vmem:[#allocation2 + $0x372] sm:$0xff] }
 0x473   : > { %v21810_v53 = vpop.f32.mrb[30].mxu1 }
 0x474   : > { %v21812_v55 = vpop.f32.mrb[31].mxu1  ;;  %17279 = vmatmul.mubr.msk.f32.gmra.mrb[72].mxu1 %vm1018_vm0, %v6523_v2  ;;  %18049 = vmatmul.mubr.msk.f32.gmra.mrb[68].mxu0 %vm1018_vm0, %v11908_v49 }
 0x475   : > { %17281 = vmatprep.mubr.msk.f32.mxu1 %vm1018_vm0, %v6524_v45  ;;  %18051 = vmatprep.mubr.msk.f32.mxu0 %vm1018_vm0, %v11909_v51  ;;  %v6535_v45 = vld [vmem:[#allocation2 + $0x379] sm:$0xff] }
 0x476   : > { %v11920_v51 = vld [vmem:[#allocation2 + $0x37a] sm:$0xff] }
 0x477   : > { %v21818_v13 = vpop.f32.mrb[32].mxu1 }
 0x478   : > { %v21820_v15 = vpop.f32.mrb[33].mxu1  ;;  %17282 = vmatmul.mubr.msk.f32.gmra.mrb[74].mxu1 %vm1018_vm0, %v6525_v61  ;;  %18052 = vmatmul.mubr.msk.f32.gmra.mrb[70].mxu0 %vm1018_vm0, %v11910_v63  ;;  %v6536_v61 = vld [vmem:[#allocation2 + $0x381] sm:$0xff] }
 0x479   : > { %17284 = vmatprep.mubr.msk.f32.mxu1 %vm1018_vm0, %v6526_v1  ;;  %18054 = vmatprep.mubr.msk.f32.mxu0 %vm1018_vm0, %v11911_v7  ;;  %v11921_v63 = vld [vmem:[#allocation2 + $0x382] sm:$0xff] }
 0x47b   : > { %v21826_v18 = vpop.f32.mrb[34].mxu1 }
 0x47c   : > { %v21828_v26 = vpop.f32.mrb[35].mxu1  ;;  %17285 = vmatmul.mubr.msk.f32.gmra.mrb[76].mxu1 %vm1018_vm0, %v6527_v62  ;;  %18055 = vmatmul.mubr.msk.f32.gmra.mrb[72].mxu0 %vm1018_vm0, %v11912_v17  ;;  %v6537_v62 = vld [vmem:[#allocation2 + $0x389] sm:$0xff] }
 0x47d   : > { %17287 = vmatprep.mubr.msk.f32.mxu1 %vm1018_vm0, %v6528_v22  ;;  %18057 = vmatprep.mubr.msk.f32.mxu0 %vm1018_vm0, %v11913_v24  ;;  %v11922_v17 = vld [vmem:[#allocation2 + $0x38a] sm:$0xff]  ;;  %v6538_v22 = vld [vmem:[#allocation2 + $0x399] sm:$0xff] }
 0x47e   : > { %v11923_v24 = vld [vmem:[#allocation2 + $0x39a] sm:$0xff] }
 0x47f   : > { %v21834_v52 = vpop.f32.mrb[36].mxu1 }
 0x480   : > { %v21836_v57 = vpop.f32.mrb[37].mxu1  ;;  %17288 = vmatmul.mubr.msk.f32.gmra.mrb[78].mxu1 %vm1018_vm0, %v6529_v30  ;;  %18058 = vmatmul.mubr.msk.f32.gmra.mrb[74].mxu0 %vm1018_vm0, %v11914_v4 }
 0x481   : > { %17290 = vmatprep.mubr.msk.f32.mxu1 %vm1018_vm0, %v6530_v38  ;;  %18060 = vmatprep.mubr.msk.f32.mxu0 %vm1018_vm0, %v11915_v40  ;;  %v6539_v38 = vld [vmem:[#allocation2 + $0x3a1] sm:$0xff] }
 0x482   : > { %v11924_v40 = vld [vmem:[#allocation2 + $0x3a2] sm:$0xff] }
 0x483   : > { %v21842_v36 = vpop.f32.mrb[38].mxu1 }
 0x484   : > { %v21844_v41 = vpop.f32.mrb[39].mxu1  ;;  %17291 = vmatmul.mubr.msk.f32.gmra.mrb[80].mxu1 %vm1018_vm0, %v6531_v60  ;;  %18061 = vmatmul.mubr.msk.f32.gmra.mrb[76].mxu0 %vm1018_vm0, %v11916_v0  ;;  %v6540_v60 = vld [vmem:[#allocation2 + $0x3a9] sm:$0xff] }
 0x485   : > { %17293 = vmatprep.mubr.msk.f32.mxu1 %vm1018_vm0, %v6532_v23  ;;  %18063 = vmatprep.mubr.msk.f32.mxu0 %vm1018_vm0, %v11917_v27  ;;  %v11925_v0 = vld [vmem:[#allocation2 + $0x3aa] sm:$0xff] }
 0x487   : > { %v21850_v2 = vpop.f32.mrb[40].mxu1 }
 0x488   : > { %v21852_v49 = vpop.f32.mrb[41].mxu1  ;;  %17294 = vmatmul.mubr.msk.f32.gmra.mrb[82].mxu1 %vm1018_vm0, %v6533_v37  ;;  %18064 = vmatmul.mubr.msk.f32.gmra.mrb[78].mxu0 %vm1018_vm0, %v11918_v6  ;;  %v6541_v37 = vld [vmem:[#allocation2 + $0x3b1] sm:$0xff] }
 0x489   : > { %17296 = vmatprep.mubr.msk.f32.mxu1 %vm1018_vm0, %v6534_v14  ;;  %18066 = vmatprep.mubr.msk.f32.mxu0 %vm1018_vm0, %v11919_v43  ;;  %v11926_v6 = vld [vmem:[#allocation2 + $0x3b2] sm:$0xff]  ;;  %v6542_v14 = vld [vmem:[#allocation2 + $0x3c1] sm:$0xff] }
 0x48a   : > { %v11927_v43 = vld [vmem:[#allocation2 + $0x3c2] sm:$0xff] }
 0x48b   : > { %v21858_v1 = vpop.f32.mrb[42].mxu1 }
 0x48c   : > { %v21860_v7 = vpop.f32.mrb[43].mxu1  ;;  %17297 = vmatmul.mubr.msk.f32.gmra.mrb[84].mxu1 %vm1018_vm0, %v6535_v45  ;;  %18067 = vmatmul.mubr.msk.f32.gmra.mrb[80].mxu0 %vm1018_vm0, %v11920_v51 }
 0x48d   : > { %17299 = vmatprep.mubr.msk.f32.mxu1 %vm1018_vm0, %v6536_v61  ;;  %18069 = vmatprep.mubr.msk.f32.mxu0 %vm1018_vm0, %v11921_v63  ;;  %v6543_v61 = vld [vmem:[#allocation2 + $0x3c9] sm:$0xff] }
 0x48e   : > { %v11928_v63 = vld [vmem:[#allocation2 + $0x3ca] sm:$0xff] }
 0x48f   : > { %v21866_v30 = vpop.f32.mrb[44].mxu1 }
 0x490   : > { %v21868_v4 = vpop.f32.mrb[45].mxu1  ;;  %17300 = vmatmul.mubr.msk.f32.gmra.mrb[86].mxu1 %vm1018_vm0, %v6537_v62  ;;  %18070 = vmatmul.mubr.msk.f32.gmra.mrb[82].mxu0 %vm1018_vm0, %v11922_v17  ;;  %v6544_v62 = vld [vmem:[#allocation2 + $0x3d1] sm:$0xff] }
 0x491   : > { %17302 = vmatprep.mubr.msk.f32.mxu1 %vm1018_vm0, %v6538_v22  ;;  %18072 = vmatprep.mubr.msk.f32.mxu0 %vm1018_vm0, %v11923_v24  ;;  %v11929_v17 = vld [vmem:[#allocation2 + $0x3d2] sm:$0xff] }
 0x493   : > { %v21874_v23 = vpop.f32.mrb[46].mxu1 }
 0x494   : > { %v21876_v27 = vpop.f32.mrb[47].mxu1  ;;  %17303 = vmatmul.mubr.msk.f32.gmra.mrb[88].mxu1 %vm1018_vm0, %v6539_v38  ;;  %18073 = vmatmul.mubr.msk.f32.gmra.mrb[84].mxu0 %vm1018_vm0, %v11924_v40  ;;  %v6545_v38 = vld [vmem:[#allocation2 + $0x3d9] sm:$0xff] }
 0x495   : > { %17305 = vmatprep.mubr.msk.f32.mxu1 %vm1018_vm0, %v6540_v60  ;;  %18075 = vmatprep.mubr.msk.f32.mxu0 %vm1018_vm0, %v11925_v0  ;;  %v11930_v40 = vld [vmem:[#allocation2 + $0x3da] sm:$0xff]  ;;  %v6546_v60 = vld [vmem:[#allocation2 + $0x3e9] sm:$0xff] }
 0x496   : > { %v11931_v0 = vld [vmem:[#allocation2 + $0x3ea] sm:$0xff] }
 0x497   : > { %v21882_v45 = vpop.f32.mrb[48].mxu1 }
 0x498   : > { %v21884_v51 = vpop.f32.mrb[49].mxu1  ;;  %17306 = vmatmul.mubr.msk.f32.gmra.mrb[90].mxu1 %vm1018_vm0, %v6541_v37  ;;  %18076 = vmatmul.mubr.msk.f32.gmra.mrb[86].mxu0 %vm1018_vm0, %v11926_v6 }
 0x499   : > { %22604 = vst [vmem:[#allocation4_spill] sm:$0xff] %v21884_v51  ;;  %17308 = vmatprep.mubr.msk.f32.mxu1 %vm1018_vm0, %v6542_v14  ;;  %18078 = vmatprep.mubr.msk.f32.mxu0 %vm1018_vm0, %v11927_v43  ;;  %v6547_v14 = vld [vmem:[#allocation2 + $0x3f1] sm:$0xff]  ;;  %v11950_v51 = vld [vmem:[#allocation2 + $0x4a2] sm:$0xff] }
 0x49a   : > { %v11932_v43 = vld [vmem:[#allocation2 + $0x3f2] sm:$0xff] }
 0x49b   : > { %v21890_v22 = vpop.f32.mrb[50].mxu1 }
 0x49c   : > { %22605 = vst [vmem:[#allocation5_spill] sm:$0xff] %v21890_v22  ;;  %v21892_v24 = vpop.f32.mrb[51].mxu1  ;;  %17309 = vmatmul.mubr.msk.f32.gmra.mrb[92].mxu1 %vm1018_vm0, %v6543_v61  ;;  %18079 = vmatmul.mubr.msk.f32.gmra.mrb[88].mxu0 %vm1018_vm0, %v11928_v63  ;;  %v6548_v61 = vld [vmem:[#allocation2 + $0x3f9] sm:$0xff] }
 0x49d   : > { %22606 = vst [vmem:[#allocation6_spill] sm:$0xff] %v21892_v24  ;;  %17311 = vmatprep.mubr.msk.f32.mxu1 %vm1018_vm0, %v6544_v62  ;;  %18081 = vmatprep.mubr.msk.f32.mxu0 %vm1018_vm0, %v11929_v17  ;;  %v11933_v63 = vld [vmem:[#allocation2 + $0x3fa] sm:$0xff] }
 0x49e   : > { %v6564_v24 = vld [vmem:[#allocation2 + $0x499] sm:$0xff] }
 0x49f   : > { %v21898_v37 = vpop.f32.mrb[52].mxu1 }
 0x4a0   : > { %22607 = vst [vmem:[#allocation3_spill] sm:$0xff] %v21898_v37  ;;  %v21900_v6 = vpop.f32.mrb[53].mxu1  ;;  %17312 = vmatmul.mubr.msk.f32.gmra.mrb[94].mxu1 %vm1018_vm0, %v6545_v38  ;;  %18082 = vmatmul.mubr.msk.f32.gmra.mrb[90].mxu0 %vm1018_vm0, %v11930_v40  ;;  %v6549_v38 = vld [vmem:[#allocation2 + $0x401] sm:$0xff] }
 0x4a1   : > { %22608 = vst [vmem:[#allocation7_spill] sm:$0xff] %v21900_v6  ;;  %17314 = vmatprep.mubr.msk.f32.mxu1 %vm1018_vm0, %v6546_v60  ;;  %18084 = vmatprep.mubr.msk.f32.mxu0 %vm1018_vm0, %v11931_v0  ;;  %v11934_v40 = vld [vmem:[#allocation2 + $0x402] sm:$0xff]  ;;  %v6550_v60 = vld [vmem:[#allocation2 + $0x411] sm:$0xff] }
 0x4a2   : > { %v11935_v0 = vld [vmem:[#allocation2 + $0x412] sm:$0xff] }
 0x4a3   : > { %v21906_v62 = vpop.f32.mrb[54].mxu1 }
 0x4a4   : > { %22609 = vst [vmem:[#allocation8_spill] sm:$0xff] %v21906_v62  ;;  %v21908_v17 = vpop.f32.mrb[55].mxu1  ;;  %17315 = vmatmul.mubr.msk.f32.gmra.mrb[96].mxu1 %vm1018_vm0, %v6547_v14  ;;  %18085 = vmatmul.mubr.msk.f32.gmra.mrb[92].mxu0 %vm1018_vm0, %v11932_v43  ;;  %v6551_v14 = vld [vmem:[#allocation2 + $0x419] sm:$0xff] }
 0x4a5   : > { %22610 = vst [vmem:[#allocation9_spill] sm:$0xff] %v21908_v17  ;;  %17317 = vmatprep.mubr.msk.f32.mxu1 %vm1018_vm0, %v6548_v61  ;;  %18087 = vmatprep.mubr.msk.f32.mxu0 %vm1018_vm0, %v11933_v63  ;;  %v11936_v43 = vld [vmem:[#allocation2 + $0x41a] sm:$0xff]  ;;  %v11937_v63 = vld [vmem:[#allocation2 + $0x422] sm:$0xff] }
 0x4a6   : > { %v6552_v61 = vld [vmem:[#allocation2 + $0x421] sm:$0xff] }
 0x4a7   : > { %v21914_v6 = vpop.f32.mrb[56].mxu1 }
 0x4a8   : > { %22611 = vst [vmem:[#allocation10_spill] sm:$0xff] %v21914_v6  ;;  %v21916_v37 = vpop.f32.mrb[57].mxu1  ;;  %17318 = vmatmul.mubr.msk.f32.gmra.mrb[98].mxu1 %vm1018_vm0, %v6549_v38  ;;  %18088 = vmatmul.mubr.msk.f32.gmra.mrb[94].mxu0 %vm1018_vm0, %v11934_v40  ;;  %v6553_v38 = vld [vmem:[#allocation2 + $0x429] sm:$0xff] }
 0x4a9   : > { %22612 = vst [vmem:[#allocation11_spill] sm:$0xff] %v21916_v37  ;;  %17320 = vmatprep.mubr.msk.f32.mxu1 %vm1018_vm0, %v6550_v60  ;;  %18090 = vmatprep.mubr.msk.f32.mxu0 %vm1018_vm0, %v11935_v0  ;;  %v11938_v40 = vld [vmem:[#allocation2 + $0x42a] sm:$0xff]  ;;  %v6554_v60 = vld [vmem:[#allocation2 + $0x439] sm:$0xff] }
 0x4aa   : > { %v11939_v0 = vld [vmem:[#allocation2 + $0x43a] sm:$0xff] }
 0x4ab   : > { %v21922_v17 = vpop.f32.mrb[58].mxu1 }
 0x4ac   : > { %22613 = vst [vmem:[#allocation12_spill] sm:$0xff] %v21922_v17  ;;  %v21924_v62 = vpop.f32.mrb[59].mxu1  ;;  %17321 = vmatmul.mubr.msk.f32.gmra.mrb[100].mxu1 %vm1018_vm0, %v6551_v14  ;;  %18091 = vmatmul.mubr.msk.f32.gmra.mrb[96].mxu0 %vm1018_vm0, %v11936_v43  ;;  %v6555_v14 = vld [vmem:[#allocation2 + $0x441] sm:$0xff] }
 0x4ad   : > { %22614 = vst [vmem:[#allocation13_spill] sm:$0xff] %v21924_v62  ;;  %17323 = vmatprep.mubr.msk.f32.mxu1 %vm1018_vm0, %v6552_v61  ;;  %18093 = vmatprep.mubr.msk.f32.mxu0 %vm1018_vm0, %v11937_v63  ;;  %v11940_v43 = vld [vmem:[#allocation2 + $0x442] sm:$0xff]  ;;  %v11941_v63 = vld [vmem:[#allocation2 + $0x44a] sm:$0xff] }
 0x4ae   : > { %v6556_v61 = vld [vmem:[#allocation2 + $0x449] sm:$0xff] }
 0x4af   : > { %v21930_v37 = vpop.f32.mrb[60].mxu1 }
 0x4b0   : > { %22615 = vst [vmem:[#allocation14_spill] sm:$0xff] %v21930_v37  ;;  %v21932_v6 = vpop.f32.mrb[61].mxu1  ;;  %17324 = vmatmul.mubr.msk.f32.gmra.mrb[102].mxu1 %vm1018_vm0, %v6553_v38  ;;  %18094 = vmatmul.mubr.msk.f32.gmra.mrb[98].mxu0 %vm1018_vm0, %v11938_v40  ;;  %v6557_v38 = vld [vmem:[#allocation2 + $0x451] sm:$0xff] }
 0x4b1   : > { %22616 = vst [vmem:[#allocation15_spill] sm:$0xff] %v21932_v6  ;;  %17326 = vmatprep.mubr.msk.f32.mxu1 %vm1018_vm0, %v6554_v60  ;;  %18096 = vmatprep.mubr.msk.f32.mxu0 %vm1018_vm0, %v11939_v0  ;;  %v11942_v40 = vld [vmem:[#allocation2 + $0x452] sm:$0xff]  ;;  %v6558_v60 = vld [vmem:[#allocation2 + $0x461] sm:$0xff] }
 0x4b2   : > { %v11943_v0 = vld [vmem:[#allocation2 + $0x462] sm:$0xff] }
 0x4b3   : > { %v21938_v62 = vpop.f32.mrb[62].mxu1 }
 0x4b4   : > { %22617 = vst [vmem:[#allocation16_spill] sm:$0xff] %v21938_v62  ;;  %v21940_v17 = vpop.f32.mrb[63].mxu1  ;;  %17327 = vmatmul.mubr.msk.f32.gmra.mrb[104].mxu1 %vm1018_vm0, %v6555_v14  ;;  %18097 = vmatmul.mubr.msk.f32.gmra.mrb[100].mxu0 %vm1018_vm0, %v11940_v43  ;;  %v6559_v14 = vld [vmem:[#allocation2 + $0x469] sm:$0xff]  ;;  %v6560_v43 = vld [vmem:[#allocation2 + $0x471] sm:$0xff] }
 0x4b5   : > { %22618 = vst [vmem:[#allocation17_spill] sm:$0xff] %v21940_v17  ;;  %17329 = vmatprep.mubr.msk.f32.mxu1 %vm1018_vm0, %v6556_v61  ;;  %18099 = vmatprep.mubr.msk.f32.mxu0 %vm1018_vm0, %v11941_v63  ;;  %v11944_v17 = vld [vmem:[#allocation2 + $0x46a] sm:$0xff]  ;;  %v11945_v62 = vld [vmem:[#allocation2 + $0x472] sm:$0xff]  ;;  %v11946_v63 = vld [vmem:[#allocation2 + $0x47a] sm:$0xff] }
 0x4b6   : > { %v6561_v61 = vld [vmem:[#allocation2 + $0x479] sm:$0xff] }
 0x4b8   : > { %17330 = vmatmul.mubr.msk.f32.gmra.mrb[106].mxu1 %vm1018_vm0, %v6557_v38  ;;  %18100 = vmatmul.mubr.msk.f32.gmra.mrb[102].mxu0 %vm1018_vm0, %v11942_v40  ;;  %v6562_v38 = vld [vmem:[#allocation2 + $0x489] sm:$0xff] }
 0x4b9   : > { %17332 = vmatprep.mubr.msk.f32.mxu1 %vm1018_vm0, %v6558_v60  ;;  %18102 = vmatprep.mubr.msk.f32.mxu0 %vm1018_vm0, %v11943_v0  ;;  %v11947_v40 = vld [vmem:[#allocation2 + $0x48a] sm:$0xff] }
 0x4bc   : > { %17333 = vmatmul.mubr.msk.f32.gmra.mrb[108].mxu1 %vm1018_vm0, %v6559_v14  ;;  %18103 = vmatmul.mubr.msk.f32.gmra.mrb[104].mxu0 %vm1018_vm0, %v11944_v17  ;;  %v6563_v14 = vld [vmem:[#allocation2 + $0x491] sm:$0xff] }
 0x4bd   : > { %17335 = vmatprep.mubr.msk.f32.mxu1 %vm1018_vm0, %v6560_v43  ;;  %18105 = vmatprep.mubr.msk.f32.mxu0 %vm1018_vm0, %v11945_v62  ;;  %v11948_v43 = vld [vmem:[#allocation2 + $0x492] sm:$0xff] }
 0x4bf   : > { %v17948_v60 = vpop.f32.mrb[0].mxu0 }
 0x4c0   : > { %v18140_v17 = vadd.f32 %v17948_v60, %v21690_v33  ;;  %17336 = vmatmul.mubr.msk.f32.gmra.mrb[110].mxu1 %vm1018_vm0, %v6561_v61  ;;  %v12419_v0 = vpop.f32.mrb[1].mxu0  ;;  %18106 = vmatmul.mubr.msk.f32.gmra.mrb[106].mxu0 %vm1018_vm0, %v11946_v63  ;;  %v11949_v33 = vld [vmem:[#allocation2 + $0x49a] sm:$0xff] }
 0x4c1   : > { %v18141_v62 = vadd.f32 %v12419_v0, %v21692_v35  ;;  %17338 = vmatprep.mubr.msk.f32.mxu1 %vm1018_vm0, %v6562_v38  ;;  %18108 = vmatprep.mubr.msk.f32.mxu0 %vm1018_vm0, %v11947_v40 }
 0x4c2   : > { %13188 = vst.msk [vmem:[%s21959_s14 + $0x8] sm:$0xff] %vm13186_vm10, %v18140_v17  ;;  %v13316_v6 = vsel %vm13186_vm10, %v18140_v17, 0.0  ;;  %v13577_v37 = vmul.f32 %v18140_v17, %v18140_v17 }
 0x4c3   : > { %13187 = vst.msk [vmem:[%s21959_s14] sm:$0xff] %vm13186_vm10, %v18141_v62  ;;  %v13315_v61 = vsel %vm13186_vm10, %v18141_v62, 0.0  ;;  %v13576_v63 = vmul.f32 %v18141_v62, %v18141_v62  ;;  %v17951_v35 = vpop.f32.mrb[2].mxu0  ;;  %v6565_v62 = vld [vmem:[#allocation2 + $0x4a1] sm:$0xff] }
 0x4c4   : > { %v13705_v38 = vsel %vm13186_vm10, %v13577_v37, 0.0  ;;  %v13317_v60 = vadd.f32 %v13316_v6, %v13315_v61  ;;  %v18142_v40 = vadd.f32 %v17951_v35, %v21698_v47  ;;  %17339 = vmatmul.mubr.msk.f32.gmra.mrb[112].mxu1 %vm1018_vm0, %v6563_v14  ;;  %v12429_v0 = vpop.f32.mrb[3].mxu0  ;;  %18109 = vmatmul.mubr.msk.f32.gmra.mrb[108].mxu0 %vm1018_vm0, %v11948_v43  ;;  %v6566_v6 = vld [vmem:[#allocation2 + $0x4b1] sm:$0xff] }
 0x4c5   : > { %v13704_v17 = vsel %vm13186_vm10, %v13576_v63, 0.0  ;;  %v18143_v22 = vadd.f32 %v12429_v0, %v21700_v48  ;;  %17341 = vmatprep.mubr.msk.f32.mxu1 %vm1018_vm0, %v6564_v24  ;;  %18111 = vmatprep.mubr.msk.f32.mxu0 %vm1018_vm0, %v11949_v33  ;;  %v11951_v47 = vld [vmem:[#allocation2 + $0x4b2] sm:$0xff] }
 0x4c6   : > { %v13706_v37 = vadd.f32 %v13705_v38, %v13704_v17  ;;  %13190 = vst.msk [vmem:[%s21959_s14 + $0x18] sm:$0xff] %vm13186_vm10, %v18142_v40  ;;  %v13579_v61 = vmul.f32 %v18142_v40, %v18142_v40  ;;  %v13320_v35 = vsel %vm13186_vm10, %v18142_v40, 0.0 }
 0x4c7   : > { %13189 = vst.msk [vmem:[%s21959_s14 + $0x10] sm:$0xff] %vm13186_vm10, %v18143_v22  ;;  %v13318_v14 = vsel %vm13186_vm10, %v18143_v22, 0.0  ;;  %v13578_v43 = vmul.f32 %v18143_v22, %v18143_v22  ;;  %v17954_v63 = vpop.f32.mrb[4].mxu0  ;;  %v6567_v22 = vld [vmem:[#allocation2 + $0x4b9] sm:$0xff] }
 0x4c8   : > { %v13319_v48 = vadd.f32 %v13318_v14, %v13317_v60  ;;  %v18144_v24 = vadd.f32 %v17954_v63, %v21706_v8  ;;  %17342 = vmatmul.mubr.msk.f32.gmra.mrb[114].mxu1 %vm1018_vm0, %v6565_v62  ;;  %v12439_v33 = vpop.f32.mrb[5].mxu0  ;;  %18112 = vmatmul.mubr.msk.f32.gmra.mrb[110].mxu0 %vm1018_vm0, %v11950_v51  ;;  %v11952_v60 = vld [vmem:[#allocation2 + $0x4ba] sm:$0xff]  ;;  %v11953_v14 = vld [vmem:[#allocation2 + $0x4c2] sm:$0xff]  ;;  %v13709_v51 = vsel %vm13186_vm10, %v13579_v61, 0.0 }
 0x4c9   : > { %v13707_v38 = vsel %vm13186_vm10, %v13578_v43, 0.0  ;;  %v18145_v0 = vadd.f32 %v12439_v33, %v21708_v12  ;;  %17344 = vmatprep.mubr.msk.f32.mxu1 %vm1018_vm0, %v6566_v6  ;;  %18114 = vmatprep.mubr.msk.f32.mxu0 %vm1018_vm0, %v11951_v47  ;;  %v6568_v62 = vld [vmem:[#allocation2 + $0x4c1] sm:$0xff] }
 0x4ca   : > { %v13321_v17 = vadd.f32 %v13320_v35, %v13319_v48  ;;  %v13708_v8 = vadd.f32 %v13707_v38, %v13706_v37  ;;  %13192 = vst.msk [vmem:[%s21959_s14 + $0x28] sm:$0xff] %vm13186_vm10, %v18144_v24  ;;  %v13581_v63 = vmul.f32 %v18144_v24, %v18144_v24  ;;  %v13324_v61 = vsel %vm13186_vm10, %v18144_v24, 0.0  ;;  %v6569_v38 = vld [vmem:[#allocation2 + $0x4c9] sm:$0xff] }
 0x4cb   : > { %13191 = vst.msk [vmem:[%s21959_s14 + $0x20] sm:$0xff] %vm13186_vm10, %v18145_v0  ;;  %v13322_v40 = vsel %vm13186_vm10, %v18145_v0, 0.0  ;;  %v13580_v12 = vmul.f32 %v18145_v0, %v18145_v0  ;;  %v17957_v43 = vpop.f32.mrb[6].mxu0  ;;  %v11954_v0 = vld [vmem:[#allocation2 + $0x4ca] sm:$0xff] }
 0x4cc   : > { %v13710_v6 = vadd.f32 %v13709_v51, %v13708_v8  ;;  %v13323_v47 = vadd.f32 %v13322_v40, %v13321_v17  ;;  %v18146_v33 = vadd.f32 %v17957_v43, %v21714_v29  ;;  %17345 = vmatmul.mubr.msk.f32.gmra.mrb[116].mxu1 %vm1018_vm0, %v6567_v22  ;;  %v12449_v37 = vpop.f32.mrb[7].mxu0  ;;  %18115 = vmatmul.mubr.msk.f32.gmra.mrb[112].mxu0 %vm1018_vm0, %v11952_v60  ;;  %v6570_v22 = vld [vmem:[#allocation2 + $0x4d9] sm:$0xff]  ;;  %v13713_v60 = vsel %vm13186_vm10, %v13581_v63, 0.0 }
 0x4cd   : > { %v13711_v48 = vsel %vm13186_vm10, %v13580_v12, 0.0  ;;  %v18147_v35 = vadd.f32 %v12449_v37, %v21716_v32  ;;  %17347 = vmatprep.mubr.msk.f32.mxu1 %vm1018_vm0, %v6568_v62  ;;  %18117 = vmatprep.mubr.msk.f32.mxu0 %vm1018_vm0, %v11953_v14  ;;  %v11955_v8 = vld [vmem:[#allocation2 + $0x4da] sm:$0xff] }
 0x4ce   : > { %v13325_v17 = vadd.f32 %v13324_v61, %v13323_v47  ;;  %v13712_v29 = vadd.f32 %v13711_v48, %v13710_v6  ;;  %13194 = vst.msk [vmem:[%s21959_s14 + $0x38] sm:$0xff] %vm13186_vm10, %v18146_v33  ;;  %v13583_v51 = vmul.f32 %v18146_v33, %v18146_v33  ;;  %v13328_v63 = vsel %vm13186_vm10, %v18146_v33, 0.0  ;;  %v6571_v37 = vld [vmem:[#allocation2 + $0x4e1] sm:$0xff] }
 0x4cf   : > { %13193 = vst.msk [vmem:[%s21959_s14 + $0x30] sm:$0xff] %vm13186_vm10, %v18147_v35  ;;  %v13326_v24 = vsel %vm13186_vm10, %v18147_v35, 0.0  ;;  %v13582_v32 = vmul.f32 %v18147_v35, %v18147_v35  ;;  %v17960_v40 = vpop.f32.mrb[8].mxu0  ;;  %v11956_v61 = vld [vmem:[#allocation2 + $0x4e2] sm:$0xff] }
 0x4d0   : > { %v13714_v62 = vadd.f32 %v13713_v60, %v13712_v29  ;;  %v13327_v14 = vadd.f32 %v13326_v24, %v13325_v17  ;;  %v18148_v12 = vadd.f32 %v17960_v40, %v21722_v50  ;;  %17348 = vmatmul.mubr.msk.f32.gmra.mrb[118].mxu1 %vm1018_vm0, %v6569_v38  ;;  %v12459_v43 = vpop.f32.mrb[9].mxu0  ;;  %18118 = vmatmul.mubr.msk.f32.gmra.mrb[114].mxu0 %vm1018_vm0, %v11954_v0  ;;  %v6572_v35 = vld [vmem:[#allocation2 + $0x4e9] sm:$0xff]  ;;  %v13717_v0 = vsel %vm13186_vm10, %v13583_v51, 0.0 }
 0x4d1   : > { %v13715_v6 = vsel %vm13186_vm10, %v13582_v32, 0.0  ;;  %v18149_v47 = vadd.f32 %v12459_v43, %v21724_v25  ;;  %17350 = vmatprep.mubr.msk.f32.mxu1 %vm1018_vm0, %v6570_v22  ;;  %18120 = vmatprep.mubr.msk.f32.mxu0 %vm1018_vm0, %v11955_v8  ;;  %v11957_v38 = vld [vmem:[#allocation2 + $0x4ea] sm:$0xff] }
 0x4d2   : > { %v13329_v48 = vadd.f32 %v13328_v63, %v13327_v14  ;;  %v13716_v50 = vadd.f32 %v13715_v6, %v13714_v62  ;;  %13196 = vst.msk [vmem:[%s21959_s14 + $0x48] sm:$0xff] %vm13186_vm10, %v18148_v12  ;;  %v13585_v17 = vmul.f32 %v18148_v12, %v18148_v12  ;;  %v13332_v51 = vsel %vm13186_vm10, %v18148_v12, 0.0  ;;  %v6573_v62 = vld [vmem:[#allocation2 + $0x4f1] sm:$0xff]  ;;  %v6574_v63 = vld [vmem:[#allocation2 + $0x501] sm:$0xff] }
 0x4d3   : > { %13195 = vst.msk [vmem:[%s21959_s14 + $0x40] sm:$0xff] %vm13186_vm10, %v18149_v47  ;;  %v13330_v33 = vsel %vm13186_vm10, %v18149_v47, 0.0  ;;  %v13584_v25 = vmul.f32 %v18149_v47, %v18149_v47  ;;  %v17963_v29 = vpop.f32.mrb[10].mxu0  ;;  %v11958_v14 = vld [vmem:[#allocation2 + $0x4f2] sm:$0xff]  ;;  %v11959_v6 = vld [vmem:[#allocation2 + $0x502] sm:$0xff] }
 0x4d4   : > { %v13718_v22 = vadd.f32 %v13717_v0, %v13716_v50  ;;  %v13331_v8 = vadd.f32 %v13330_v33, %v13329_v48  ;;  %v18150_v60 = vadd.f32 %v17963_v29, %v21730_v39  ;;  %17351 = vmatmul.mubr.msk.f32.gmra.mrb[120].mxu1 %vm1018_vm0, %v6571_v37  ;;  %v12469_v24 = vpop.f32.mrb[11].mxu0  ;;  %18121 = vmatmul.mubr.msk.f32.gmra.mrb[116].mxu0 %vm1018_vm0, %v11956_v61  ;;  %v13721_v47 = vsel %vm13186_vm10, %v13585_v17, 0.0  ;;  %v11960_v29 = vld [vmem:[#allocation2 + $0x50a] sm:$0xff] }
 0x4d5   : > { %v13719_v32 = vsel %vm13186_vm10, %v13584_v25, 0.0  ;;  %v18151_v40 = vadd.f32 %v12469_v24, %v21732_v31  ;;  %17353 = vmatprep.mubr.msk.f32.mxu1 %vm1018_vm0, %v6572_v35  ;;  %18123 = vmatprep.mubr.msk.f32.mxu0 %vm1018_vm0, %v11957_v38  ;;  %v6575_v25 = vld [vmem:[#allocation2 + $0x509] sm:$0xff]  ;;  %v11961_v24 = vld [vmem:[#allocation2 + $0x512] sm:$0xff] }
 0x4d6   : > { %v13333_v43 = vadd.f32 %v13332_v51, %v13331_v8  ;;  %v13720_v39 = vadd.f32 %v13719_v32, %v13718_v22  ;;  %13198 = vst.msk [vmem:[%s21959_s14 + $0x58] sm:$0xff] %vm13186_vm10, %v18150_v60  ;;  %v13587_v37 = vmul.f32 %v18150_v60, %v18150_v60  ;;  %v13336_v0 = vsel %vm13186_vm10, %v18150_v60, 0.0  ;;  %v6576_v8 = vld [vmem:[#allocation2 + $0x511] sm:$0xff] }
 0x4d7   : > { %13197 = vst.msk [vmem:[%s21959_s14 + $0x50] sm:$0xff] %vm13186_vm10, %v18151_v40  ;;  %v13334_v12 = vsel %vm13186_vm10, %v18151_v40, 0.0  ;;  %v13586_v31 = vmul.f32 %v18151_v40, %v18151_v40  ;;  %v17966_v61 = vpop.f32.mrb[12].mxu0 }
 0x4d8   : > { %v13722_v48 = vadd.f32 %v13721_v47, %v13720_v39  ;;  %v13335_v50 = vadd.f32 %v13334_v12, %v13333_v43  ;;  %v18152_v35 = vadd.f32 %v17966_v61, %v21738_v10  ;;  %17354 = vmatmul.mubr.msk.f32.gmra.mrb[122].mxu1 %vm1018_vm0, %v6573_v62  ;;  %v12479_v38 = vpop.f32.mrb[13].mxu0  ;;  %18124 = vmatmul.mubr.msk.f32.gmra.mrb[118].mxu0 %vm1018_vm0, %v11958_v14  ;;  %v13725_v51 = vsel %vm13186_vm10, %v13587_v37, 0.0  ;;  %v6577_v37 = vld [vmem:[#allocation2 + $0x519] sm:$0xff]  ;;  %v11963_v61 = vld [vmem:[#allocation2 + $0x52a] sm:$0xff] }
 0x4d9   : > { %v13723_v17 = vsel %vm13186_vm10, %v13586_v31, 0.0  ;;  %v18153_v33 = vadd.f32 %v12479_v38, %v21740_v21  ;;  %17356 = vmatprep.mubr.msk.f32.mxu1 %vm1018_vm0, %v6574_v63  ;;  %18126 = vmatprep.mubr.msk.f32.mxu0 %vm1018_vm0, %v11959_v6  ;;  %v11962_v12 = vld [vmem:[#allocation2 + $0x51a] sm:$0xff] }
 0x4da   : > { %v13337_v22 = vadd.f32 %v13336_v0, %v13335_v50  ;;  %v13724_v10 = vadd.f32 %v13723_v17, %v13722_v48  ;;  %13200 = vst.msk [vmem:[%s21959_s14 + $0x68] sm:$0xff] %vm13186_vm10, %v18152_v35  ;;  %v13589_v32 = vmul.f32 %v18152_v35, %v18152_v35  ;;  %v13340_v63 = vsel %vm13186_vm10, %v18152_v35, 0.0 }
 0x4db   : > { %13199 = vst.msk [vmem:[%s21959_s14 + $0x60] sm:$0xff] %vm13186_vm10, %v18153_v33  ;;  %v13338_v60 = vsel %vm13186_vm10, %v18153_v33, 0.0  ;;  %v13588_v21 = vmul.f32 %v18153_v33, %v18153_v33  ;;  %v17969_v40 = vpop.f32.mrb[14].mxu0 }
 0x4dc   : > { %v13726_v62 = vadd.f32 %v13725_v51, %v13724_v10  ;;  %v13339_v14 = vadd.f32 %v13338_v60, %v13337_v22  ;;  %v18154_v43 = vadd.f32 %v17969_v40, %v21746_v58  ;;  %17357 = vmatmul.mubr.msk.f32.gmra.mrb[124].mxu1 %vm1018_vm0, %v6575_v25  ;;  %v12489_v39 = vpop.f32.mrb[15].mxu0  ;;  %18127 = vmatmul.mubr.msk.f32.gmra.mrb[120].mxu0 %vm1018_vm0, %v11960_v29  ;;  %v13729_v48 = vsel %vm13186_vm10, %v13589_v32, 0.0  ;;  %v11965_v32 = vld [vmem:[#allocation2 + $0x53a] sm:$0xff] }
 0x4dd   : > { %v13727_v6 = vsel %vm13186_vm10, %v13588_v21, 0.0  ;;  %v18155_v47 = vadd.f32 %v12489_v39, %v21748_v59  ;;  %17359 = vmatprep.mubr.msk.f32.mxu1 %vm1018_vm0, %v6576_v8  ;;  %18129 = vmatprep.mubr.msk.f32.mxu0 %vm1018_vm0, %v11961_v24  ;;  %v11964_v8 = vld [vmem:[#allocation2 + $0x532] sm:$0xff] }
 0x4de   : > { %v13341_v31 = vadd.f32 %v13340_v63, %v13339_v14  ;;  %v13728_v58 = vadd.f32 %v13727_v6, %v13726_v62  ;;  %13202 = vst.msk [vmem:[%s21959_s14 + $0x78] sm:$0xff] %vm13186_vm10, %v18154_v43  ;;  %v13591_v50 = vmul.f32 %v18154_v43, %v18154_v43  ;;  %v13344_v29 = vsel %vm13186_vm10, %v18154_v43, 0.0 }
 0x4df   : > { %13201 = vst.msk [vmem:[%s21959_s14 + $0x70] sm:$0xff] %vm13186_vm10, %v18155_v47  ;;  %v13342_v35 = vsel %vm13186_vm10, %v18155_v47, 0.0  ;;  %v13590_v59 = vmul.f32 %v18155_v47, %v18155_v47  ;;  %v17972_v38 = vpop.f32.mrb[16].mxu0 }
 0x4e0   : > { %v13730_v0 = vadd.f32 %v13729_v48, %v13728_v58  ;;  %v13343_v17 = vadd.f32 %v13342_v35, %v13341_v31  ;;  %v18156_v33 = vadd.f32 %v17972_v38, %v21754_v9  ;;  %17360 = vmatmul.mubr.msk.f32.gmra.mrb[126].mxu1 %vm1018_vm0, %v6577_v37  ;;  %v12499_v25 = vpop.f32.mrb[17].mxu0  ;;  %18130 = vmatmul.mubr.msk.f32.gmra.mrb[122].mxu0 %vm1018_vm0, %v11962_v12  ;;  %v13733_v9 = vsel %vm13186_vm10, %v13591_v50, 0.0  ;;  %v11966_v37 = vld [vmem:[#allocation2 + $0x542] sm:$0xff] }
 0x4e1   : > { %v13731_v22 = vsel %vm13186_vm10, %v13590_v59, 0.0  ;;  %v18157_v10 = vadd.f32 %v12499_v25, %v21756_v11  ;;  %18132 = vmatprep.mubr.msk.f32.mxu0 %vm1018_vm0, %v11963_v61 }
 0x4e2   : > { %v13345_v24 = vadd.f32 %v13344_v29, %v13343_v17  ;;  %v13732_v51 = vadd.f32 %v13731_v22, %v13730_v0  ;;  %13204 = vst.msk [vmem:[%s21959_s14 + $0x88] sm:$0xff] %vm13186_vm10, %v18156_v33  ;;  %v13593_v60 = vmul.f32 %v18156_v33, %v18156_v33  ;;  %v13348_v63 = vsel %vm13186_vm10, %v18156_v33, 0.0 }
 0x4e3   : > { %13203 = vst.msk [vmem:[%s21959_s14 + $0x80] sm:$0xff] %vm13186_vm10, %v18157_v10  ;;  %v13346_v21 = vsel %vm13186_vm10, %v18157_v10, 0.0  ;;  %v13592_v40 = vmul.f32 %v18157_v10, %v18157_v10  ;;  %v17975_v62 = vpop.f32.mrb[18].mxu0 }
 0x4e4   : > { %v13734_v11 = vadd.f32 %v13733_v9, %v13732_v51  ;;  %v13347_v14 = vadd.f32 %v13346_v21, %v13345_v24  ;;  %v18158_v43 = vadd.f32 %v17975_v62, %v21762_v19  ;;  %v12509_v39 = vpop.f32.mrb[19].mxu0  ;;  %18133 = vmatmul.mubr.msk.f32.gmra.mrb[124].mxu0 %vm1018_vm0, %v11964_v8  ;;  %v13737_v58 = vsel %vm13186_vm10, %v13593_v60, 0.0 }
 0x4e5   : > { %v13735_v6 = vsel %vm13186_vm10, %v13592_v40, 0.0  ;;  %v18159_v47 = vadd.f32 %v12509_v39, %v21764_v20  ;;  %18135 = vmatprep.mubr.msk.f32.mxu0 %vm1018_vm0, %v11965_v32 }
 0x4e6   : > { %v13349_v12 = vadd.f32 %v13348_v63, %v13347_v14  ;;  %v13736_v31 = vadd.f32 %v13735_v6, %v13734_v11  ;;  %13206 = vst.msk [vmem:[%s21959_s14 + $0x98] sm:$0xff] %vm13186_vm10, %v18158_v43  ;;  %v13595_v19 = vmul.f32 %v18158_v43, %v18158_v43  ;;  %v13352_v0 = vsel %vm13186_vm10, %v18158_v43, 0.0 }
 0x4e7   : > { %13205 = vst.msk [vmem:[%s21959_s14 + $0x90] sm:$0xff] %vm13186_vm10, %v18159_v47  ;;  %v13350_v61 = vsel %vm13186_vm10, %v18159_v47, 0.0  ;;  %v13594_v48 = vmul.f32 %v18159_v47, %v18159_v47  ;;  %v17978_v50 = vpop.f32.mrb[20].mxu0 }
 0x4e8   : > { %v13738_v35 = vadd.f32 %v13737_v58, %v13736_v31  ;;  %v13351_v20 = vadd.f32 %v13350_v61, %v13349_v12  ;;  %v18160_v59 = vadd.f32 %v17978_v50, %v21770_v28  ;;  %v12519_v38 = vpop.f32.mrb[21].mxu0  ;;  %18136 = vmatmul.mubr.msk.f32.gmra.mrb[126].mxu0 %vm1018_vm0, %v11966_v37  ;;  %v13741_v22 = vsel %vm13186_vm10, %v13595_v19, 0.0 }
 0x4e9   : > { %v13739_v17 = vsel %vm13186_vm10, %v13594_v48, 0.0  ;;  %v18161_v33 = vadd.f32 %v12519_v38, %v21772_v56  ;;  %vm13965_vm0 = vcmask 1040384  }
 0x4ea   : > { %v13353_v25 = vadd.f32 %v13352_v0, %v13351_v20  ;;  %v13740_v29 = vadd.f32 %v13739_v17, %v13738_v35  ;;  %13208 = vst.msk [vmem:[%s21959_s14 + $0xa8] sm:$0xff] %vm13186_vm10, %v18160_v59  ;;  %v13597_v10 = vmul.f32 %v18160_v59, %v18160_v59  ;;  %v13356_v60 = vsel %vm13186_vm10, %v18160_v59, 0.0 }
 0x4eb   : > { %13207 = vst.msk [vmem:[%s21959_s14 + $0xa0] sm:$0xff] %vm13186_vm10, %v18161_v33  ;;  %v13354_v28 = vsel %vm13186_vm10, %v18161_v33, 0.0  ;;  %v13596_v8 = vmul.f32 %v18161_v33, %v18161_v33  ;;  %v17981_v24 = vpop.f32.mrb[22].mxu0 }
 0x4ec   : > { %v13742_v51 = vadd.f32 %v13741_v22, %v13740_v29  ;;  %v13355_v32 = vadd.f32 %v13354_v28, %v13353_v25  ;;  %v18162_v9 = vadd.f32 %v17981_v24, %v21778_v42  ;;  %v12529_v56 = vpop.f32.mrb[23].mxu0  ;;  %v13745_v14 = vsel %vm13186_vm10, %v13597_v10, 0.0 }
 0x4ed   : > { %v13743_v21 = vsel %vm13186_vm10, %v13596_v8, 0.0  ;;  %v18163_v40 = vadd.f32 %v12529_v56, %v21780_v44 }
 0x4ee   : > { %v13357_v62 = vadd.f32 %v13356_v60, %v13355_v32  ;;  %v13744_v11 = vadd.f32 %v13743_v21, %v13742_v51  ;;  %13210 = vst.msk [vmem:[%s21959_s14 + $0xb8] sm:$0xff] %vm13186_vm10, %v18162_v9  ;;  %v13599_v43 = vmul.f32 %v18162_v9, %v18162_v9  ;;  %v13360_v12 = vsel %vm13186_vm10, %v18162_v9, 0.0 }
 0x4ef   : > { %13209 = vst.msk [vmem:[%s21959_s14 + $0xb0] sm:$0xff] %vm13186_vm10, %v18163_v40  ;;  %v13358_v42 = vsel %vm13186_vm10, %v18163_v40, 0.0  ;;  %v13598_v39 = vmul.f32 %v18163_v40, %v18163_v40  ;;  %v17984_v63 = vpop.f32.mrb[24].mxu0 }
 0x4f0   : > { %v13746_v6 = vadd.f32 %v13745_v14, %v13744_v11  ;;  %v13359_v47 = vadd.f32 %v13358_v42, %v13357_v62  ;;  %v18164_v37 = vadd.f32 %v17984_v63, %v21786_v16  ;;  %v12539_v44 = vpop.f32.mrb[25].mxu0  ;;  %v13749_v48 = vsel %vm13186_vm10, %v13599_v43, 0.0 }
 0x4f1   : > { %v13747_v31 = vsel %vm13186_vm10, %v13598_v39, 0.0  ;;  %v18165_v58 = vadd.f32 %v12539_v44, %v21788_v5 }
 0x4f2   : > { %v13361_v19 = vadd.f32 %v13360_v12, %v13359_v47  ;;  %v13748_v61 = vadd.f32 %v13747_v31, %v13746_v6  ;;  %13212 = vst.msk [vmem:[%s21959_s14 + $0xc8] sm:$0xff] %vm13186_vm10, %v18164_v37  ;;  %v13601_v50 = vmul.f32 %v18164_v37, %v18164_v37  ;;  %v13364_v17 = vsel %vm13186_vm10, %v18164_v37, 0.0 }
 0x4f3   : > { %13211 = vst.msk [vmem:[%s21959_s14 + $0xc0] sm:$0xff] %vm13186_vm10, %v18165_v58  ;;  %v13362_v16 = vsel %vm13186_vm10, %v18165_v58, 0.0  ;;  %v13600_v35 = vmul.f32 %v18165_v58, %v18165_v58  ;;  %v17987_v20 = vpop.f32.mrb[26].mxu0 }
 0x4f4   : > { %v13750_v59 = vadd.f32 %v13749_v48, %v13748_v61  ;;  %v13363_v38 = vadd.f32 %v13362_v16, %v13361_v19  ;;  %v18166_v0 = vadd.f32 %v17987_v20, %v21794_v54  ;;  %v12549_v5 = vpop.f32.mrb[27].mxu0  ;;  %v13753_v10 = vsel %vm13186_vm10, %v13601_v50, 0.0 }
 0x4f5   : > { %v13751_v33 = vsel %vm13186_vm10, %v13600_v35, 0.0  ;;  %v18167_v25 = vadd.f32 %v12549_v5, %v21796_v46 }
 0x4f6   : > { %v13365_v29 = vadd.f32 %v13364_v17, %v13363_v38  ;;  %v13752_v22 = vadd.f32 %v13751_v33, %v13750_v59  ;;  %13214 = vst.msk [vmem:[%s21959_s14 + $0xd8] sm:$0xff] %vm13186_vm10, %v18166_v0  ;;  %v13603_v28 = vmul.f32 %v18166_v0, %v18166_v0  ;;  %v13368_v56 = vsel %vm13186_vm10, %v18166_v0, 0.0 }
 0x4f7   : > { %13213 = vst.msk [vmem:[%s21959_s14 + $0xd0] sm:$0xff] %vm13186_vm10, %v18167_v25  ;;  %v13366_v54 = vsel %vm13186_vm10, %v18167_v25, 0.0  ;;  %v13602_v8 = vmul.f32 %v18167_v25, %v18167_v25  ;;  %v17990_v24 = vpop.f32.mrb[28].mxu0 }
 0x4f8   : > { %v13754_v51 = vadd.f32 %v13753_v10, %v13752_v22  ;;  %v13367_v32 = vadd.f32 %v13366_v54, %v13365_v29  ;;  %v18168_v9 = vadd.f32 %v17990_v24, %v21802_v34  ;;  %v12559_v46 = vpop.f32.mrb[29].mxu0  ;;  %v13757_v11 = vsel %vm13186_vm10, %v13603_v28, 0.0 }
 0x4f9   : > { %v13755_v60 = vsel %vm13186_vm10, %v13602_v8, 0.0  ;;  %v18169_v21 = vadd.f32 %v12559_v46, %v21804_v3 }
 0x4fa   : > { %v13369_v40 = vadd.f32 %v13368_v56, %v13367_v32  ;;  %v13756_v62 = vadd.f32 %v13755_v60, %v13754_v51  ;;  %13216 = vst.msk [vmem:[%s21959_s14 + $0xe8] sm:$0xff] %vm13186_vm10, %v18168_v9  ;;  %v13605_v14 = vmul.f32 %v18168_v9, %v18168_v9  ;;  %v13372_v47 = vsel %vm13186_vm10, %v18168_v9, 0.0 }
 0x4fb   : > { %13215 = vst.msk [vmem:[%s21959_s14 + $0xe0] sm:$0xff] %vm13186_vm10, %v18169_v21  ;;  %v13370_v34 = vsel %vm13186_vm10, %v18169_v21, 0.0  ;;  %v13604_v43 = vmul.f32 %v18169_v21, %v18169_v21  ;;  %v17993_v42 = vpop.f32.mrb[30].mxu0 }
 0x4fc   : > { %v13758_v39 = vadd.f32 %v13757_v11, %v13756_v62  ;;  %v13371_v63 = vadd.f32 %v13370_v34, %v13369_v40  ;;  %v18170_v6 = vadd.f32 %v17993_v42, %v21810_v53  ;;  %v12569_v3 = vpop.f32.mrb[31].mxu0  ;;  %v13761_v58 = vsel %vm13186_vm10, %v13605_v14, 0.0 }
 0x4fd   : > { %v13759_v37 = vsel %vm13186_vm10, %v13604_v43, 0.0  ;;  %v18171_v44 = vadd.f32 %v12569_v3, %v21812_v55 }
 0x4fe   : > { %v13373_v12 = vadd.f32 %v13372_v47, %v13371_v63  ;;  %v13760_v31 = vadd.f32 %v13759_v37, %v13758_v39  ;;  %13218 = vst.msk [vmem:[%s21959_s14 + $0xf8] sm:$0xff] %vm13186_vm10, %v18170_v6  ;;  %v13607_v19 = vmul.f32 %v18170_v6, %v18170_v6  ;;  %v13376_v20 = vsel %vm13186_vm10, %v18170_v6, 0.0 }
 0x4ff   : > { %13217 = vst.msk [vmem:[%s21959_s14 + $0xf0] sm:$0xff] %vm13186_vm10, %v18171_v44  ;;  %v13374_v53 = vsel %vm13186_vm10, %v18171_v44, 0.0  ;;  %v13606_v61 = vmul.f32 %v18171_v44, %v18171_v44  ;;  %v17996_v48 = vpop.f32.mrb[32].mxu0 }
 0x500   : > { %v13762_v50 = vadd.f32 %v13761_v58, %v13760_v31  ;;  %v13375_v16 = vadd.f32 %v13374_v53, %v13373_v12  ;;  %v18172_v35 = vadd.f32 %v17996_v48, %v21818_v13  ;;  %v12579_v55 = vpop.f32.mrb[33].mxu0  ;;  %v13765_v17 = vsel %vm13186_vm10, %v13607_v19, 0.0 }
 0x501   : > { %v13763_v59 = vsel %vm13186_vm10, %v13606_v61, 0.0  ;;  %v18173_v38 = vadd.f32 %v12579_v55, %v21820_v15 }
 0x502   : > { %v13377_v0 = vadd.f32 %v13376_v20, %v13375_v16  ;;  %v13764_v5 = vadd.f32 %v13763_v59, %v13762_v50  ;;  %13220 = vst.msk [vmem:[%s21959_s14 + $0x108] sm:$0xff] %vm13186_vm10, %v18172_v35  ;;  %v13609_v33 = vmul.f32 %v18172_v35, %v18172_v35  ;;  %v13380_v54 = vsel %vm13186_vm10, %v18172_v35, 0.0 }
 0x503   : > { %13219 = vst.msk [vmem:[%s21959_s14 + $0x100] sm:$0xff] %vm13186_vm10, %v18173_v38  ;;  %v13378_v13 = vsel %vm13186_vm10, %v18173_v38, 0.0  ;;  %v13608_v25 = vmul.f32 %v18173_v38, %v18173_v38  ;;  %v17999_v29 = vpop.f32.mrb[34].mxu0 }
 0x504   : > { %v13766_v22 = vadd.f32 %v13765_v17, %v13764_v5  ;;  %v13379_v10 = vadd.f32 %v13378_v13, %v13377_v0  ;;  %v18174_v28 = vadd.f32 %v17999_v29, %v21826_v18  ;;  %v12589_v15 = vpop.f32.mrb[35].mxu0  ;;  %v13769_v9 = vsel %vm13186_vm10, %v13609_v33, 0.0 }
 0x505   : > { %v13767_v8 = vsel %vm13186_vm10, %v13608_v25, 0.0  ;;  %v18175_v24 = vadd.f32 %v12589_v15, %v21828_v26 }
 0x506   : > { %v13381_v51 = vadd.f32 %v13380_v54, %v13379_v10  ;;  %v13768_v32 = vadd.f32 %v13767_v8, %v13766_v22  ;;  %13222 = vst.msk [vmem:[%s21959_s14 + $0x118] sm:$0xff] %vm13186_vm10, %v18174_v28  ;;  %v13611_v46 = vmul.f32 %v18174_v28, %v18174_v28  ;;  %v13384_v11 = vsel %vm13186_vm10, %v18174_v28, 0.0 }
 0x507   : > { %13221 = vst.msk [vmem:[%s21959_s14 + $0x110] sm:$0xff] %vm13186_vm10, %v18175_v24  ;;  %v13382_v18 = vsel %vm13186_vm10, %v18175_v24, 0.0  ;;  %v13610_v56 = vmul.f32 %v18175_v24, %v18175_v24  ;;  %v18002_v60 = vpop.f32.mrb[36].mxu0 }
 0x508   : > { %v13770_v21 = vadd.f32 %v13769_v9, %v13768_v32  ;;  %v13383_v40 = vadd.f32 %v13382_v18, %v13381_v51  ;;  %v18176_v62 = vadd.f32 %v18002_v60, %v21834_v52  ;;  %v12599_v26 = vpop.f32.mrb[37].mxu0  ;;  %v13773_v39 = vsel %vm13186_vm10, %v13611_v46, 0.0 }
 0x509   : > { %v13771_v14 = vsel %vm13186_vm10, %v13610_v56, 0.0  ;;  %v18177_v34 = vadd.f32 %v12599_v26, %v21836_v57 }
 0x50a   : > { %v13385_v43 = vadd.f32 %v13384_v11, %v13383_v40  ;;  %v13772_v42 = vadd.f32 %v13771_v14, %v13770_v21  ;;  %13224 = vst.msk [vmem:[%s21959_s14 + $0x128] sm:$0xff] %vm13186_vm10, %v18176_v62  ;;  %v13613_v63 = vmul.f32 %v18176_v62, %v18176_v62  ;;  %v13388_v12 = vsel %vm13186_vm10, %v18176_v62, 0.0 }
 0x50b   : > { %13223 = vst.msk [vmem:[%s21959_s14 + $0x120] sm:$0xff] %vm13186_vm10, %v18177_v34  ;;  %v13386_v52 = vsel %vm13186_vm10, %v18177_v34, 0.0  ;;  %v13612_v6 = vmul.f32 %v18177_v34, %v18177_v34  ;;  %v18005_v3 = vpop.f32.mrb[38].mxu0 }
 0x50c   : > { %v13774_v47 = vadd.f32 %v13773_v39, %v13772_v42  ;;  %v13387_v37 = vadd.f32 %v13386_v52, %v13385_v43  ;;  %v18178_v44 = vadd.f32 %v18005_v3, %v21842_v36  ;;  %v12609_v57 = vpop.f32.mrb[39].mxu0  ;;  %v13777_v61 = vsel %vm13186_vm10, %v13613_v63, 0.0 }
 0x50d   : > { %v13775_v31 = vsel %vm13186_vm10, %v13612_v6, 0.0  ;;  %v18179_v58 = vadd.f32 %v12609_v57, %v21844_v41 }
 0x50e   : > { %v13389_v19 = vadd.f32 %v13388_v12, %v13387_v37  ;;  %v13776_v53 = vadd.f32 %v13775_v31, %v13774_v47  ;;  %13226 = vst.msk [vmem:[%s21959_s14 + $0x138] sm:$0xff] %vm13186_vm10, %v18178_v44  ;;  %v13615_v48 = vmul.f32 %v18178_v44, %v18178_v44  ;;  %v13392_v59 = vsel %vm13186_vm10, %v18178_v44, 0.0 }
 0x50f   : > { %13225 = vst.msk [vmem:[%s21959_s14 + $0x130] sm:$0xff] %vm13186_vm10, %v18179_v58  ;;  %v13390_v36 = vsel %vm13186_vm10, %v18179_v58, 0.0  ;;  %v13614_v50 = vmul.f32 %v18179_v58, %v18179_v58  ;;  %v18008_v16 = vpop.f32.mrb[40].mxu0 }
 0x510   : > { %v13778_v35 = vadd.f32 %v13777_v61, %v13776_v53  ;;  %v13391_v55 = vadd.f32 %v13390_v36, %v13389_v19  ;;  %v18180_v20 = vadd.f32 %v18008_v16, %v21850_v2  ;;  %v12619_v41 = vpop.f32.mrb[41].mxu0  ;;  %v13781_v33 = vsel %vm13186_vm10, %v13615_v48, 0.0  ;;  %v22619_v16 = vld [vmem:[#allocation4_spill] sm:$0xff] }
 0x511   : > { %v13779_v38 = vsel %vm13186_vm10, %v13614_v50, 0.0  ;;  %v18181_v0 = vadd.f32 %v12619_v41, %v21852_v49 }
 0x512   : > { %v13393_v5 = vadd.f32 %v13392_v59, %v13391_v55  ;;  %v13780_v17 = vadd.f32 %v13779_v38, %v13778_v35  ;;  %13228 = vst.msk [vmem:[%s21959_s14 + $0x148] sm:$0xff] %vm13186_vm10, %v18180_v20  ;;  %v13617_v13 = vmul.f32 %v18180_v20, %v18180_v20  ;;  %v13396_v15 = vsel %vm13186_vm10, %v18180_v20, 0.0 }
 0x513   : > { %13227 = vst.msk [vmem:[%s21959_s14 + $0x140] sm:$0xff] %vm13186_vm10, %v18181_v0  ;;  %v13394_v2 = vsel %vm13186_vm10, %v18181_v0, 0.0  ;;  %v13616_v25 = vmul.f32 %v18181_v0, %v18181_v0  ;;  %v18011_v29 = vpop.f32.mrb[42].mxu0 }
 0x514   : > { %v13782_v22 = vadd.f32 %v13781_v33, %v13780_v17  ;;  %v13395_v10 = vadd.f32 %v13394_v2, %v13393_v5  ;;  %v18182_v28 = vadd.f32 %v18011_v29, %v21858_v1  ;;  %v12629_v49 = vpop.f32.mrb[43].mxu0  ;;  %v13785_v32 = vsel %vm13186_vm10, %v13617_v13, 0.0  ;;  %v22620_v33 = vld [vmem:[#allocation5_spill] sm:$0xff] }
 0x515   : > { %v13783_v54 = vsel %vm13186_vm10, %v13616_v25, 0.0  ;;  %v18183_v8 = vadd.f32 %v12629_v49, %v21860_v7 }
 0x516   : > { %v13397_v24 = vadd.f32 %v13396_v15, %v13395_v10  ;;  %v13784_v51 = vadd.f32 %v13783_v54, %v13782_v22  ;;  %13230 = vst.msk [vmem:[%s21959_s14 + $0x158] sm:$0xff] %vm13186_vm10, %v18182_v28  ;;  %v13619_v9 = vmul.f32 %v18182_v28, %v18182_v28  ;;  %v13400_v40 = vsel %vm13186_vm10, %v18182_v28, 0.0  ;;  %v22621_v22 = vld [vmem:[#allocation6_spill] sm:$0xff] }
 0x517   : > { %13229 = vst.msk [vmem:[%s21959_s14 + $0x150] sm:$0xff] %vm13186_vm10, %v18183_v8  ;;  %v13398_v1 = vsel %vm13186_vm10, %v18183_v8, 0.0  ;;  %v13618_v46 = vmul.f32 %v18183_v8, %v18183_v8  ;;  %v18014_v18 = vpop.f32.mrb[44].mxu0 }
 0x518   : > { %v13786_v56 = vadd.f32 %v13785_v32, %v13784_v51  ;;  %v13399_v60 = vadd.f32 %v13398_v1, %v13397_v24  ;;  %v18184_v21 = vadd.f32 %v18014_v18, %v21866_v30  ;;  %v12639_v7 = vpop.f32.mrb[45].mxu0  ;;  %v13789_v34 = vsel %vm13186_vm10, %v13619_v9, 0.0  ;;  %v22622_v1 = vld [vmem:[#allocation3_spill] sm:$0xff] }
 0x519   : > { %v13787_v62 = vsel %vm13186_vm10, %v13618_v46, 0.0  ;;  %v18185_v26 = vadd.f32 %v12639_v7, %v21868_v4 }
 0x51a   : > { %v13401_v11 = vadd.f32 %v13400_v40, %v13399_v60  ;;  %v13788_v14 = vadd.f32 %v13787_v62, %v13786_v56  ;;  %13232 = vst.msk [vmem:[%s21959_s14 + $0x168] sm:$0xff] %vm13186_vm10, %v18184_v21  ;;  %v13621_v43 = vmul.f32 %v18184_v21, %v18184_v21  ;;  %v13404_v3 = vsel %vm13186_vm10, %v18184_v21, 0.0  ;;  %v22623_v21 = vld [vmem:[#allocation7_spill] sm:$0xff] }
 0x51b   : > { %13231 = vst.msk [vmem:[%s21959_s14 + $0x160] sm:$0xff] %vm13186_vm10, %v18185_v26  ;;  %v13402_v30 = vsel %vm13186_vm10, %v18185_v26, 0.0  ;;  %v13620_v42 = vmul.f32 %v18185_v26, %v18185_v26  ;;  %v18017_v39 = vpop.f32.mrb[46].mxu0 }
 0x51c   : > { %v13790_v63 = vadd.f32 %v13789_v34, %v13788_v14  ;;  %v13403_v52 = vadd.f32 %v13402_v30, %v13401_v11  ;;  %v18186_v6 = vadd.f32 %v18017_v39, %v21874_v23  ;;  %v12649_v4 = vpop.f32.mrb[47].mxu0  ;;  %v13793_v12 = vsel %vm13186_vm10, %v13621_v43, 0.0  ;;  %v22624_v39 = vld [vmem:[#allocation8_spill] sm:$0xff] }
 0x51d   : > { %v13791_v47 = vsel %vm13186_vm10, %v13620_v42, 0.0  ;;  %v18187_v37 = vadd.f32 %v12649_v4, %v21876_v27 }
 0x51e   : > { %v13405_v44 = vadd.f32 %v13404_v3, %v13403_v52  ;;  %v13792_v57 = vadd.f32 %v13791_v47, %v13790_v63  ;;  %13234 = vst.msk [vmem:[%s21959_s14 + $0x178] sm:$0xff] %vm13186_vm10, %v18186_v6  ;;  %v13623_v31 = vmul.f32 %v18186_v6, %v18186_v6  ;;  %v13408_v36 = vsel %vm13186_vm10, %v18186_v6, 0.0  ;;  %v22625_v3 = vld [vmem:[#allocation9_spill] sm:$0xff] }
 0x51f   : > { %13233 = vst.msk [vmem:[%s21959_s14 + $0x170] sm:$0xff] %vm13186_vm10, %v18187_v37  ;;  %v13406_v23 = vsel %vm13186_vm10, %v18187_v37, 0.0  ;;  %v13622_v58 = vmul.f32 %v18187_v37, %v18187_v37  ;;  %v18020_v19 = vpop.f32.mrb[48].mxu0 }
 0x520   : > { %v13794_v53 = vadd.f32 %v13793_v12, %v13792_v57  ;;  %v13407_v61 = vadd.f32 %v13406_v23, %v13405_v44  ;;  %v18188_v48 = vadd.f32 %v18020_v19, %v21882_v45  ;;  %v12659_v27 = vpop.f32.mrb[49].mxu0  ;;  %v13797_v41 = vsel %vm13186_vm10, %v13623_v31, 0.0 }
 0x521   : > { %v13795_v50 = vsel %vm13186_vm10, %v13622_v58, 0.0  ;;  %v18189_v35 = vadd.f32 %v12659_v27, %v22619_v16  ;;  %v22627_v16 = vld [vmem:[#allocation11_spill] sm:$0xff] }
 0x522   : > { %v13409_v55 = vadd.f32 %v13408_v36, %v13407_v61  ;;  %v13796_v20 = vadd.f32 %v13795_v50, %v13794_v53  ;;  %13236 = vst.msk [vmem:[%s21959_s14 + $0x188] sm:$0xff] %vm13186_vm10, %v18188_v48  ;;  %v13625_v59 = vmul.f32 %v18188_v48, %v18188_v48  ;;  %v13412_v25 = vsel %vm13186_vm10, %v18188_v48, 0.0  ;;  %v22626_v61 = vld [vmem:[#allocation10_spill] sm:$0xff] }
 0x523   : > { %13235 = vst.msk [vmem:[%s21959_s14 + $0x180] sm:$0xff] %vm13186_vm10, %v18189_v35  ;;  %v13410_v45 = vsel %vm13186_vm10, %v18189_v35, 0.0  ;;  %v13624_v38 = vmul.f32 %v18189_v35, %v18189_v35  ;;  %v18023_v0 = vpop.f32.mrb[50].mxu0 }
 0x524   : > { %v13798_v5 = vadd.f32 %v13797_v41, %v13796_v20  ;;  %v13411_v17 = vadd.f32 %v13410_v45, %v13409_v55  ;;  %v18190_v13 = vadd.f32 %v18023_v0, %v22620_v33  ;;  %v12669_v2 = vpop.f32.mrb[51].mxu0  ;;  %v13801_v15 = vsel %vm13186_vm10, %v13625_v59, 0.0  ;;  %v22628_v33 = vld [vmem:[#allocation12_spill] sm:$0xff] }
 0x525   : > { %v13799_v29 = vsel %vm13186_vm10, %v13624_v38, 0.0  ;;  %v18191_v10 = vadd.f32 %v12669_v2, %v22621_v22  ;;  %v22629_v22 = vld [vmem:[#allocation13_spill] sm:$0xff] }
 0x526   : > { %v13413_v28 = vadd.f32 %v13412_v25, %v13411_v17  ;;  %v13800_v49 = vadd.f32 %v13799_v29, %v13798_v5  ;;  %13238 = vst.msk [vmem:[%s21959_s14 + $0x198] sm:$0xff] %vm13186_vm10, %v18190_v13  ;;  %v13627_v54 = vmul.f32 %v18190_v13, %v18190_v13  ;;  %v13416_v56 = vsel %vm13186_vm10, %v18190_v13, 0.0 }
 0x527   : > { %13237 = vst.msk [vmem:[%s21959_s14 + $0x190] sm:$0xff] %vm13186_vm10, %v18191_v10  ;;  %v13414_v8 = vsel %vm13186_vm10, %v18191_v10, 0.0  ;;  %v13626_v24 = vmul.f32 %v18191_v10, %v18191_v10  ;;  %v18026_v51 = vpop.f32.mrb[52].mxu0 }
 0x528   : > { %v13802_v32 = vadd.f32 %v13801_v15, %v13800_v49  ;;  %v13415_v9 = vadd.f32 %v13414_v8, %v13413_v28  ;;  %v18192_v46 = vadd.f32 %v18026_v51, %v22622_v1  ;;  %v12679_v18 = vpop.f32.mrb[53].mxu0  ;;  %v13805_v26 = vsel %vm13186_vm10, %v13627_v54, 0.0 }
 0x529   : > { %v13803_v60 = vsel %vm13186_vm10, %v13626_v24, 0.0  ;;  %v18193_v7 = vadd.f32 %v12679_v18, %v22623_v21 }
 0x52a   : > { %v13417_v40 = vadd.f32 %v13416_v56, %v13415_v9  ;;  %v13804_v62 = vadd.f32 %v13803_v60, %v13802_v32  ;;  %13240 = vst.msk [vmem:[%s21959_s14 + $0x1a8] sm:$0xff] %vm13186_vm10, %v18192_v46  ;;  %v13629_v11 = vmul.f32 %v18192_v46, %v18192_v46  ;;  %v13420_v6 = vsel %vm13186_vm10, %v18192_v46, 0.0  ;;  %v22630_v46 = vld [vmem:[#allocation14_spill] sm:$0xff] }
 0x52b   : > { %13239 = vst.msk [vmem:[%s21959_s14 + $0x1a0] sm:$0xff] %vm13186_vm10, %v18193_v7  ;;  %v13418_v14 = vsel %vm13186_vm10, %v18193_v7, 0.0  ;;  %v13628_v34 = vmul.f32 %v18193_v7, %v18193_v7  ;;  %v18029_v43 = vpop.f32.mrb[54].mxu0 }
 0x52c   : > { %v13806_v30 = vadd.f32 %v13805_v26, %v13804_v62  ;;  %v13419_v42 = vadd.f32 %v13418_v14, %v13417_v40  ;;  %v18194_v63 = vadd.f32 %v18029_v43, %v22624_v39  ;;  %v12689_v52 = vpop.f32.mrb[55].mxu0  ;;  %v13809_v57 = vsel %vm13186_vm10, %v13629_v11, 0.0  ;;  %v22631_v40 = vld [vmem:[#allocation15_spill] sm:$0xff] }
 0x52d   : > { %v13807_v4 = vsel %vm13186_vm10, %v13628_v34, 0.0  ;;  %v18195_v47 = vadd.f32 %v12689_v52, %v22625_v3 }
 0x52e   : > { %v13421_v37 = vadd.f32 %v13420_v6, %v13419_v42  ;;  %v13808_v44 = vadd.f32 %v13807_v4, %v13806_v30  ;;  %13242 = vst.msk [vmem:[%s21959_s14 + $0x1b8] sm:$0xff] %vm13186_vm10, %v18194_v63  ;;  %v13631_v12 = vmul.f32 %v18194_v63, %v18194_v63  ;;  %v13424_v36 = vsel %vm13186_vm10, %v18194_v63, 0.0  ;;  %v22632_v6 = vld [vmem:[#allocation16_spill] sm:$0xff] }
 0x52f   : > { %13241 = vst.msk [vmem:[%s21959_s14 + $0x1b0] sm:$0xff] %vm13186_vm10, %v18195_v47  ;;  %v13422_v31 = vsel %vm13186_vm10, %v18195_v47, 0.0  ;;  %v13630_v23 = vmul.f32 %v18195_v47, %v18195_v47  ;;  %v18032_v58 = vpop.f32.mrb[56].mxu0 }
 0x530   : > { %v13810_v19 = vadd.f32 %v13809_v57, %v13808_v44  ;;  %v13423_v53 = vadd.f32 %v13422_v31, %v13421_v37  ;;  %v18196_v48 = vadd.f32 %v18032_v58, %v22626_v61  ;;  %v12699_v27 = vpop.f32.mrb[57].mxu0  ;;  %v13813_v41 = vsel %vm13186_vm10, %v13631_v12, 0.0  ;;  %v22633_v57 = vld [vmem:[#allocation17_spill] sm:$0xff] }
 0x531   : > { %v13811_v50 = vsel %vm13186_vm10, %v13630_v23, 0.0  ;;  %v18197_v35 = vadd.f32 %v12699_v27, %v22627_v16 }
 0x532   : > { %v13425_v55 = vadd.f32 %v13424_v36, %v13423_v53  ;;  %v13812_v20 = vadd.f32 %v13811_v50, %v13810_v19  ;;  %13244 = vst.msk [vmem:[%s21959_s14 + $0x1c8] sm:$0xff] %vm13186_vm10, %v18196_v48  ;;  %v13633_v59 = vmul.f32 %v18196_v48, %v18196_v48  ;;  %v13428_v25 = vsel %vm13186_vm10, %v18196_v48, 0.0 }
 0x533   : > { %13243 = vst.msk [vmem:[%s21959_s14 + $0x1c0] sm:$0xff] %vm13186_vm10, %v18197_v35  ;;  %v13426_v45 = vsel %vm13186_vm10, %v18197_v35, 0.0  ;;  %v13632_v38 = vmul.f32 %v18197_v35, %v18197_v35  ;;  %v18035_v0 = vpop.f32.mrb[58].mxu0 }
 0x534   : > { %v13814_v5 = vadd.f32 %v13813_v41, %v13812_v20  ;;  %v13427_v17 = vadd.f32 %v13426_v45, %v13425_v55  ;;  %v18198_v13 = vadd.f32 %v18035_v0, %v22628_v33  ;;  %v12709_v2 = vpop.f32.mrb[59].mxu0  ;;  %v13817_v15 = vsel %vm13186_vm10, %v13633_v59, 0.0 }
 0x535   : > { %v13815_v29 = vsel %vm13186_vm10, %v13632_v38, 0.0  ;;  %v18199_v10 = vadd.f32 %v12709_v2, %v22629_v22 }
 0x536   : > { %v13429_v28 = vadd.f32 %v13428_v25, %v13427_v17  ;;  %v13816_v49 = vadd.f32 %v13815_v29, %v13814_v5  ;;  %13246 = vst.msk [vmem:[%s21959_s14 + $0x1d8] sm:$0xff] %vm13186_vm10, %v18198_v13  ;;  %v13635_v54 = vmul.f32 %v18198_v13, %v18198_v13  ;;  %v13432_v21 = vsel %vm13186_vm10, %v18198_v13, 0.0 }
 0x537   : > { %13245 = vst.msk [vmem:[%s21959_s14 + $0x1d0] sm:$0xff] %vm13186_vm10, %v18199_v10  ;;  %v13430_v8 = vsel %vm13186_vm10, %v18199_v10, 0.0  ;;  %v13634_v24 = vmul.f32 %v18199_v10, %v18199_v10  ;;  %v17268_v51 = vpop.f32.mrb[64].mxu1  ;;  %v18038_v32 = vpop.f32.mrb[60].mxu0 }
 0x538   : > { %v13818_v9 = vadd.f32 %v13817_v15, %v13816_v49  ;;  %v13431_v1 = vadd.f32 %v13430_v8, %v13429_v28  ;;  %v18200_v18 = vadd.f32 %v18038_v32, %v22630_v46  ;;  %v7350_v56 = vpop.f32.mrb[65].mxu1  ;;  %v12719_v60 = vpop.f32.mrb[61].mxu0  ;;  %v13821_v14 = vsel %vm13186_vm10, %v13635_v54, 0.0 }
 0x539   : > { %v13819_v7 = vsel %vm13186_vm10, %v13634_v24, 0.0  ;;  %v18201_v62 = vadd.f32 %v12719_v60, %v22631_v40 }
 0x53a   : > { %v13433_v26 = vadd.f32 %v13432_v21, %v13431_v1  ;;  %v13820_v11 = vadd.f32 %v13819_v7, %v13818_v9  ;;  %13248 = vst.msk [vmem:[%s21959_s14 + $0x1e8] sm:$0xff] %vm13186_vm10, %v18200_v18  ;;  %v13637_v34 = vmul.f32 %v18200_v18, %v18200_v18  ;;  %v13436_v37 = vsel %vm13186_vm10, %v18200_v18, 0.0 }
 0x53b   : > { %13247 = vst.msk [vmem:[%s21959_s14 + $0x1e0] sm:$0xff] %vm13186_vm10, %v18201_v62  ;;  %v13434_v43 = vsel %vm13186_vm10, %v18201_v62, 0.0  ;;  %v13636_v30 = vmul.f32 %v18201_v62, %v18201_v62  ;;  %v17271_v42 = vpop.f32.mrb[66].mxu1  ;;  %v18041_v39 = vpop.f32.mrb[62].mxu0 }
 0x53c   : > { %v13822_v63 = vadd.f32 %v13821_v14, %v13820_v11  ;;  %v13435_v52 = vadd.f32 %v13434_v43, %v13433_v26  ;;  %v18202_v4 = vadd.f32 %v18041_v39, %v22632_v6  ;;  %v7360_v3 = vpop.f32.mrb[67].mxu1  ;;  %v12729_v47 = vpop.f32.mrb[63].mxu0  ;;  %v13825_v58 = vsel %vm13186_vm10, %v13637_v34, 0.0 }
 0x53d   : > { %v13823_v44 = vsel %vm13186_vm10, %v13636_v30, 0.0  ;;  %v18203_v12 = vadd.f32 %v12729_v47, %v22633_v57 }
 0x53e   : > { %v13437_v31 = vadd.f32 %v13436_v37, %v13435_v52  ;;  %v13824_v23 = vadd.f32 %v13823_v44, %v13822_v63  ;;  %13250 = vst.msk [vmem:[%s21959_s14 + $0x1f8] sm:$0xff] %vm13186_vm10, %v18202_v4  ;;  %v13639_v19 = vmul.f32 %v18202_v4, %v18202_v4  ;;  %v13440_v20 = vsel %vm13186_vm10, %v18202_v4, 0.0 }
 0x53f   : > { %13249 = vst.msk [vmem:[%s21959_s14 + $0x1f0] sm:$0xff] %vm13186_vm10, %v18203_v12  ;;  %v13438_v53 = vsel %vm13186_vm10, %v18203_v12, 0.0  ;;  %v13638_v61 = vmul.f32 %v18203_v12, %v18203_v12  ;;  %v17274_v48 = vpop.f32.mrb[68].mxu1  ;;  %v18044_v27 = vpop.f32.mrb[64].mxu0 }
 0x540   : > { %v13826_v36 = vadd.f32 %v13825_v58, %v13824_v23  ;;  %v13439_v50 = vadd.f32 %v13438_v53, %v13437_v31  ;;  %v18204_v16 = vadd.f32 %v18044_v27, %v17268_v51  ;;  %v7370_v35 = vpop.f32.mrb[69].mxu1  ;;  %v12739_v55 = vpop.f32.mrb[65].mxu0  ;;  %v13829_v0 = vsel %vm13186_vm10, %v13639_v19, 0.0 }
 0x541   : > { %v13827_v41 = vsel %vm13186_vm10, %v13638_v61, 0.0  ;;  %v18205_v59 = vadd.f32 %v12739_v55, %v7350_v56 }
 0x542   : > { %v13441_v45 = vadd.f32 %v13440_v20, %v13439_v50  ;;  %v13828_v38 = vadd.f32 %v13827_v41, %v13826_v36  ;;  %13252 = vst.msk [vmem:[%s21959_s14 + $0x208] sm:$0xff] %vm13186_vm10, %v18204_v16  ;;  %v13641_v5 = vmul.f32 %v18204_v16, %v18204_v16  ;;  %v13444_v49 = vsel %vm13186_vm10, %v18204_v16, 0.0 }
 0x543   : > { %13251 = vst.msk [vmem:[%s21959_s14 + $0x200] sm:$0xff] %vm13186_vm10, %v18205_v59  ;;  %v13442_v17 = vsel %vm13186_vm10, %v18205_v59, 0.0  ;;  %v13640_v33 = vmul.f32 %v18205_v59, %v18205_v59  ;;  %v17277_v13 = vpop.f32.mrb[70].mxu1  ;;  %v18047_v2 = vpop.f32.mrb[66].mxu0 }
 0x544   : > { %v13830_v25 = vadd.f32 %v13829_v0, %v13828_v38  ;;  %v13443_v29 = vadd.f32 %v13442_v17, %v13441_v45  ;;  %v18206_v22 = vadd.f32 %v18047_v2, %v17271_v42  ;;  %v7380_v10 = vpop.f32.mrb[71].mxu1  ;;  %v12749_v28 = vpop.f32.mrb[67].mxu0  ;;  %v13833_v51 = vsel %vm13186_vm10, %v13641_v5, 0.0 }
 0x545   : > { %v13831_v15 = vsel %vm13186_vm10, %v13640_v33, 0.0  ;;  %v18207_v54 = vadd.f32 %v12749_v28, %v7360_v3 }
 0x546   : > { %v13445_v8 = vadd.f32 %v13444_v49, %v13443_v29  ;;  %v13832_v24 = vadd.f32 %v13831_v15, %v13830_v25  ;;  %13254 = vst.msk [vmem:[%s21959_s14 + $0x218] sm:$0xff] %vm13186_vm10, %v18206_v22  ;;  %v13643_v32 = vmul.f32 %v18206_v22, %v18206_v22  ;;  %v13448_v62 = vsel %vm13186_vm10, %v18206_v22, 0.0 }
 0x547   : > { %13253 = vst.msk [vmem:[%s21959_s14 + $0x210] sm:$0xff] %vm13186_vm10, %v18207_v54  ;;  %v13446_v9 = vsel %vm13186_vm10, %v18207_v54, 0.0  ;;  %v13642_v1 = vmul.f32 %v18207_v54, %v18207_v54  ;;  %v17280_v46 = vpop.f32.mrb[72].mxu1  ;;  %v18050_v18 = vpop.f32.mrb[68].mxu0 }
 0x548   : > { %v13834_v56 = vadd.f32 %v13833_v51, %v13832_v24  ;;  %v13447_v60 = vadd.f32 %v13446_v9, %v13445_v8  ;;  %v18208_v21 = vadd.f32 %v18050_v18, %v17274_v48  ;;  %v7390_v7 = vpop.f32.mrb[73].mxu1  ;;  %v12759_v40 = vpop.f32.mrb[69].mxu0  ;;  %v13837_v43 = vsel %vm13186_vm10, %v13643_v32, 0.0 }
 0x549   : > { %v13835_v26 = vsel %vm13186_vm10, %v13642_v1, 0.0  ;;  %v18209_v11 = vadd.f32 %v12759_v40, %v7370_v35 }
 0x54a   : > { %v13836_v14 = vadd.f32 %v13835_v26, %v13834_v56  ;;  %13256 = vst.msk [vmem:[%s21959_s14 + $0x228] sm:$0xff] %vm13186_vm10, %v18208_v21  ;;  %v13449_v34 = vadd.f32 %v13448_v62, %v13447_v60  ;;  %v13645_v30 = vmul.f32 %v18208_v21, %v18208_v21  ;;  %v13452_v44 = vsel %vm13186_vm10, %v18208_v21, 0.0 }
 0x54b   : > { %13255 = vst.msk [vmem:[%s21959_s14 + $0x220] sm:$0xff] %vm13186_vm10, %v18209_v11  ;;  %v13450_v42 = vsel %vm13186_vm10, %v18209_v11, 0.0  ;;  %v13644_v39 = vmul.f32 %v18209_v11, %v18209_v11  ;;  %v17283_v63 = vpop.f32.mrb[74].mxu1  ;;  %v18053_v52 = vpop.f32.mrb[70].mxu0 }
 0x54c   : > { %v13451_v6 = vadd.f32 %v13450_v42, %v13449_v34  ;;  %v13838_v4 = vadd.f32 %v13837_v43, %v13836_v14  ;;  %v18210_v3 = vadd.f32 %v18053_v52, %v17277_v13  ;;  %v7400_v47 = vpop.f32.mrb[75].mxu1  ;;  %v12769_v37 = vpop.f32.mrb[71].mxu0  ;;  %v13841_v58 = vsel %vm13186_vm10, %v13645_v30, 0.0 }
 0x54d   : > { %v13839_v57 = vsel %vm13186_vm10, %v13644_v39, 0.0  ;;  %v18211_v12 = vadd.f32 %v12769_v37, %v7380_v10 }
 0x54e   : > { %v13840_v31 = vadd.f32 %v13839_v57, %v13838_v4  ;;  %13258 = vst.msk [vmem:[%s21959_s14 + $0x238] sm:$0xff] %vm13186_vm10, %v18210_v3  ;;  %v13453_v23 = vadd.f32 %v13452_v44, %v13451_v6  ;;  %v13647_v19 = vmul.f32 %v18210_v3, %v18210_v3  ;;  %v13456_v20 = vsel %vm13186_vm10, %v18210_v3, 0.0 }
 0x54f   : > { %13257 = vst.msk [vmem:[%s21959_s14 + $0x230] sm:$0xff] %vm13186_vm10, %v18211_v12  ;;  %v13454_v53 = vsel %vm13186_vm10, %v18211_v12, 0.0  ;;  %v13646_v61 = vmul.f32 %v18211_v12, %v18211_v12  ;;  %v17286_v48 = vpop.f32.mrb[76].mxu1  ;;  %v18056_v27 = vpop.f32.mrb[72].mxu0 }
 0x550   : > { %v13455_v36 = vadd.f32 %v13454_v53, %v13453_v23  ;;  %v13842_v50 = vadd.f32 %v13841_v58, %v13840_v31  ;;  %v18212_v16 = vadd.f32 %v18056_v27, %v17280_v46  ;;  %v7410_v35 = vpop.f32.mrb[77].mxu1  ;;  %v12779_v55 = vpop.f32.mrb[73].mxu0  ;;  %v13845_v0 = vsel %vm13186_vm10, %v13647_v19, 0.0 }
 0x551   : > { %v13843_v41 = vsel %vm13186_vm10, %v13646_v61, 0.0  ;;  %v18213_v59 = vadd.f32 %v12779_v55, %v7390_v7 }
 0x552   : > { %v13844_v45 = vadd.f32 %v13843_v41, %v13842_v50  ;;  %13260 = vst.msk [vmem:[%s21959_s14 + $0x248] sm:$0xff] %vm13186_vm10, %v18212_v16  ;;  %v13457_v38 = vadd.f32 %v13456_v20, %v13455_v36  ;;  %v13649_v5 = vmul.f32 %v18212_v16, %v18212_v16  ;;  %v13460_v49 = vsel %vm13186_vm10, %v18212_v16, 0.0 }
 0x553   : > { %13259 = vst.msk [vmem:[%s21959_s14 + $0x240] sm:$0xff] %vm13186_vm10, %v18213_v59  ;;  %v13458_v17 = vsel %vm13186_vm10, %v18213_v59, 0.0  ;;  %v13648_v33 = vmul.f32 %v18213_v59, %v18213_v59  ;;  %v17289_v13 = vpop.f32.mrb[78].mxu1  ;;  %v18059_v2 = vpop.f32.mrb[74].mxu0 }
 0x554   : > { %v13459_v25 = vadd.f32 %v13458_v17, %v13457_v38  ;;  %v13846_v29 = vadd.f32 %v13845_v0, %v13844_v45  ;;  %v18214_v22 = vadd.f32 %v18059_v2, %v17283_v63  ;;  %v7420_v10 = vpop.f32.mrb[79].mxu1  ;;  %v12789_v28 = vpop.f32.mrb[75].mxu0  ;;  %v13849_v51 = vsel %vm13186_vm10, %v13649_v5, 0.0 }
 0x555   : > { %v13847_v15 = vsel %vm13186_vm10, %v13648_v33, 0.0  ;;  %v18215_v54 = vadd.f32 %v12789_v28, %v7400_v47 }
 0x556   : > { %v13848_v8 = vadd.f32 %v13847_v15, %v13846_v29  ;;  %13262 = vst.msk [vmem:[%s21959_s14 + $0x258] sm:$0xff] %vm13186_vm10, %v18214_v22  ;;  %v13461_v24 = vadd.f32 %v13460_v49, %v13459_v25  ;;  %v13651_v32 = vmul.f32 %v18214_v22, %v18214_v22  ;;  %v13464_v62 = vsel %vm13186_vm10, %v18214_v22, 0.0 }
 0x557   : > { %13261 = vst.msk [vmem:[%s21959_s14 + $0x250] sm:$0xff] %vm13186_vm10, %v18215_v54  ;;  %v13462_v9 = vsel %vm13186_vm10, %v18215_v54, 0.0  ;;  %v13650_v1 = vmul.f32 %v18215_v54, %v18215_v54  ;;  %v17292_v46 = vpop.f32.mrb[80].mxu1  ;;  %v18062_v18 = vpop.f32.mrb[76].mxu0 }
 0x558   : > { %v13463_v56 = vadd.f32 %v13462_v9, %v13461_v24  ;;  %v13850_v60 = vadd.f32 %v13849_v51, %v13848_v8  ;;  %v18216_v21 = vadd.f32 %v18062_v18, %v17286_v48  ;;  %v7430_v7 = vpop.f32.mrb[81].mxu1  ;;  %v12799_v40 = vpop.f32.mrb[77].mxu0  ;;  %v13853_v43 = vsel %vm13186_vm10, %v13651_v32, 0.0 }
 0x559   : > { %v13851_v26 = vsel %vm13186_vm10, %v13650_v1, 0.0  ;;  %v18217_v11 = vadd.f32 %v12799_v40, %v7410_v35 }
 0x55a   : > { %v13852_v14 = vadd.f32 %v13851_v26, %v13850_v60  ;;  %13264 = vst.msk [vmem:[%s21959_s14 + $0x268] sm:$0xff] %vm13186_vm10, %v18216_v21  ;;  %v13465_v34 = vadd.f32 %v13464_v62, %v13463_v56  ;;  %v13653_v30 = vmul.f32 %v18216_v21, %v18216_v21  ;;  %v13468_v44 = vsel %vm13186_vm10, %v18216_v21, 0.0 }
 0x55b   : > { %13263 = vst.msk [vmem:[%s21959_s14 + $0x260] sm:$0xff] %vm13186_vm10, %v18217_v11  ;;  %v13466_v42 = vsel %vm13186_vm10, %v18217_v11, 0.0  ;;  %v13652_v39 = vmul.f32 %v18217_v11, %v18217_v11  ;;  %v17295_v63 = vpop.f32.mrb[82].mxu1  ;;  %v18065_v52 = vpop.f32.mrb[78].mxu0 }
 0x55c   : > { %v13467_v6 = vadd.f32 %v13466_v42, %v13465_v34  ;;  %v13854_v4 = vadd.f32 %v13853_v43, %v13852_v14  ;;  %v18218_v3 = vadd.f32 %v18065_v52, %v17289_v13  ;;  %v7440_v47 = vpop.f32.mrb[83].mxu1  ;;  %v12809_v37 = vpop.f32.mrb[79].mxu0  ;;  %v13857_v58 = vsel %vm13186_vm10, %v13653_v30, 0.0 }
 0x55d   : > { %v13855_v57 = vsel %vm13186_vm10, %v13652_v39, 0.0  ;;  %v18219_v12 = vadd.f32 %v12809_v37, %v7420_v10 }
 0x55e   : > { %v13856_v31 = vadd.f32 %v13855_v57, %v13854_v4  ;;  %13266 = vst.msk [vmem:[%s21959_s14 + $0x278] sm:$0xff] %vm13186_vm10, %v18218_v3  ;;  %v13469_v23 = vadd.f32 %v13468_v44, %v13467_v6  ;;  %v13655_v19 = vmul.f32 %v18218_v3, %v18218_v3  ;;  %v13472_v20 = vsel %vm13186_vm10, %v18218_v3, 0.0 }
 0x55f   : > { %13265 = vst.msk [vmem:[%s21959_s14 + $0x270] sm:$0xff] %vm13186_vm10, %v18219_v12  ;;  %v13470_v53 = vsel %vm13186_vm10, %v18219_v12, 0.0  ;;  %v13654_v61 = vmul.f32 %v18219_v12, %v18219_v12  ;;  %v17298_v48 = vpop.f32.mrb[84].mxu1  ;;  %v18068_v27 = vpop.f32.mrb[80].mxu0 }
 0x560   : > { %v13471_v36 = vadd.f32 %v13470_v53, %v13469_v23  ;;  %v13858_v50 = vadd.f32 %v13857_v58, %v13856_v31  ;;  %v18220_v16 = vadd.f32 %v18068_v27, %v17292_v46  ;;  %v7450_v35 = vpop.f32.mrb[85].mxu1  ;;  %v12819_v55 = vpop.f32.mrb[81].mxu0  ;;  %v13861_v0 = vsel %vm13186_vm10, %v13655_v19, 0.0 }
 0x561   : > { %v13859_v41 = vsel %vm13186_vm10, %v13654_v61, 0.0  ;;  %v18221_v59 = vadd.f32 %v12819_v55, %v7430_v7 }
 0x562   : > { %v13860_v45 = vadd.f32 %v13859_v41, %v13858_v50  ;;  %13268 = vst.msk [vmem:[%s21959_s14 + $0x288] sm:$0xff] %vm13186_vm10, %v18220_v16  ;;  %v13473_v38 = vadd.f32 %v13472_v20, %v13471_v36  ;;  %v13657_v5 = vmul.f32 %v18220_v16, %v18220_v16  ;;  %v13476_v49 = vsel %vm13186_vm10, %v18220_v16, 0.0 }
 0x563   : > { %13267 = vst.msk [vmem:[%s21959_s14 + $0x280] sm:$0xff] %vm13186_vm10, %v18221_v59  ;;  %v13474_v17 = vsel %vm13186_vm10, %v18221_v59, 0.0  ;;  %v13656_v33 = vmul.f32 %v18221_v59, %v18221_v59  ;;  %v17301_v13 = vpop.f32.mrb[86].mxu1  ;;  %v18071_v2 = vpop.f32.mrb[82].mxu0 }
 0x564   : > { %v13475_v25 = vadd.f32 %v13474_v17, %v13473_v38  ;;  %v13862_v29 = vadd.f32 %v13861_v0, %v13860_v45  ;;  %v18222_v22 = vadd.f32 %v18071_v2, %v17295_v63  ;;  %v7460_v10 = vpop.f32.mrb[87].mxu1  ;;  %v12829_v28 = vpop.f32.mrb[83].mxu0  ;;  %v13865_v51 = vsel %vm13186_vm10, %v13657_v5, 0.0 }
 0x565   : > { %v13863_v15 = vsel %vm13186_vm10, %v13656_v33, 0.0  ;;  %v18223_v54 = vadd.f32 %v12829_v28, %v7440_v47 }
 0x566   : > { %v13864_v8 = vadd.f32 %v13863_v15, %v13862_v29  ;;  %13270 = vst.msk [vmem:[%s21959_s14 + $0x298] sm:$0xff] %vm13186_vm10, %v18222_v22  ;;  %v13477_v24 = vadd.f32 %v13476_v49, %v13475_v25  ;;  %v13659_v32 = vmul.f32 %v18222_v22, %v18222_v22  ;;  %v13480_v62 = vsel %vm13186_vm10, %v18222_v22, 0.0 }
 0x567   : > { %13269 = vst.msk [vmem:[%s21959_s14 + $0x290] sm:$0xff] %vm13186_vm10, %v18223_v54  ;;  %v13478_v9 = vsel %vm13186_vm10, %v18223_v54, 0.0  ;;  %v13658_v1 = vmul.f32 %v18223_v54, %v18223_v54  ;;  %v17304_v46 = vpop.f32.mrb[88].mxu1  ;;  %v18074_v18 = vpop.f32.mrb[84].mxu0 }
 0x568   : > { %v13479_v56 = vadd.f32 %v13478_v9, %v13477_v24  ;;  %v13866_v60 = vadd.f32 %v13865_v51, %v13864_v8  ;;  %v18224_v21 = vadd.f32 %v18074_v18, %v17298_v48  ;;  %v7470_v7 = vpop.f32.mrb[89].mxu1  ;;  %v12839_v40 = vpop.f32.mrb[85].mxu0  ;;  %v13869_v43 = vsel %vm13186_vm10, %v13659_v32, 0.0 }
 0x569   : > { %v13867_v26 = vsel %vm13186_vm10, %v13658_v1, 0.0  ;;  %v18225_v11 = vadd.f32 %v12839_v40, %v7450_v35 }
 0x56a   : > { %v13868_v14 = vadd.f32 %v13867_v26, %v13866_v60  ;;  %13272 = vst.msk [vmem:[%s21959_s14 + $0x2a8] sm:$0xff] %vm13186_vm10, %v18224_v21  ;;  %v13481_v34 = vadd.f32 %v13480_v62, %v13479_v56  ;;  %v13661_v30 = vmul.f32 %v18224_v21, %v18224_v21  ;;  %v13484_v44 = vsel %vm13186_vm10, %v18224_v21, 0.0 }
 0x56b   : > { %13271 = vst.msk [vmem:[%s21959_s14 + $0x2a0] sm:$0xff] %vm13186_vm10, %v18225_v11  ;;  %v13482_v42 = vsel %vm13186_vm10, %v18225_v11, 0.0  ;;  %v13660_v39 = vmul.f32 %v18225_v11, %v18225_v11  ;;  %v17307_v63 = vpop.f32.mrb[90].mxu1  ;;  %v18077_v52 = vpop.f32.mrb[86].mxu0 }
 0x56c   : > { %v13483_v6 = vadd.f32 %v13482_v42, %v13481_v34  ;;  %v13870_v4 = vadd.f32 %v13869_v43, %v13868_v14  ;;  %v18226_v3 = vadd.f32 %v18077_v52, %v17301_v13  ;;  %v7480_v47 = vpop.f32.mrb[91].mxu1  ;;  %v12849_v37 = vpop.f32.mrb[87].mxu0  ;;  %v13873_v58 = vsel %vm13186_vm10, %v13661_v30, 0.0 }
 0x56d   : > { %v13871_v57 = vsel %vm13186_vm10, %v13660_v39, 0.0  ;;  %v18227_v12 = vadd.f32 %v12849_v37, %v7460_v10 }
 0x56e   : > { %v13872_v31 = vadd.f32 %v13871_v57, %v13870_v4  ;;  %13274 = vst.msk [vmem:[%s21959_s14 + $0x2b8] sm:$0xff] %vm13186_vm10, %v18226_v3  ;;  %v13485_v23 = vadd.f32 %v13484_v44, %v13483_v6  ;;  %v13663_v19 = vmul.f32 %v18226_v3, %v18226_v3  ;;  %v13488_v20 = vsel %vm13186_vm10, %v18226_v3, 0.0 }
 0x56f   : > { %13273 = vst.msk [vmem:[%s21959_s14 + $0x2b0] sm:$0xff] %vm13186_vm10, %v18227_v12  ;;  %v13486_v53 = vsel %vm13186_vm10, %v18227_v12, 0.0  ;;  %v13662_v61 = vmul.f32 %v18227_v12, %v18227_v12  ;;  %v17310_v48 = vpop.f32.mrb[92].mxu1  ;;  %v18080_v27 = vpop.f32.mrb[88].mxu0 }
 0x570   : > { %v13487_v36 = vadd.f32 %v13486_v53, %v13485_v23  ;;  %v13874_v50 = vadd.f32 %v13873_v58, %v13872_v31  ;;  %v18228_v16 = vadd.f32 %v18080_v27, %v17304_v46  ;;  %v7490_v35 = vpop.f32.mrb[93].mxu1  ;;  %v12859_v55 = vpop.f32.mrb[89].mxu0  ;;  %v13877_v0 = vsel %vm13186_vm10, %v13663_v19, 0.0 }
 0x571   : > { %v13875_v41 = vsel %vm13186_vm10, %v13662_v61, 0.0  ;;  %v18229_v59 = vadd.f32 %v12859_v55, %v7470_v7 }
 0x572   : > { %v13876_v45 = vadd.f32 %v13875_v41, %v13874_v50  ;;  %13276 = vst.msk [vmem:[%s21959_s14 + $0x2c8] sm:$0xff] %vm13186_vm10, %v18228_v16  ;;  %v13489_v38 = vadd.f32 %v13488_v20, %v13487_v36  ;;  %v13665_v5 = vmul.f32 %v18228_v16, %v18228_v16  ;;  %v13492_v49 = vsel %vm13186_vm10, %v18228_v16, 0.0 }
 0x573   : > { %13275 = vst.msk [vmem:[%s21959_s14 + $0x2c0] sm:$0xff] %vm13186_vm10, %v18229_v59  ;;  %v13490_v17 = vsel %vm13186_vm10, %v18229_v59, 0.0  ;;  %v13664_v33 = vmul.f32 %v18229_v59, %v18229_v59  ;;  %v17313_v13 = vpop.f32.mrb[94].mxu1  ;;  %v18083_v2 = vpop.f32.mrb[90].mxu0 }
 0x574   : > { %v13491_v25 = vadd.f32 %v13490_v17, %v13489_v38  ;;  %v13878_v29 = vadd.f32 %v13877_v0, %v13876_v45  ;;  %v18230_v22 = vadd.f32 %v18083_v2, %v17307_v63  ;;  %v7500_v10 = vpop.f32.mrb[95].mxu1  ;;  %v12869_v28 = vpop.f32.mrb[91].mxu0  ;;  %v13881_v51 = vsel %vm13186_vm10, %v13665_v5, 0.0 }
 0x575   : > { %v13879_v15 = vsel %vm13186_vm10, %v13664_v33, 0.0  ;;  %v18231_v54 = vadd.f32 %v12869_v28, %v7480_v47 }
 0x576   : > { %v13880_v8 = vadd.f32 %v13879_v15, %v13878_v29  ;;  %13278 = vst.msk [vmem:[%s21959_s14 + $0x2d8] sm:$0xff] %vm13186_vm10, %v18230_v22  ;;  %v13493_v24 = vadd.f32 %v13492_v49, %v13491_v25  ;;  %v13667_v32 = vmul.f32 %v18230_v22, %v18230_v22  ;;  %v13496_v62 = vsel %vm13186_vm10, %v18230_v22, 0.0 }
 0x577   : > { %13277 = vst.msk [vmem:[%s21959_s14 + $0x2d0] sm:$0xff] %vm13186_vm10, %v18231_v54  ;;  %v13494_v9 = vsel %vm13186_vm10, %v18231_v54, 0.0  ;;  %v13666_v1 = vmul.f32 %v18231_v54, %v18231_v54  ;;  %v17316_v46 = vpop.f32.mrb[96].mxu1  ;;  %v18086_v18 = vpop.f32.mrb[92].mxu0 }
 0x578   : > { %v13495_v56 = vadd.f32 %v13494_v9, %v13493_v24  ;;  %v13882_v60 = vadd.f32 %v13881_v51, %v13880_v8  ;;  %v18232_v21 = vadd.f32 %v18086_v18, %v17310_v48  ;;  %v7510_v7 = vpop.f32.mrb[97].mxu1  ;;  %v12879_v40 = vpop.f32.mrb[93].mxu0  ;;  %v13885_v43 = vsel %vm13186_vm10, %v13667_v32, 0.0 }
 0x579   : > { %v13883_v26 = vsel %vm13186_vm10, %v13666_v1, 0.0  ;;  %v18233_v11 = vadd.f32 %v12879_v40, %v7490_v35 }
 0x57a   : > { %v13884_v14 = vadd.f32 %v13883_v26, %v13882_v60  ;;  %13280 = vst.msk [vmem:[%s21959_s14 + $0x2e8] sm:$0xff] %vm13186_vm10, %v18232_v21  ;;  %v13497_v34 = vadd.f32 %v13496_v62, %v13495_v56  ;;  %v13669_v30 = vmul.f32 %v18232_v21, %v18232_v21  ;;  %v13500_v44 = vsel %vm13186_vm10, %v18232_v21, 0.0 }
 0x57b   : > { %13279 = vst.msk [vmem:[%s21959_s14 + $0x2e0] sm:$0xff] %vm13186_vm10, %v18233_v11  ;;  %v13498_v42 = vsel %vm13186_vm10, %v18233_v11, 0.0  ;;  %v13668_v39 = vmul.f32 %v18233_v11, %v18233_v11  ;;  %v17319_v63 = vpop.f32.mrb[98].mxu1  ;;  %v18089_v52 = vpop.f32.mrb[94].mxu0 }
 0x57c   : > { %v13499_v6 = vadd.f32 %v13498_v42, %v13497_v34  ;;  %v13886_v4 = vadd.f32 %v13885_v43, %v13884_v14  ;;  %v18234_v3 = vadd.f32 %v18089_v52, %v17313_v13  ;;  %v7520_v47 = vpop.f32.mrb[99].mxu1  ;;  %v12889_v37 = vpop.f32.mrb[95].mxu0  ;;  %v13889_v58 = vsel %vm13186_vm10, %v13669_v30, 0.0 }
 0x57d   : > { %v13887_v57 = vsel %vm13186_vm10, %v13668_v39, 0.0  ;;  %v18235_v12 = vadd.f32 %v12889_v37, %v7500_v10 }
 0x57e   : > { %v13888_v31 = vadd.f32 %v13887_v57, %v13886_v4  ;;  %13282 = vst.msk [vmem:[%s21959_s14 + $0x2f8] sm:$0xff] %vm13186_vm10, %v18234_v3  ;;  %v13501_v23 = vadd.f32 %v13500_v44, %v13499_v6  ;;  %v13671_v19 = vmul.f32 %v18234_v3, %v18234_v3  ;;  %v13504_v20 = vsel %vm13186_vm10, %v18234_v3, 0.0 }
 0x57f   : > { %13281 = vst.msk [vmem:[%s21959_s14 + $0x2f0] sm:$0xff] %vm13186_vm10, %v18235_v12  ;;  %v13502_v53 = vsel %vm13186_vm10, %v18235_v12, 0.0  ;;  %v13670_v61 = vmul.f32 %v18235_v12, %v18235_v12  ;;  %v17322_v48 = vpop.f32.mrb[100].mxu1  ;;  %v18092_v27 = vpop.f32.mrb[96].mxu0 }
 0x580   : > { %v13503_v36 = vadd.f32 %v13502_v53, %v13501_v23  ;;  %v13890_v50 = vadd.f32 %v13889_v58, %v13888_v31  ;;  %v18236_v16 = vadd.f32 %v18092_v27, %v17316_v46  ;;  %v7530_v35 = vpop.f32.mrb[101].mxu1  ;;  %v12899_v55 = vpop.f32.mrb[97].mxu0  ;;  %v13893_v0 = vsel %vm13186_vm10, %v13671_v19, 0.0 }
 0x581   : > { %v13891_v41 = vsel %vm13186_vm10, %v13670_v61, 0.0  ;;  %v18237_v59 = vadd.f32 %v12899_v55, %v7510_v7 }
 0x582   : > { %v13892_v45 = vadd.f32 %v13891_v41, %v13890_v50  ;;  %13284 = vst.msk [vmem:[%s21959_s14 + $0x308] sm:$0xff] %vm13186_vm10, %v18236_v16  ;;  %v13505_v38 = vadd.f32 %v13504_v20, %v13503_v36  ;;  %v13673_v5 = vmul.f32 %v18236_v16, %v18236_v16  ;;  %v13508_v49 = vsel %vm13186_vm10, %v18236_v16, 0.0 }
 0x583   : > { %13283 = vst.msk [vmem:[%s21959_s14 + $0x300] sm:$0xff] %vm13186_vm10, %v18237_v59  ;;  %v13506_v17 = vsel %vm13186_vm10, %v18237_v59, 0.0  ;;  %v13672_v33 = vmul.f32 %v18237_v59, %v18237_v59  ;;  %v17325_v13 = vpop.f32.mrb[102].mxu1  ;;  %v18095_v2 = vpop.f32.mrb[98].mxu0 }
 0x584   : > { %v13507_v25 = vadd.f32 %v13506_v17, %v13505_v38  ;;  %v13894_v29 = vadd.f32 %v13893_v0, %v13892_v45  ;;  %v18238_v22 = vadd.f32 %v18095_v2, %v17319_v63  ;;  %v7540_v10 = vpop.f32.mrb[103].mxu1  ;;  %v12909_v28 = vpop.f32.mrb[99].mxu0  ;;  %v13897_v51 = vsel %vm13186_vm10, %v13673_v5, 0.0 }
 0x585   : > { %v13895_v15 = vsel %vm13186_vm10, %v13672_v33, 0.0  ;;  %v18239_v54 = vadd.f32 %v12909_v28, %v7520_v47 }
 0x586   : > { %v13896_v8 = vadd.f32 %v13895_v15, %v13894_v29  ;;  %13286 = vst.msk [vmem:[%s21959_s14 + $0x318] sm:$0xff] %vm13186_vm10, %v18238_v22  ;;  %v13509_v24 = vadd.f32 %v13508_v49, %v13507_v25  ;;  %v13675_v32 = vmul.f32 %v18238_v22, %v18238_v22  ;;  %v13512_v62 = vsel %vm13186_vm10, %v18238_v22, 0.0 }
 0x587   : > { %13285 = vst.msk [vmem:[%s21959_s14 + $0x310] sm:$0xff] %vm13186_vm10, %v18239_v54  ;;  %v13510_v9 = vsel %vm13186_vm10, %v18239_v54, 0.0  ;;  %v13674_v1 = vmul.f32 %v18239_v54, %v18239_v54  ;;  %v17328_v46 = vpop.f32.mrb[104].mxu1  ;;  %v18098_v18 = vpop.f32.mrb[100].mxu0 }
 0x588   : > { %v13511_v56 = vadd.f32 %v13510_v9, %v13509_v24  ;;  %v13898_v60 = vadd.f32 %v13897_v51, %v13896_v8  ;;  %v18240_v21 = vadd.f32 %v18098_v18, %v17322_v48  ;;  %v7550_v7 = vpop.f32.mrb[105].mxu1  ;;  %v12919_v40 = vpop.f32.mrb[101].mxu0  ;;  %v13901_v43 = vsel %vm13186_vm10, %v13675_v32, 0.0 }
 0x589   : > { %v13899_v26 = vsel %vm13186_vm10, %v13674_v1, 0.0  ;;  %v18241_v11 = vadd.f32 %v12919_v40, %v7530_v35 }
 0x58a   : > { %v13900_v14 = vadd.f32 %v13899_v26, %v13898_v60  ;;  %13288 = vst.msk [vmem:[%s21959_s14 + $0x328] sm:$0xff] %vm13186_vm10, %v18240_v21  ;;  %v13513_v34 = vadd.f32 %v13512_v62, %v13511_v56  ;;  %v13677_v30 = vmul.f32 %v18240_v21, %v18240_v21  ;;  %v13516_v44 = vsel %vm13186_vm10, %v18240_v21, 0.0 }
 0x58b   : > { %13287 = vst.msk [vmem:[%s21959_s14 + $0x320] sm:$0xff] %vm13186_vm10, %v18241_v11  ;;  %v13514_v42 = vsel %vm13186_vm10, %v18241_v11, 0.0  ;;  %v13676_v39 = vmul.f32 %v18241_v11, %v18241_v11  ;;  %v17331_v63 = vpop.f32.mrb[106].mxu1  ;;  %v18101_v52 = vpop.f32.mrb[102].mxu0 }
 0x58c   : > { %v13515_v6 = vadd.f32 %v13514_v42, %v13513_v34  ;;  %v13902_v4 = vadd.f32 %v13901_v43, %v13900_v14  ;;  %v18242_v3 = vadd.f32 %v18101_v52, %v17325_v13  ;;  %v7560_v47 = vpop.f32.mrb[107].mxu1  ;;  %v12929_v37 = vpop.f32.mrb[103].mxu0  ;;  %v13905_v58 = vsel %vm13186_vm10, %v13677_v30, 0.0 }
 0x58d   : > { %v13903_v57 = vsel %vm13186_vm10, %v13676_v39, 0.0  ;;  %v18243_v12 = vadd.f32 %v12929_v37, %v7540_v10 }
 0x58e   : > { %v13904_v31 = vadd.f32 %v13903_v57, %v13902_v4  ;;  %13290 = vst.msk [vmem:[%s21959_s14 + $0x338] sm:$0xff] %vm13186_vm10, %v18242_v3  ;;  %v13517_v23 = vadd.f32 %v13516_v44, %v13515_v6  ;;  %v13679_v19 = vmul.f32 %v18242_v3, %v18242_v3  ;;  %v13520_v20 = vsel %vm13186_vm10, %v18242_v3, 0.0 }
 0x58f   : > { %13289 = vst.msk [vmem:[%s21959_s14 + $0x330] sm:$0xff] %vm13186_vm10, %v18243_v12  ;;  %v13518_v53 = vsel %vm13186_vm10, %v18243_v12, 0.0  ;;  %v13678_v61 = vmul.f32 %v18243_v12, %v18243_v12  ;;  %v17334_v48 = vpop.f32.mrb[108].mxu1  ;;  %v18104_v27 = vpop.f32.mrb[104].mxu0 }
 0x590   : > { %v13519_v36 = vadd.f32 %v13518_v53, %v13517_v23  ;;  %v13906_v50 = vadd.f32 %v13905_v58, %v13904_v31  ;;  %v18244_v16 = vadd.f32 %v18104_v27, %v17328_v46  ;;  %v7570_v35 = vpop.f32.mrb[109].mxu1  ;;  %v12939_v55 = vpop.f32.mrb[105].mxu0  ;;  %v13909_v0 = vsel %vm13186_vm10, %v13679_v19, 0.0 }
 0x591   : > { %v13907_v41 = vsel %vm13186_vm10, %v13678_v61, 0.0  ;;  %v18245_v59 = vadd.f32 %v12939_v55, %v7550_v7 }
 0x592   : > { %v13908_v45 = vadd.f32 %v13907_v41, %v13906_v50  ;;  %13292 = vst.msk [vmem:[%s21959_s14 + $0x348] sm:$0xff] %vm13186_vm10, %v18244_v16  ;;  %v13521_v38 = vadd.f32 %v13520_v20, %v13519_v36  ;;  %v13681_v5 = vmul.f32 %v18244_v16, %v18244_v16  ;;  %v13524_v49 = vsel %vm13186_vm10, %v18244_v16, 0.0 }
 0x593   : > { %13291 = vst.msk [vmem:[%s21959_s14 + $0x340] sm:$0xff] %vm13186_vm10, %v18245_v59  ;;  %v13522_v17 = vsel %vm13186_vm10, %v18245_v59, 0.0  ;;  %v13680_v33 = vmul.f32 %v18245_v59, %v18245_v59  ;;  %v17337_v13 = vpop.f32.mrb[110].mxu1  ;;  %v18107_v2 = vpop.f32.mrb[106].mxu0 }
 0x594   : > { %v13523_v25 = vadd.f32 %v13522_v17, %v13521_v38  ;;  %v13910_v29 = vadd.f32 %v13909_v0, %v13908_v45  ;;  %v18246_v22 = vadd.f32 %v18107_v2, %v17331_v63  ;;  %v7580_v10 = vpop.f32.mrb[111].mxu1  ;;  %v12949_v28 = vpop.f32.mrb[107].mxu0  ;;  %v13913_v51 = vsel %vm13186_vm10, %v13681_v5, 0.0 }
 0x595   : > { %v13911_v15 = vsel %vm13186_vm10, %v13680_v33, 0.0  ;;  %v18247_v54 = vadd.f32 %v12949_v28, %v7560_v47 }
 0x596   : > { %v13912_v8 = vadd.f32 %v13911_v15, %v13910_v29  ;;  %13294 = vst.msk [vmem:[%s21959_s14 + $0x358] sm:$0xff] %vm13186_vm10, %v18246_v22  ;;  %v13525_v24 = vadd.f32 %v13524_v49, %v13523_v25  ;;  %v13683_v32 = vmul.f32 %v18246_v22, %v18246_v22  ;;  %v13528_v62 = vsel %vm13186_vm10, %v18246_v22, 0.0 }
 0x597   : > { %13293 = vst.msk [vmem:[%s21959_s14 + $0x350] sm:$0xff] %vm13186_vm10, %v18247_v54  ;;  %v13526_v9 = vsel %vm13186_vm10, %v18247_v54, 0.0  ;;  %v13682_v1 = vmul.f32 %v18247_v54, %v18247_v54  ;;  %v17340_v46 = vpop.f32.mrb[112].mxu1  ;;  %v18110_v18 = vpop.f32.mrb[108].mxu0 }
 0x598   : > { %v13527_v56 = vadd.f32 %v13526_v9, %v13525_v24  ;;  %v13914_v60 = vadd.f32 %v13913_v51, %v13912_v8  ;;  %v18248_v21 = vadd.f32 %v18110_v18, %v17334_v48  ;;  %v7590_v7 = vpop.f32.mrb[113].mxu1  ;;  %v12959_v40 = vpop.f32.mrb[109].mxu0  ;;  %v13917_v43 = vsel %vm13186_vm10, %v13683_v32, 0.0 }
 0x599   : > { %v13915_v26 = vsel %vm13186_vm10, %v13682_v1, 0.0  ;;  %v18249_v11 = vadd.f32 %v12959_v40, %v7570_v35 }
 0x59a   : > { %v13916_v14 = vadd.f32 %v13915_v26, %v13914_v60  ;;  %13296 = vst.msk [vmem:[%s21959_s14 + $0x368] sm:$0xff] %vm13186_vm10, %v18248_v21  ;;  %v13529_v34 = vadd.f32 %v13528_v62, %v13527_v56  ;;  %v13685_v30 = vmul.f32 %v18248_v21, %v18248_v21  ;;  %v13532_v44 = vsel %vm13186_vm10, %v18248_v21, 0.0 }
 0x59b   : > { %13295 = vst.msk [vmem:[%s21959_s14 + $0x360] sm:$0xff] %vm13186_vm10, %v18249_v11  ;;  %v13530_v42 = vsel %vm13186_vm10, %v18249_v11, 0.0  ;;  %v13684_v39 = vmul.f32 %v18249_v11, %v18249_v11  ;;  %v17343_v63 = vpop.f32.mrb[114].mxu1  ;;  %v18113_v52 = vpop.f32.mrb[110].mxu0 }
 0x59c   : > { %v13531_v6 = vadd.f32 %v13530_v42, %v13529_v34  ;;  %v13918_v4 = vadd.f32 %v13917_v43, %v13916_v14  ;;  %v18250_v3 = vadd.f32 %v18113_v52, %v17337_v13  ;;  %v7600_v47 = vpop.f32.mrb[115].mxu1  ;;  %v12969_v37 = vpop.f32.mrb[111].mxu0  ;;  %v13921_v58 = vsel %vm13186_vm10, %v13685_v30, 0.0 }
 0x59d   : > { %v13919_v57 = vsel %vm13186_vm10, %v13684_v39, 0.0  ;;  %v18251_v12 = vadd.f32 %v12969_v37, %v7580_v10 }
 0x59e   : > { %v13920_v31 = vadd.f32 %v13919_v57, %v13918_v4  ;;  %13298 = vst.msk [vmem:[%s21959_s14 + $0x378] sm:$0xff] %vm13186_vm10, %v18250_v3  ;;  %v13533_v23 = vadd.f32 %v13532_v44, %v13531_v6  ;;  %v13687_v19 = vmul.f32 %v18250_v3, %v18250_v3  ;;  %v13536_v20 = vsel %vm13186_vm10, %v18250_v3, 0.0 }
 0x59f   : > { %13297 = vst.msk [vmem:[%s21959_s14 + $0x370] sm:$0xff] %vm13186_vm10, %v18251_v12  ;;  %v13534_v53 = vsel %vm13186_vm10, %v18251_v12, 0.0  ;;  %v13686_v61 = vmul.f32 %v18251_v12, %v18251_v12  ;;  %v17346_v48 = vpop.f32.mrb[116].mxu1  ;;  %v18116_v27 = vpop.f32.mrb[112].mxu0 }
 0x5a0   : > { %v13535_v36 = vadd.f32 %v13534_v53, %v13533_v23  ;;  %v13922_v50 = vadd.f32 %v13921_v58, %v13920_v31  ;;  %v18252_v16 = vadd.f32 %v18116_v27, %v17340_v46  ;;  %v7610_v35 = vpop.f32.mrb[117].mxu1  ;;  %v12979_v55 = vpop.f32.mrb[113].mxu0  ;;  %v13925_v0 = vsel %vm13186_vm10, %v13687_v19, 0.0 }
 0x5a1   : > { %v13923_v41 = vsel %vm13186_vm10, %v13686_v61, 0.0  ;;  %v18253_v59 = vadd.f32 %v12979_v55, %v7590_v7 }
 0x5a2   : > { %v13924_v45 = vadd.f32 %v13923_v41, %v13922_v50  ;;  %13300 = vst.msk [vmem:[%s21959_s14 + $0x388] sm:$0xff] %vm13186_vm10, %v18252_v16  ;;  %v13537_v38 = vadd.f32 %v13536_v20, %v13535_v36  ;;  %v13689_v5 = vmul.f32 %v18252_v16, %v18252_v16  ;;  %v13540_v49 = vsel %vm13186_vm10, %v18252_v16, 0.0 }
 0x5a3   : > { %13299 = vst.msk [vmem:[%s21959_s14 + $0x380] sm:$0xff] %vm13186_vm10, %v18253_v59  ;;  %v13538_v17 = vsel %vm13186_vm10, %v18253_v59, 0.0  ;;  %v13688_v33 = vmul.f32 %v18253_v59, %v18253_v59  ;;  %v17349_v13 = vpop.f32.mrb[118].mxu1  ;;  %v18119_v2 = vpop.f32.mrb[114].mxu0 }
 0x5a4   : > { %v13539_v25 = vadd.f32 %v13538_v17, %v13537_v38  ;;  %v13926_v29 = vadd.f32 %v13925_v0, %v13924_v45  ;;  %v18254_v22 = vadd.f32 %v18119_v2, %v17343_v63  ;;  %v7620_v10 = vpop.f32.mrb[119].mxu1  ;;  %v12989_v28 = vpop.f32.mrb[115].mxu0  ;;  %v13929_v51 = vsel %vm13186_vm10, %v13689_v5, 0.0 }
 0x5a5   : > { %v13927_v15 = vsel %vm13186_vm10, %v13688_v33, 0.0  ;;  %v18255_v54 = vadd.f32 %v12989_v28, %v7600_v47 }
 0x5a6   : > { %v13928_v8 = vadd.f32 %v13927_v15, %v13926_v29  ;;  %13302 = vst.msk [vmem:[%s21959_s14 + $0x398] sm:$0xff] %vm13186_vm10, %v18254_v22  ;;  %v13541_v24 = vadd.f32 %v13540_v49, %v13539_v25  ;;  %v13691_v32 = vmul.f32 %v18254_v22, %v18254_v22  ;;  %v13544_v62 = vsel %vm13186_vm10, %v18254_v22, 0.0 }
 0x5a7   : > { %13301 = vst.msk [vmem:[%s21959_s14 + $0x390] sm:$0xff] %vm13186_vm10, %v18255_v54  ;;  %v13542_v9 = vsel %vm13186_vm10, %v18255_v54, 0.0  ;;  %v13690_v1 = vmul.f32 %v18255_v54, %v18255_v54  ;;  %v17352_v46 = vpop.f32.mrb[120].mxu1  ;;  %v18122_v18 = vpop.f32.mrb[116].mxu0 }
 0x5a8   : > { %v13543_v56 = vadd.f32 %v13542_v9, %v13541_v24  ;;  %v13930_v60 = vadd.f32 %v13929_v51, %v13928_v8  ;;  %v18256_v21 = vadd.f32 %v18122_v18, %v17346_v48  ;;  %v7630_v7 = vpop.f32.mrb[121].mxu1  ;;  %v12999_v40 = vpop.f32.mrb[117].mxu0  ;;  %v13933_v43 = vsel %vm13186_vm10, %v13691_v32, 0.0 }
 0x5a9   : > { %v13931_v26 = vsel %vm13186_vm10, %v13690_v1, 0.0  ;;  %v18257_v11 = vadd.f32 %v12999_v40, %v7610_v35 }
 0x5aa   : > { %v13932_v14 = vadd.f32 %v13931_v26, %v13930_v60  ;;  %13304 = vst.msk [vmem:[%s21959_s14 + $0x3a8] sm:$0xff] %vm13186_vm10, %v18256_v21  ;;  %v13545_v34 = vadd.f32 %v13544_v62, %v13543_v56  ;;  %v13693_v30 = vmul.f32 %v18256_v21, %v18256_v21  ;;  %v13548_v44 = vsel %vm13186_vm10, %v18256_v21, 0.0 }
 0x5ab   : > { %13303 = vst.msk [vmem:[%s21959_s14 + $0x3a0] sm:$0xff] %vm13186_vm10, %v18257_v11  ;;  %v13546_v42 = vsel %vm13186_vm10, %v18257_v11, 0.0  ;;  %v13692_v39 = vmul.f32 %v18257_v11, %v18257_v11  ;;  %v17355_v63 = vpop.f32.mrb[122].mxu1  ;;  %v18125_v52 = vpop.f32.mrb[118].mxu0 }
 0x5ac   : > { %v13547_v6 = vadd.f32 %v13546_v42, %v13545_v34  ;;  %v13934_v4 = vadd.f32 %v13933_v43, %v13932_v14  ;;  %v18258_v3 = vadd.f32 %v18125_v52, %v17349_v13  ;;  %v7640_v47 = vpop.f32.mrb[123].mxu1  ;;  %v13009_v37 = vpop.f32.mrb[119].mxu0  ;;  %v13937_v58 = vsel %vm13186_vm10, %v13693_v30, 0.0 }
 0x5ad   : > { %v13935_v57 = vsel %vm13186_vm10, %v13692_v39, 0.0  ;;  %v18259_v12 = vadd.f32 %v13009_v37, %v7620_v10 }
 0x5ae   : > { %v13936_v31 = vadd.f32 %v13935_v57, %v13934_v4  ;;  %13306 = vst.msk [vmem:[%s21959_s14 + $0x3b8] sm:$0xff] %vm13186_vm10, %v18258_v3  ;;  %v13549_v23 = vadd.f32 %v13548_v44, %v13547_v6  ;;  %v13695_v19 = vmul.f32 %v18258_v3, %v18258_v3  ;;  %v13552_v20 = vsel %vm13186_vm10, %v18258_v3, 0.0 }
 0x5af   : > { %13305 = vst.msk [vmem:[%s21959_s14 + $0x3b0] sm:$0xff] %vm13186_vm10, %v18259_v12  ;;  %v13550_v53 = vsel %vm13186_vm10, %v18259_v12, 0.0  ;;  %v13694_v61 = vmul.f32 %v18259_v12, %v18259_v12  ;;  %v17358_v48 = vpop.f32.mrb[124].mxu1  ;;  %v18128_v27 = vpop.f32.mrb[120].mxu0 }
 0x5b0   : > { %v13551_v36 = vadd.f32 %v13550_v53, %v13549_v23  ;;  %v13938_v50 = vadd.f32 %v13937_v58, %v13936_v31  ;;  %v18260_v16 = vadd.f32 %v18128_v27, %v17352_v46  ;;  %v7650_v35 = vpop.f32.mrb[125].mxu1  ;;  %v13019_v55 = vpop.f32.mrb[121].mxu0  ;;  %v13941_v0 = vsel %vm13186_vm10, %v13695_v19, 0.0 }
 0x5b1   : > { %v13939_v41 = vsel %vm13186_vm10, %v13694_v61, 0.0  ;;  %v18261_v59 = vadd.f32 %v13019_v55, %v7630_v7 }
 0x5b2   : > { %v13940_v45 = vadd.f32 %v13939_v41, %v13938_v50  ;;  %13308 = vst.msk [vmem:[%s21959_s14 + $0x3c8] sm:$0xff] %vm13186_vm10, %v18260_v16  ;;  %v13553_v38 = vadd.f32 %v13552_v20, %v13551_v36  ;;  %v13697_v5 = vmul.f32 %v18260_v16, %v18260_v16  ;;  %v13556_v49 = vsel %vm13186_vm10, %v18260_v16, 0.0 }
 0x5b3   : > { %13307 = vst.msk [vmem:[%s21959_s14 + $0x3c0] sm:$0xff] %vm13186_vm10, %v18261_v59  ;;  %v13554_v17 = vsel %vm13186_vm10, %v18261_v59, 0.0  ;;  %v13696_v33 = vmul.f32 %v18261_v59, %v18261_v59  ;;  %v17361_v13 = vpop.f32.mrb[126].mxu1  ;;  %v18131_v2 = vpop.f32.mrb[122].mxu0 }
 0x5b4   : > { %v13555_v25 = vadd.f32 %v13554_v17, %v13553_v38  ;;  %v13942_v29 = vadd.f32 %v13941_v0, %v13940_v45  ;;  %v18262_v22 = vadd.f32 %v18131_v2, %v17355_v63  ;;  %v7660_v10 = vpop.f32.mrb[127].mxu1  ;;  %v13029_v28 = vpop.f32.mrb[123].mxu0  ;;  %v13945_v51 = vsel %vm13186_vm10, %v13697_v5, 0.0 }
 0x5b5   : > { %v13943_v15 = vsel %vm13186_vm10, %v13696_v33, 0.0  ;;  %v18263_v54 = vadd.f32 %v13029_v28, %v7640_v47 }
 0x5b6   : > { %v13944_v8 = vadd.f32 %v13943_v15, %v13942_v29  ;;  %13310 = vst.msk [vmem:[%s21959_s14 + $0x3d8] sm:$0xff] %vm13186_vm10, %v18262_v22  ;;  %v13557_v24 = vadd.f32 %v13556_v49, %v13555_v25  ;;  %v13699_v32 = vmul.f32 %v18262_v22, %v18262_v22  ;;  %v13560_v7 = vsel %vm13186_vm10, %v18262_v22, 0.0 }
 0x5b7   : > { %13309 = vst.msk [vmem:[%s21959_s14 + $0x3d0] sm:$0xff] %vm13186_vm10, %v18263_v54  ;;  %v13558_v9 = vsel %vm13186_vm10, %v18263_v54, 0.0  ;;  %v13698_v1 = vmul.f32 %v18263_v54, %v18263_v54  ;;  %v18134_v46 = vpop.f32.mrb[124].mxu0 }
 0x5b8   : > { %v13559_v18 = vadd.f32 %v13558_v9, %v13557_v24  ;;  %v13946_v56 = vadd.f32 %v13945_v51, %v13944_v8  ;;  %v18264_v60 = vadd.f32 %v18134_v46, %v17358_v48  ;;  %v13039_v21 = vpop.f32.mrb[125].mxu0  ;;  %v13949_v14 = vsel %vm13186_vm10, %v13699_v32, 0.0 }
 0x5b9   : > { %v13947_v40 = vsel %vm13186_vm10, %v13698_v1, 0.0  ;;  %v18265_v62 = vadd.f32 %v13039_v21, %v7650_v35 }
 0x5ba   : > { %v13948_v26 = vadd.f32 %v13947_v40, %v13946_v56  ;;  %13312 = vst.msk [vmem:[%s21959_s14 + $0x3e8] sm:$0xff] %vm13186_vm10, %v18264_v60  ;;  %v13561_v11 = vadd.f32 %v13560_v7, %v13559_v18  ;;  %v13701_v34 = vmul.f32 %v18264_v60, %v18264_v60  ;;  %v13564_v4 = vsel %vm13186_vm10, %v18264_v60, 0.0 }
 0x5bb   : > { %13311 = vst.msk [vmem:[%s21959_s14 + $0x3e0] sm:$0xff] %vm13186_vm10, %v18265_v62  ;;  %v13562_v43 = vsel %vm13186_vm10, %v18265_v62, 0.0  ;;  %v13700_v30 = vmul.f32 %v18265_v62, %v18265_v62  ;;  %v18137_v42 = vpop.f32.mrb[126].mxu0 }
 0x5bc   : > { %v13563_v39 = vadd.f32 %v13562_v43, %v13561_v11  ;;  %v13950_v63 = vadd.f32 %v13949_v14, %v13948_v26  ;;  %v18266_v52 = vadd.f32 %v18137_v42, %v17361_v13  ;;  %v13049_v6 = vpop.f32.mrb[127].mxu0  ;;  %v13953_v57 = vsel %vm13186_vm10, %v13701_v34, 0.0 }
 0x5bd   : > { %v13951_v3 = vsel %vm13186_vm10, %v13700_v30, 0.0  ;;  %v18267_v47 = vadd.f32 %v13049_v6, %v7660_v10 }
 0x5be   : > { %v13952_v37 = vadd.f32 %v13951_v3, %v13950_v63  ;;  %13314 = vst.msk [vmem:[%s21959_s14 + $0x3f8] sm:$0xff] %vm13186_vm10, %v18266_v52  ;;  %v13565_v44 = vadd.f32 %v13564_v4, %v13563_v39  ;;  %v13703_v12 = vmul.f32 %v18266_v52, %v18266_v52  ;;  %v13568_v53 = vsel %vm13186_vm10, %v18266_v52, 0.0 }
 0x5bf   : > { %13313 = vst.msk [vmem:[%s21959_s14 + $0x3f0] sm:$0xff] %vm13186_vm10, %v18267_v47  ;;  %v13566_v31 = vsel %vm13186_vm10, %v18267_v47, 0.0  ;;  %v13702_v23 = vmul.f32 %v18267_v47, %v18267_v47 }
 0x5c0   : > { %v13567_v58 = vadd.f32 %v13566_v31, %v13565_v44  ;;  %v13954_v19 = vadd.f32 %v13953_v57, %v13952_v37  ;;  %v13957_v36 = vsel %vm13186_vm10, %v13703_v12, 0.0 }
 0x5c1   : > { %v13955_v61 = vsel %vm13186_vm10, %v13702_v23, 0.0 }
 0x5c2   : > { %v13569_v48 = vadd.f32 %v13568_v53, %v13567_v58  ;;  %v13956_v27 = vadd.f32 %v13955_v61, %v13954_v19 }
 0x5c4   : > { %v13570_v50 = vrot.slane %v13569_v48, 4  ;;  %v13958_v16 = vadd.f32 %v13957_v36, %v13956_v27 }
 0x5c6   : > { %v13571_v35 = vadd.f32 %v13570_v50, %v13569_v48  ;;  %v13959_v55 = vrot.slane %v13958_v16, 4 }
 0x5c8   : > { %v13572_v20 = vrot.slane %v13571_v35, 2  ;;  %v13960_v41 = vadd.f32 %v13959_v55, %v13958_v16 }
 0x5ca   : > { %v13573_v59 = vadd.f32 %v13572_v20, %v13571_v35  ;;  %v13961_v45 = vrot.slane %v13960_v41, 2 }
 0x5cc   : > { %v13574_v38 = vrot.slane %v13573_v59, 1  ;;  %v13962_v0 = vadd.f32 %v13961_v45, %v13960_v41 }
 0x5ce   : > { %v13963_v5 = vrot.slane %v13962_v0, 1  ;;  %v13575_v17 = vadd.f32 %v13574_v38, %v13573_v59 }
 0x5d0   : > { %v13964_v33 = vadd.f32 %v13963_v5, %v13962_v0 }
 0x5d2   : > { %v13966_v13 = vsel %vm13965_vm0, %v13575_v17, %v13964_v33 }
 0x5d3   : > { %13968 = vst.msk [vmem:[%s235_s17] sm:$0x3] %vm13967_vm11, %v13966_v13 }
 0x5d4 PF: > { %s16_s18 = sadd.s32 1, %s19185_s18  }
 0x5d5   : > { %p13_p4 = scmp.ge.s32.totalorder %s16_s18, 4  }
 0x5d7   :  { %15 = sbr.rel (!%p13_p4) target bundleno = 1 (0x1), region = 88 }

</bundles_post_ra>
